<compile_context>
chip_gen: v7x
topology: tpu7x:2x2x1
jax: 0.10.0
libtpu: 0.0.40
codegen_flags: <defaults>
</compile_context>

<pallas_src>
import functools

import jax
import jax.numpy as jnp
from jax.experimental import pallas as pl
from jax.experimental.pallas import tpu as pltpu


def _round_up(x, m):
    return ((x + m - 1) // m) * m


def _default_tile_b():
    """128-row batch tiles on v5e (4x128 MXU, slower HBM, 1 vst slot), 256 elsewhere."""
    try:
        kind = jax.devices()[0].device_kind.lower()
    except Exception:
        return 256
    if "v5 lite" in kind or "v5e" in kind or "v5lite" in kind:
        return 128
    return 256


def prepare_fc_encoder_params(w1_t, b1, w2_t, b2, *, compute_dtype=jnp.bfloat16):
    """One-time (parameter-init-time) weight preparation.

    w1_t: (input_dim, 1024)      pre-transposed vs. PyTorch's (out, in)
    b1:   (1024,)
    w2_t: (1024, latent_dim)
    b2:   (latent_dim,)

    Returns a dict of device-ready arrays: bf16 weights, f32 (1, n) biases, with
    W2/b2 zero-padded on the lane dim to a multiple of 128 (lane-dense output).
    """
    input_dim, hidden = w1_t.shape
    latent_dim = w2_t.shape[1]
    latent_pad = _round_up(latent_dim, 128)
    if latent_pad != latent_dim:
        w2_t = jnp.pad(w2_t, ((0, 0), (0, latent_pad - latent_dim)))
        b2 = jnp.pad(b2, (0, latent_pad - latent_dim))
    # TODO(synk): on v7x, weights could additionally be stored as fp8 (e4m3) for a
    # further 2x cut in weight HBM/VMEM traffic (requires re-validating tolerances).
    return dict(
        w1=jnp.asarray(w1_t, compute_dtype),
        b1=jnp.asarray(b1, jnp.float32).reshape(1, hidden),
        w2=jnp.asarray(w2_t, compute_dtype),
        b2=jnp.asarray(b2, jnp.float32).reshape(1, latent_pad),
        latent_dim=latent_dim,
    )


def _fc_encoder_kernel(x_ref, w1_ref, b1_ref, w2_ref, b2_ref, out_ref, *, hidden_chunk):
    # In-kernel cast of the activation tile to the matmul compute dtype (VPU op;
    # x makes a single f32 pass through HBM, no wrapper-side cast/pad pass).
    x = x_ref[...].astype(w1_ref.dtype)
    hidden = w1_ref.shape[1]
    acc = jnp.zeros(out_ref.shape, jnp.float32)
    # Static slab loop over the hidden dim: h_chunk stays <= (tb, hidden_chunk) f32
    # instead of a full (tb, 1024) f32 intermediate staged through VMEM.
    for lo in range(0, hidden, hidden_chunk):
        hi = lo + hidden_chunk
        h = jnp.dot(x, w1_ref[:, lo:hi], preferred_element_type=jnp.float32)
        h = jnp.maximum(h + b1_ref[:, lo:hi], 0.0).astype(w2_ref.dtype)
        acc = acc + jnp.dot(h, w2_ref[lo:hi, :], preferred_element_type=jnp.float32)
    out_ref[...] = (acc + b2_ref[...]).astype(out_ref.dtype)


def fc_encoder(x, params, *, tile_b=None, hidden_chunk=256, slice_output=True):
    """Fused FCEncoder forward.

    x:      (B, input_dim), any float dtype (cast to bf16 inside the kernel).
    params: output of prepare_fc_encoder_params().
    Returns (B, latent_dim) in x.dtype (or (B, latent_pad) if slice_output=False,
    letting the consumer fuse the lane crop).
    """
    w1, b1, w2, b2 = params["w1"], params["b1"], params["w2"], params["b2"]
    latent_dim = params["latent_dim"]
    B, input_dim = x.shape
    hidden = w1.shape[1]
    latent_pad = w2.shape[1]
    out_dtype = x.dtype

    if tile_b is None:
        tile_b = _default_tile_b()

    # Batch tile: ragged grid, no padding of x. Tiny batches -> one full-extent
    # tile (always layout-legal); otherwise aim for >= 2 grid steps (v7x megacore,
    # DMA/compute overlap) capped at the generation tile.
    if B <= 128:
        tb = B
    else:
        tb = min(tile_b, max(128, _round_up(pl.cdiv(B, 2), 128)))
    grid = (pl.cdiv(B, tb),)

    if hidden % hidden_chunk != 0:
        hidden_chunk = hidden  # fallback: single slab

    kernel = functools.partial(_fc_encoder_kernel, hidden_chunk=hidden_chunk)

    w_itemsize = jnp.dtype(w1.dtype).itemsize
    cost = pl.CostEstimate(
        flops=2 * B * (input_dim * hidden + hidden * latent_pad),
        transcendentals=0,
        bytes_accessed=(B * input_dim * x.dtype.itemsize
                        + (w1.size + w2.size) * w_itemsize
                        + (hidden + latent_pad) * 4
                        + B * latent_pad * jnp.dtype(out_dtype).itemsize),
    )

    def build(single_buffer_weights):
        def resident(shape):
            # Constant index_map -> weights stay resident; single buffer is enough.
            if single_buffer_weights:
                return pl.BlockSpec(shape, lambda i: (0, 0),
                                    pipeline_mode=pl.Buffered(1))
            return pl.BlockSpec(shape, lambda i: (0, 0))

        return pl.pallas_call(
            kernel,
            out_shape=jax.ShapeDtypeStruct((B, latent_pad), out_dtype),
            grid_spec=pltpu.PrefetchScalarGridSpec(
                num_scalar_prefetch=0,
                grid=grid,
                in_specs=[
                    pl.BlockSpec((tb, input_dim), lambda i: (i, 0)),  # x tile (ragged ok)
                    resident((input_dim, hidden)),                    # W1 (resident)
                    resident((1, hidden)),                            # b1
                    resident((hidden, latent_pad)),                   # W2 (resident)
                    resident((1, latent_pad)),                        # b2
                ],
                out_specs=pl.BlockSpec((tb, latent_pad), lambda i: (i, 0)),
            ),
            compiler_params=pltpu.CompilerParams(
                dimension_semantics=("parallel",)),
            cost_estimate=cost,
        )

    try:
        out_padded = build(True)(x, w1, b1, w2, b2)
    except Exception:
        # Fallback if single-buffered resident specs are rejected by this jax build.
        out_padded = build(False)(x, w1, b1, w2, b2)

    if not slice_output or latent_pad == latent_dim:
        return out_padded
    return out_padded[:, :latent_dim]


def fc_encoder_ref_exact(x, w1_t, b1, w2_t, b2, compute_dtype=jnp.bfloat16):
    """Reference mirroring the kernel's dtype choices (bf16 operands, f32 accum)."""
    xc = x.astype(compute_dtype)
    h = jnp.dot(xc, w1_t.astype(compute_dtype), preferred_element_type=jnp.float32)
    h = jnp.maximum(h + b1.astype(jnp.float32), 0.0).astype(compute_dtype)
    out = jnp.dot(h, w2_t.astype(compute_dtype), preferred_element_type=jnp.float32)
    return (out + b2.astype(jnp.float32)).astype(x.dtype)


def fc_encoder_ref_f32(x, w1_t, b1, w2_t, b2):
    """Pure-f32 reference matching the PyTorch module semantics."""
    h = jnp.maximum(x @ w1_t + b1, 0.0)
    return h @ w2_t + b2


if __name__ == "__main__":
    # input_dim=256, hidden=1024 (fixed by the module), latent_dim=64 (module default).
    # batch=384 exercises the ragged grid (two tiles of 256 and 128 rows with
    # tile_b=256) and the 64 -> 128 lane-dense output padding.
    batch, input_dim, hidden, latent_dim = 384, 256, 1024, 64

    key = jax.random.PRNGKey(0)
    kx, kw1, kb1, kw2, kb2 = jax.random.split(key, 5)

    x = jax.random.normal(kx, (batch, input_dim), dtype=jnp.float32)

    # Deterministic parameter init (uniform, PyTorch-Linear-like scale).
    bound1 = 1.0 / (input_dim ** 0.5)
    w1_t = jax.random.uniform(kw1, (input_dim, hidden), jnp.float32, -bound1, bound1)
    b1 = jax.random.uniform(kb1, (hidden,), jnp.float32, -bound1, bound1)
    bound2 = 1.0 / (hidden ** 0.5)
    w2_t = jax.random.uniform(kw2, (hidden, latent_dim), jnp.float32, -bound2, bound2)
    b2 = jax.random.uniform(kb2, (latent_dim,), jnp.float32, -bound2, bound2)

    # One-time weight prep (hoisted out of the per-call path).
    params = prepare_fc_encoder_params(w1_t, b1, w2_t, b2)

    latent = fc_encoder(x, params)
    latent = jax.block_until_ready(latent)
    assert latent.shape == (batch, latent_dim)

    # Tight check against a reference using the same bf16/f32-accum recipe.
    ref_exact = fc_encoder_ref_exact(x, w1_t, b1, w2_t, b2)
    assert jnp.allclose(latent, ref_exact, atol=2e-3, rtol=2e-3), \
        "mismatch vs dtype-matched reference"

    # Loose check against the full-f32 module semantics (bf16 rounding only).
    ref_f32 = fc_encoder_ref_f32(x, w1_t, b1, w2_t, b2)
    assert jnp.allclose(latent, ref_f32, atol=5e-2, rtol=5e-2), \
        "mismatch vs f32 module reference"

    print("KERNEL_OK")
</pallas_src>

<mosaic_0001>
module attributes {stable_mosaic.version = 11 : i64} {
  func.func @_fc_encoder_kernel(%arg0: i32, %arg1: memref<256x256xf32, #tpu.memory_space<vmem>>, %arg2: memref<256x1024xbf16, #tpu.memory_space<vmem>>, %arg3: memref<1x1024xf32, #tpu.memory_space<vmem>>, %arg4: memref<1024x128xbf16, #tpu.memory_space<vmem>>, %arg5: memref<1x128xf32, #tpu.memory_space<vmem>>, %arg6: memref<256x128xf32, #tpu.memory_space<vmem>>) attributes {dimension_semantics = [#tpu.dimension_semantics<parallel>], iteration_bounds = array<i64: 2>, scalar_prefetch = 0 : i64, scratch_operands = 0 : i64, tpu.core_type = #tpu.core_type<tc>, window_params = [{transform_indices = @transform_0, window_bounds = array<i64: 256, 256>}, {pipeline_mode = #tpu.pipeline_mode<synchronous>, transform_indices = @transform_1, window_bounds = array<i64: 256, 1024>}, {pipeline_mode = #tpu.pipeline_mode<synchronous>, transform_indices = @transform_2, window_bounds = array<i64: 1, 1024>}, {pipeline_mode = #tpu.pipeline_mode<synchronous>, transform_indices = @transform_3, window_bounds = array<i64: 1024, 128>}, {pipeline_mode = #tpu.pipeline_mode<synchronous>, transform_indices = @transform_4, window_bounds = array<i64: 1, 128>}, {transform_indices = @transform_5, window_bounds = array<i64: 256, 128>}]} {
    %c0 = arith.constant 0 : index
    %c0_0 = arith.constant 0 : index
    %0 = vector.load %arg1[%c0, %c0_0] : memref<256x256xf32, #tpu.memory_space<vmem>>, vector<256x256xf32>
    %1 = arith.truncf %0 : vector<256x256xf32> to vector<256x256xbf16>
    %cst = arith.constant 0.000000e+00 : f32
    %2 = vector.broadcast %cst : f32 to vector<256x128xf32>
    %c0_1 = arith.constant 0 : index
    %c0_2 = arith.constant 0 : index
    %3 = vector.load %arg2[%c0_1, %c0_2] : memref<256x1024xbf16, #tpu.memory_space<vmem>>, vector<256x256xbf16>
    %cst_3 = arith.constant dense<0.000000e+00> : vector<256x256xf32>
    %4 = tpu.matmul %1, %3, %cst_3 {dimension_numbers = #tpu.dot_dimension_numbers<[1], [0], [0], [1], [0, 0, 1, 1], [], []>} : vector<256x256xbf16>, vector<256x256xbf16>, vector<256x256xf32> -> vector<256x256xf32>
    %c0_4 = arith.constant 0 : index
    %c0_5 = arith.constant 0 : index
    %5 = vector.load %arg3[%c0_4, %c0_5] : memref<1x1024xf32, #tpu.memory_space<vmem>>, vector<1x256xf32>
    %6 = vector.broadcast %5 : vector<1x256xf32> to vector<256x256xf32>
    %7 = arith.addf %4, %6 : vector<256x256xf32>
    %cst_6 = arith.constant 0.000000e+00 : f32
    %8 = vector.broadcast %cst_6 : f32 to vector<256x256xf32>
    %9 = arith.maximumf %7, %8 : vector<256x256xf32>
    %10 = arith.truncf %9 : vector<256x256xf32> to vector<256x256xbf16>
    %c0_7 = arith.constant 0 : index
    %c0_8 = arith.constant 0 : index
    %11 = vector.load %arg4[%c0_7, %c0_8] : memref<1024x128xbf16, #tpu.memory_space<vmem>>, vector<256x128xbf16>
    %cst_9 = arith.constant dense<0.000000e+00> : vector<256x128xf32>
    %12 = tpu.matmul %10, %11, %cst_9 {dimension_numbers = #tpu.dot_dimension_numbers<[1], [0], [0], [1], [0, 0, 1, 1], [], []>} : vector<256x256xbf16>, vector<256x128xbf16>, vector<256x128xf32> -> vector<256x128xf32>
    %13 = arith.addf %2, %12 : vector<256x128xf32>
    %c0_10 = arith.constant 0 : index
    %c256 = arith.constant 256 : index
    %14 = vector.load %arg2[%c0_10, %c256] : memref<256x1024xbf16, #tpu.memory_space<vmem>>, vector<256x256xbf16>
    %cst_11 = arith.constant dense<0.000000e+00> : vector<256x256xf32>
    %15 = tpu.matmul %1, %14, %cst_11 {dimension_numbers = #tpu.dot_dimension_numbers<[1], [0], [0], [1], [0, 0, 1, 1], [], []>} : vector<256x256xbf16>, vector<256x256xbf16>, vector<256x256xf32> -> vector<256x256xf32>
    %c0_12 = arith.constant 0 : index
    %c256_13 = arith.constant 256 : index
    %16 = vector.load %arg3[%c0_12, %c256_13] : memref<1x1024xf32, #tpu.memory_space<vmem>>, vector<1x256xf32>
    %17 = vector.broadcast %16 : vector<1x256xf32> to vector<256x256xf32>
    %18 = arith.addf %15, %17 : vector<256x256xf32>
    %cst_14 = arith.constant 0.000000e+00 : f32
    %19 = vector.broadcast %cst_14 : f32 to vector<256x256xf32>
    %20 = arith.maximumf %18, %19 : vector<256x256xf32>
    %21 = arith.truncf %20 : vector<256x256xf32> to vector<256x256xbf16>
    %c256_15 = arith.constant 256 : index
    %c0_16 = arith.constant 0 : index
    %22 = vector.load %arg4[%c256_15, %c0_16] : memref<1024x128xbf16, #tpu.memory_space<vmem>>, vector<256x128xbf16>
    %cst_17 = arith.constant dense<0.000000e+00> : vector<256x128xf32>
    %23 = tpu.matmul %21, %22, %cst_17 {dimension_numbers = #tpu.dot_dimension_numbers<[1], [0], [0], [1], [0, 0, 1, 1], [], []>} : vector<256x256xbf16>, vector<256x128xbf16>, vector<256x128xf32> -> vector<256x128xf32>
    %24 = arith.addf %13, %23 : vector<256x128xf32>
    %c0_18 = arith.constant 0 : index
    %c512 = arith.constant 512 : index
    %25 = vector.load %arg2[%c0_18, %c512] : memref<256x1024xbf16, #tpu.memory_space<vmem>>, vector<256x256xbf16>
    %cst_19 = arith.constant dense<0.000000e+00> : vector<256x256xf32>
    %26 = tpu.matmul %1, %25, %cst_19 {dimension_numbers = #tpu.dot_dimension_numbers<[1], [0], [0], [1], [0, 0, 1, 1], [], []>} : vector<256x256xbf16>, vector<256x256xbf16>, vector<256x256xf32> -> vector<256x256xf32>
    %c0_20 = arith.constant 0 : index
    %c512_21 = arith.constant 512 : index
    %27 = vector.load %arg3[%c0_20, %c512_21] : memref<1x1024xf32, #tpu.memory_space<vmem>>, vector<1x256xf32>
    %28 = vector.broadcast %27 : vector<1x256xf32> to vector<256x256xf32>
    %29 = arith.addf %26, %28 : vector<256x256xf32>
    %cst_22 = arith.constant 0.000000e+00 : f32
    %30 = vector.broadcast %cst_22 : f32 to vector<256x256xf32>
    %31 = arith.maximumf %29, %30 : vector<256x256xf32>
    %32 = arith.truncf %31 : vector<256x256xf32> to vector<256x256xbf16>
    %c512_23 = arith.constant 512 : index
    %c0_24 = arith.constant 0 : index
    %33 = vector.load %arg4[%c512_23, %c0_24] : memref<1024x128xbf16, #tpu.memory_space<vmem>>, vector<256x128xbf16>
    %cst_25 = arith.constant dense<0.000000e+00> : vector<256x128xf32>
    %34 = tpu.matmul %32, %33, %cst_25 {dimension_numbers = #tpu.dot_dimension_numbers<[1], [0], [0], [1], [0, 0, 1, 1], [], []>} : vector<256x256xbf16>, vector<256x128xbf16>, vector<256x128xf32> -> vector<256x128xf32>
    %35 = arith.addf %24, %34 : vector<256x128xf32>
    %c0_26 = arith.constant 0 : index
    %c768 = arith.constant 768 : index
    %36 = vector.load %arg2[%c0_26, %c768] : memref<256x1024xbf16, #tpu.memory_space<vmem>>, vector<256x256xbf16>
    %cst_27 = arith.constant dense<0.000000e+00> : vector<256x256xf32>
    %37 = tpu.matmul %1, %36, %cst_27 {dimension_numbers = #tpu.dot_dimension_numbers<[1], [0], [0], [1], [0, 0, 1, 1], [], []>} : vector<256x256xbf16>, vector<256x256xbf16>, vector<256x256xf32> -> vector<256x256xf32>
    %c0_28 = arith.constant 0 : index
    %c768_29 = arith.constant 768 : index
    %38 = vector.load %arg3[%c0_28, %c768_29] : memref<1x1024xf32, #tpu.memory_space<vmem>>, vector<1x256xf32>
    %39 = vector.broadcast %38 : vector<1x256xf32> to vector<256x256xf32>
    %40 = arith.addf %37, %39 : vector<256x256xf32>
    %cst_30 = arith.constant 0.000000e+00 : f32
    %41 = vector.broadcast %cst_30 : f32 to vector<256x256xf32>
    %42 = arith.maximumf %40, %41 : vector<256x256xf32>
    %43 = arith.truncf %42 : vector<256x256xf32> to vector<256x256xbf16>
    %c768_31 = arith.constant 768 : index
    %c0_32 = arith.constant 0 : index
    %44 = vector.load %arg4[%c768_31, %c0_32] : memref<1024x128xbf16, #tpu.memory_space<vmem>>, vector<256x128xbf16>
    %cst_33 = arith.constant dense<0.000000e+00> : vector<256x128xf32>
    %45 = tpu.matmul %43, %44, %cst_33 {dimension_numbers = #tpu.dot_dimension_numbers<[1], [0], [0], [1], [0, 0, 1, 1], [], []>} : vector<256x256xbf16>, vector<256x128xbf16>, vector<256x128xf32> -> vector<256x128xf32>
    %46 = arith.addf %35, %45 : vector<256x128xf32>
    %c0_34 = arith.constant 0 : index
    %c0_35 = arith.constant 0 : index
    %47 = vector.load %arg5[%c0_34, %c0_35] : memref<1x128xf32, #tpu.memory_space<vmem>>, vector<1x128xf32>
    %48 = vector.broadcast %47 : vector<1x128xf32> to vector<256x128xf32>
    %49 = arith.addf %46, %48 : vector<256x128xf32>
    %c0_36 = arith.constant 0 : index
    %c0_37 = arith.constant 0 : index
    %50 = vector.load %arg6[%c0_36, %c0_37] : memref<256x128xf32, #tpu.memory_space<vmem>>, vector<256x128xf32>
    tpu.vector_store %arg6[%c0_36, %c0_37], %49 {strides = array<i32>} : memref<256x128xf32, #tpu.memory_space<vmem>>, vector<256x128xf32>,
    return
  }
  func.func @transform_0(%arg0: i32) -> (i32, i32) {
    %c0_i32 = arith.constant 0 : i32
    %c0_i32_0 = arith.constant 0 : i32
    return %arg0, %c0_i32 : i32, i32
  }
  func.func @transform_1(%arg0: i32) -> (i32, i32) {
    %c0_i32 = arith.constant 0 : i32
    %c0_i32_0 = arith.constant 0 : i32
    %c0_i32_1 = arith.constant 0 : i32
    return %c0_i32, %c0_i32_0 : i32, i32
  }
  func.func @transform_2(%arg0: i32) -> (i32, i32) {
    %c0_i32 = arith.constant 0 : i32
    %c0_i32_0 = arith.constant 0 : i32
    %c0_i32_1 = arith.constant 0 : i32
    return %c0_i32, %c0_i32_0 : i32, i32
  }
  func.func @transform_3(%arg0: i32) -> (i32, i32) {
    %c0_i32 = arith.constant 0 : i32
    %c0_i32_0 = arith.constant 0 : i32
    %c0_i32_1 = arith.constant 0 : i32
    return %c0_i32, %c0_i32_0 : i32, i32
  }
  func.func @transform_4(%arg0: i32) -> (i32, i32) {
    %c0_i32 = arith.constant 0 : i32
    %c0_i32_0 = arith.constant 0 : i32
    %c0_i32_1 = arith.constant 0 : i32
    return %c0_i32, %c0_i32_0 : i32, i32
  }
  func.func @transform_5(%arg0: i32) -> (i32, i32) {
    %c0_i32 = arith.constant 0 : i32
    %c0_i32_0 = arith.constant 0 : i32
    return %arg0, %c0_i32 : i32, i32
  }
}

module attributes {stable_mosaic.version = 11 : i64} {
  func.func @_fc_encoder_kernel(%arg0: i32, %arg1: memref<256x256xf32, #tpu.memory_space<vmem>>, %arg2: memref<256x1024xbf16, #tpu.memory_space<vmem>>, %arg3: memref<1x1024xf32, #tpu.memory_space<vmem>>, %arg4: memref<1024x128xbf16, #tpu.memory_space<vmem>>, %arg5: memref<1x128xf32, #tpu.memory_space<vmem>>, %arg6: memref<256x128xf32, #tpu.memory_space<vmem>>) attributes {dimension_semantics = [#tpu.dimension_semantics<parallel>], iteration_bounds = array<i64: 2>, scalar_prefetch = 0 : i64, scratch_operands = 0 : i64, tpu.core_type = #tpu.core_type<tc>, window_params = [{transform_indices = @transform_0, window_bounds = array<i64: 256, 256>}, {pipeline_mode = #tpu.pipeline_mode<synchronous>, transform_indices = @transform_1, window_bounds = array<i64: 256, 1024>}, {pipeline_mode = #tpu.pipeline_mode<synchronous>, transform_indices = @transform_2, window_bounds = array<i64: 1, 1024>}, {pipeline_mode = #tpu.pipeline_mode<synchronous>, transform_indices = @transform_3, window_bounds = array<i64: 1024, 128>}, {pipeline_mode = #tpu.pipeline_mode<synchronous>, transform_indices = @transform_4, window_bounds = array<i64: 1, 128>}, {transform_indices = @transform_5, window_bounds = array<i64: 256, 128>}]} {
    %c0 = arith.constant 0 : index
    %c0_0 = arith.constant 0 : index
    %0 = vector.load %arg1[%c0, %c0_0] : memref<256x256xf32, #tpu.memory_space<vmem>>, vector<256x256xf32>
    %1 = arith.truncf %0 : vector<256x256xf32> to vector<256x256xbf16>
    %cst = arith.constant 0.000000e+00 : f32
    %2 = vector.broadcast %cst : f32 to vector<256x128xf32>
    %c0_1 = arith.constant 0 : index
    %c0_2 = arith.constant 0 : index
    %3 = vector.load %arg2[%c0_1, %c0_2] : memref<256x1024xbf16, #tpu.memory_space<vmem>>, vector<256x256xbf16>
    %cst_3 = arith.constant dense<0.000000e+00> : vector<256x256xf32>
    %4 = tpu.matmul %1, %3, %cst_3 {dimension_numbers = #tpu.dot_dimension_numbers<[1], [0], [0], [1], [0, 0, 1, 1], [], []>} : vector<256x256xbf16>, vector<256x256xbf16>, vector<256x256xf32> -> vector<256x256xf32>
    %c0_4 = arith.constant 0 : index
    %c0_5 = arith.constant 0 : index
    %5 = vector.load %arg3[%c0_4, %c0_5] : memref<1x1024xf32, #tpu.memory_space<vmem>>, vector<1x256xf32>
    %6 = vector.broadcast %5 : vector<1x256xf32> to vector<256x256xf32>
    %7 = arith.addf %4, %6 : vector<256x256xf32>
    %cst_6 = arith.constant 0.000000e+00 : f32
    %8 = vector.broadcast %cst_6 : f32 to vector<256x256xf32>
    %9 = arith.maximumf %7, %8 : vector<256x256xf32>
    %10 = arith.truncf %9 : vector<256x256xf32> to vector<256x256xbf16>
    %c0_7 = arith.constant 0 : index
    %c0_8 = arith.constant 0 : index
    %11 = vector.load %arg4[%c0_7, %c0_8] : memref<1024x128xbf16, #tpu.memory_space<vmem>>, vector<256x128xbf16>
    %cst_9 = arith.constant dense<0.000000e+00> : vector<256x128xf32>
    %12 = tpu.matmul %10, %11, %cst_9 {dimension_numbers = #tpu.dot_dimension_numbers<[1], [0], [0], [1], [0, 0, 1, 1], [], []>} : vector<256x256xbf16>, vector<256x128xbf16>, vector<256x128xf32> -> vector<256x128xf32>
    %13 = arith.addf %2, %12 : vector<256x128xf32>
    %c0_10 = arith.constant 0 : index
    %c256 = arith.constant 256 : index
    %14 = vector.load %arg2[%c0_10, %c256] : memref<256x1024xbf16, #tpu.memory_space<vmem>>, vector<256x256xbf16>
    %cst_11 = arith.constant dense<0.000000e+00> : vector<256x256xf32>
    %15 = tpu.matmul %1, %14, %cst_11 {dimension_numbers = #tpu.dot_dimension_numbers<[1], [0], [0], [1], [0, 0, 1, 1], [], []>} : vector<256x256xbf16>, vector<256x256xbf16>, vector<256x256xf32> -> vector<256x256xf32>
    %c0_12 = arith.constant 0 : index
    %c256_13 = arith.constant 256 : index
    %16 = vector.load %arg3[%c0_12, %c256_13] : memref<1x1024xf32, #tpu.memory_space<vmem>>, vector<1x256xf32>
    %17 = vector.broadcast %16 : vector<1x256xf32> to vector<256x256xf32>
    %18 = arith.addf %15, %17 : vector<256x256xf32>
    %cst_14 = arith.constant 0.000000e+00 : f32
    %19 = vector.broadcast %cst_14 : f32 to vector<256x256xf32>
    %20 = arith.maximumf %18, %19 : vector<256x256xf32>
    %21 = arith.truncf %20 : vector<256x256xf32> to vector<256x256xbf16>
    %c256_15 = arith.constant 256 : index
    %c0_16 = arith.constant 0 : index
    %22 = vector.load %arg4[%c256_15, %c0_16] : memref<1024x128xbf16, #tpu.memory_space<vmem>>, vector<256x128xbf16>
    %cst_17 = arith.constant dense<0.000000e+00> : vector<256x128xf32>
    %23 = tpu.matmul %21, %22, %cst_17 {dimension_numbers = #tpu.dot_dimension_numbers<[1], [0], [0], [1], [0, 0, 1, 1], [], []>} : vector<256x256xbf16>, vector<256x128xbf16>, vector<256x128xf32> -> vector<256x128xf32>
    %24 = arith.addf %13, %23 : vector<256x128xf32>
    %c0_18 = arith.constant 0 : index
    %c512 = arith.constant 512 : index
    %25 = vector.load %arg2[%c0_18, %c512] : memref<256x1024xbf16, #tpu.memory_space<vmem>>, vector<256x256xbf16>
    %cst_19 = arith.constant dense<0.000000e+00> : vector<256x256xf32>
    %26 = tpu.matmul %1, %25, %cst_19 {dimension_numbers = #tpu.dot_dimension_numbers<[1], [0], [0], [1], [0, 0, 1, 1], [], []>} : vector<256x256xbf16>, vector<256x256xbf16>, vector<256x256xf32> -> vector<256x256xf32>
    %c0_20 = arith.constant 0 : index
    %c512_21 = arith.constant 512 : index
    %27 = vector.load %arg3[%c0_20, %c512_21] : memref<1x1024xf32, #tpu.memory_space<vmem>>, vector<1x256xf32>
    %28 = vector.broadcast %27 : vector<1x256xf32> to vector<256x256xf32>
    %29 = arith.addf %26, %28 : vector<256x256xf32>
    %cst_22 = arith.constant 0.000000e+00 : f32
    %30 = vector.broadcast %cst_22 : f32 to vector<256x256xf32>
    %31 = arith.maximumf %29, %30 : vector<256x256xf32>
    %32 = arith.truncf %31 : vector<256x256xf32> to vector<256x256xbf16>
    %c512_23 = arith.constant 512 : index
    %c0_24 = arith.constant 0 : index
    %33 = vector.load %arg4[%c512_23, %c0_24] : memref<1024x128xbf16, #tpu.memory_space<vmem>>, vector<256x128xbf16>
    %cst_25 = arith.constant dense<0.000000e+00> : vector<256x128xf32>
    %34 = tpu.matmul %32, %33, %cst_25 {dimension_numbers = #tpu.dot_dimension_numbers<[1], [0], [0], [1], [0, 0, 1, 1], [], []>} : vector<256x256xbf16>, vector<256x128xbf16>, vector<256x128xf32> -> vector<256x128xf32>
    %35 = arith.addf %24, %34 : vector<256x128xf32>
    %c0_26 = arith.constant 0 : index
    %c768 = arith.constant 768 : index
    %36 = vector.load %arg2[%c0_26, %c768] : memref<256x1024xbf16, #tpu.memory_space<vmem>>, vector<256x256xbf16>
    %cst_27 = arith.constant dense<0.000000e+00> : vector<256x256xf32>
    %37 = tpu.matmul %1, %36, %cst_27 {dimension_numbers = #tpu.dot_dimension_numbers<[1], [0], [0], [1], [0, 0, 1, 1], [], []>} : vector<256x256xbf16>, vector<256x256xbf16>, vector<256x256xf32> -> vector<256x256xf32>
    %c0_28 = arith.constant 0 : index
    %c768_29 = arith.constant 768 : index
    %38 = vector.load %arg3[%c0_28, %c768_29] : memref<1x1024xf32, #tpu.memory_space<vmem>>, vector<1x256xf32>
    %39 = vector.broadcast %38 : vector<1x256xf32> to vector<256x256xf32>
    %40 = arith.addf %37, %39 : vector<256x256xf32>
    %cst_30 = arith.constant 0.000000e+00 : f32
    %41 = vector.broadcast %cst_30 : f32 to vector<256x256xf32>
    %42 = arith.maximumf %40, %41 : vector<256x256xf32>
    %43 = arith.truncf %42 : vector<256x256xf32> to vector<256x256xbf16>
    %c768_31 = arith.constant 768 : index
    %c0_32 = arith.constant 0 : index
    %44 = vector.load %arg4[%c768_31, %c0_32] : memref<1024x128xbf16, #tpu.memory_space<vmem>>, vector<256x128xbf16>
    %cst_33 = arith.constant dense<0.000000e+00> : vector<256x128xf32>
    %45 = tpu.matmul %43, %44, %cst_33 {dimension_numbers = #tpu.dot_dimension_numbers<[1], [0], [0], [1], [0, 0, 1, 1], [], []>} : vector<256x256xbf16>, vector<256x128xbf16>, vector<256x128xf32> -> vector<256x128xf32>
    %46 = arith.addf %35, %45 : vector<256x128xf32>
    %c0_34 = arith.constant 0 : index
    %c0_35 = arith.constant 0 : index
    %47 = vector.load %arg5[%c0_34, %c0_35] : memref<1x128xf32, #tpu.memory_space<vmem>>, vector<1x128xf32>
    %48 = vector.broadcast %47 : vector<1x128xf32> to vector<256x128xf32>
    %49 = arith.addf %46, %48 : vector<256x128xf32>
    %c0_36 = arith.constant 0 : index
    %c0_37 = arith.constant 0 : index
    %50 = vector.load %arg6[%c0_36, %c0_37] : memref<256x128xf32, #tpu.memory_space<vmem>>, vector<256x128xf32>
    tpu.vector_store %arg6[%c0_36, %c0_37], %49 {strides = array<i32>} : memref<256x128xf32, #tpu.memory_space<vmem>>, vector<256x128xf32>,
    return
  }
  func.func @transform_0(%arg0: i32) -> (i32, i32) {
    %c0_i32 = arith.constant 0 : i32
    %c0_i32_0 = arith.constant 0 : i32
    return %arg0, %c0_i32 : i32, i32
  }
  func.func @transform_1(%arg0: i32) -> (i32, i32) {
    %c0_i32 = arith.constant 0 : i32
    %c0_i32_0 = arith.constant 0 : i32
    %c0_i32_1 = arith.constant 0 : i32
    return %c0_i32, %c0_i32_0 : i32, i32
  }
  func.func @transform_2(%arg0: i32) -> (i32, i32) {
    %c0_i32 = arith.constant 0 : i32
    %c0_i32_0 = arith.constant 0 : i32
    %c0_i32_1 = arith.constant 0 : i32
    return %c0_i32, %c0_i32_0 : i32, i32
  }
  func.func @transform_3(%arg0: i32) -> (i32, i32) {
    %c0_i32 = arith.constant 0 : i32
    %c0_i32_0 = arith.constant 0 : i32
    %c0_i32_1 = arith.constant 0 : i32
    return %c0_i32, %c0_i32_0 : i32, i32
  }
  func.func @transform_4(%arg0: i32) -> (i32, i32) {
    %c0_i32 = arith.constant 0 : i32
    %c0_i32_0 = arith.constant 0 : i32
    %c0_i32_1 = arith.constant 0 : i32
    return %c0_i32, %c0_i32_0 : i32, i32
  }
  func.func @transform_5(%arg0: i32) -> (i32, i32) {
    %c0_i32 = arith.constant 0 : i32
    %c0_i32_0 = arith.constant 0 : i32
    return %arg0, %c0_i32 : i32, i32
  }
}

</mosaic_0001>

<bundles_post_ra>
// kernel: tpu_custom_call.1
= control target key start
LH: loop header
LB: loop body
LE: loop exit
PB: predicated region body
PF: predicated region fallthrough
CT: control target
= control target key end

     0   :  { %10 = vsyncpa [#allocation3], 0  ;;  %s5930_s0 = inlined_call_operand.hbm [shape: f32[384,256], index: 0, kind: input, shape index: {}]   ;;  %s5931_s1 = inlined_call_operand.hbm [shape: bf16[256,1024], index: 1, kind: input, shape index: {}]   ;;  %s5932_s2 = inlined_call_operand.hbm [shape: f32[1,1024], index: 2, kind: input, shape index: {}]   ;;  %s5933_s3 = inlined_call_operand.hbm [shape: bf16[1024,128], index: 3, kind: input, shape index: {}]   ;;  %s5934_s4 = inlined_call_operand.vmem [shape: f32[1,128], index: 4, kind: input, shape index: {}]   ;;  %s5935_s5 = inlined_call_operand.hbm [shape: f32[384,128], index: 5, kind: output, shape index: {}]  }
   0x1   :  { %12 = vsyncpa [#allocation3 + $0x1], 0 }
   0x2   :  { %13 = vsyncpa [#allocation6], 0 }
   0x3   :  { %14 = vsyncpa [#allocation9], 0 }
   0x4   :  { %15 = vsyncpa [#allocation4], 0 }
   0x5   :  { %17 = vsyncpa [#allocation4 + $0x1], 0  ;;  %s4834_s18 = smov 0   ;;  %s4836_s19 = smov 0  }
   0x6   :  { %s4838_s20 = smov 0   ;;  %s4840_s21 = smov 0  }
   0x7 LB: > { %s4855_s22 = sadd.s32 4294967295, %s4789_s21   ;;  %s3786_s23 = sadd.s32 4294967294, %s4789_s21   ;;  %s4789_s21 = sphi %s4840_s21, %s5993_s21   ;;  %s4785_s20 = sphi %s4838_s20, %s5997_s20   ;;  %s4781_s19 = sphi %s4836_s19, %s5996_s19   ;;  %s4777_s18 = sphi %s4834_s18, %s5995_s18  }
   0x8   : > { %s4859_s24 = sadd.s32 1, %s4789_s21   ;;  %s30_s25 = sadd.s32 1, %s4785_s20 }
   0x9   : > { %5957 = sst [smem:[#allocation15_spill]] %s4859_s24  ;;  %s27_s26 = ssub.s32 %s4789_s21, %s4859_s24 }
   0xa   : > { %p37_p0 = scmp.ne.s32.totalorder %s4785_s20, %s4781_s19  ;;  %p28_p1 = scmp.eq.s32.totalorder %s27_s26, 0 }
   0xb   : > { %p38_p2 = scmp.eq.s32.totalorder %s4789_s21, 0  ;;  %p43_p3 = scmp.ne.s32.totalorder %s4781_s19, %s4777_s18 }
   0xc   : > { %p5936_p4 = scmp.eq.s32.totalorder %s4855_s22, 0  ;;  %p151_p7 = scmp.eq.s32.totalorder %s4855_s22, 1 }
   0xd   : > { %s4871_s27 = scalar_select %p28_p1, %s4785_s20, %s30_s25  }
   0xe   : > { %p4873_p5 = por %p38_p2, %p37_p0  ;;  %p4879_p6 = por %p5936_p4, %p43_p3 }
   0xf   : > { %5958 = sst [smem:[#allocation16_spill]] %s4871_s27  ;;  %p157_p8 = scmp.eq.s32.totalorder %s3786_s23, 1 }
  0x10   : > { %s5959_s28 = scalar_select %p4873_p5, 1, 0 }
  0x11   : > { %s5960_s29 = scalar_select %p4879_p6, 1, 0 }
  0x12   : > { %p3787_p9 = scmp.ge.s32.totalorder %s4789_s21, 1  ;;  %p164_p10 = scmp.lt.s32.totalorder %s4789_s21, 3 }
  0x13   : > { %p4886_p11 = por %p151_p7, %p37_p0  ;;  %p4890_p12 = por %p157_p8, %p43_p3 }
  0x14   : > { %p4894_p13 = pnand %p3787_p9, %p164_p10  ;;  %s4791_s8 = smov [#allocation5]  }
  0x15   : > { %s5961_s30 = scalar_select %p4886_p11, 1, 0 }
  0x16   : > { %s5962_s6 = scalar_select %p4890_p12, 1, 0 }
  0x17   : > { %s5963_s7 = scalar_select %p4894_p13, 1, 0 }
  0x18   : > { %p4475_p1 = pneg %p4894_p13  ;;  %s176_s9 = sshll.u32 %s4791_s8, 4  ;;  %s177_s9 = int_to_ptr.vmem [resolvable:$true] %s176_s9 }
  0x19   : > { %s4792_s11 = smov [#allocation7]   ;;  %s4603_s15 = scalar_lea.hbm %s5931_s1, 16384 }
  0x1a   : > { %p4902_p2 = pnand %p4475_p1, %p5936_p4  ;;  %s190_s12 = sshll.u32 %s4792_s11, 4  ;;  %s4906_s12 = int_to_ptr.vmem [resolvable:$true] %s190_s12 }
  0x1b   : > { %p4604_p0 = scmp.ne.s32.totalorder %s5931_s1, %s4603_s15  ;;  %p4610_p9 = scmp.lt.u32.totalorder %s4603_s15, %s5931_s1 }
  0x1c   : > { %p4916_p3 = pneg %p4902_p2 }
  0x1e   : > { %p4606_p7 = pnand %p4916_p3, %p4604_p0 }
  0x20   : > { %p4607_p8 = pneg %p4606_p7 }
  0x22   : > { %p4612_p10 = pnand %p4610_p9, %p4607_p8 }
  0x24   : > { %4615 = shalt.err (!%p4612_p10)
}
  0x25   : > { %s4616_s8 = scalar_lea.vmem %s177_s9, 16384  ;;  %p4624_p11 = scmp.lt.s32.totalorder %s177_s9, %s177_s9 }
  0x26   : > { %p4617_p1 = scmp.ne.s32.totalorder %s177_s9, %s4616_s8  ;;  %p4625_p6 = scmp.lt.s32.totalorder %s4616_s8, %s4616_s8 }
  0x28   : > { %p4619_p4 = pnand %p4617_p1, %p4916_p3  ;;  %p4626_p13 = por %p4625_p6, %p4624_p11 }
  0x2a   : > { %p4620_p12 = pneg %p4619_p4 }
  0x2c   : > { %p4627_p5 = pnand %p4626_p13, %p4620_p12 }
  0x2e   : > { %4630 = shalt.err (!%p4627_p5)
}
  0x2f   : > { %s4793_s11 = smov 512   ;;  %s4794_s13 = smov 32  }
  0x30   : > { %4478 = dma.hbm_to_vmem [thread:$0]  (!%p4902_p2), %s5931_s1, 16384, %s177_s9, [#allocation6], %s4793_s11, %s4793_s11, %s4794_s13  }
  0x31   : > { %s4631_s25 = scalar_lea.hbm %s5932_s2, 128 }
  0x32   : > { %p4632_p4 = scmp.ne.s32.totalorder %s5932_s2, %s4631_s25  ;;  %p4638_p11 = scmp.lt.u32.totalorder %s4631_s25, %s5932_s2 }
  0x34   : > { %p4634_p6 = pnand %p4632_p4, %p4916_p3 }
  0x36   : > { %p4635_p5 = pneg %p4634_p6 }
  0x38   : > { %p4640_p12 = pnand %p4638_p11, %p4635_p5 }
  0x3a   : > { %4643 = shalt.err (!%p4640_p12)
}
  0x3b   : > { %s4644_s9 = scalar_lea.vmem %s4906_s12, 128  ;;  %p4652_p8 = scmp.lt.s32.totalorder %s4906_s12, %s4906_s12 }
  0x3c   : > { %p4645_p13 = scmp.ne.s32.totalorder %s4906_s12, %s4644_s9  ;;  %p4653_p9 = scmp.lt.s32.totalorder %s4644_s9, %s4644_s9 }
  0x3e   : > { %p4647_p0 = pnand %p4645_p13, %p4916_p3  ;;  %p4654_p10 = por %p4653_p9, %p4652_p8 }
  0x40   : > { %p4648_p7 = pneg %p4647_p0 }
  0x42   : > { %p4655_p1 = pnand %p4654_p10, %p4648_p7 }
  0x44   : > { %4658 = shalt.err (!%p4655_p1)
}
  0x45   : > { %4481 = dma.hbm_to_vmem [thread:$0]  (!%p4902_p2), %s5932_s2, 128, %s4906_s12, [#allocation6]  }
  0x46   : > { %s4795_s11 = smov [#allocation8]   ;;  %s4659_s16 = scalar_lea.hbm %s5933_s3, 8192 }
  0x47   : > { %s200_s13 = sshll.u32 %s4795_s11, 4  ;;  %p4660_p4 = scmp.ne.s32.totalorder %s5933_s3, %s4659_s16  ;;  %s201_s13 = int_to_ptr.vmem [resolvable:$true] %s200_s13 }
  0x48   : > { %p4666_p11 = scmp.lt.u32.totalorder %s4659_s16, %s5933_s3 }
  0x49   : > { %p4662_p6 = pnand %p4660_p4, %p4916_p3 }
  0x4b   : > { %p4663_p5 = pneg %p4662_p6 }
  0x4d   : > { %p4668_p12 = pnand %p4666_p11, %p4663_p5 }
  0x4f   : > { %4671 = shalt.err (!%p4668_p12)
}
  0x50   : > { %s4672_s12 = scalar_lea.vmem %s201_s13, 8192  ;;  %p4680_p8 = scmp.lt.s32.totalorder %s201_s13, %s201_s13 }
  0x51   : > { %p4673_p13 = scmp.ne.s32.totalorder %s201_s13, %s4672_s12  ;;  %p4681_p9 = scmp.lt.s32.totalorder %s4672_s12, %s4672_s12 }
  0x53   : > { %p4675_p0 = pnand %p4673_p13, %p4916_p3  ;;  %p4682_p10 = por %p4681_p9, %p4680_p8 }
  0x55   : > { %p4676_p7 = pneg %p4675_p0 }
  0x57   : > { %p4683_p1 = pnand %p4682_p10, %p4676_p7 }
  0x59   : > { %4686 = shalt.err (!%p4683_p1)
}
  0x5a   : > { %s4796_s9 = smov 64   ;;  %s4797_s24 = smov 4  }
  0x5b   : > { %4484 = dma.hbm_to_vmem [thread:$0]  (!%p4902_p2), %s5933_s3, 8192, %s201_s13, [#allocation9], %s4796_s9, %s4796_s9, %s4797_s24  }
  0x5c   : > { %p3791_p4 = scmp.ge.s32.totalorder %s4789_s21, 2 }
  0x5d   : > { %p5966_p3 = scmp.ne.s32.totalorder (!%p3791_p4), %s5959_s28, 0 }
  0x5e   : > { %213 = sbr.rel (%p3791_p4) target bundleno = 136 (0x88), region = 32 }
  0x65   : > { %216 = sbr.rel (!%p5966_p3) target bundleno = 136 (0x88), region = 36  ;;  %s217_s23 = sand.u32 (%p5966_p3), 1, %s4785_s20  }
  0x66   : > { %s3793_s14 = sshll.u32 (%p5966_p3), %s4789_s21, 5  ;;  %s3792_s15 = sshll.u32 (%p5966_p3), %s217_s23, 9 }
  0x67   : > { %s223_s16 = ssub.s32 (%p5966_p3), 48, %s3793_s14  ;;  %s4983_s17 = scalar_lea.sflag (%p5966_p3), [#allocation3], %s217_s23 }
  0x68   : > { %p224_p6 = scmp.lt.s32.totalorder (%p5966_p3), %s223_s16, 32  ;;  %s221_s25 = scalar_lea.vmem (%p5966_p3), [#allocation2], %s3792_s15 }
  0x6c   : > { %s5999_s16 = smov (!%p224_p6, %s223_s16), 32 }
  0x6d   : > { %s4980_s10 = sshll.u32 %s5999_s16, 8 }
  0x6e   : > { %s229_s13 = ssub.s32 8192, %s4980_s10 }
  0x6f   : > { %230 = vsyncadd %s4983_s17, %s229_s13  ;;  %p3796_p2 = scmp.ne.s32.totalorder %s4980_s10, 0  ;;  %s4011_s28 = sshll.u32 %s4789_s21, 13 }
  0x70   : > { %s4991_s12 = scalar_lea.hbm %s5930_s0, %s4011_s28  ;;  %s236_s9 = sshll.u32 %s221_s25, 4  ;;  %s4993_s9 = int_to_ptr.vmem [resolvable:$true] %s236_s9 }
  0x71   : > { %s4687_s24 = scalar_lea.hbm %s4991_s12, %s4980_s10  ;;  %s4691_s23 = scalar_lea.hbm %s5930_s0, 12288 }
  0x72   : > { %p4688_p5 = scmp.ne.s32.totalorder %s4991_s12, %s4687_s24  ;;  %p4692_p13 = scmp.lt.u32.totalorder %s4991_s12, %s5930_s0 }
  0x73   : > { %p4693_p0 = scmp.lt.u32.totalorder %s4691_s23, %s4687_s24  ;;  %p4695_p8 = scmp.lt.u32.totalorder %s4687_s24, %s4991_s12 }
  0x74   : > { %p4689_p11 = pnand %p4688_p5, %p3796_p2 }
  0x75   : > { %p4694_p7 = por %p4693_p0, %p4692_p13 }
  0x76   : > { %p4690_p12 = pneg %p4689_p11 }
  0x77   : > { %p4696_p9 = por %p4695_p8, %p4694_p7 }
  0x79   : > { %p4697_p10 = pnand %p4696_p9, %p4690_p12 }
  0x7b   : > { %4700 = shalt.err (!%p4697_p10)
}
  0x7c   : > { %s4701_s16 = scalar_lea.vmem %s4993_s9, %s4980_s10  ;;  %s4798_s13 = smov [#allocation2]  }
  0x7d   : > { %p4702_p1 = scmp.ne.s32.totalorder %s4993_s9, %s4701_s16  ;;  %s4705_s25 = sshll.u32 %s4798_s13, 4  ;;  %s4706_s25 = int_to_ptr.vmem [resolvable:$false] %s4705_s25 }
  0x7e   : > { %s4707_s28 = scalar_lea.vmem %s4706_s25, 16384  ;;  %p4708_p5 = scmp.lt.s32.totalorder %s4993_s9, %s4706_s25 }
  0x7f   : > { %p4703_p3 = pnand %p4702_p1, %p3796_p2  ;;  %p4709_p11 = scmp.lt.s32.totalorder %s4707_s28, %s4701_s16 }
  0x81   : > { %p4704_p6 = pneg %p4703_p3  ;;  %p4710_p13 = por %p4709_p11, %p4708_p5 }
  0x83   : > { %p4711_p0 = pnand %p4710_p13, %p4704_p6 }
  0x85   : > { %4714 = shalt.err (!%p4711_p0)
}
  0x86   : > { %s4799_s26 = smov 256   ;;  %s4800_s8 = smov 16  }
  0x87   : > { %242 = dma.hbm_to_vmem [thread:$0]  (%p3796_p2), %s4991_s12, %s4980_s10, %s4993_s9, %s4983_s17, %s4799_s26, %s4799_s26, %s4800_s8  }
  0x88 PF: > { %p5967_p12 = scmp.ne.s32.totalorder %s5963_s7, 0 }
  0x8a   : > { %248 = sbr.rel (%p5967_p12) target bundleno = 1294 (0x50e), region = 40 }
  0x91   : > { %s5023_s24 = sand.u32 1, %s4781_s19   ;;  %p5968_p7 = scmp.ne.s32.totalorder %s5960_s29, 0 }
  0x92   : > { %s3802_s27 = sshll.u32 %s5023_s24, 9  ;;  %s251_s11 = scalar_lea.sflag [#allocation3], %s5023_s24 }
  0x93   : > { %s5027_s23 = scalar_lea.vmem [#allocation2], %s3802_s27 }
  0x94   : > { %4760 = dma.done.wait (%p5968_p7), %s251_s11, 8192  }
  0x95   : > { %4762 = vsyncadd (%p5968_p7), %s251_s11, 4294959104  ;;  %p5969_p2 = scmp.eq.s32.totalorder %s4855_s22, 0 }
  0x97   : > { %4764 = dma.done.wait (%p5969_p2), [#allocation6], 16512   ;;  %p5970_p8 = pmov %p5969_p2 }
  0x98   : > { %p5971_p9 = pmov %p5969_p2 }
  0x99   : > { %4766 = vsyncadd (%p5970_p8), [#allocation6], 4294950784 }
  0x9a   : > { %4768 = dma.done.wait (%p5971_p9), [#allocation9], 8192   ;;  %p5972_p10 = pmov %p5969_p2 }
  0x9b   : > { %v401_v0 = vld [vmem:[#allocation5] sm:$0xff]  ;;  %v926_v2 = vld [vmem:[#allocation5 + $0x8] sm:$0xff]  ;;  %v308_v54 = vld [vmem:[%s5027_s23 + $0x18] sm:$0xff]  ;;  %s3806_s29 = sshll.u32 %s5023_s24, 8  ;;  %s3665_s12 = scalar_lea.sflag [#allocation4], %s5023_s24 }
  0x9c   : > { %4770 = vsyncadd (%p5972_p10), [#allocation9], 4294959104  ;;  %v402_v1 = vld [vmem:[#allocation5 + $0x20] sm:$0xff]  ;;  %v927_v4 = vld [vmem:[#allocation5 + $0x28] sm:$0xff]  ;;  %s5772_s17 = scalar_lea.vmem [#allocation10], %s3806_s29  ;;  %p5991_p1 = scmp.ne.s32.totalorder %s5961_s30, 0 }
  0x9d   : > { %v3808_v3 = vcombine.high %v401_v0, %v402_v1  ;;  %v3807_v5 = vcombine.low %v401_v0, %v402_v1  ;;  %v403_v6 = vld [vmem:[#allocation5 + $0x40] sm:$0xff]  ;;  %v3840_v8 = vcombine.high %v926_v2, %v927_v4  ;;  %v3839_v9 = vcombine.low %v926_v2, %v927_v4  ;;  %v928_v11 = vld [vmem:[#allocation5 + $0x48] sm:$0xff]  ;;  %s4001_s9 = sshll.u32 (%p5991_p1), %s4855_s22, 5 }
  0x9e   : > { %v404_v7 = vld [vmem:[#allocation5 + $0x60] sm:$0xff]  ;;  %v929_v12 = vld [vmem:[#allocation5 + $0x68] sm:$0xff]  ;;  %s3673_s14 = ssub.s32 (%p5991_p1), 48, %s4001_s9 }
  0x9f   : > { %v3810_v10 = vcombine.high %v403_v6, %v404_v7  ;;  %v405_v13 = vld [vmem:[#allocation5 + $0x80] sm:$0xff]  ;;  %605 = vmatprep.subr.bf16.mxu0 %v3808_v3  ;;  %v3842_v14 = vcombine.high %v928_v11, %v929_v12  ;;  %v930_v16 = vld [vmem:[#allocation5 + $0x88] sm:$0xff]  ;;  %1130 = vmatprep.subr.bf16.mxu1 %v3840_v8  ;;  %v3809_v18 = vcombine.low %v403_v6, %v404_v7  ;;  %p3674_p3 = scmp.lt.s32.totalorder (%p5991_p1), %s3673_s14, 32 }
  0xa0   : > { %v406_v15 = vld [vmem:[#allocation5 + $0xa0] sm:$0xff]  ;;  %v931_v17 = vld [vmem:[#allocation5 + $0xa8] sm:$0xff]  ;;  %606 = vmatpush1.bf16.msra.mxu0 %v3807_v5  ;;  %1131 = vmatpush1.bf16.msra.mxu1 %v3839_v9  ;;  %v3841_v19 = vcombine.low %v928_v11, %v929_v12 }
  0xa1   : > { %607 = vmatprep.subr.bf16.mxu0 %v3810_v10  ;;  %v3812_v20 = vcombine.high %v405_v13, %v406_v15  ;;  %1132 = vmatprep.subr.bf16.mxu1 %v3842_v14  ;;  %v3844_v21 = vcombine.high %v930_v16, %v931_v17  ;;  %v407_v22 = vld [vmem:[#allocation5 + $0xc0] sm:$0xff]  ;;  %v932_v24 = vld [vmem:[#allocation5 + $0xc8] sm:$0xff]  ;;  %v3811_v26 = vcombine.low %v405_v13, %v406_v15 }
  0xa2   : > { %v408_v23 = vld [vmem:[#allocation5 + $0xe0] sm:$0xff]  ;;  %v933_v25 = vld [vmem:[#allocation5 + $0xe8] sm:$0xff]  ;;  %v3843_v27 = vcombine.low %v930_v16, %v931_v17 }
  0xa3   : > { %v3814_v28 = vcombine.high %v407_v22, %v408_v23  ;;  %v3846_v29 = vcombine.high %v932_v24, %v933_v25  ;;  %v409_v30 = vld [vmem:[#allocation5 + $0x100] sm:$0xff]  ;;  %v934_v32 = vld [vmem:[#allocation5 + $0x108] sm:$0xff]  ;;  %v3813_v34 = vcombine.low %v407_v22, %v408_v23  ;;  %v3845_v35 = vcombine.low %v932_v24, %v933_v25 }
  0xa4   : > { %608 = vmatpush1.bf16.msra.mxu0 %v3809_v18  ;;  %1133 = vmatpush1.bf16.msra.mxu1 %v3841_v19  ;;  %v410_v31 = vld [vmem:[#allocation5 + $0x120] sm:$0xff]  ;;  %v935_v33 = vld [vmem:[#allocation5 + $0x128] sm:$0xff] }
  0xa5   : > { %609 = vmatprep.subr.bf16.mxu0 %v3812_v20  ;;  %1134 = vmatprep.subr.bf16.mxu1 %v3844_v21  ;;  %v3816_v36 = vcombine.high %v409_v30, %v410_v31  ;;  %v3848_v37 = vcombine.high %v934_v32, %v935_v33  ;;  %v411_v38 = vld [vmem:[#allocation5 + $0x140] sm:$0xff]  ;;  %v936_v40 = vld [vmem:[#allocation5 + $0x148] sm:$0xff]  ;;  %v3815_v42 = vcombine.low %v409_v30, %v410_v31 }
  0xa6   : > { %v412_v39 = vld [vmem:[#allocation5 + $0x160] sm:$0xff]  ;;  %v937_v41 = vld [vmem:[#allocation5 + $0x168] sm:$0xff]  ;;  %v3847_v43 = vcombine.low %v934_v32, %v935_v33 }
  0xa7   : > { %v3818_v44 = vcombine.high %v411_v38, %v412_v39  ;;  %v3850_v45 = vcombine.high %v936_v40, %v937_v41  ;;  %v413_v46 = vld [vmem:[#allocation5 + $0x180] sm:$0xff]  ;;  %v938_v48 = vld [vmem:[#allocation5 + $0x188] sm:$0xff]  ;;  %v3817_v50 = vcombine.low %v411_v38, %v412_v39  ;;  %v3849_v51 = vcombine.low %v936_v40, %v937_v41 }
  0xa8   : > { %610 = vmatpush1.bf16.msra.mxu0 %v3811_v26  ;;  %1135 = vmatpush1.bf16.msra.mxu1 %v3843_v27  ;;  %v414_v47 = vld [vmem:[#allocation5 + $0x1a0] sm:$0xff]  ;;  %v939_v49 = vld [vmem:[#allocation5 + $0x1a8] sm:$0xff] }
  0xa9   : > { %611 = vmatprep.subr.bf16.mxu0 %v3814_v28  ;;  %1136 = vmatprep.subr.bf16.mxu1 %v3846_v29  ;;  %v3820_v52 = vcombine.high %v413_v46, %v414_v47  ;;  %v306_v53 = vld [vmem:[%s5027_s23 + $0x8] sm:$0xff]  ;;  %v3852_v55 = vcombine.high %v938_v48, %v939_v49  ;;  %v415_v56 = vld [vmem:[#allocation5 + $0x1c0] sm:$0xff]  ;;  %v3819_v61 = vcombine.low %v413_v46, %v414_v47 }
  0xaa   : > { %v416_v57 = vld [vmem:[#allocation5 + $0x1e0] sm:$0xff]  ;;  %v5043_v58 = vpack.c.bf16 %v308_v54, %v306_v53  ;;  %v940_v59 = vld [vmem:[#allocation5 + $0x1c8] sm:$0xff]  ;;  %v3851_v62 = vcombine.low %v938_v48, %v939_v49 }
  0xab   : > { %v941_v60 = vld [vmem:[#allocation5 + $0x1e8] sm:$0xff]  ;;  %v3822_v63 = vcombine.high %v415_v56, %v416_v57  ;;  %v417_v1 = vld [vmem:[#allocation5 + $0x200] sm:$0xff]  ;;  %v3821_v5 = vcombine.low %v415_v56, %v416_v57 }
  0xac   : > { %612 = vmatpush1.bf16.msra.mxu0 %v3813_v34  ;;  %1137 = vmatpush1.bf16.msra.mxu1 %v3845_v35  ;;  %v3854_v0 = vcombine.high %v940_v59, %v941_v60  ;;  %v418_v2 = vld [vmem:[#allocation5 + $0x220] sm:$0xff]  ;;  %v942_v3 = vld [vmem:[#allocation5 + $0x208] sm:$0xff]  ;;  %v3853_v6 = vcombine.low %v940_v59, %v941_v60 }
  0xad   : > { %613 = vmatprep.subr.bf16.mxu0 %v3816_v36  ;;  %1138 = vmatprep.subr.bf16.mxu1 %v3848_v37  ;;  %v943_v4 = vld [vmem:[#allocation5 + $0x228] sm:$0xff]  ;;  %v3824_v7 = vcombine.high %v417_v1, %v418_v2  ;;  %v419_v9 = vld [vmem:[#allocation5 + $0x240] sm:$0xff]  ;;  %v3823_v13 = vcombine.low %v417_v1, %v418_v2 }
  0xae   : > { %637 = vmatprep.mubr.bf16.mxu0 %v5043_v58  ;;  %1162 = vmatprep.mubr.bf16.mxu1 %v5043_v58  ;;  %v3856_v8 = vcombine.high %v942_v3, %v943_v4  ;;  %v420_v10 = vld [vmem:[#allocation5 + $0x260] sm:$0xff]  ;;  %v944_v11 = vld [vmem:[#allocation5 + $0x248] sm:$0xff]  ;;  %v3855_v14 = vcombine.low %v942_v3, %v943_v4  ;;  %v307_v4 = vld [vmem:[%s5027_s23 + $0x10] sm:$0xff] }
  0xaf   : > { %v945_v12 = vld [vmem:[#allocation5 + $0x268] sm:$0xff]  ;;  %v3826_v15 = vcombine.high %v419_v9, %v420_v10  ;;  %v421_v17 = vld [vmem:[#allocation5 + $0x280] sm:$0xff]  ;;  %v3825_v21 = vcombine.low %v419_v9, %v420_v10 }
  0xb0   : > { %614 = vmatpush1.bf16.msra.mxu0 %v3815_v42  ;;  %1139 = vmatpush1.bf16.msra.mxu1 %v3847_v43  ;;  %v3858_v16 = vcombine.high %v944_v11, %v945_v12  ;;  %v422_v18 = vld [vmem:[#allocation5 + $0x2a0] sm:$0xff]  ;;  %v946_v19 = vld [vmem:[#allocation5 + $0x288] sm:$0xff]  ;;  %v3857_v22 = vcombine.low %v944_v11, %v945_v12 }
  0xb1   : > { %615 = vmatprep.subr.bf16.mxu0 %v3818_v44  ;;  %1140 = vmatprep.subr.bf16.mxu1 %v3850_v45  ;;  %v947_v20 = vld [vmem:[#allocation5 + $0x2a8] sm:$0xff]  ;;  %v3828_v23 = vcombine.high %v421_v17, %v422_v18  ;;  %v423_v24 = vld [vmem:[#allocation5 + $0x2c0] sm:$0xff]  ;;  %v3827_v29 = vcombine.low %v421_v17, %v422_v18  ;;  %v316_v18 = vld [vmem:[%s5027_s23 + $0x58] sm:$0xff] }
  0xb2   : > { %v3860_v25 = vcombine.high %v946_v19, %v947_v20  ;;  %v424_v26 = vld [vmem:[#allocation5 + $0x2e0] sm:$0xff]  ;;  %v948_v27 = vld [vmem:[#allocation5 + $0x2c8] sm:$0xff]  ;;  %v3859_v31 = vcombine.low %v946_v19, %v947_v20  ;;  %v4542_v19 = vld [vmem:[#allocation8 + $0x88] sm:$0xff]  }
  0xb3   : > { %v949_v28 = vld [vmem:[#allocation5 + $0x2e8] sm:$0xff]  ;;  %v425_v30 = vld [vmem:[#allocation5 + $0x300] sm:$0xff]  ;;  %v3830_v32 = vcombine.high %v423_v24, %v424_v26  ;;  %v3829_v37 = vcombine.low %v423_v24, %v424_v26  ;;  %v4555_v20 = vld [vmem:[#allocation8 + $0x48] sm:$0xff]  }
  0xb4   : > { %616 = vmatpush1.bf16.msra.mxu0 %v3817_v50  ;;  %1141 = vmatpush1.bf16.msra.mxu1 %v3849_v51  ;;  %v426_v33 = vld [vmem:[#allocation5 + $0x320] sm:$0xff]  ;;  %v950_v34 = vld [vmem:[#allocation5 + $0x308] sm:$0xff]  ;;  %v3862_v36 = vcombine.high %v948_v27, %v949_v28  ;;  %v3861_v39 = vcombine.low %v948_v27, %v949_v28  ;;  %v4558_v28 = vld [vmem:[#allocation8 + $0x10] sm:$0xff]  }
  0xb5   : > { %617 = vmatprep.subr.bf16.mxu0 %v3820_v52  ;;  %1142 = vmatprep.subr.bf16.mxu1 %v3852_v55  ;;  %v951_v35 = vld [vmem:[#allocation5 + $0x328] sm:$0xff]  ;;  %v427_v38 = vld [vmem:[#allocation5 + $0x340] sm:$0xff]  ;;  %v3832_v40 = vcombine.high %v425_v30, %v426_v33  ;;  %v3831_v45 = vcombine.low %v425_v30, %v426_v33  ;;  %v320_v33 = vld [vmem:[%s5027_s23 + $0x78] sm:$0xff] }
  0xb6   : > { %v428_v41 = vld [vmem:[#allocation5 + $0x360] sm:$0xff]  ;;  %v952_v42 = vld [vmem:[#allocation5 + $0x348] sm:$0xff]  ;;  %v3864_v44 = vcombine.high %v950_v34, %v951_v35  ;;  %v3863_v48 = vcombine.low %v950_v34, %v951_v35 }
  0xb7   : > { %v953_v43 = vld [vmem:[#allocation5 + $0x368] sm:$0xff]  ;;  %v429_v46 = vld [vmem:[#allocation5 + $0x380] sm:$0xff]  ;;  %v3834_v49 = vcombine.high %v427_v38, %v428_v41  ;;  %v3833_v53 = vcombine.low %v427_v38, %v428_v41  ;;  %v4549_v41 = vld [vmem:[#allocation8 + $0xe8] sm:$0xff]  }
  0xb8   : > { %618 = vmatpush1.bf16.msra.mxu0 %v3819_v61  ;;  %1143 = vmatpush1.bf16.msra.mxu1 %v3851_v62  ;;  %v430_v47 = vld [vmem:[#allocation5 + $0x3a0] sm:$0xff]  ;;  %v954_v50 = vld [vmem:[#allocation5 + $0x388] sm:$0xff]  ;;  %v3866_v52 = vcombine.high %v952_v42, %v953_v43  ;;  %v3865_v56 = vcombine.low %v952_v42, %v953_v43  ;;  %v4565_v43 = vld [vmem:[#allocation8 + $0x68] sm:$0xff]  }
  0xb9   : > { %619 = vmatprep.subr.bf16.mxu0 %v3822_v63  ;;  %1144 = vmatprep.subr.bf16.mxu1 %v3854_v0  ;;  %v955_v51 = vld [vmem:[#allocation5 + $0x3a8] sm:$0xff]  ;;  %v431_v54 = vld [vmem:[#allocation5 + $0x3c0] sm:$0xff]  ;;  %v3836_v57 = vcombine.high %v429_v46, %v430_v47  ;;  %v3835_v62 = vcombine.low %v429_v46, %v430_v47  ;;  %v324_v47 = vld [vmem:[%s5027_s23 + $0x98] sm:$0xff] }
  0xba   : > { %v432_v55 = vld [vmem:[#allocation5 + $0x3e0] sm:$0xff]  ;;  %v956_v59 = vld [vmem:[#allocation5 + $0x3c8] sm:$0xff]  ;;  %v3868_v61 = vcombine.high %v954_v50, %v955_v51  ;;  %v3867_v63 = vcombine.low %v954_v50, %v955_v51  ;;  %v4552_v51 = vld [vmem:[#allocation8 + $0xb0] sm:$0xff]  }
  0xbb   : > { %v957_v60 = vld [vmem:[#allocation5 + $0x3e8] sm:$0xff]  ;;  %v3838_v0 = vcombine.high %v431_v54, %v432_v55  ;;  %v3837_v2 = vcombine.low %v431_v54, %v432_v55  ;;  %v305_v3 = vld [vmem:[%s5027_s23] sm:$0xff]  ;;  %v323_v55 = vld [vmem:[%s5027_s23 + $0x90] sm:$0xff] }
  0xbc   : > { %620 = vmatpush1.bf16.msra.mxu0 %v3821_v5  ;;  %1145 = vmatpush1.bf16.msra.mxu1 %v3853_v6  ;;  %v3870_v1 = vcombine.high %v956_v59, %v957_v60  ;;  %v3869_v5 = vcombine.low %v956_v59, %v957_v60  ;;  %v310_v6 = vld [vmem:[%s5027_s23 + $0x28] sm:$0xff]  ;;  %v5051_v9 = vpack.c.bf16 %v307_v4, %v305_v3  ;;  %v4545_v27 = vld [vmem:[#allocation8 + $0xd8] sm:$0xff]  }
  0xbd   : > { %621 = vmatprep.subr.bf16.mxu0 %v3824_v7  ;;  %1146 = vmatprep.subr.bf16.mxu1 %v3856_v8  ;;  %v312_v7 = vld [vmem:[%s5027_s23 + $0x38] sm:$0xff]  ;;  %v4539_v8 = vld [vmem:[#allocation8 + $0xc0] sm:$0xff]   ;;  %v313_v30 = vld [vmem:[%s5027_s23 + $0x40] sm:$0xff] }
  0xbe   : > { %v4553_v10 = vld [vmem:[#allocation8 + $0x40] sm:$0xff]   ;;  %v5053_v11 = vpack.c.bf16 %v312_v7, %v310_v6  ;;  %v4546_v34 = vld [vmem:[#allocation8 + $0x98] sm:$0xff]   ;;  %v336_v7 = vld [vmem:[%s5027_s23 + $0xf8] sm:$0xff] }
  0xbf   : > { %v4540_v12 = vld [vmem:[#allocation8 + $0x80] sm:$0xff]   ;;  %v321_v54 = vld [vmem:[%s5027_s23 + $0x80] sm:$0xff] }
  0xc0   : > { %622 = vmatpush1.bf16.msra.mxu0 %v3823_v13  ;;  %1147 = vmatpush1.bf16.msra.mxu1 %v3855_v14  ;;  %v309_v13 = vld [vmem:[%s5027_s23 + $0x20] sm:$0xff]  ;;  %v311_v14 = vld [vmem:[%s5027_s23 + $0x30] sm:$0xff]  ;;  %v314_v17 = vld [vmem:[%s5027_s23 + $0x48] sm:$0xff]  ;;  %v5099_v60 = vpack.c.bf16 %v323_v55, %v321_v54 }
  0xc1   : > { %623 = vmatprep.subr.bf16.mxu0 %v3826_v15  ;;  %1148 = vmatprep.subr.bf16.mxu1 %v3858_v16  ;;  %v4541_v15 = vld [vmem:[#allocation8 + $0xc8] sm:$0xff]   ;;  %v4554_v16 = vld [vmem:[#allocation8] sm:$0xff]   ;;  %v5063_v24 = vpack.c.bf16 %v311_v14, %v309_v13  ;;  %v5065_v26 = vpack.c.bf16 %v316_v18, %v314_v17  ;;  %v4562_v59 = vld [vmem:[#allocation8 + $0xb8] sm:$0xff]  }
  0xc2   : > { %v4547_v35 = vld [vmem:[#allocation8 + $0xe0] sm:$0xff]   ;;  %v329_v4 = vld [vmem:[%s5027_s23 + $0xc0] sm:$0xff]  ;;  %v335_v13 = vld [vmem:[%s5027_s23 + $0xf0] sm:$0xff] }
  0xc3   : > { %v4564_v42 = vld [vmem:[#allocation8 + $0x20] sm:$0xff]   ;;  %v337_v18 = vld [vmem:[%s5027_s23 + $0x100] sm:$0xff]  ;;  %v360_v55 = vld [vmem:[%s5027_s23 + $0x1b8] sm:$0xff] }
  0xc4   : > { %624 = vmatpush1.bf16.msra.mxu0 %v3825_v21  ;;  %1149 = vmatpush1.bf16.msra.mxu1 %v3857_v22  ;;  %v4543_v21 = vld [vmem:[#allocation8 + $0xd0] sm:$0xff]   ;;  %v4556_v22 = vld [vmem:[#allocation8 + $0x8] sm:$0xff]   ;;  %v322_v46 = vld [vmem:[%s5027_s23 + $0x88] sm:$0xff] }
  0xc5   : > { %625 = vmatprep.subr.bf16.mxu0 %v3828_v23  ;;  %1150 = vmatprep.subr.bf16.mxu1 %v3860_v25  ;;  %v4557_v23 = vld [vmem:[#allocation8 + $0x50] sm:$0xff]   ;;  %v334_v6 = vld [vmem:[%s5027_s23 + $0xe8] sm:$0xff] }
  0xc6   : > { %v4544_v25 = vld [vmem:[#allocation8 + $0x90] sm:$0xff]   ;;  %v338_v14 = vld [vmem:[%s5027_s23 + $0x108] sm:$0xff] }
  0xc7   : > { %v358_v54 = vld [vmem:[%s5027_s23 + $0x1a8] sm:$0xff] }
  0xc8   : > { %626 = vmatpush1.bf16.msra.mxu0 %v3827_v29  ;;  %1151 = vmatpush1.bf16.msra.mxu1 %v3859_v31  ;;  %v4559_v29 = vld [vmem:[#allocation8 + $0x58] sm:$0xff]   ;;  %v315_v31 = vld [vmem:[%s5027_s23 + $0x50] sm:$0xff] }
  0xc9   : > { %627 = vmatprep.subr.bf16.mxu0 %v3830_v32  ;;  %1152 = vmatprep.subr.bf16.mxu1 %v3862_v36  ;;  %v318_v32 = vld [vmem:[%s5027_s23 + $0x68] sm:$0xff]  ;;  %v4560_v36 = vld [vmem:[#allocation8 + $0x18] sm:$0xff]   ;;  %v5075_v38 = vpack.c.bf16 %v315_v31, %v313_v30 }
  0xcc   : > { %628 = vmatpush1.bf16.msra.mxu0 %v3829_v37  ;;  %1153 = vmatpush1.bf16.msra.mxu1 %v3861_v39  ;;  %v4563_v37 = vld [vmem:[#allocation8 + $0x60] sm:$0xff]  }
  0xcd   : > { %629 = vmatprep.subr.bf16.mxu0 %v3832_v40  ;;  %1154 = vmatprep.subr.bf16.mxu1 %v3864_v44  ;;  %v4548_v39 = vld [vmem:[#allocation8 + $0xa0] sm:$0xff]   ;;  %v5077_v40 = vpack.c.bf16 %v320_v33, %v318_v32  ;;  %v317_v44 = vld [vmem:[%s5027_s23 + $0x60] sm:$0xff]  ;;  %v347_v33 = vld [vmem:[%s5027_s23 + $0x150] sm:$0xff] }
  0xce   : > { %v345_v32 = vld [vmem:[%s5027_s23 + $0x140] sm:$0xff] }
  0xd0   : > { %630 = vmatpush1.bf16.msra.mxu0 %v3831_v45  ;;  %1155 = vmatpush1.bf16.msra.mxu1 %v3863_v48  ;;  %v319_v45 = vld [vmem:[%s5027_s23 + $0x70] sm:$0xff] }
  0xd1   : > { %631 = vmatprep.subr.bf16.mxu0 %v3834_v49  ;;  %1156 = vmatprep.subr.bf16.mxu1 %v3866_v52  ;;  %v4550_v48 = vld [vmem:[#allocation8 + $0xa8] sm:$0xff]   ;;  %v4551_v49 = vld [vmem:[#allocation8 + $0xf0] sm:$0xff]   ;;  %v5087_v50 = vpack.c.bf16 %v319_v45, %v317_v44  ;;  %v5089_v52 = vpack.c.bf16 %v324_v47, %v322_v46 }
  0xd2   : > { %v4566_v44 = vld [vmem:[#allocation8 + $0x28] sm:$0xff]   ;;  %v4567_v47 = vld [vmem:[#allocation8 + $0x70] sm:$0xff]  }
  0xd4   : > { %632 = vmatpush1.bf16.msra.mxu0 %v3833_v53  ;;  %1157 = vmatpush1.bf16.msra.mxu1 %v3865_v56  ;;  %v4561_v53 = vld [vmem:[#allocation8 + $0xf8] sm:$0xff]   ;;  %v326_v56 = vld [vmem:[%s5027_s23 + $0xa8] sm:$0xff] }
  0xd5   : > { %633 = vmatprep.subr.bf16.mxu0 %v3836_v57  ;;  %1158 = vmatprep.subr.bf16.mxu1 %v3868_v61  ;;  %v328_v57 = vld [vmem:[%s5027_s23 + $0xb8] sm:$0xff] }
  0xd6   : > { %v5101_v61 = vpack.c.bf16 %v328_v57, %v326_v56  ;;  %v4570_v56 = vld [vmem:[#allocation8 + $0x38] sm:$0xff]  }
  0xd8   : > { %634 = vmatpush1.bf16.msra.mxu0 %v3835_v62  ;;  %1159 = vmatpush1.bf16.msra.mxu1 %v3867_v63  ;;  %v325_v62 = vld [vmem:[%s5027_s23 + $0xa0] sm:$0xff]  ;;  %v327_v63 = vld [vmem:[%s5027_s23 + $0xb0] sm:$0xff] }
  0xd9   : > { %635 = vmatprep.subr.bf16.mxu0 %v3838_v0  ;;  %1160 = vmatprep.subr.bf16.mxu1 %v3870_v1  ;;  %v330_v0 = vld [vmem:[%s5027_s23 + $0xc8] sm:$0xff]  ;;  %v332_v1 = vld [vmem:[%s5027_s23 + $0xd8] sm:$0xff] }
  0xda   : > { %v5113_v3 = vpack.c.bf16 %v332_v1, %v330_v0  ;;  %v362_v0 = vld [vmem:[%s5027_s23 + $0x1c8] sm:$0xff]  ;;  %v364_v1 = vld [vmem:[%s5027_s23 + $0x1d8] sm:$0xff] }
  0xdc   : > { %636 = vmatpush1.bf16.msra.mxu0 %v3837_v2  ;;  %1161 = vmatpush1.bf16.msra.mxu1 %v3869_v5  ;;  %v5111_v2 = vpack.c.bf16 %v327_v63, %v325_v62  ;;  %v331_v5 = vld [vmem:[%s5027_s23 + $0xd0] sm:$0xff]  ;;  %v357_v62 = vld [vmem:[%s5027_s23 + $0x1a0] sm:$0xff] }
  0xdd   : > { %4013 = vmatprep.subr.bf16.mxu0 %v4539_v8  ;;  %4125 = vmatprep.subr.bf16.mxu1 %v4553_v10  ;;  %v5123_v8 = vpack.c.bf16 %v331_v5, %v329_v4  ;;  %v5125_v10 = vpack.c.bf16 %v336_v7, %v334_v6  ;;  %v359_v63 = vld [vmem:[%s5027_s23 + $0x1b0] sm:$0xff] }
  0xde   : > { %v5207_v4 = vld [vmem:[#allocation5 + $0x10] sm:$0xff]  ;;  %v5211_v6 = vpack.c.bf16 %v359_v63, %v357_v62 }
  0xdf   : > { %638 = vmatmul.mubr.bf16.vlgmr.msra.gmra.mrb[0].mxu0 %v5051_v9  ;;  %1163 = vmatmul.mubr.bf16.vlgmr.msra.gmra.mrb[0].mxu1 %v5051_v9  ;;  %v5209_v5 = vld [vmem:[#allocation5 + $0x30] sm:$0xff] }
  0xe0   : > { %647 = vmatprep.mubr.bf16.mxu0 %v5053_v11  ;;  %1172 = vmatprep.mubr.bf16.mxu1 %v5053_v11  ;;  %5974 = vst [vmem:[#allocation18_spill] sm:$0xff] %v5211_v6 }
  0xe1   : > { %4014 = vmatpush3.bf16.msra.mxu0 %v4540_v12  ;;  %4126 = vmatpush3.bf16.msra.mxu1 %v4554_v16  ;;  %v333_v12 = vld [vmem:[%s5027_s23 + $0xe0] sm:$0xff] }
  0xe2   : > { %4015 = vmatprep.subr.bf16.mxu0 %v4541_v15  ;;  %4127 = vmatprep.subr.bf16.mxu1 %v4555_v20  ;;  %v340_v15 = vld [vmem:[%s5027_s23 + $0x118] sm:$0xff]  ;;  %v5135_v16 = vpack.c.bf16 %v335_v13, %v333_v12  ;;  %v342_v20 = vld [vmem:[%s5027_s23 + $0x128] sm:$0xff]  ;;  %v3904_v12 = vcombine.high %v5207_v4, %v5209_v5  ;;  %v5217_v13 = vpack.c.bf16 %v364_v1, %v362_v0 }
  0xe3   : > { %v5137_v17 = vpack.c.bf16 %v340_v15, %v338_v14  ;;  %v361_v14 = vld [vmem:[%s5027_s23 + $0x1c0] sm:$0xff]  ;;  %v363_v15 = vld [vmem:[%s5027_s23 + $0x1d0] sm:$0xff] }
  0xe4   : > { %5975 = vst [vmem:[#allocation19_spill] sm:$0xff] %v5217_v13 }
  0xe5   : > { %4016 = vmatpush3.bf16.msra.mxu0 %v4542_v19  ;;  %4128 = vmatpush3.bf16.msra.mxu1 %v4556_v22  ;;  %v339_v19 = vld [vmem:[%s5027_s23 + $0x110] sm:$0xff] }
  0xe6   : > { %4017 = vmatprep.subr.bf16.mxu0 %v4543_v21  ;;  %4129 = vmatprep.subr.bf16.mxu1 %v4557_v23  ;;  %v344_v21 = vld [vmem:[%s5027_s23 + $0x138] sm:$0xff]  ;;  %v5147_v22 = vpack.c.bf16 %v339_v19, %v337_v18  ;;  %v366_v18 = vld [vmem:[%s5027_s23 + $0x1e8] sm:$0xff] }
  0xe7   : > { %648 = vmatmul.mubr.bf16.gmra.mrb[4].mxu0 %v5063_v24  ;;  %1173 = vmatmul.mubr.bf16.gmra.mrb[4].mxu1 %v5063_v24  ;;  %v5149_v23 = vpack.c.bf16 %v344_v21, %v342_v20  ;;  %v368_v19 = vld [vmem:[%s5027_s23 + $0x1f8] sm:$0xff]  ;;  %v5227_v20 = vpack.c.bf16 %v363_v15, %v361_v14 }
  0xe8   : > { %657 = vmatprep.mubr.bf16.mxu0 %v5065_v26  ;;  %1182 = vmatprep.mubr.bf16.mxu1 %v5065_v26  ;;  %v5229_v21 = vpack.c.bf16 %v368_v19, %v366_v18 }
  0xe9   : > { %4018 = vmatpush3.bf16.msra.mxu0 %v4544_v25  ;;  %4130 = vmatpush3.bf16.msra.mxu1 %v4558_v28  ;;  %v341_v25 = vld [vmem:[%s5027_s23 + $0x120] sm:$0xff]  ;;  %v346_v28 = vld [vmem:[%s5027_s23 + $0x148] sm:$0xff]  ;;  %5976 = vst [vmem:[#allocation20_spill] sm:$0xff] %v5227_v20 }
  0xea   : > { %4019 = vmatprep.subr.bf16.mxu0 %v4545_v27  ;;  %4131 = vmatprep.subr.bf16.mxu1 %v4559_v29  ;;  %v343_v27 = vld [vmem:[%s5027_s23 + $0x130] sm:$0xff]  ;;  %v348_v29 = vld [vmem:[%s5027_s23 + $0x158] sm:$0xff]  ;;  %5977 = vst [vmem:[#allocation21_spill] sm:$0xff] %v5229_v21 }
  0xeb   : > { %v5159_v30 = vpack.c.bf16 %v343_v27, %v341_v25  ;;  %v5161_v31 = vpack.c.bf16 %v348_v29, %v346_v28  ;;  %v365_v25 = vld [vmem:[%s5027_s23 + $0x1e0] sm:$0xff]  ;;  %v367_v27 = vld [vmem:[%s5027_s23 + $0x1f0] sm:$0xff]  ;;  %v435_v29 = vlaneseq }
  0xec   : > { %v5237_v28 = vpack.c.bf16 %v367_v27, %v365_v25 }
  0xed   : > { %4020 = vmatpush3.bf16.msra.mxu0 %v4546_v34  ;;  %4132 = vmatpush3.bf16.msra.mxu1 %v4560_v36  ;;  %v350_v34 = vld [vmem:[%s5027_s23 + $0x168] sm:$0xff]  ;;  %v5171_v36 = vpack.c.bf16 %v347_v33, %v345_v32  ;;  %v436_v32 = vshrl.u32 %v435_v29, 7  ;;  %v433_v33 = vld [vmem:[#allocation7] sm:$0x3]  ;;  %v5265_v29 = vld [vmem:[#allocation5 + $0x18] sm:$0xff] }
  0xee   : > { %4021 = vmatprep.subr.bf16.mxu0 %v4547_v35  ;;  %4133 = vmatprep.subr.bf16.mxu1 %v4563_v37  ;;  %v352_v35 = vld [vmem:[%s5027_s23 + $0x178] sm:$0xff]  ;;  %5978 = vst [vmem:[#allocation22_spill] sm:$0xff] %v5237_v28 }
  0xef   : > { %658 = vmatmul.mubr.bf16.gmra.mrb[8].mxu0 %v5075_v38  ;;  %1183 = vmatmul.mubr.bf16.gmra.mrb[8].mxu1 %v5075_v38  ;;  %v5173_v37 = vpack.c.bf16 %v352_v35, %v350_v34  ;;  %v5241_v34 = vsub.s32 0, %v436_v32  ;;  %v958_v35 = vld [vmem:[#allocation7 + $0x2] sm:$0x3] }
  0xf0   : > { %667 = vmatprep.mubr.bf16.mxu0 %v5077_v40  ;;  %1192 = vmatprep.mubr.bf16.mxu1 %v5077_v40 }
  0xf1   : > { %4022 = vmatpush3.bf16.msra.mxu0 %v4548_v39  ;;  %4134 = vmatpush3.bf16.msra.mxu1 %v4564_v42  ;;  %v349_v39 = vld [vmem:[%s5027_s23 + $0x160] sm:$0xff]  ;;  %v354_v42 = vld [vmem:[%s5027_s23 + $0x188] sm:$0xff]  ;;  %5979 = vst [vmem:[#allocation23_spill] sm:$0xff] %v5241_v34 }
  0xf2   : > { %4023 = vmatprep.subr.bf16.mxu0 %v4549_v41  ;;  %4135 = vmatprep.subr.bf16.mxu1 %v4565_v43  ;;  %v351_v41 = vld [vmem:[%s5027_s23 + $0x170] sm:$0xff]  ;;  %v356_v43 = vld [vmem:[%s5027_s23 + $0x198] sm:$0xff] }
  0xf3   : > { %v5183_v45 = vpack.c.bf16 %v351_v41, %v349_v39  ;;  %v5185_v46 = vpack.c.bf16 %v356_v43, %v354_v42  ;;  %v5243_v39 = vsub.s32 1, %v436_v32  ;;  %v5246_v41 = vrot.slane %v433_v33, %v5241_v34  ;;  %v5267_v32 = vld [vmem:[#allocation5 + $0x38] sm:$0xff] }
  0xf4   : > { %v5249_v42 = vrot.slane %v958_v35, %v5241_v34 }
  0xf5   : > { %4024 = vmatpush3.bf16.msra.mxu0 %v4550_v48  ;;  %4136 = vmatpush3.bf16.msra.mxu1 %v4566_v44  ;;  %v4568_v48 = vld [vmem:[#allocation8 + $0x30] sm:$0xff]   ;;  %5980 = vst [vmem:[#allocation24_spill] sm:$0xff] %v5243_v39  ;;  %v5252_v43 = vrot.slane %v433_v33, %v5243_v39  ;;  %v5255_v44 = vrot.slane %v958_v35, %v5243_v39 }
  0xf6   : > { %4025 = vmatprep.subr.bf16.mxu0 %v4551_v49  ;;  %4137 = vmatprep.subr.bf16.mxu1 %v4567_v47  ;;  %v353_v49 = vld [vmem:[%s5027_s23 + $0x180] sm:$0xff] }
  0xf7   : > { %668 = vmatmul.mubr.bf16.gmra.mrb[12].mxu0 %v5087_v50  ;;  %1193 = vmatmul.mubr.bf16.gmra.mrb[12].mxu1 %v5087_v50 }
  0xf8   : > { %677 = vmatprep.mubr.bf16.mxu0 %v5089_v52  ;;  %1202 = vmatprep.mubr.bf16.mxu1 %v5089_v52 }
  0xf9   : > { %4026 = vmatpush3.bf16.msra.mxu0 %v4552_v51  ;;  %4138 = vmatpush3.bf16.msra.mxu1 %v4568_v48  ;;  %v355_v51 = vld [vmem:[%s5027_s23 + $0x190] sm:$0xff] }
  0xfa   : > { %4027 = vmatprep.subr.bf16.mxu0 %v4561_v53  ;;  %v4569_v53 = vld [vmem:[#allocation8 + $0x78] sm:$0xff]   ;;  %v5195_v57 = vpack.c.bf16 %v355_v51, %v353_v49 }
  0xfb   : > { %4139 = vmatprep.subr.bf16.mxu1 %v4569_v53 }
  0xfd   : > { %4028 = vmatpush3.bf16.msra.mxu0 %v4562_v59  ;;  %4140 = vmatpush3.bf16.msra.mxu1 %v4570_v56  ;;  %v5197_v59 = vpack.c.bf16 %v360_v55, %v358_v54 }
  0xfe   : > { %2169 = vmatprep.subr.bf16.mxu0 %v3904_v12 }
  0xff   : > { %678 = vmatmul.mubr.bf16.gmra.mrb[16].mxu0 %v5099_v60  ;;  %1203 = vmatmul.mubr.bf16.gmra.mrb[16].mxu1 %v5099_v60  ;;  %5973 = vst [vmem:[#allocation17_spill] sm:$0xff] %v5197_v59 }
 0x100   : > { %687 = vmatprep.mubr.bf16.mxu0 %v5101_v61  ;;  %1212 = vmatprep.mubr.bf16.mxu1 %v5101_v61 }
 0x107   : > { %688 = vmatmul.mubr.bf16.gmra.mrb[20].mxu0 %v5111_v2  ;;  %1213 = vmatmul.mubr.bf16.gmra.mrb[20].mxu1 %v5111_v2 }
 0x108   : > { %697 = vmatprep.mubr.bf16.mxu0 %v5113_v3  ;;  %1222 = vmatprep.mubr.bf16.mxu1 %v5113_v3 }
 0x10f   : > { %698 = vmatmul.mubr.bf16.gmra.mrb[24].mxu0 %v5123_v8  ;;  %1223 = vmatmul.mubr.bf16.gmra.mrb[24].mxu1 %v5123_v8 }
 0x110   : > { %707 = vmatprep.mubr.bf16.mxu0 %v5125_v10  ;;  %1232 = vmatprep.mubr.bf16.mxu1 %v5125_v10 }
 0x117   : > { %708 = vmatmul.mubr.bf16.gmra.mrb[28].mxu0 %v5135_v16  ;;  %1233 = vmatmul.mubr.bf16.gmra.mrb[28].mxu1 %v5135_v16 }
 0x118   : > { %717 = vmatprep.mubr.bf16.mxu0 %v5137_v17  ;;  %1242 = vmatprep.mubr.bf16.mxu1 %v5137_v17 }
 0x11f   : > { %718 = vmatmul.mubr.bf16.gmra.mrb[32].mxu0 %v5147_v22  ;;  %1243 = vmatmul.mubr.bf16.gmra.mrb[32].mxu1 %v5147_v22 }
 0x120   : > { %727 = vmatprep.mubr.bf16.mxu0 %v5149_v23  ;;  %1252 = vmatprep.mubr.bf16.mxu1 %v5149_v23 }
 0x127   : > { %728 = vmatmul.mubr.bf16.gmra.mrb[36].mxu0 %v5159_v30  ;;  %1253 = vmatmul.mubr.bf16.gmra.mrb[36].mxu1 %v5159_v30 }
 0x128   : > { %737 = vmatprep.mubr.bf16.mxu0 %v5161_v31  ;;  %1262 = vmatprep.mubr.bf16.mxu1 %v5161_v31 }
 0x12f   : > { %738 = vmatmul.mubr.bf16.gmra.mrb[40].mxu0 %v5171_v36  ;;  %1263 = vmatmul.mubr.bf16.gmra.mrb[40].mxu1 %v5171_v36 }
 0x130   : > { %747 = vmatprep.mubr.bf16.mxu0 %v5173_v37  ;;  %1272 = vmatprep.mubr.bf16.mxu1 %v5173_v37 }
 0x137   : > { %748 = vmatmul.mubr.bf16.gmra.mrb[44].mxu0 %v5183_v45  ;;  %1273 = vmatmul.mubr.bf16.gmra.mrb[44].mxu1 %v5183_v45 }
 0x138   : > { %757 = vmatprep.mubr.bf16.mxu0 %v5185_v46  ;;  %1282 = vmatprep.mubr.bf16.mxu1 %v5185_v46 }
 0x13f   : > { %758 = vmatmul.mubr.bf16.gmra.mrb[48].mxu0 %v5195_v57  ;;  %1283 = vmatmul.mubr.bf16.gmra.mrb[48].mxu1 %v5195_v57 }
 0x140   : > { %767 = vmatprep.mubr.bf16.mxu0 %v5197_v59  ;;  %1292 = vmatprep.mubr.bf16.mxu1 %v5197_v59 }
 0x147   : > { %768 = vmatmul.mubr.bf16.gmra.mrb[52].mxu0 %v5211_v6  ;;  %1293 = vmatmul.mubr.bf16.gmra.mrb[52].mxu1 %v5211_v6 }
 0x148   : > { %777 = vmatprep.mubr.bf16.mxu0 %v5217_v13  ;;  %1302 = vmatprep.mubr.bf16.mxu1 %v5217_v13 }
 0x14f   : > { %778 = vmatmul.mubr.bf16.gmra.mrb[56].mxu0 %v5227_v20  ;;  %1303 = vmatmul.mubr.bf16.gmra.mrb[56].mxu1 %v5227_v20  ;;  %v1971_v20 = vld [vmem:[#allocation5 + $0xd0] sm:$0xff] }
 0x150   : > { %787 = vmatprep.mubr.bf16.mxu0 %v5229_v21  ;;  %1312 = vmatprep.mubr.bf16.mxu1 %v5229_v21 }
 0x157   : > { %788 = vmatmul.mubr.bf16.gmra.mrb[60].mxu0 %v5237_v28  ;;  %1313 = vmatmul.mubr.bf16.gmra.mrb[60].mxu1 %v5237_v28 }
 0x1b2   : > { %v639_v47 = vpop.f32.mrb[0].mxu0  ;;  %v1164_v49 = vpop.f32.mrb[0].mxu1 }
 0x1b3   : > { %v640_v48 = vadd.f32 %v639_v47, %v5246_v41  ;;  %v641_v51 = vpop.f32.mrb[1].mxu0  ;;  %v1165_v53 = vadd.f32 %v1164_v49, %v5249_v42  ;;  %v1166_v55 = vpop.f32.mrb[1].mxu1 }
 0x1b4   : > { %v642_v54 = vadd.f32 %v641_v51, %v5252_v43  ;;  %v643_v56 = vpop.f32.mrb[2].mxu0  ;;  %v1167_v63 = vadd.f32 %v1166_v55, %v5255_v44  ;;  %v1168_v1 = vpop.f32.mrb[2].mxu1  ;;  %v1967_v55 = vld [vmem:[#allocation5 + $0x50] sm:$0xff] }
 0x1b5   : > { %v798_v62 = vmax.f32 %v640_v48, 0.0  ;;  %v644_v0 = vadd.f32 %v643_v56, %v5246_v41  ;;  %v645_v12 = vpop.f32.mrb[3].mxu0  ;;  %v1169_v15 = vadd.f32 %v1168_v1, %v5249_v42  ;;  %v1170_v19 = vpop.f32.mrb[3].mxu1  ;;  %v1323_v33 = vmax.f32 %v1165_v53, 0.0  ;;  %v1968_v56 = vld [vmem:[#allocation5 + $0x70] sm:$0xff] }
 0x1b6   : > { %v799_v14 = vmax.f32 %v642_v54, 0.0  ;;  %v646_v18 = vadd.f32 %v645_v12, %v5252_v43  ;;  %v1171_v27 = vadd.f32 %v1170_v19, %v5255_v44  ;;  %v1324_v49 = vmax.f32 %v1167_v63, 0.0 }
 0x1b7   : > { %v800_v25 = vmax.f32 %v644_v0, 0.0  ;;  %v1325_v35 = vmax.f32 %v1169_v15, 0.0  ;;  %v3906_v63 = vcombine.high %v1967_v55, %v1968_v56 }
 0x1b8   : > { %v801_v47 = vmax.f32 %v646_v18, 0.0  ;;  %v1326_v54 = vmax.f32 %v1171_v27, 0.0 }
 0x1b9   : > { %v862_v51 = vpack.c.bf16 %v800_v25, %v798_v62  ;;  %v1387_v1 = vpack.c.bf16 %v1325_v35, %v1323_v33  ;;  %v1969_v35 = vld [vmem:[#allocation5 + $0x90] sm:$0xff] }
 0x1ba   : > { %v863_v12 = vpack.c.bf16 %v801_v47, %v799_v14  ;;  %v649_v0 = vpop.f32.mrb[4].mxu0  ;;  %v1388_v7 = vpack.c.bf16 %v1326_v54, %v1324_v49  ;;  %v1174_v39 = vpop.f32.mrb[4].mxu1  ;;  %v1970_v47 = vld [vmem:[#allocation5 + $0xb0] sm:$0xff] }
 0x1bb   : > { %v650_v19 = vadd.f32 %v649_v0, %v5246_v41  ;;  %v651_v34 = vpop.f32.mrb[5].mxu0  ;;  %v1175_v53 = vadd.f32 %v1174_v39, %v5249_v42  ;;  %v1176_v18 = vpop.f32.mrb[5].mxu1  ;;  %v3908_v48 = vcombine.high %v1969_v35, %v1970_v47 }
 0x1bc   : > { %v652_v15 = vadd.f32 %v651_v34, %v5252_v43  ;;  %v653_v28 = vpop.f32.mrb[6].mxu0  ;;  %1836 = vmatprep.mubr.bf16.mxu1 %v863_v12  ;;  %v1177_v25 = vadd.f32 %v1176_v18, %v5255_v44  ;;  %v1178_v14 = vpop.f32.mrb[6].mxu1  ;;  %1579 = vmatprep.mubr.bf16.mxu0 %v1388_v7 }
 0x1bd   : > { %v802_v62 = vmax.f32 %v650_v19, 0.0  ;;  %v654_v27 = vadd.f32 %v653_v28, %v5246_v41  ;;  %v655_v33 = vpop.f32.mrb[7].mxu0  ;;  %1837 = vmatmul.mubr.bf16.vlgmr.msra.gmra.mrb[64].mxu1 %v862_v51  ;;  %v1179_v39 = vadd.f32 %v1178_v14, %v5249_v42  ;;  %v1180_v54 = vpop.f32.mrb[7].mxu1  ;;  %1580 = vmatmul.mubr.bf16.vlgmr.msra.gmra.mrb[64].mxu0 %v1387_v1  ;;  %v5981_v19 = vcombine.low %v5207_v4, %v5209_v5 }
 0x1be   : > { %v803_v49 = vmax.f32 %v652_v15, 0.0  ;;  %v656_v34 = vadd.f32 %v655_v33, %v5252_v43  ;;  %v1181_v0 = vadd.f32 %v1180_v54, %v5255_v44  ;;  %v3905_v28 = vcombine.low %v1967_v55, %v1968_v56  ;;  %v1972_v33 = vld [vmem:[#allocation5 + $0xf0] sm:$0xff] }
 0x1bf   : > { %v804_v12 = vmax.f32 %v654_v27, 0.0  ;;  %2170 = vmatpush1.bf16.msra.mxu0 %v5981_v19  ;;  %v1327_v7 = vmax.f32 %v1175_v53, 0.0  ;;  %v1329_v18 = vmax.f32 %v1179_v39, 0.0  ;;  %v1328_v15 = vmax.f32 %v1177_v25, 0.0 }
 0x1c0   : > { %v805_v51 = vmax.f32 %v656_v34, 0.0  ;;  %2171 = vmatprep.subr.bf16.mxu0 %v3906_v63  ;;  %v1330_v14 = vmax.f32 %v1181_v0, 0.0  ;;  %v3907_v5 = vcombine.low %v1969_v35, %v1970_v47  ;;  %v1973_v0 = vld [vmem:[#allocation5 + $0x110] sm:$0xff] }
 0x1c1   : > { %v864_v21 = vpack.c.bf16 %v804_v12, %v802_v62  ;;  %v1389_v13 = vpack.c.bf16 %v1329_v18, %v1327_v7  ;;  %v3910_v62 = vcombine.high %v1971_v20, %v1972_v33  ;;  %v1974_v35 = vld [vmem:[#allocation5 + $0x130] sm:$0xff]  ;;  %v3909_v18 = vcombine.low %v1971_v20, %v1972_v33 }
 0x1c2   : > { %v865_v1 = vpack.c.bf16 %v805_v51, %v803_v49  ;;  %v659_v27 = vpop.f32.mrb[8].mxu0  ;;  %v1390_v6 = vpack.c.bf16 %v1330_v14, %v1328_v15  ;;  %v1184_v59 = vpop.f32.mrb[8].mxu1  ;;  %v3911_v20 = vcombine.low %v1973_v0, %v1974_v35 }
 0x1c3   : > { %v660_v54 = vadd.f32 %v659_v27, %v5246_v41  ;;  %v661_v4 = vpop.f32.mrb[9].mxu0  ;;  %2172 = vmatpush1.bf16.msra.mxu0 %v3905_v28  ;;  %v1185_v55 = vadd.f32 %v1184_v59, %v5249_v42  ;;  %v1186_v53 = vpop.f32.mrb[9].mxu1 }
 0x1c4   : > { %v662_v56 = vadd.f32 %v661_v4, %v5252_v43  ;;  %v663_v63 = vpop.f32.mrb[10].mxu0  ;;  %1844 = vmatprep.mubr.bf16.mxu1 %v865_v1  ;;  %2173 = vmatprep.subr.bf16.mxu0 %v3908_v48  ;;  %v1187_v49 = vadd.f32 %v1186_v53, %v5255_v44  ;;  %v1188_v34 = vpop.f32.mrb[10].mxu1  ;;  %v1976_v4 = vld [vmem:[#allocation5 + $0x170] sm:$0xff] }
 0x1c5   : > { %v806_v25 = vmax.f32 %v660_v54, 0.0  ;;  %v664_v39 = vadd.f32 %v663_v63, %v5246_v41  ;;  %1587 = vmatprep.mubr.bf16.mxu0 %v1390_v6  ;;  %v665_v12 = vpop.f32.mrb[11].mxu0  ;;  %1845 = vmatmul.mubr.bf16.gmra.mrb[68].mxu1 %v864_v21  ;;  %v1189_v59 = vadd.f32 %v1188_v34, %v5249_v42  ;;  %v1190_v28 = vpop.f32.mrb[11].mxu1  ;;  %v1331_v51 = vmax.f32 %v1185_v55, 0.0  ;;  %v1975_v54 = vld [vmem:[#allocation5 + $0x150] sm:$0xff] }
 0x1c6   : > { %v807_v47 = vmax.f32 %v662_v56, 0.0  ;;  %v666_v19 = vadd.f32 %v665_v12, %v5252_v43  ;;  %1588 = vmatmul.mubr.bf16.gmra.mrb[68].mxu0 %v1389_v13  ;;  %v1191_v7 = vadd.f32 %v1190_v28, %v5255_v44  ;;  %v3912_v6 = vcombine.high %v1973_v0, %v1974_v35  ;;  %v1978_v0 = vld [vmem:[#allocation5 + $0x1b0] sm:$0xff] }
 0x1c7   : > { %v808_v48 = vmax.f32 %v664_v39, 0.0  ;;  %2174 = vmatpush1.bf16.msra.mxu0 %v3907_v5  ;;  %v1333_v15 = vmax.f32 %v1189_v59, 0.0  ;;  %v1332_v21 = vmax.f32 %v1187_v49, 0.0 }
 0x1c8   : > { %v809_v14 = vmax.f32 %v666_v19, 0.0  ;;  %2175 = vmatprep.subr.bf16.mxu0 %v3910_v62  ;;  %v1334_v27 = vmax.f32 %v1191_v7, 0.0 }
 0x1c9   : > { %v866_v1 = vpack.c.bf16 %v808_v48, %v806_v25  ;;  %v1391_v56 = vpack.c.bf16 %v1333_v15, %v1331_v51  ;;  %v3914_v25 = vcombine.high %v1975_v54, %v1976_v4  ;;  %v1977_v48 = vld [vmem:[#allocation5 + $0x190] sm:$0xff] }
 0x1ca   : > { %v867_v53 = vpack.c.bf16 %v809_v14, %v807_v47  ;;  %v669_v63 = vpop.f32.mrb[12].mxu0  ;;  %v1392_v34 = vpack.c.bf16 %v1334_v27, %v1332_v21  ;;  %v1194_v39 = vpop.f32.mrb[12].mxu1 }
 0x1cb   : > { %v670_v13 = vadd.f32 %v669_v63, %v5246_v41  ;;  %v671_v12 = vpop.f32.mrb[13].mxu0  ;;  %2176 = vmatpush1.bf16.msra.mxu0 %v3909_v18  ;;  %v1195_v33 = vadd.f32 %v1194_v39, %v5249_v42  ;;  %v1196_v55 = vpop.f32.mrb[13].mxu1  ;;  %v3916_v63 = vcombine.high %v1977_v48, %v1978_v0  ;;  %v1979_v39 = vld [vmem:[#allocation5 + $0x1d0] sm:$0xff] }
 0x1cc   : > { %v672_v5 = vadd.f32 %v671_v12, %v5252_v43  ;;  %v673_v62 = vpop.f32.mrb[14].mxu0  ;;  %1852 = vmatprep.mubr.bf16.mxu1 %v867_v53  ;;  %2177 = vmatprep.subr.bf16.mxu0 %v3912_v6  ;;  %v1197_v47 = vadd.f32 %v1196_v55, %v5255_v44  ;;  %v1198_v19 = vpop.f32.mrb[14].mxu1  ;;  %v3913_v6 = vcombine.low %v1975_v54, %v1976_v4  ;;  %v1980_v12 = vld [vmem:[#allocation5 + $0x1f0] sm:$0xff] }
 0x1cd   : > { %v810_v49 = vmax.f32 %v670_v13, 0.0  ;;  %v674_v59 = vadd.f32 %v673_v62, %v5246_v41  ;;  %1595 = vmatprep.mubr.bf16.mxu0 %v1392_v34  ;;  %v675_v28 = vpop.f32.mrb[15].mxu0  ;;  %1853 = vmatmul.mubr.bf16.gmra.mrb[72].mxu1 %v866_v1  ;;  %v1199_v7 = vadd.f32 %v1198_v19, %v5249_v42  ;;  %v1200_v51 = vpop.f32.mrb[15].mxu1  ;;  %v1335_v21 = vmax.f32 %v1195_v33, 0.0 }
 0x1ce   : > { %v811_v35 = vmax.f32 %v672_v5, 0.0  ;;  %v676_v18 = vadd.f32 %v675_v28, %v5252_v43  ;;  %1596 = vmatmul.mubr.bf16.gmra.mrb[72].mxu0 %v1391_v56  ;;  %v1201_v14 = vadd.f32 %v1200_v51, %v5255_v44  ;;  %v1336_v1 = vmax.f32 %v1197_v47, 0.0 }
 0x1cf   : > { %v812_v15 = vmax.f32 %v674_v59, 0.0  ;;  %2178 = vmatpush1.bf16.msra.mxu0 %v3911_v20  ;;  %v1337_v27 = vmax.f32 %v1199_v7, 0.0  ;;  %v3915_v54 = vcombine.low %v1977_v48, %v1978_v0  ;;  %v1982_v48 = vld [vmem:[#allocation5 + $0x230] sm:$0xff] }
 0x1d0   : > { %v813_v53 = vmax.f32 %v676_v18, 0.0  ;;  %2179 = vmatprep.subr.bf16.mxu0 %v3914_v25  ;;  %v1338_v13 = vmax.f32 %v1201_v14, 0.0 }
 0x1d1   : > { %v868_v34 = vpack.c.bf16 %v812_v15, %v810_v49  ;;  %v1393_v5 = vpack.c.bf16 %v1337_v27, %v1335_v21  ;;  %v3918_v49 = vcombine.high %v1979_v39, %v1980_v12  ;;  %v1981_v15 = vld [vmem:[#allocation5 + $0x210] sm:$0xff] }
 0x1d2   : > { %v869_v55 = vpack.c.bf16 %v813_v53, %v811_v35  ;;  %v679_v62 = vpop.f32.mrb[16].mxu0  ;;  %v1394_v19 = vpack.c.bf16 %v1338_v13, %v1336_v1  ;;  %v1204_v59 = vpop.f32.mrb[16].mxu1 }
 0x1d3   : > { %v680_v56 = vadd.f32 %v679_v62, %v5246_v41  ;;  %v681_v28 = vpop.f32.mrb[17].mxu0  ;;  %2180 = vmatpush1.bf16.msra.mxu0 %v3913_v6  ;;  %v1205_v4 = vadd.f32 %v1204_v59, %v5249_v42  ;;  %v1206_v33 = vpop.f32.mrb[17].mxu1  ;;  %v3920_v62 = vcombine.high %v1981_v15, %v1982_v48  ;;  %v1983_v59 = vld [vmem:[#allocation5 + $0x250] sm:$0xff] }
 0x1d4   : > { %v682_v20 = vadd.f32 %v681_v28, %v5252_v43  ;;  %v683_v25 = vpop.f32.mrb[18].mxu0  ;;  %1860 = vmatprep.mubr.bf16.mxu1 %v869_v55  ;;  %2181 = vmatprep.subr.bf16.mxu0 %v3916_v63  ;;  %v1207_v35 = vadd.f32 %v1206_v33, %v5255_v44  ;;  %v1208_v18 = vpop.f32.mrb[18].mxu1  ;;  %v3917_v63 = vcombine.low %v1979_v39, %v1980_v12  ;;  %v1984_v28 = vld [vmem:[#allocation5 + $0x270] sm:$0xff] }
 0x1d5   : > { %v814_v47 = vmax.f32 %v680_v56, 0.0  ;;  %v684_v7 = vadd.f32 %v683_v25, %v5246_v41  ;;  %1603 = vmatprep.mubr.bf16.mxu0 %v1394_v19  ;;  %v685_v51 = vpop.f32.mrb[19].mxu0  ;;  %1861 = vmatmul.mubr.bf16.gmra.mrb[76].mxu1 %v868_v34  ;;  %v1209_v14 = vadd.f32 %v1208_v18, %v5249_v42  ;;  %v1210_v21 = vpop.f32.mrb[19].mxu1  ;;  %v1339_v1 = vmax.f32 %v1205_v4, 0.0 }
 0x1d6   : > { %v815_v0 = vmax.f32 %v682_v20, 0.0  ;;  %v686_v6 = vadd.f32 %v685_v51, %v5252_v43  ;;  %1604 = vmatmul.mubr.bf16.gmra.mrb[76].mxu0 %v1393_v5  ;;  %v1211_v53 = vadd.f32 %v1210_v21, %v5255_v44  ;;  %v1340_v34 = vmax.f32 %v1207_v35, 0.0 }
 0x1d7   : > { %v816_v27 = vmax.f32 %v684_v7, 0.0  ;;  %2182 = vmatpush1.bf16.msra.mxu0 %v3915_v54  ;;  %v1341_v13 = vmax.f32 %v1209_v14, 0.0  ;;  %v3919_v39 = vcombine.low %v1981_v15, %v1982_v48  ;;  %v1986_v15 = vld [vmem:[#allocation5 + $0x2b0] sm:$0xff] }
 0x1d8   : > { %v817_v55 = vmax.f32 %v686_v6, 0.0  ;;  %2183 = vmatprep.subr.bf16.mxu0 %v3918_v49  ;;  %v1342_v56 = vmax.f32 %v1211_v53, 0.0 }
 0x1d9   : > { %v870_v19 = vpack.c.bf16 %v816_v27, %v814_v47  ;;  %v1395_v20 = vpack.c.bf16 %v1341_v13, %v1339_v1  ;;  %v3922_v47 = vcombine.high %v1983_v59, %v1984_v28  ;;  %v1985_v27 = vld [vmem:[#allocation5 + $0x290] sm:$0xff] }
 0x1da   : > { %v871_v33 = vpack.c.bf16 %v817_v55, %v815_v0  ;;  %v689_v25 = vpop.f32.mrb[20].mxu0  ;;  %v1396_v18 = vpack.c.bf16 %v1342_v56, %v1340_v34  ;;  %v1214_v7 = vpop.f32.mrb[20].mxu1 }
 0x1db   : > { %v690_v5 = vadd.f32 %v689_v25, %v5246_v41  ;;  %v691_v51 = vpop.f32.mrb[21].mxu0  ;;  %2184 = vmatpush1.bf16.msra.mxu0 %v3917_v63  ;;  %v1215_v12 = vadd.f32 %v1214_v7, %v5249_v42  ;;  %v1216_v4 = vpop.f32.mrb[21].mxu1  ;;  %v3924_v25 = vcombine.high %v1985_v27, %v1986_v15  ;;  %v1987_v7 = vld [vmem:[#allocation5 + $0x2d0] sm:$0xff] }
 0x1dc   : > { %v692_v54 = vadd.f32 %v691_v51, %v5252_v43  ;;  %v693_v49 = vpop.f32.mrb[22].mxu0  ;;  %1868 = vmatprep.mubr.bf16.mxu1 %v871_v33  ;;  %2185 = vmatprep.subr.bf16.mxu0 %v3920_v62  ;;  %v1217_v0 = vadd.f32 %v1216_v4, %v5255_v44  ;;  %v1218_v6 = vpop.f32.mrb[22].mxu1  ;;  %v3921_v62 = vcombine.low %v1983_v59, %v1984_v28  ;;  %v1988_v51 = vld [vmem:[#allocation5 + $0x2f0] sm:$0xff] }
 0x1dd   : > { %v818_v35 = vmax.f32 %v690_v5, 0.0  ;;  %v694_v14 = vadd.f32 %v693_v49, %v5246_v41  ;;  %1611 = vmatprep.mubr.bf16.mxu0 %v1396_v18  ;;  %v695_v21 = vpop.f32.mrb[23].mxu0  ;;  %1869 = vmatmul.mubr.bf16.gmra.mrb[80].mxu1 %v870_v19  ;;  %v1219_v53 = vadd.f32 %v1218_v6, %v5249_v42  ;;  %v1220_v1 = vpop.f32.mrb[23].mxu1  ;;  %v1343_v34 = vmax.f32 %v1215_v12, 0.0 }
 0x1de   : > { %v819_v48 = vmax.f32 %v692_v54, 0.0  ;;  %v696_v63 = vadd.f32 %v695_v21, %v5252_v43  ;;  %1612 = vmatmul.mubr.bf16.gmra.mrb[80].mxu0 %v1395_v20  ;;  %v1221_v55 = vadd.f32 %v1220_v1, %v5255_v44  ;;  %v1344_v19 = vmax.f32 %v1217_v0, 0.0 }
 0x1df   : > { %v820_v13 = vmax.f32 %v694_v14, 0.0  ;;  %2186 = vmatpush1.bf16.msra.mxu0 %v3919_v39  ;;  %v1345_v56 = vmax.f32 %v1219_v53, 0.0  ;;  %v3923_v59 = vcombine.low %v1985_v27, %v1986_v15  ;;  %v1990_v27 = vld [vmem:[#allocation5 + $0x330] sm:$0xff] }
 0x1e0   : > { %v821_v33 = vmax.f32 %v696_v63, 0.0  ;;  %2187 = vmatprep.subr.bf16.mxu0 %v3922_v47  ;;  %v1346_v5 = vmax.f32 %v1221_v55, 0.0 }
 0x1e1   : > { %v872_v18 = vpack.c.bf16 %v820_v13, %v818_v35  ;;  %v1397_v54 = vpack.c.bf16 %v1345_v56, %v1343_v34  ;;  %v3926_v35 = vcombine.high %v1987_v7, %v1988_v51  ;;  %v1989_v13 = vld [vmem:[#allocation5 + $0x310] sm:$0xff] }
 0x1e2   : > { %v873_v4 = vpack.c.bf16 %v821_v33, %v819_v48  ;;  %v699_v49 = vpop.f32.mrb[24].mxu0  ;;  %v1398_v6 = vpack.c.bf16 %v1346_v5, %v1344_v19  ;;  %v1224_v14 = vpop.f32.mrb[24].mxu1 }
 0x1e3   : > { %v700_v20 = vadd.f32 %v699_v49, %v5246_v41  ;;  %v701_v21 = vpop.f32.mrb[25].mxu0  ;;  %2188 = vmatpush1.bf16.msra.mxu0 %v3921_v62  ;;  %v1225_v28 = vadd.f32 %v1224_v14, %v5249_v42  ;;  %v1226_v12 = vpop.f32.mrb[25].mxu1  ;;  %v3928_v49 = vcombine.high %v1989_v13, %v1990_v27  ;;  %v1991_v14 = vld [vmem:[#allocation5 + $0x350] sm:$0xff] }
 0x1e4   : > { %v702_v39 = vadd.f32 %v701_v21, %v5252_v43  ;;  %v703_v47 = vpop.f32.mrb[26].mxu0  ;;  %1876 = vmatprep.mubr.bf16.mxu1 %v873_v4  ;;  %2189 = vmatprep.subr.bf16.mxu0 %v3924_v25  ;;  %v1227_v48 = vadd.f32 %v1226_v12, %v5255_v44  ;;  %v1228_v63 = vpop.f32.mrb[26].mxu1  ;;  %v3925_v25 = vcombine.low %v1987_v7, %v1988_v51  ;;  %v1992_v21 = vld [vmem:[#allocation5 + $0x370] sm:$0xff] }
 0x1e5   : > { %v822_v0 = vmax.f32 %v700_v20, 0.0  ;;  %v704_v53 = vadd.f32 %v703_v47, %v5246_v41  ;;  %1619 = vmatprep.mubr.bf16.mxu0 %v1398_v6  ;;  %v705_v1 = vpop.f32.mrb[27].mxu0  ;;  %1877 = vmatmul.mubr.bf16.gmra.mrb[84].mxu1 %v872_v18  ;;  %v1229_v55 = vadd.f32 %v1228_v63, %v5249_v42  ;;  %v1230_v34 = vpop.f32.mrb[27].mxu1  ;;  %v1347_v19 = vmax.f32 %v1225_v28, 0.0 }
 0x1e6   : > { %v823_v15 = vmax.f32 %v702_v39, 0.0  ;;  %v706_v62 = vadd.f32 %v705_v1, %v5252_v43  ;;  %1620 = vmatmul.mubr.bf16.gmra.mrb[84].mxu0 %v1397_v54  ;;  %v1231_v33 = vadd.f32 %v1230_v34, %v5255_v44  ;;  %v1348_v18 = vmax.f32 %v1227_v48, 0.0 }
 0x1e7   : > { %v824_v56 = vmax.f32 %v704_v53, 0.0  ;;  %2190 = vmatpush1.bf16.msra.mxu0 %v3923_v59  ;;  %v1349_v5 = vmax.f32 %v1229_v55, 0.0  ;;  %v3927_v7 = vcombine.low %v1989_v13, %v1990_v27  ;;  %v1994_v13 = vld [vmem:[#allocation5 + $0x3b0] sm:$0xff] }
 0x1e8   : > { %v825_v4 = vmax.f32 %v706_v62, 0.0  ;;  %2191 = vmatprep.subr.bf16.mxu0 %v3926_v35  ;;  %v1350_v20 = vmax.f32 %v1231_v33, 0.0 }
 0x1e9   : > { %v874_v6 = vpack.c.bf16 %v824_v56, %v822_v0  ;;  %v1399_v39 = vpack.c.bf16 %v1349_v5, %v1347_v19  ;;  %v3930_v0 = vcombine.high %v1991_v14, %v1992_v21  ;;  %v1993_v56 = vld [vmem:[#allocation5 + $0x390] sm:$0xff] }
 0x1ea   : > { %v875_v12 = vpack.c.bf16 %v825_v4, %v823_v15  ;;  %v709_v47 = vpop.f32.mrb[28].mxu0  ;;  %v1400_v63 = vpack.c.bf16 %v1350_v20, %v1348_v18  ;;  %v1234_v53 = vpop.f32.mrb[28].mxu1 }
 0x1eb   : > { %v710_v54 = vadd.f32 %v709_v47, %v5246_v41  ;;  %v711_v1 = vpop.f32.mrb[29].mxu0  ;;  %2192 = vmatpush1.bf16.msra.mxu0 %v3925_v25  ;;  %v1235_v51 = vadd.f32 %v1234_v53, %v5249_v42  ;;  %v1236_v28 = vpop.f32.mrb[29].mxu1  ;;  %v3932_v47 = vcombine.high %v1993_v56, %v1994_v13  ;;  %v1995_v53 = vld [vmem:[#allocation5 + $0x3d0] sm:$0xff] }
 0x1ec   : > { %v712_v59 = vadd.f32 %v711_v1, %v5252_v43  ;;  %v713_v35 = vpop.f32.mrb[30].mxu0  ;;  %1884 = vmatprep.mubr.bf16.mxu1 %v875_v12  ;;  %2193 = vmatprep.subr.bf16.mxu0 %v3928_v49  ;;  %v1237_v15 = vadd.f32 %v1236_v28, %v5255_v44  ;;  %v1238_v62 = vpop.f32.mrb[30].mxu1  ;;  %v3929_v49 = vcombine.low %v1991_v14, %v1992_v21  ;;  %v1996_v1 = vld [vmem:[#allocation5 + $0x3f0] sm:$0xff] }
 0x1ed   : > { %v826_v48 = vmax.f32 %v710_v54, 0.0  ;;  %v714_v55 = vadd.f32 %v713_v35, %v5246_v41  ;;  %1627 = vmatprep.mubr.bf16.mxu0 %v1400_v63  ;;  %v715_v34 = vpop.f32.mrb[31].mxu0  ;;  %1885 = vmatmul.mubr.bf16.gmra.mrb[88].mxu1 %v874_v6  ;;  %v1239_v33 = vadd.f32 %v1238_v62, %v5249_v42  ;;  %v1240_v19 = vpop.f32.mrb[31].mxu1  ;;  %v1351_v18 = vmax.f32 %v1235_v51, 0.0 }
 0x1ee   : > { %v827_v27 = vmax.f32 %v712_v59, 0.0  ;;  %v716_v25 = vadd.f32 %v715_v34, %v5252_v43  ;;  %1628 = vmatmul.mubr.bf16.gmra.mrb[88].mxu0 %v1399_v39  ;;  %v1241_v4 = vadd.f32 %v1240_v19, %v5255_v44  ;;  %v1352_v6 = vmax.f32 %v1237_v15, 0.0 }
 0x1ef   : > { %v828_v5 = vmax.f32 %v714_v55, 0.0  ;;  %2194 = vmatpush1.bf16.msra.mxu0 %v3927_v7  ;;  %v1353_v20 = vmax.f32 %v1239_v33, 0.0  ;;  %v3931_v14 = vcombine.low %v1993_v56, %v1994_v13 }
 0x1f0   : > { %v829_v12 = vmax.f32 %v716_v25, 0.0  ;;  %2195 = vmatprep.subr.bf16.mxu0 %v3930_v0  ;;  %v1354_v54 = vmax.f32 %v1241_v4, 0.0 }
 0x1f1   : > { %v876_v63 = vpack.c.bf16 %v828_v5, %v826_v48  ;;  %v1401_v59 = vpack.c.bf16 %v1353_v20, %v1351_v18  ;;  %v3934_v48 = vcombine.high %v1995_v53, %v1996_v1  ;;  %v3933_v20 = vcombine.low %v1995_v53, %v1996_v1 }
 0x1f2   : > { %v877_v28 = vpack.c.bf16 %v829_v12, %v827_v27  ;;  %v719_v35 = vpop.f32.mrb[32].mxu0  ;;  %v1402_v62 = vpack.c.bf16 %v1354_v54, %v1352_v6  ;;  %v1244_v55 = vpop.f32.mrb[32].mxu1  ;;  %v3952_v54 = vcombine.high %v5265_v29, %v5267_v32 }
 0x1f3   : > { %v720_v39 = vadd.f32 %v719_v35, %v5246_v41  ;;  %v721_v34 = vpop.f32.mrb[33].mxu0  ;;  %2196 = vmatpush1.bf16.msra.mxu0 %v3929_v49  ;;  %v1245_v21 = vadd.f32 %v1244_v55, %v5249_v42  ;;  %v1246_v51 = vpop.f32.mrb[33].mxu1 }
 0x1f4   : > { %v722_v7 = vadd.f32 %v721_v34, %v5252_v43  ;;  %v723_v0 = vpop.f32.mrb[34].mxu0  ;;  %1892 = vmatprep.mubr.bf16.mxu1 %v877_v28  ;;  %2197 = vmatprep.subr.bf16.mxu0 %v3932_v47  ;;  %v1247_v27 = vadd.f32 %v1246_v51, %v5255_v44  ;;  %v1248_v25 = vpop.f32.mrb[34].mxu1 }
 0x1f5   : > { %v830_v15 = vmax.f32 %v720_v39, 0.0  ;;  %v724_v33 = vadd.f32 %v723_v0, %v5246_v41  ;;  %1635 = vmatprep.mubr.bf16.mxu0 %v1402_v62  ;;  %v725_v19 = vpop.f32.mrb[35].mxu0  ;;  %1893 = vmatmul.mubr.bf16.gmra.mrb[92].mxu1 %v876_v63  ;;  %v1249_v56 = vadd.f32 %v1248_v25, %v5249_v42  ;;  %v1250_v4 = vpop.f32.mrb[35].mxu1  ;;  %v1355_v12 = vmax.f32 %v1245_v21, 0.0 }
 0x1f6   : > { %v831_v5 = vmax.f32 %v722_v7, 0.0  ;;  %v726_v13 = vadd.f32 %v725_v19, %v5252_v43  ;;  %1636 = vmatmul.mubr.bf16.gmra.mrb[92].mxu0 %v1401_v59  ;;  %v1251_v18 = vadd.f32 %v1250_v4, %v5255_v44  ;;  %v1356_v63 = vmax.f32 %v1247_v27, 0.0 }
 0x1f7   : > { %v832_v49 = vmax.f32 %v724_v33, 0.0  ;;  %2198 = vmatpush1.bf16.msra.mxu0 %v3931_v14  ;;  %v1357_v47 = vmax.f32 %v1249_v56, 0.0 }
 0x1f8   : > { %v833_v6 = vmax.f32 %v726_v13, 0.0  ;;  %2199 = vmatprep.subr.bf16.mxu0 %v3934_v48  ;;  %v1358_v35 = vmax.f32 %v1251_v18, 0.0 }
 0x1f9   : > { %v878_v28 = vpack.c.bf16 %v832_v49, %v830_v15  ;;  %v1403_v62 = vpack.c.bf16 %v1357_v47, %v1355_v12 }
 0x1fa   : > { %v879_v39 = vpack.c.bf16 %v833_v6, %v831_v5  ;;  %v729_v55 = vpop.f32.mrb[36].mxu0  ;;  %v1404_v34 = vpack.c.bf16 %v1358_v35, %v1356_v63  ;;  %v1254_v7 = vpop.f32.mrb[36].mxu1 }
 0x1fb   : > { %v730_v59 = vadd.f32 %v729_v55, %v5246_v41  ;;  %v731_v51 = vpop.f32.mrb[37].mxu0  ;;  %2200 = vmatpush1.bf16.msra.mxu0 %v3933_v20  ;;  %v1255_v53 = vadd.f32 %v1254_v7, %v5249_v42  ;;  %v1256_v14 = vpop.f32.mrb[37].mxu1 }
 0x1fc   : > { %v732_v1 = vadd.f32 %v731_v51, %v5252_v43  ;;  %v733_v21 = vpop.f32.mrb[38].mxu0  ;;  %1900 = vmatprep.mubr.bf16.mxu1 %v879_v39  ;;  %2983 = vmatprep.subr.bf16.mxu0 %v3952_v54  ;;  %v1257_v48 = vadd.f32 %v1256_v14, %v5255_v44  ;;  %v1258_v27 = vpop.f32.mrb[38].mxu1 }
 0x1fd   : > { %v834_v0 = vmax.f32 %v730_v59, 0.0  ;;  %v734_v15 = vadd.f32 %v733_v21, %v5246_v41  ;;  %1643 = vmatprep.mubr.bf16.mxu0 %v1404_v34  ;;  %v735_v33 = vpop.f32.mrb[39].mxu0  ;;  %1901 = vmatmul.mubr.bf16.gmra.mrb[96].mxu1 %v878_v28  ;;  %v1259_v19 = vadd.f32 %v1258_v27, %v5249_v42  ;;  %v1260_v56 = vpop.f32.mrb[39].mxu1  ;;  %v1359_v49 = vmax.f32 %v1255_v53, 0.0 }
 0x1fe   : > { %v835_v25 = vmax.f32 %v732_v1, 0.0  ;;  %v736_v5 = vadd.f32 %v735_v33, %v5252_v43  ;;  %1644 = vmatmul.mubr.bf16.gmra.mrb[96].mxu0 %v1403_v62  ;;  %v1261_v4 = vadd.f32 %v1260_v56, %v5255_v44  ;;  %v1360_v12 = vmax.f32 %v1257_v48, 0.0 }
 0x1ff   : > { %v836_v13 = vmax.f32 %v734_v15, 0.0  ;;  %v1361_v18 = vmax.f32 %v1259_v19, 0.0 }
 0x200   : > { %v837_v20 = vmax.f32 %v736_v5, 0.0  ;;  %v1362_v6 = vmax.f32 %v1261_v4, 0.0 }
 0x201   : > { %v880_v47 = vpack.c.bf16 %v836_v13, %v834_v0  ;;  %v1405_v54 = vpack.c.bf16 %v1361_v18, %v1359_v49 }
 0x202   : > { %v881_v63 = vpack.c.bf16 %v837_v20, %v835_v25  ;;  %v739_v35 = vpop.f32.mrb[40].mxu0  ;;  %v1406_v28 = vpack.c.bf16 %v1362_v6, %v1360_v12  ;;  %v1264_v55 = vpop.f32.mrb[40].mxu1 }
 0x203   : > { %v740_v39 = vadd.f32 %v739_v35, %v5246_v41  ;;  %v741_v34 = vpop.f32.mrb[41].mxu0  ;;  %v1265_v59 = vadd.f32 %v1264_v55, %v5249_v42  ;;  %v1266_v7 = vpop.f32.mrb[41].mxu1 }
 0x204   : > { %v742_v62 = vadd.f32 %v741_v34, %v5252_v43  ;;  %v743_v51 = vpop.f32.mrb[42].mxu0  ;;  %1908 = vmatprep.mubr.bf16.mxu1 %v881_v63  ;;  %v1267_v1 = vadd.f32 %v1266_v7, %v5255_v44  ;;  %v1268_v21 = vpop.f32.mrb[42].mxu1  ;;  %1651 = vmatprep.mubr.bf16.mxu0 %v1406_v28 }
 0x205   : > { %v838_v53 = vmax.f32 %v740_v39, 0.0  ;;  %v744_v14 = vadd.f32 %v743_v51, %v5246_v41  ;;  %v745_v0 = vpop.f32.mrb[43].mxu0  ;;  %1909 = vmatmul.mubr.bf16.gmra.mrb[100].mxu1 %v880_v47  ;;  %v1269_v15 = vadd.f32 %v1268_v21, %v5249_v42  ;;  %v1270_v33 = vpop.f32.mrb[43].mxu1  ;;  %v1363_v5 = vmax.f32 %v1265_v59, 0.0 }
 0x206   : > { %v839_v48 = vmax.f32 %v742_v62, 0.0  ;;  %v746_v27 = vadd.f32 %v745_v0, %v5252_v43  ;;  %1652 = vmatmul.mubr.bf16.gmra.mrb[100].mxu0 %v1405_v54  ;;  %v1271_v19 = vadd.f32 %v1270_v33, %v5255_v44  ;;  %v1364_v4 = vmax.f32 %v1267_v1, 0.0 }
 0x207   : > { %v840_v25 = vmax.f32 %v744_v14, 0.0  ;;  %v1365_v56 = vmax.f32 %v1269_v15, 0.0 }
 0x208   : > { %v841_v13 = vmax.f32 %v746_v27, 0.0  ;;  %v1366_v18 = vmax.f32 %v1271_v19, 0.0 }
 0x209   : > { %v882_v49 = vpack.c.bf16 %v840_v25, %v838_v53  ;;  %v1407_v20 = vpack.c.bf16 %v1365_v56, %v1363_v5 }
 0x20a   : > { %v883_v12 = vpack.c.bf16 %v841_v13, %v839_v48  ;;  %v749_v6 = vpop.f32.mrb[44].mxu0  ;;  %v1408_v47 = vpack.c.bf16 %v1366_v18, %v1364_v4  ;;  %v1274_v35 = vpop.f32.mrb[44].mxu1 }
 0x20b   : > { %v750_v63 = vadd.f32 %v749_v6, %v5246_v41  ;;  %v751_v28 = vpop.f32.mrb[45].mxu0  ;;  %v1275_v39 = vadd.f32 %v1274_v35, %v5249_v42  ;;  %v1276_v55 = vpop.f32.mrb[45].mxu1 }
 0x20c   : > { %v752_v54 = vadd.f32 %v751_v28, %v5252_v43  ;;  %v753_v34 = vpop.f32.mrb[46].mxu0  ;;  %1916 = vmatprep.mubr.bf16.mxu1 %v883_v12  ;;  %v1277_v62 = vadd.f32 %v1276_v55, %v5255_v44  ;;  %v1278_v51 = vpop.f32.mrb[46].mxu1  ;;  %1659 = vmatprep.mubr.bf16.mxu0 %v1408_v47 }
 0x20d   : > { %v842_v59 = vmax.f32 %v750_v63, 0.0  ;;  %v754_v7 = vadd.f32 %v753_v34, %v5246_v41  ;;  %v755_v53 = vpop.f32.mrb[47].mxu0  ;;  %1917 = vmatmul.mubr.bf16.gmra.mrb[104].mxu1 %v882_v49  ;;  %v1279_v14 = vadd.f32 %v1278_v51, %v5249_v42  ;;  %v1280_v0 = vpop.f32.mrb[47].mxu1  ;;  %v1367_v27 = vmax.f32 %v1275_v39, 0.0 }
 0x20e   : > { %v843_v1 = vmax.f32 %v752_v54, 0.0  ;;  %v756_v21 = vadd.f32 %v755_v53, %v5252_v43  ;;  %1660 = vmatmul.mubr.bf16.gmra.mrb[104].mxu0 %v1407_v20  ;;  %v1281_v15 = vadd.f32 %v1280_v0, %v5255_v44  ;;  %v1368_v19 = vmax.f32 %v1277_v62, 0.0 }
 0x20f   : > { %v844_v48 = vmax.f32 %v754_v7, 0.0  ;;  %v1369_v33 = vmax.f32 %v1279_v14, 0.0 }
 0x210   : > { %v845_v25 = vmax.f32 %v756_v21, 0.0  ;;  %v1370_v56 = vmax.f32 %v1281_v15, 0.0 }
 0x211   : > { %v884_v5 = vpack.c.bf16 %v844_v48, %v842_v59  ;;  %v1409_v13 = vpack.c.bf16 %v1369_v33, %v1367_v27 }
 0x212   : > { %v885_v4 = vpack.c.bf16 %v845_v25, %v843_v1  ;;  %v759_v18 = vpop.f32.mrb[48].mxu0  ;;  %v1410_v49 = vpack.c.bf16 %v1370_v56, %v1368_v19  ;;  %v1284_v6 = vpop.f32.mrb[48].mxu1 }
 0x213   : > { %v760_v12 = vadd.f32 %v759_v18, %v5246_v41  ;;  %v761_v47 = vpop.f32.mrb[49].mxu0  ;;  %v1285_v63 = vadd.f32 %v1284_v6, %v5249_v42  ;;  %v1286_v35 = vpop.f32.mrb[49].mxu1 }
 0x214   : > { %v762_v20 = vadd.f32 %v761_v47, %v5252_v43  ;;  %v763_v28 = vpop.f32.mrb[50].mxu0  ;;  %1924 = vmatprep.mubr.bf16.mxu1 %v885_v4  ;;  %v1287_v54 = vadd.f32 %v1286_v35, %v5255_v44  ;;  %v1288_v34 = vpop.f32.mrb[50].mxu1  ;;  %1667 = vmatprep.mubr.bf16.mxu0 %v1410_v49 }
 0x215   : > { %v846_v39 = vmax.f32 %v760_v12, 0.0  ;;  %v764_v55 = vadd.f32 %v763_v28, %v5246_v41  ;;  %v765_v59 = vpop.f32.mrb[51].mxu0  ;;  %1925 = vmatmul.mubr.bf16.gmra.mrb[108].mxu1 %v884_v5  ;;  %v1289_v7 = vadd.f32 %v1288_v34, %v5249_v42  ;;  %v1290_v53 = vpop.f32.mrb[51].mxu1  ;;  %v1371_v21 = vmax.f32 %v1285_v63, 0.0 }
 0x216   : > { %v847_v62 = vmax.f32 %v762_v20, 0.0  ;;  %v766_v51 = vadd.f32 %v765_v59, %v5252_v43  ;;  %1668 = vmatmul.mubr.bf16.gmra.mrb[108].mxu0 %v1409_v13  ;;  %v1291_v14 = vadd.f32 %v1290_v53, %v5255_v44  ;;  %v1372_v15 = vmax.f32 %v1287_v54, 0.0  ;;  %v4571_v54 = vld [vmem:[#allocation8 + $0x140] sm:$0xff]  }
 0x217   : > { %v848_v1 = vmax.f32 %v764_v55, 0.0  ;;  %v1373_v0 = vmax.f32 %v1289_v7, 0.0  ;;  %4237 = vmatprep.subr.bf16.mxu1 %v4571_v54  ;;  %v4572_v53 = vld [vmem:[#allocation8 + $0x100] sm:$0xff]  }
 0x218   : > { %v849_v48 = vmax.f32 %v766_v51, 0.0  ;;  %v1374_v33 = vmax.f32 %v1291_v14, 0.0  ;;  %4238 = vmatpush3.bf16.msra.mxu1 %v4572_v53 }
 0x219   : > { %v886_v27 = vpack.c.bf16 %v848_v1, %v846_v39  ;;  %v1411_v25 = vpack.c.bf16 %v1373_v0, %v1371_v21 }
 0x21a   : > { %v887_v19 = vpack.c.bf16 %v849_v48, %v847_v62  ;;  %v769_v56 = vpop.f32.mrb[52].mxu0  ;;  %v1412_v5 = vpack.c.bf16 %v1374_v33, %v1372_v15  ;;  %v1294_v18 = vpop.f32.mrb[52].mxu1 }
 0x21b   : > { %v770_v4 = vadd.f32 %v769_v56, %v5246_v41  ;;  %v771_v49 = vpop.f32.mrb[53].mxu0  ;;  %v1295_v12 = vadd.f32 %v1294_v18, %v5249_v42  ;;  %v1296_v6 = vpop.f32.mrb[53].mxu1 }
 0x21c   : > { %v772_v13 = vadd.f32 %v771_v49, %v5252_v43  ;;  %v773_v47 = vpop.f32.mrb[54].mxu0  ;;  %1932 = vmatprep.mubr.bf16.mxu1 %v887_v19  ;;  %v1297_v20 = vadd.f32 %v1296_v6, %v5255_v44  ;;  %v1298_v28 = vpop.f32.mrb[54].mxu1  ;;  %1675 = vmatprep.mubr.bf16.mxu0 %v1412_v5 }
 0x21d   : > { %v850_v63 = vmax.f32 %v770_v4, 0.0  ;;  %v774_v35 = vadd.f32 %v773_v47, %v5246_v41  ;;  %v775_v39 = vpop.f32.mrb[55].mxu0  ;;  %1933 = vmatmul.mubr.bf16.gmra.mrb[112].mxu1 %v886_v27  ;;  %v1299_v34 = vadd.f32 %v1298_v28, %v5249_v42  ;;  %v1300_v62 = vpop.f32.mrb[55].mxu1  ;;  %v1375_v1 = vmax.f32 %v1295_v12, 0.0 }
 0x21e   : > { %v851_v55 = vmax.f32 %v772_v13, 0.0  ;;  %v776_v59 = vadd.f32 %v775_v39, %v5252_v43  ;;  %1676 = vmatmul.mubr.bf16.gmra.mrb[112].mxu0 %v1411_v25  ;;  %v1301_v51 = vadd.f32 %v1300_v62, %v5255_v44  ;;  %v1376_v0 = vmax.f32 %v1297_v20, 0.0 }
 0x21f   : > { %v852_v7 = vmax.f32 %v774_v35, 0.0  ;;  %v1377_v14 = vmax.f32 %v1299_v34, 0.0 }
 0x220   : > { %v853_v21 = vmax.f32 %v776_v59, 0.0  ;;  %v1378_v15 = vmax.f32 %v1301_v51, 0.0 }
 0x221   : > { %v888_v48 = vpack.c.bf16 %v852_v7, %v850_v63  ;;  %v1413_v27 = vpack.c.bf16 %v1377_v14, %v1375_v1 }
 0x222   : > { %v889_v33 = vpack.c.bf16 %v853_v21, %v851_v55  ;;  %v779_v19 = vpop.f32.mrb[56].mxu0  ;;  %v1414_v56 = vpack.c.bf16 %v1378_v15, %v1376_v0  ;;  %v1304_v4 = vpop.f32.mrb[56].mxu1 }
 0x223   : > { %v780_v5 = vadd.f32 %v779_v19, %v5246_v41  ;;  %v781_v25 = vpop.f32.mrb[57].mxu0  ;;  %v1305_v18 = vadd.f32 %v1304_v4, %v5249_v42  ;;  %v1306_v13 = vpop.f32.mrb[57].mxu1 }
 0x224   : > { %v782_v49 = vadd.f32 %v781_v25, %v5252_v43  ;;  %v783_v12 = vpop.f32.mrb[58].mxu0  ;;  %1940 = vmatprep.mubr.bf16.mxu1 %v889_v33  ;;  %v1307_v47 = vadd.f32 %v1306_v13, %v5255_v44  ;;  %v1308_v20 = vpop.f32.mrb[58].mxu1  ;;  %1683 = vmatprep.mubr.bf16.mxu0 %v1414_v56 }
 0x225   : > { %v854_v6 = vmax.f32 %v780_v5, 0.0  ;;  %v784_v63 = vadd.f32 %v783_v12, %v5246_v41  ;;  %v785_v35 = vpop.f32.mrb[59].mxu0  ;;  %1941 = vmatmul.mubr.bf16.gmra.mrb[116].mxu1 %v888_v48  ;;  %v1309_v39 = vadd.f32 %v1308_v20, %v5249_v42  ;;  %v1310_v55 = vpop.f32.mrb[59].mxu1  ;;  %v1379_v62 = vmax.f32 %v1305_v18, 0.0 }
 0x226   : > { %v855_v28 = vmax.f32 %v782_v49, 0.0  ;;  %v786_v54 = vadd.f32 %v785_v35, %v5252_v43  ;;  %1684 = vmatmul.mubr.bf16.gmra.mrb[116].mxu0 %v1413_v27  ;;  %v1311_v59 = vadd.f32 %v1310_v55, %v5255_v44  ;;  %v1380_v53 = vmax.f32 %v1307_v47, 0.0  ;;  %v4573_v47 = vld [vmem:[#allocation8 + $0x148] sm:$0xff]  }
 0x227   : > { %v856_v34 = vmax.f32 %v784_v63, 0.0  ;;  %v1381_v7 = vmax.f32 %v1309_v39, 0.0  ;;  %4239 = vmatprep.subr.bf16.mxu1 %v4573_v47  ;;  %v4574_v55 = vld [vmem:[#allocation8 + $0x108] sm:$0xff]  }
 0x228   : > { %v857_v51 = vmax.f32 %v786_v54, 0.0  ;;  %v1382_v14 = vmax.f32 %v1311_v59, 0.0  ;;  %4240 = vmatpush3.bf16.msra.mxu1 %v4574_v55  ;;  %v2793_v55 = vld [vmem:[#allocation5 + $0x1d8] sm:$0xff] }
 0x229   : > { %v890_v1 = vpack.c.bf16 %v856_v34, %v854_v6  ;;  %v1415_v21 = vpack.c.bf16 %v1381_v7, %v1379_v62 }
 0x22a   : > { %v891_v0 = vpack.c.bf16 %v857_v51, %v855_v28  ;;  %v789_v15 = vpop.f32.mrb[60].mxu0  ;;  %v1416_v48 = vpack.c.bf16 %v1382_v14, %v1380_v53  ;;  %v1314_v19 = vpop.f32.mrb[60].mxu1 }
 0x22b   : > { %v790_v33 = vadd.f32 %v789_v15, %v5246_v41  ;;  %v791_v56 = vpop.f32.mrb[61].mxu0  ;;  %v1315_v5 = vadd.f32 %v1314_v19, %v5249_v42  ;;  %v1316_v4 = vpop.f32.mrb[61].mxu1  ;;  %v4575_v15 = vld [vmem:[#allocation8 + $0x150] sm:$0xff]  }
 0x22c   : > { %v792_v27 = vadd.f32 %v791_v56, %v5252_v43  ;;  %v793_v25 = vpop.f32.mrb[62].mxu0  ;;  %1948 = vmatprep.mubr.bf16.mxu1 %v891_v0  ;;  %v1317_v49 = vadd.f32 %v1316_v4, %v5255_v44  ;;  %v1318_v12 = vpop.f32.mrb[62].mxu1  ;;  %1691 = vmatprep.mubr.bf16.mxu0 %v1416_v48  ;;  %v2784_v0 = vld [vmem:[#allocation5 + $0xb8] sm:$0xff]  ;;  %v5982_v48 = vcombine.low %v5265_v29, %v5267_v32 }
 0x22d   : > { %v858_v18 = vmax.f32 %v790_v33, 0.0  ;;  %v794_v13 = vadd.f32 %v793_v25, %v5246_v41  ;;  %v795_v6 = vpop.f32.mrb[63].mxu0  ;;  %1949 = vmatmul.mubr.bf16.gmra.mrb[120].mxu1 %v890_v1  ;;  %v1319_v20 = vadd.f32 %v1318_v12, %v5249_v42  ;;  %v1320_v28 = vpop.f32.mrb[63].mxu1  ;;  %v1383_v34 = vmax.f32 %v1315_v5, 0.0  ;;  %v2781_v42 = vld [vmem:[#allocation5 + $0x58] sm:$0xff]  ;;  %4241 = vmatprep.subr.bf16.mxu1 %v4575_v15 }
 0x22e   : > { %v859_v63 = vmax.f32 %v792_v27, 0.0  ;;  %v796_v35 = vadd.f32 %v795_v6, %v5252_v43  ;;  %1692 = vmatmul.mubr.bf16.gmra.mrb[120].mxu0 %v1415_v21  ;;  %v1321_v54 = vadd.f32 %v1320_v28, %v5255_v44  ;;  %v1384_v62 = vmax.f32 %v1317_v49, 0.0  ;;  %v2782_v43 = vld [vmem:[#allocation5 + $0x78] sm:$0xff] }
 0x22f   : > { %v860_v39 = vmax.f32 %v794_v13, 0.0  ;;  %v1385_v59 = vmax.f32 %v1319_v20, 0.0  ;;  %v3954_v44 = vcombine.high %v2781_v42, %v2782_v43  ;;  %v2783_v21 = vld [vmem:[#allocation5 + $0x98] sm:$0xff]  ;;  %v3953_v33 = vcombine.low %v2781_v42, %v2782_v43 }
 0x230   : > { %v861_v41 = vmax.f32 %v796_v35, 0.0  ;;  %v1386_v51 = vmax.f32 %v1321_v54, 0.0  ;;  %v4576_v19 = vld [vmem:[#allocation8 + $0x110] sm:$0xff]   ;;  %v3956_v56 = vcombine.high %v2783_v21, %v2784_v0  ;;  %v3955_v4 = vcombine.low %v2783_v21, %v2784_v0  ;;  %v4577_v35 = vld [vmem:[#allocation8 + $0x158] sm:$0xff]   ;;  %v4579_v0 = vld [vmem:[#allocation8 + $0x160] sm:$0xff]  }
 0x231   : > { %v892_v7 = vpack.c.bf16 %v860_v39, %v858_v18  ;;  %v1417_v53 = vpack.c.bf16 %v1385_v59, %v1383_v34  ;;  %v2785_v5 = vld [vmem:[#allocation5 + $0xd8] sm:$0xff]  ;;  %4242 = vmatpush3.bf16.msra.mxu1 %v4576_v19  ;;  %v4578_v39 = vld [vmem:[#allocation8 + $0x118] sm:$0xff]  }
 0x232   : > { %v893_v1 = vpack.c.bf16 %v861_v41, %v859_v63  ;;  %v1418_v14 = vpack.c.bf16 %v1386_v51, %v1384_v62  ;;  %v2786_v27 = vld [vmem:[#allocation5 + $0xf8] sm:$0xff]  ;;  %4243 = vmatprep.subr.bf16.mxu1 %v4577_v35  ;;  %v4582_v35 = vld [vmem:[#allocation8 + $0x128] sm:$0xff]  }
 0x233   : > { %v3958_v25 = vcombine.high %v2785_v5, %v2786_v27  ;;  %v2787_v18 = vld [vmem:[#allocation5 + $0x118] sm:$0xff]  ;;  %v3957_v29 = vcombine.low %v2785_v5, %v2786_v27 }
 0x234   : > { %1956 = vmatprep.mubr.bf16.mxu1 %v893_v1  ;;  %1699 = vmatprep.mubr.bf16.mxu0 %v1418_v14  ;;  %v2788_v49 = vld [vmem:[#allocation5 + $0x138] sm:$0xff] }
 0x235   : > { %1957 = vmatmul.mubr.bf16.gmra.mrb[124].mxu1 %v892_v7  ;;  %v3960_v32 = vcombine.high %v2787_v18, %v2788_v49  ;;  %v2789_v13 = vld [vmem:[#allocation5 + $0x158] sm:$0xff]  ;;  %v3959_v6 = vcombine.low %v2787_v18, %v2788_v49 }
 0x236   : > { %1700 = vmatmul.mubr.bf16.gmra.mrb[124].mxu0 %v1417_v53  ;;  %v2790_v12 = vld [vmem:[#allocation5 + $0x178] sm:$0xff]  ;;  %4244 = vmatpush3.bf16.msra.mxu1 %v4578_v39 }
 0x237   : > { %2201 = vmatprep.mubr.bf16.mxu0 %v5043_v58  ;;  %v3962_v47 = vcombine.high %v2789_v13, %v2790_v12  ;;  %v2791_v63 = vld [vmem:[#allocation5 + $0x198] sm:$0xff]  ;;  %v3961_v28 = vcombine.low %v2789_v13, %v2790_v12  ;;  %4245 = vmatprep.subr.bf16.mxu1 %v4579_v0 }
 0x238   : > { %v2792_v20 = vld [vmem:[#allocation5 + $0x1b8] sm:$0xff] }
 0x239   : > { %v3964_v54 = vcombine.high %v2791_v63, %v2792_v20  ;;  %v2794_v34 = vld [vmem:[#allocation5 + $0x1f8] sm:$0xff]  ;;  %v3963_v59 = vcombine.low %v2791_v63, %v2792_v20  ;;  %v4581_v63 = vld [vmem:[#allocation8 + $0x168] sm:$0xff]  }
 0x23a   : > { %v3966_v41 = vcombine.high %v2793_v55, %v2794_v34  ;;  %v2795_v62 = vld [vmem:[#allocation5 + $0x218] sm:$0xff]  ;;  %v3965_v51 = vcombine.low %v2793_v55, %v2794_v34 }
 0x23b   : > { %v2796_v7 = vld [vmem:[#allocation5 + $0x238] sm:$0xff] }
 0x23c   : > { %v3968_v53 = vcombine.high %v2795_v62, %v2796_v7  ;;  %v2797_v1 = vld [vmem:[#allocation5 + $0x258] sm:$0xff]  ;;  %v3967_v42 = vcombine.low %v2795_v62, %v2796_v7  ;;  %v4585_v7 = vld [vmem:[#allocation8 + $0x178] sm:$0xff]  }
 0x23d   : > { %v2798_v14 = vld [vmem:[#allocation5 + $0x278] sm:$0xff] }
 0x23e   : > { %2202 = vmatmul.mubr.bf16.vlgmr.msra.gmra.mrb[128].mxu0 %v5051_v9  ;;  %v3970_v43 = vcombine.high %v2797_v1, %v2798_v14  ;;  %v2800_v21 = vld [vmem:[#allocation5 + $0x2b8] sm:$0xff]  ;;  %v3969_v15 = vcombine.low %v2797_v1, %v2798_v14 }
 0x23f   : > { %2984 = vmatpush1.bf16.msra.mxu0 %v5982_v48  ;;  %2211 = vmatprep.mubr.bf16.mxu0 %v5053_v11  ;;  %v4580_v48 = vld [vmem:[#allocation8 + $0x120] sm:$0xff]   ;;  %v2801_v19 = vld [vmem:[#allocation5 + $0x2d8] sm:$0xff] }
 0x240   : > { %2985 = vmatprep.subr.bf16.mxu0 %v3954_v44  ;;  %v2799_v44 = vld [vmem:[#allocation5 + $0x298] sm:$0xff]  ;;  %4246 = vmatpush3.bf16.msra.mxu1 %v4580_v48 }
 0x241   : > { %v3971_v5 = vcombine.low %v2799_v44, %v2800_v21  ;;  %4247 = vmatprep.subr.bf16.mxu1 %v4581_v63  ;;  %v2809_v39 = vld [vmem:[#allocation5 + $0x3d8] sm:$0xff] }
 0x242   : > { %v4584_v62 = vld [vmem:[#allocation8 + $0x130] sm:$0xff]  }
 0x243   : > { %2986 = vmatpush1.bf16.msra.mxu0 %v3953_v33  ;;  %v3972_v33 = vcombine.high %v2799_v44, %v2800_v21 }
 0x244   : > { %2987 = vmatprep.subr.bf16.mxu0 %v3956_v56  ;;  %v2802_v56 = vld [vmem:[#allocation5 + $0x2f8] sm:$0xff]  ;;  %4248 = vmatpush3.bf16.msra.mxu1 %v4582_v35 }
 0x245   : > { %v3974_v27 = vcombine.high %v2801_v19, %v2802_v56  ;;  %v3973_v18 = vcombine.low %v2801_v19, %v2802_v56 }
 0x246   : > { %2212 = vmatmul.mubr.bf16.gmra.mrb[132].mxu0 %v5063_v24 }
 0x247   : > { %2221 = vmatprep.mubr.bf16.mxu0 %v5065_v26  ;;  %2988 = vmatpush1.bf16.msra.mxu0 %v3955_v4  ;;  %v2803_v4 = vld [vmem:[#allocation5 + $0x318] sm:$0xff] }
 0x248   : > { %2989 = vmatprep.subr.bf16.mxu0 %v3958_v25  ;;  %v2804_v25 = vld [vmem:[#allocation5 + $0x338] sm:$0xff] }
 0x249   : > { %v3976_v49 = vcombine.high %v2803_v4, %v2804_v25  ;;  %v3975_v13 = vcombine.low %v2803_v4, %v2804_v25 }
 0x24b   : > { %2990 = vmatpush1.bf16.msra.mxu0 %v3957_v29  ;;  %v2805_v29 = vld [vmem:[#allocation5 + $0x358] sm:$0xff] }
 0x24c   : > { %2991 = vmatprep.subr.bf16.mxu0 %v3960_v32  ;;  %v2806_v32 = vld [vmem:[#allocation5 + $0x378] sm:$0xff] }
 0x24d   : > { %v3978_v12 = vcombine.high %v2805_v29, %v2806_v32  ;;  %v3977_v20 = vcombine.low %v2805_v29, %v2806_v32 }
 0x24e   : > { %2222 = vmatmul.mubr.bf16.gmra.mrb[136].mxu0 %v5075_v38 }
 0x24f   : > { %2231 = vmatprep.mubr.bf16.mxu0 %v5077_v40  ;;  %2992 = vmatpush1.bf16.msra.mxu0 %v3959_v6  ;;  %v2807_v6 = vld [vmem:[#allocation5 + $0x398] sm:$0xff] }
 0x250   : > { %2993 = vmatprep.subr.bf16.mxu0 %v3962_v47  ;;  %v2808_v47 = vld [vmem:[#allocation5 + $0x3b8] sm:$0xff] }
 0x251   : > { %v3979_v55 = vcombine.low %v2807_v6, %v2808_v47 }
 0x253   : > { %2994 = vmatpush1.bf16.msra.mxu0 %v3961_v28  ;;  %v3980_v28 = vcombine.high %v2807_v6, %v2808_v47 }
 0x254   : > { %2995 = vmatprep.subr.bf16.mxu0 %v3964_v54  ;;  %v2810_v54 = vld [vmem:[#allocation5 + $0x3f8] sm:$0xff] }
 0x255   : > { %v3982_v34 = vcombine.high %v2809_v39, %v2810_v54 }
 0x256   : > { %2232 = vmatmul.mubr.bf16.gmra.mrb[140].mxu0 %v5087_v50 }
 0x257   : > { %2241 = vmatprep.mubr.bf16.mxu0 %v5089_v52  ;;  %2996 = vmatpush1.bf16.msra.mxu0 %v3963_v59  ;;  %v3981_v59 = vcombine.low %v2809_v39, %v2810_v54  ;;  %v4587_v54 = vld [vmem:[#allocation8 + $0x1c0] sm:$0xff]  }
 0x258   : > { %2997 = vmatprep.subr.bf16.mxu0 %v3966_v41  ;;  %v4583_v41 = vld [vmem:[#allocation8 + $0x170] sm:$0xff]  }
 0x259   : > { %4249 = vmatprep.subr.bf16.mxu1 %v4583_v41 }
 0x25a   : > { %4250 = vmatpush3.bf16.msra.mxu1 %v4584_v62 }
 0x25b   : > { %2998 = vmatpush1.bf16.msra.mxu0 %v3965_v51  ;;  %4251 = vmatprep.subr.bf16.mxu1 %v4585_v7  ;;  %v4586_v51 = vld [vmem:[#allocation8 + $0x138] sm:$0xff]  }
 0x25c   : > { %2999 = vmatprep.subr.bf16.mxu0 %v3968_v53 }
 0x25e   : > { %2242 = vmatmul.mubr.bf16.gmra.mrb[144].mxu0 %v5099_v60  ;;  %4252 = vmatpush3.bf16.msra.mxu1 %v4586_v51 }
 0x25f   : > { %2251 = vmatprep.mubr.bf16.mxu0 %v5101_v61  ;;  %3000 = vmatpush1.bf16.msra.mxu0 %v3967_v42 }
 0x260   : > { %3001 = vmatprep.subr.bf16.mxu0 %v3970_v43  ;;  %4349 = vmatprep.subr.bf16.mxu1 %v4587_v54 }
 0x263   : > { %3002 = vmatpush1.bf16.msra.mxu0 %v3969_v15 }
 0x264   : > { %3003 = vmatprep.subr.bf16.mxu0 %v3972_v33 }
 0x266   : > { %2252 = vmatmul.mubr.bf16.gmra.mrb[148].mxu0 %v5111_v2 }
 0x267   : > { %2261 = vmatprep.mubr.bf16.mxu0 %v5113_v3  ;;  %3004 = vmatpush1.bf16.msra.mxu0 %v3971_v5 }
 0x268   : > { %3005 = vmatprep.subr.bf16.mxu0 %v3974_v27 }
 0x26b   : > { %3006 = vmatpush1.bf16.msra.mxu0 %v3973_v18 }
 0x26c   : > { %3007 = vmatprep.subr.bf16.mxu0 %v3976_v49 }
 0x26e   : > { %2262 = vmatmul.mubr.bf16.gmra.mrb[152].mxu0 %v5123_v8 }
 0x26f   : > { %2271 = vmatprep.mubr.bf16.mxu0 %v5125_v10  ;;  %3008 = vmatpush1.bf16.msra.mxu0 %v3975_v13 }
 0x270   : > { %3009 = vmatprep.subr.bf16.mxu0 %v3978_v12 }
 0x273   : > { %3010 = vmatpush1.bf16.msra.mxu0 %v3977_v20 }
 0x274   : > { %3011 = vmatprep.subr.bf16.mxu0 %v3980_v28  ;;  %v5983_v28 = vld [vmem:[#allocation17_spill] sm:$0xff] }
 0x276   : > { %2272 = vmatmul.mubr.bf16.gmra.mrb[156].mxu0 %v5135_v16 }
 0x277   : > { %2281 = vmatprep.mubr.bf16.mxu0 %v5137_v17  ;;  %3012 = vmatpush1.bf16.msra.mxu0 %v3979_v55 }
 0x278   : > { %3013 = vmatprep.subr.bf16.mxu0 %v3982_v34 }
 0x27b   : > { %3014 = vmatpush1.bf16.msra.mxu0 %v3981_v59 }
 0x27e   : > { %2282 = vmatmul.mubr.bf16.gmra.mrb[160].mxu0 %v5147_v22 }
 0x27f   : > { %2291 = vmatprep.mubr.bf16.mxu0 %v5149_v23 }
 0x286   : > { %2292 = vmatmul.mubr.bf16.gmra.mrb[164].mxu0 %v5159_v30 }
 0x287   : > { %2301 = vmatprep.mubr.bf16.mxu0 %v5161_v31 }
 0x28e   : > { %2302 = vmatmul.mubr.bf16.gmra.mrb[168].mxu0 %v5171_v36 }
 0x28f   : > { %2311 = vmatprep.mubr.bf16.mxu0 %v5173_v37 }
 0x290   : > { %v4141_v53 = vpop.f32.mrb[64].mxu1  ;;  %v4029_v1 = vpop.f32.mrb[64].mxu0 }
 0x291   : > { %v4142_v14 = vpop.f32.mrb[65].mxu1  ;;  %v4030_v42 = vpop.f32.mrb[65].mxu0 }
 0x292   : > { %v4143_v43 = vadd.f32 %v4142_v14, %v4141_v53  ;;  %v4144_v44 = vpop.f32.mrb[66].mxu1  ;;  %v4031_v21 = vadd.f32 %v4030_v42, %v4029_v1  ;;  %v4032_v0 = vpop.f32.mrb[66].mxu0 }
 0x293   : > { %v4145_v15 = vpop.f32.mrb[67].mxu1  ;;  %v4033_v48 = vpop.f32.mrb[67].mxu0 }
 0x294   : > { %v4146_v33 = vadd.f32 %v4145_v15, %v4144_v44  ;;  %v5422_v19 = vadd.f32 %v4143_v43, %v4031_v21  ;;  %v4034_v56 = vadd.f32 %v4033_v48, %v4032_v0  ;;  %v5984_v44 = vld [vmem:[#allocation18_spill] sm:$0xff]  ;;  %v5985_v0 = vld [vmem:[#allocation19_spill] sm:$0xff] }
 0x296   : > { %2312 = vmatmul.mubr.bf16.gmra.mrb[172].mxu0 %v5183_v45  ;;  %v5425_v5 = vadd.f32 %v4146_v33, %v4034_v56 }
 0x297   : > { %2321 = vmatprep.mubr.bf16.mxu0 %v5185_v46 }
 0x298   : > { %v4147_v27 = vpop.f32.mrb[68].mxu1 }
 0x299   : > { %v4035_v4 = vpop.f32.mrb[68].mxu0  ;;  %v4148_v25 = vpop.f32.mrb[69].mxu1 }
 0x29a   : > { %v4036_v18 = vpop.f32.mrb[69].mxu0  ;;  %v4149_v49 = vadd.f32 %v4148_v25, %v4147_v27  ;;  %v4150_v29 = vpop.f32.mrb[70].mxu1 }
 0x29b   : > { %v4037_v32 = vadd.f32 %v4036_v18, %v4035_v4  ;;  %v4038_v13 = vpop.f32.mrb[70].mxu0  ;;  %v4151_v12 = vpop.f32.mrb[71].mxu1 }
 0x29c   : > { %v4039_v6 = vpop.f32.mrb[71].mxu0  ;;  %v4152_v47 = vadd.f32 %v4151_v12, %v4150_v29 }
 0x29d   : > { %v5428_v63 = vadd.f32 %v4149_v49, %v4037_v32  ;;  %v4040_v20 = vadd.f32 %v4039_v6, %v4038_v13  ;;  %v5986_v6 = vld [vmem:[#allocation20_spill] sm:$0xff] }
 0x29e   : > { %2322 = vmatmul.mubr.bf16.gmra.mrb[176].mxu0 %v5195_v57 }
 0x29f   : > { %v5431_v35 = vadd.f32 %v4152_v47, %v4040_v20  ;;  %2331 = vmatprep.mubr.bf16.mxu0 %v5983_v28  ;;  %v5987_v20 = vld [vmem:[#allocation21_spill] sm:$0xff] }
 0x2a0   : > { %v4153_v39 = vpop.f32.mrb[72].mxu1 }
 0x2a1   : > { %v4041_v55 = vpop.f32.mrb[72].mxu0  ;;  %v4154_v34 = vpop.f32.mrb[73].mxu1 }
 0x2a2   : > { %v4042_v59 = vpop.f32.mrb[73].mxu0  ;;  %v4155_v41 = vadd.f32 %v4154_v34, %v4153_v39  ;;  %v4156_v62 = vpop.f32.mrb[74].mxu1 }
 0x2a3   : > { %v4043_v7 = vadd.f32 %v4042_v59, %v4041_v55  ;;  %v4044_v51 = vpop.f32.mrb[74].mxu0  ;;  %v4157_v53 = vpop.f32.mrb[75].mxu1 }
 0x2a4   : > { %v4045_v1 = vpop.f32.mrb[75].mxu0  ;;  %v4158_v14 = vadd.f32 %v4157_v53, %v4156_v62 }
 0x2a5   : > { %v5434_v42 = vadd.f32 %v4155_v41, %v4043_v7  ;;  %v4046_v43 = vadd.f32 %v4045_v1, %v4044_v51 }
 0x2a6   : > { %2332 = vmatmul.mubr.bf16.gmra.mrb[180].mxu0 %v5984_v44 }
 0x2a7   : > { %v5437_v21 = vadd.f32 %v4158_v14, %v4046_v43  ;;  %2341 = vmatprep.mubr.bf16.mxu0 %v5985_v0 }
 0x2a8   : > { %v4159_v15 = vpop.f32.mrb[76].mxu1 }
 0x2a9   : > { %v4047_v48 = vpop.f32.mrb[76].mxu0  ;;  %v4160_v33 = vpop.f32.mrb[77].mxu1 }
 0x2aa   : > { %v4048_v56 = vpop.f32.mrb[77].mxu0  ;;  %v4161_v27 = vadd.f32 %v4160_v33, %v4159_v15  ;;  %v4162_v4 = vpop.f32.mrb[78].mxu1  ;;  %v5988_v15 = vld [vmem:[#allocation22_spill] sm:$0xff] }
 0x2ab   : > { %v4049_v25 = vadd.f32 %v4048_v56, %v4047_v48  ;;  %v4050_v18 = vpop.f32.mrb[78].mxu0  ;;  %v4163_v49 = vpop.f32.mrb[79].mxu1 }
 0x2ac   : > { %v4051_v29 = vpop.f32.mrb[79].mxu0  ;;  %v4164_v32 = vadd.f32 %v4163_v49, %v4162_v4 }
 0x2ad   : > { %v5440_v13 = vadd.f32 %v4161_v27, %v4049_v25  ;;  %v4052_v12 = vadd.f32 %v4051_v29, %v4050_v18 }
 0x2ae   : > { %2342 = vmatmul.mubr.bf16.gmra.mrb[184].mxu0 %v5986_v6 }
 0x2af   : > { %v5443_v47 = vadd.f32 %v4164_v32, %v4052_v12  ;;  %2351 = vmatprep.mubr.bf16.mxu0 %v5987_v20 }
 0x2b0   : > { %v4165_v39 = vpop.f32.mrb[80].mxu1 }
 0x2b1   : > { %v4053_v54 = vpop.f32.mrb[80].mxu0  ;;  %v4166_v55 = vpop.f32.mrb[81].mxu1 }
 0x2b2   : > { %v4054_v34 = vpop.f32.mrb[81].mxu0  ;;  %v4167_v59 = vadd.f32 %v4166_v55, %v4165_v39  ;;  %v4168_v41 = vpop.f32.mrb[82].mxu1 }
 0x2b3   : > { %v4055_v62 = vadd.f32 %v4054_v34, %v4053_v54  ;;  %v4056_v7 = vpop.f32.mrb[82].mxu0  ;;  %v4169_v51 = vpop.f32.mrb[83].mxu1 }
 0x2b4   : > { %v4057_v53 = vpop.f32.mrb[83].mxu0  ;;  %v4170_v1 = vadd.f32 %v4169_v51, %v4168_v41 }
 0x2b5   : > { %v5446_v14 = vadd.f32 %v4167_v59, %v4055_v62  ;;  %v4058_v43 = vadd.f32 %v4057_v53, %v4056_v7 }
 0x2b6   : > { %2352 = vmatmul.mubr.bf16.gmra.mrb[188].mxu0 %v5988_v15 }
 0x2b7   : > { %v5449_v48 = vadd.f32 %v4170_v1, %v4058_v43  ;;  %3015 = vmatprep.mubr.bf16.mxu0 %v5043_v58 }
 0x2b8   : > { %v4171_v33 = vpop.f32.mrb[84].mxu1 }
 0x2b9   : > { %v4059_v56 = vpop.f32.mrb[84].mxu0  ;;  %v4172_v27 = vpop.f32.mrb[85].mxu1 }
 0x2ba   : > { %v4060_v4 = vpop.f32.mrb[85].mxu0  ;;  %v4173_v25 = vadd.f32 %v4172_v27, %v4171_v33  ;;  %v4174_v18 = vpop.f32.mrb[86].mxu1 }
 0x2bb   : > { %v4061_v49 = vadd.f32 %v4060_v4, %v4059_v56  ;;  %v4062_v29 = vpop.f32.mrb[86].mxu0  ;;  %v4175_v32 = vpop.f32.mrb[87].mxu1 }
 0x2bc   : > { %v4063_v12 = vpop.f32.mrb[87].mxu0  ;;  %v4176_v39 = vadd.f32 %v4175_v32, %v4174_v18 }
 0x2bd   : > { %v5452_v54 = vadd.f32 %v4173_v25, %v4061_v49  ;;  %v4064_v55 = vadd.f32 %v4063_v12, %v4062_v29 }
 0x2be   : > { %3016 = vmatmul.mubr.bf16.vlgmr.msra.gmra.mrb[192].mxu0 %v5051_v9 }
 0x2bf   : > { %v5455_v34 = vadd.f32 %v4176_v39, %v4064_v55  ;;  %3025 = vmatprep.mubr.bf16.mxu0 %v5053_v11 }
 0x2c0   : > { %v4177_v58 = vpop.f32.mrb[88].mxu1 }
 0x2c1   : > { %v4065_v59 = vpop.f32.mrb[88].mxu0  ;;  %v4178_v41 = vpop.f32.mrb[89].mxu1 }
 0x2c2   : > { %v4066_v62 = vpop.f32.mrb[89].mxu0  ;;  %v4179_v7 = vadd.f32 %v4178_v41, %v4177_v58  ;;  %v4180_v51 = vpop.f32.mrb[90].mxu1 }
 0x2c3   : > { %v4067_v53 = vadd.f32 %v4066_v62, %v4065_v59  ;;  %v4068_v1 = vpop.f32.mrb[90].mxu0  ;;  %v4181_v43 = vpop.f32.mrb[91].mxu1 }
 0x2c4   : > { %v4069_v33 = vpop.f32.mrb[91].mxu0  ;;  %v4182_v56 = vadd.f32 %v4181_v43, %v4180_v51 }
 0x2c5   : > { %v5458_v27 = vadd.f32 %v4179_v7, %v4067_v53  ;;  %v4070_v4 = vadd.f32 %v4069_v33, %v4068_v1 }
 0x2c6   : > { %3026 = vmatmul.mubr.bf16.gmra.mrb[196].mxu0 %v5063_v24 }
 0x2c7   : > { %v5461_v9 = vadd.f32 %v4182_v56, %v4070_v4  ;;  %3035 = vmatprep.mubr.bf16.mxu0 %v5065_v26 }
 0x2c8   : > { %v4183_v11 = vpop.f32.mrb[92].mxu1 }
 0x2c9   : > { %v4071_v25 = vpop.f32.mrb[92].mxu0  ;;  %v4184_v18 = vpop.f32.mrb[93].mxu1 }
 0x2ca   : > { %v4072_v49 = vpop.f32.mrb[93].mxu0  ;;  %v4185_v29 = vadd.f32 %v4184_v18, %v4183_v11  ;;  %v4186_v32 = vpop.f32.mrb[94].mxu1 }
 0x2cb   : > { %v4073_v12 = vadd.f32 %v4072_v49, %v4071_v25  ;;  %v4074_v39 = vpop.f32.mrb[94].mxu0  ;;  %v4187_v55 = vpop.f32.mrb[95].mxu1 }
 0x2cc   : > { %v4075_v58 = vpop.f32.mrb[95].mxu0  ;;  %v4188_v59 = vadd.f32 %v4187_v55, %v4186_v32 }
 0x2cd   : > { %v5464_v41 = vadd.f32 %v4185_v29, %v4073_v12  ;;  %v4076_v62 = vadd.f32 %v4075_v58, %v4074_v39 }
 0x2ce   : > { %3036 = vmatmul.mubr.bf16.gmra.mrb[200].mxu0 %v5075_v38 }
 0x2cf   : > { %v5467_v24 = vadd.f32 %v4188_v59, %v4076_v62  ;;  %3045 = vmatprep.mubr.bf16.mxu0 %v5077_v40 }
 0x2d0   : > { %v4189_v26 = vpop.f32.mrb[96].mxu1 }
 0x2d1   : > { %v4077_v7 = vpop.f32.mrb[96].mxu0  ;;  %v4190_v51 = vpop.f32.mrb[97].mxu1 }
 0x2d2   : > { %v4078_v53 = vpop.f32.mrb[97].mxu0  ;;  %v4191_v1 = vadd.f32 %v4190_v51, %v4189_v26  ;;  %v4192_v43 = vpop.f32.mrb[98].mxu1 }
 0x2d3   : > { %v4079_v33 = vadd.f32 %v4078_v53, %v4077_v7  ;;  %v4080_v56 = vpop.f32.mrb[98].mxu0  ;;  %v4193_v4 = vpop.f32.mrb[99].mxu1 }
 0x2d4   : > { %v4081_v11 = vpop.f32.mrb[99].mxu0  ;;  %v4194_v25 = vadd.f32 %v4193_v4, %v4192_v43 }
 0x2d5   : > { %v5470_v18 = vadd.f32 %v4191_v1, %v4079_v33  ;;  %v4082_v49 = vadd.f32 %v4081_v11, %v4080_v56 }
 0x2d6   : > { %3046 = vmatmul.mubr.bf16.gmra.mrb[204].mxu0 %v5087_v50 }
 0x2d7   : > { %v5473_v38 = vadd.f32 %v4194_v25, %v4082_v49  ;;  %3055 = vmatprep.mubr.bf16.mxu0 %v5089_v52 }
 0x2d8   : > { %v4195_v40 = vpop.f32.mrb[100].mxu1 }
 0x2d9   : > { %v4083_v29 = vpop.f32.mrb[100].mxu0  ;;  %v4196_v32 = vpop.f32.mrb[101].mxu1 }
 0x2da   : > { %v4084_v12 = vpop.f32.mrb[101].mxu0  ;;  %v4197_v39 = vadd.f32 %v4196_v32, %v4195_v40  ;;  %v4198_v55 = vpop.f32.mrb[102].mxu1 }
 0x2db   : > { %v4085_v58 = vadd.f32 %v4084_v12, %v4083_v29  ;;  %v4086_v59 = vpop.f32.mrb[102].mxu0  ;;  %v4199_v62 = vpop.f32.mrb[103].mxu1 }
 0x2dc   : > { %v4087_v26 = vpop.f32.mrb[103].mxu0  ;;  %v4200_v7 = vadd.f32 %v4199_v62, %v4198_v55 }
 0x2dd   : > { %v5476_v51 = vadd.f32 %v4197_v39, %v4085_v58  ;;  %v4088_v53 = vadd.f32 %v4087_v26, %v4086_v59 }
 0x2de   : > { %3056 = vmatmul.mubr.bf16.gmra.mrb[208].mxu0 %v5099_v60 }
 0x2df   : > { %v5479_v50 = vadd.f32 %v4200_v7, %v4088_v53  ;;  %3065 = vmatprep.mubr.bf16.mxu0 %v5101_v61 }
 0x2e0   : > { %v4201_v52 = vpop.f32.mrb[104].mxu1 }
 0x2e1   : > { %v4089_v1 = vpop.f32.mrb[104].mxu0  ;;  %v4202_v43 = vpop.f32.mrb[105].mxu1 }
 0x2e2   : > { %v4090_v33 = vpop.f32.mrb[105].mxu0  ;;  %v4203_v56 = vadd.f32 %v4202_v43, %v4201_v52  ;;  %v4204_v4 = vpop.f32.mrb[106].mxu1 }
 0x2e3   : > { %v4091_v11 = vadd.f32 %v4090_v33, %v4089_v1  ;;  %v4092_v25 = vpop.f32.mrb[106].mxu0  ;;  %v4205_v49 = vpop.f32.mrb[107].mxu1 }
 0x2e4   : > { %v4093_v40 = vpop.f32.mrb[107].mxu0  ;;  %v4206_v29 = vadd.f32 %v4205_v49, %v4204_v4 }
 0x2e5   : > { %v5482_v32 = vadd.f32 %v4203_v56, %v4091_v11  ;;  %v4094_v12 = vadd.f32 %v4093_v40, %v4092_v25 }
 0x2e6   : > { %3066 = vmatmul.mubr.bf16.gmra.mrb[212].mxu0 %v5111_v2 }
 0x2e7   : > { %v5485_v60 = vadd.f32 %v4206_v29, %v4094_v12  ;;  %3075 = vmatprep.mubr.bf16.mxu0 %v5113_v3 }
 0x2e8   : > { %v4207_v61 = vpop.f32.mrb[108].mxu1 }
 0x2e9   : > { %v4095_v39 = vpop.f32.mrb[108].mxu0  ;;  %v4208_v55 = vpop.f32.mrb[109].mxu1 }
 0x2ea   : > { %v4096_v58 = vpop.f32.mrb[109].mxu0  ;;  %v4209_v59 = vadd.f32 %v4208_v55, %v4207_v61  ;;  %v4210_v62 = vpop.f32.mrb[110].mxu1 }
 0x2eb   : > { %v4097_v26 = vadd.f32 %v4096_v58, %v4095_v39  ;;  %v4098_v7 = vpop.f32.mrb[110].mxu0  ;;  %v4211_v53 = vpop.f32.mrb[111].mxu1 }
 0x2ec   : > { %v4099_v52 = vpop.f32.mrb[111].mxu0  ;;  %v4212_v1 = vadd.f32 %v4211_v53, %v4210_v62 }
 0x2ed   : > { %v5488_v43 = vadd.f32 %v4209_v59, %v4097_v26  ;;  %v4100_v33 = vadd.f32 %v4099_v52, %v4098_v7 }
 0x2ee   : > { %3076 = vmatmul.mubr.bf16.gmra.mrb[216].mxu0 %v5123_v8 }
 0x2ef   : > { %v5491_v2 = vadd.f32 %v4212_v1, %v4100_v33  ;;  %3085 = vmatprep.mubr.bf16.mxu0 %v5125_v10 }
 0x2f0   : > { %v4213_v3 = vpop.f32.mrb[112].mxu1 }
 0x2f1   : > { %v4101_v56 = vpop.f32.mrb[112].mxu0  ;;  %v4214_v4 = vpop.f32.mrb[113].mxu1 }
 0x2f2   : > { %v4102_v11 = vpop.f32.mrb[113].mxu0  ;;  %v4215_v25 = vadd.f32 %v4214_v4, %v4213_v3  ;;  %v4216_v49 = vpop.f32.mrb[114].mxu1 }
 0x2f3   : > { %v4103_v40 = vadd.f32 %v4102_v11, %v4101_v56  ;;  %v4104_v29 = vpop.f32.mrb[114].mxu0  ;;  %v4217_v12 = vpop.f32.mrb[115].mxu1 }
 0x2f4   : > { %v4105_v61 = vpop.f32.mrb[115].mxu0  ;;  %v4218_v39 = vadd.f32 %v4217_v12, %v4216_v49 }
 0x2f5   : > { %v5494_v55 = vadd.f32 %v4215_v25, %v4103_v40  ;;  %v4106_v58 = vadd.f32 %v4105_v61, %v4104_v29 }
 0x2f6   : > { %3086 = vmatmul.mubr.bf16.gmra.mrb[220].mxu0 %v5135_v16 }
 0x2f7   : > { %v5497_v8 = vadd.f32 %v4218_v39, %v4106_v58  ;;  %3095 = vmatprep.mubr.bf16.mxu0 %v5137_v17 }
 0x2f8   : > { %v4219_v10 = vpop.f32.mrb[116].mxu1 }
 0x2f9   : > { %v4107_v59 = vpop.f32.mrb[116].mxu0  ;;  %v4220_v62 = vpop.f32.mrb[117].mxu1 }
 0x2fa   : > { %v4108_v26 = vpop.f32.mrb[117].mxu0  ;;  %v4221_v7 = vadd.f32 %v4220_v62, %v4219_v10  ;;  %v4222_v53 = vpop.f32.mrb[118].mxu1 }
 0x2fb   : > { %v4109_v52 = vadd.f32 %v4108_v26, %v4107_v59  ;;  %v4110_v1 = vpop.f32.mrb[118].mxu0  ;;  %v4223_v33 = vpop.f32.mrb[119].mxu1 }
 0x2fc   : > { %v4111_v3 = vpop.f32.mrb[119].mxu0  ;;  %v4224_v56 = vadd.f32 %v4223_v33, %v4222_v53 }
 0x2fd   : > { %v5500_v4 = vadd.f32 %v4221_v7, %v4109_v52  ;;  %v4112_v11 = vadd.f32 %v4111_v3, %v4110_v1 }
 0x2fe   : > { %3096 = vmatmul.mubr.bf16.gmra.mrb[224].mxu0 %v5147_v22 }
 0x2ff   : > { %v5503_v16 = vadd.f32 %v4224_v56, %v4112_v11  ;;  %3105 = vmatprep.mubr.bf16.mxu0 %v5149_v23 }
 0x300   : > { %v4225_v17 = vpop.f32.mrb[120].mxu1 }
 0x301   : > { %v4113_v25 = vpop.f32.mrb[120].mxu0  ;;  %v4226_v49 = vpop.f32.mrb[121].mxu1 }
 0x302   : > { %v4114_v40 = vpop.f32.mrb[121].mxu0  ;;  %v4227_v29 = vadd.f32 %v4226_v49, %v4225_v17  ;;  %v4228_v12 = vpop.f32.mrb[122].mxu1  ;;  %v1997_v17 = vld [vmem:[#allocation7 + $0x4] sm:$0x3] }
 0x303   : > { %v4115_v61 = vadd.f32 %v4114_v40, %v4113_v25  ;;  %v4116_v39 = vpop.f32.mrb[122].mxu0  ;;  %v4229_v58 = vpop.f32.mrb[123].mxu1 }
 0x304   : > { %v4117_v10 = vpop.f32.mrb[123].mxu0  ;;  %v4230_v59 = vadd.f32 %v4229_v58, %v4228_v12 }
 0x305   : > { %v5506_v62 = vadd.f32 %v4227_v29, %v4115_v61  ;;  %v4118_v26 = vadd.f32 %v4117_v10, %v4116_v39  ;;  %v5990_v61 = vld [vmem:[#allocation24_spill] sm:$0xff] }
 0x306   : > { %3106 = vmatmul.mubr.bf16.gmra.mrb[228].mxu0 %v5159_v30  ;;  %v5989_v30 = vld [vmem:[#allocation23_spill] sm:$0xff]  ;;  %v5521_v39 = vrot.slane %v1997_v17, %v5990_v61 }
 0x307   : > { %v5509_v22 = vadd.f32 %v4230_v59, %v4118_v26  ;;  %3115 = vmatprep.mubr.bf16.mxu0 %v5161_v31  ;;  %v5516_v12 = vrot.slane %v1997_v17, %v5989_v30  ;;  %v4588_v17 = vld [vmem:[#allocation8 + $0x180] sm:$0xff]  }
 0x308   : > { %v4231_v23 = vpop.f32.mrb[124].mxu1 }
 0x309   : > { %v4119_v7 = vpop.f32.mrb[124].mxu0  ;;  %v4232_v53 = vpop.f32.mrb[125].mxu1 }
 0x30a   : > { %v4120_v52 = vpop.f32.mrb[125].mxu0  ;;  %v4233_v1 = vadd.f32 %v4232_v53, %v4231_v23  ;;  %v4234_v33 = vpop.f32.mrb[126].mxu1 }
 0x30b   : > { %v4121_v3 = vadd.f32 %v4120_v52, %v4119_v7  ;;  %v4122_v56 = vpop.f32.mrb[126].mxu0  ;;  %v4235_v11 = vpop.f32.mrb[127].mxu1 }
 0x30c   : > { %v4123_v25 = vpop.f32.mrb[127].mxu0  ;;  %v4236_v49 = vadd.f32 %v4235_v11, %v4234_v33 }
 0x30d   : > { %v5512_v40 = vadd.f32 %v4233_v1, %v4121_v3  ;;  %v4124_v29 = vadd.f32 %v4123_v25, %v4122_v56 }
 0x30e   : > { %3116 = vmatmul.mubr.bf16.gmra.mrb[232].mxu0 %v5171_v36 }
 0x30f   : > { %v5518_v31 = vadd.f32 %v4236_v49, %v4124_v29  ;;  %3125 = vmatprep.mubr.bf16.mxu0 %v5173_v37  ;;  %v4589_v29 = vld [vmem:[#allocation8 + $0x1c8] sm:$0xff]  }
 0x311   : > { %v2203_v58 = vpop.f32.mrb[128].mxu0 }
 0x312   : > { %v2204_v10 = vadd.f32 %v2203_v58, %v5516_v12  ;;  %v2205_v59 = vpop.f32.mrb[129].mxu0 }
 0x313   : > { %v2206_v26 = vadd.f32 %v2205_v59, %v5521_v39  ;;  %v2207_v23 = vpop.f32.mrb[130].mxu0 }
 0x314   : > { %v2208_v7 = vadd.f32 %v2207_v23, %v5516_v12  ;;  %v2209_v36 = vpop.f32.mrb[131].mxu0  ;;  %v2362_v52 = vmax.f32 %v2204_v10, 0.0 }
 0x315   : > { %v2210_v53 = vadd.f32 %v2209_v36, %v5521_v39  ;;  %v2363_v33 = vmax.f32 %v2206_v26, 0.0  ;;  %v4591_v36 = vld [vmem:[#allocation8 + $0x1d0] sm:$0xff]  }
 0x316   : > { %v2364_v1 = vmax.f32 %v2208_v7, 0.0  ;;  %3126 = vmatmul.mubr.bf16.gmra.mrb[236].mxu0 %v5183_v45 }
 0x317   : > { %v2365_v3 = vmax.f32 %v2210_v53, 0.0  ;;  %3135 = vmatprep.mubr.bf16.mxu0 %v5185_v46  ;;  %v4590_v46 = vld [vmem:[#allocation8 + $0x188] sm:$0xff]  }
 0x318   : > { %v2426_v37 = vpack.c.bf16 %v2364_v1, %v2362_v52 }
 0x319   : > { %v2427_v56 = vpack.c.bf16 %v2365_v3, %v2363_v33  ;;  %v2213_v11 = vpop.f32.mrb[132].mxu0 }
 0x31a   : > { %v2214_v25 = vadd.f32 %v2213_v11, %v5516_v12  ;;  %v2215_v49 = vpop.f32.mrb[133].mxu0 }
 0x31b   : > { %v2216_v58 = vadd.f32 %v2215_v49, %v5521_v39  ;;  %v2217_v59 = vpop.f32.mrb[134].mxu0  ;;  %2618 = vmatprep.mubr.bf16.mxu1 %v2427_v56  ;;  %v4592_v56 = vld [vmem:[#allocation8 + $0x190] sm:$0xff]  }
 0x31c   : > { %v2218_v10 = vadd.f32 %v2217_v59, %v5516_v12  ;;  %v2219_v23 = vpop.f32.mrb[135].mxu0  ;;  %2619 = vmatmul.mubr.bf16.vlgmr.msra.gmra.mrb[128].mxu1 %v2426_v37  ;;  %v2366_v26 = vmax.f32 %v2214_v25, 0.0 }
 0x31d   : > { %v2220_v45 = vadd.f32 %v2219_v23, %v5521_v39  ;;  %4350 = vmatpush3.bf16.msra.mxu1 %v4588_v17  ;;  %v2367_v53 = vmax.f32 %v2216_v58, 0.0  ;;  %v4593_v17 = vld [vmem:[#allocation8 + $0x1d8] sm:$0xff]   ;;  %v4595_v23 = vld [vmem:[#allocation8 + $0x1e0] sm:$0xff]  }
 0x31e   : > { %v2368_v7 = vmax.f32 %v2218_v10, 0.0  ;;  %3136 = vmatmul.mubr.bf16.gmra.mrb[240].mxu0 %v5195_v57  ;;  %4351 = vmatprep.subr.bf16.mxu1 %v4589_v29  ;;  %v4594_v58 = vld [vmem:[#allocation8 + $0x198] sm:$0xff]  }
 0x31f   : > { %v2369_v52 = vmax.f32 %v2220_v45, 0.0  ;;  %3145 = vmatprep.mubr.bf16.mxu0 %v5983_v28 }
 0x320   : > { %v2428_v1 = vpack.c.bf16 %v2368_v7, %v2366_v26 }
 0x321   : > { %v2429_v33 = vpack.c.bf16 %v2369_v52, %v2367_v53  ;;  %v2223_v3 = vpop.f32.mrb[136].mxu0  ;;  %4352 = vmatpush3.bf16.msra.mxu1 %v4590_v46  ;;  %v4596_v53 = vld [vmem:[#allocation8 + $0x1a0] sm:$0xff]  }
 0x322   : > { %v2224_v37 = vadd.f32 %v2223_v3, %v5516_v12  ;;  %v2225_v11 = vpop.f32.mrb[137].mxu0  ;;  %4353 = vmatprep.subr.bf16.mxu1 %v4591_v36 }
 0x323   : > { %v2226_v25 = vadd.f32 %v2225_v11, %v5521_v39  ;;  %v2227_v49 = vpop.f32.mrb[138].mxu0  ;;  %2626 = vmatprep.mubr.bf16.mxu1 %v2429_v33  ;;  %v4597_v33 = vld [vmem:[#allocation8 + $0x1e8] sm:$0xff]  }
 0x324   : > { %v2228_v57 = vadd.f32 %v2227_v49, %v5516_v12  ;;  %v2229_v29 = vpop.f32.mrb[139].mxu0  ;;  %2627 = vmatmul.mubr.bf16.gmra.mrb[132].mxu1 %v2428_v1  ;;  %v2370_v59 = vmax.f32 %v2224_v37, 0.0  ;;  %v4598_v11 = vld [vmem:[#allocation8 + $0x1a8] sm:$0xff]   ;;  %v4599_v49 = vld [vmem:[#allocation8 + $0x1f0] sm:$0xff]  }
 0x325   : > { %v2230_v28 = vadd.f32 %v2229_v29, %v5521_v39  ;;  %4354 = vmatpush3.bf16.msra.mxu1 %v4592_v56  ;;  %v2371_v45 = vmax.f32 %v2226_v25, 0.0 }
 0x326   : > { %v2372_v10 = vmax.f32 %v2228_v57, 0.0  ;;  %3146 = vmatmul.mubr.bf16.gmra.mrb[244].mxu0 %v5984_v44  ;;  %4355 = vmatprep.subr.bf16.mxu1 %v4593_v17 }
 0x327   : > { %v2373_v46 = vmax.f32 %v2230_v28, 0.0  ;;  %3155 = vmatprep.mubr.bf16.mxu0 %v5985_v0 }
 0x328   : > { %v2430_v26 = vpack.c.bf16 %v2372_v10, %v2370_v59  ;;  %v4600_v10 = vld [vmem:[#allocation8 + $0x1b0] sm:$0xff]  }
 0x329   : > { %v2431_v7 = vpack.c.bf16 %v2373_v46, %v2371_v45  ;;  %v2233_v36 = vpop.f32.mrb[140].mxu0  ;;  %4356 = vmatpush3.bf16.msra.mxu1 %v4594_v58  ;;  %v4601_v46 = vld [vmem:[#allocation8 + $0x1f8] sm:$0xff]  }
 0x32a   : > { %v2234_v52 = vadd.f32 %v2233_v36, %v5516_v12  ;;  %v2235_v1 = vpop.f32.mrb[141].mxu0  ;;  %4357 = vmatprep.subr.bf16.mxu1 %v4595_v23 }
 0x32b   : > { %v2236_v3 = vadd.f32 %v2235_v1, %v5521_v39  ;;  %v2237_v56 = vpop.f32.mrb[142].mxu0  ;;  %2634 = vmatprep.mubr.bf16.mxu1 %v2431_v7 }
 0x32c   : > { %v2238_v44 = vadd.f32 %v2237_v56, %v5516_v12  ;;  %v2239_v37 = vpop.f32.mrb[143].mxu0  ;;  %2635 = vmatmul.mubr.bf16.gmra.mrb[136].mxu1 %v2430_v26  ;;  %v2374_v17 = vmax.f32 %v2234_v52, 0.0 }
 0x32d   : > { %v2240_v0 = vadd.f32 %v2239_v37, %v5521_v39  ;;  %4358 = vmatpush3.bf16.msra.mxu1 %v4596_v53  ;;  %v2375_v57 = vmax.f32 %v2236_v3, 0.0  ;;  %v4602_v53 = vld [vmem:[#allocation8 + $0x1b8] sm:$0xff]  }
 0x32e   : > { %v2376_v25 = vmax.f32 %v2238_v44, 0.0  ;;  %3156 = vmatmul.mubr.bf16.gmra.mrb[248].mxu0 %v5986_v6  ;;  %4359 = vmatprep.subr.bf16.mxu1 %v4597_v33 }
 0x32f   : > { %v2377_v29 = vmax.f32 %v2240_v0, 0.0  ;;  %3165 = vmatprep.mubr.bf16.mxu0 %v5987_v20 }
 0x330   : > { %v2432_v28 = vpack.c.bf16 %v2376_v25, %v2374_v17 }
 0x331   : > { %v2433_v58 = vpack.c.bf16 %v2377_v29, %v2375_v57  ;;  %v2243_v59 = vpop.f32.mrb[144].mxu0  ;;  %4360 = vmatpush3.bf16.msra.mxu1 %v4598_v11 }
 0x332   : > { %v2244_v23 = vadd.f32 %v2243_v59, %v5516_v12  ;;  %v2245_v45 = vpop.f32.mrb[145].mxu0  ;;  %4361 = vmatprep.subr.bf16.mxu1 %v4599_v49 }
 0x333   : > { %v2246_v26 = vadd.f32 %v2245_v45, %v5521_v39  ;;  %v2247_v7 = vpop.f32.mrb[146].mxu0  ;;  %2642 = vmatprep.mubr.bf16.mxu1 %v2433_v58 }
 0x334   : > { %v2248_v6 = vadd.f32 %v2247_v7, %v5516_v12  ;;  %v2249_v36 = vpop.f32.mrb[147].mxu0  ;;  %2643 = vmatmul.mubr.bf16.gmra.mrb[140].mxu1 %v2432_v28  ;;  %v2378_v52 = vmax.f32 %v2244_v23, 0.0 }
 0x335   : > { %v2250_v20 = vadd.f32 %v2249_v36, %v5521_v39  ;;  %4362 = vmatpush3.bf16.msra.mxu1 %v4600_v10  ;;  %v2379_v33 = vmax.f32 %v2246_v26, 0.0 }
 0x336   : > { %v2380_v1 = vmax.f32 %v2248_v6, 0.0  ;;  %3166 = vmatmul.mubr.bf16.gmra.mrb[252].mxu0 %v5988_v15  ;;  %4363 = vmatprep.subr.bf16.mxu1 %v4601_v46 }
 0x337   : > { %v2381_v3 = vmax.f32 %v2250_v20, 0.0 }
 0x338   : > { %v2434_v56 = vpack.c.bf16 %v2380_v1, %v2378_v52 }
 0x339   : > { %v2435_v44 = vpack.c.bf16 %v2381_v3, %v2379_v33  ;;  %v2253_v37 = vpop.f32.mrb[148].mxu0  ;;  %4364 = vmatpush3.bf16.msra.mxu1 %v4602_v53 }
 0x33a   : > { %v2254_v0 = vadd.f32 %v2253_v37, %v5516_v12  ;;  %v2255_v11 = vpop.f32.mrb[149].mxu0 }
 0x33b   : > { %v2256_v17 = vadd.f32 %v2255_v11, %v5521_v39  ;;  %v2257_v25 = vpop.f32.mrb[150].mxu0  ;;  %2650 = vmatprep.mubr.bf16.mxu1 %v2435_v44 }
 0x33c   : > { %v2258_v49 = vadd.f32 %v2257_v25, %v5516_v12  ;;  %v2259_v57 = vpop.f32.mrb[151].mxu0  ;;  %2651 = vmatmul.mubr.bf16.gmra.mrb[144].mxu1 %v2434_v56  ;;  %v2382_v29 = vmax.f32 %v2254_v0, 0.0 }
 0x33d   : > { %v2260_v15 = vadd.f32 %v2259_v57, %v5521_v39  ;;  %v2383_v58 = vmax.f32 %v2256_v17, 0.0 }
 0x33e   : > { %v2384_v28 = vmax.f32 %v2258_v49, 0.0 }
 0x33f   : > { %v2385_v59 = vmax.f32 %v2260_v15, 0.0 }
 0x340   : > { %v2436_v10 = vpack.c.bf16 %v2384_v28, %v2382_v29 }
 0x341   : > { %v2437_v23 = vpack.c.bf16 %v2385_v59, %v2383_v58  ;;  %v2263_v45 = vpop.f32.mrb[152].mxu0 }
 0x342   : > { %v2264_v46 = vadd.f32 %v2263_v45, %v5516_v12  ;;  %v2265_v26 = vpop.f32.mrb[153].mxu0 }
 0x343   : > { %v2266_v7 = vadd.f32 %v2265_v26, %v5521_v39  ;;  %v2267_v6 = vpop.f32.mrb[154].mxu0  ;;  %2658 = vmatprep.mubr.bf16.mxu1 %v2437_v23 }
 0x344   : > { %v2268_v36 = vadd.f32 %v2267_v6, %v5516_v12  ;;  %v2269_v20 = vpop.f32.mrb[155].mxu0  ;;  %2659 = vmatmul.mubr.bf16.gmra.mrb[148].mxu1 %v2436_v10  ;;  %v2386_v52 = vmax.f32 %v2264_v46, 0.0 }
 0x345   : > { %v2270_v53 = vadd.f32 %v2269_v20, %v5521_v39  ;;  %v2387_v33 = vmax.f32 %v2266_v7, 0.0 }
 0x346   : > { %v2388_v1 = vmax.f32 %v2268_v36, 0.0 }
 0x347   : > { %v2389_v3 = vmax.f32 %v2270_v53, 0.0 }
 0x348   : > { %v2438_v56 = vpack.c.bf16 %v2388_v1, %v2386_v52 }
 0x349   : > { %v2439_v44 = vpack.c.bf16 %v2389_v3, %v2387_v33  ;;  %v2273_v37 = vpop.f32.mrb[156].mxu0 }
 0x34a   : > { %v2274_v0 = vadd.f32 %v2273_v37, %v5516_v12  ;;  %v2275_v11 = vpop.f32.mrb[157].mxu0 }
 0x34b   : > { %v2276_v17 = vadd.f32 %v2275_v11, %v5521_v39  ;;  %v2277_v25 = vpop.f32.mrb[158].mxu0  ;;  %2666 = vmatprep.mubr.bf16.mxu1 %v2439_v44 }
 0x34c   : > { %v2278_v49 = vadd.f32 %v2277_v25, %v5516_v12  ;;  %v2279_v57 = vpop.f32.mrb[159].mxu0  ;;  %2667 = vmatmul.mubr.bf16.gmra.mrb[152].mxu1 %v2438_v56  ;;  %v2390_v29 = vmax.f32 %v2274_v0, 0.0 }
 0x34d   : > { %v2280_v15 = vadd.f32 %v2279_v57, %v5521_v39  ;;  %v2391_v58 = vmax.f32 %v2276_v17, 0.0 }
 0x34e   : > { %v2392_v28 = vmax.f32 %v2278_v49, 0.0 }
 0x34f   : > { %v2393_v59 = vmax.f32 %v2280_v15, 0.0 }
 0x350   : > { %v2440_v10 = vpack.c.bf16 %v2392_v28, %v2390_v29 }
 0x351   : > { %v2441_v23 = vpack.c.bf16 %v2393_v59, %v2391_v58  ;;  %v2283_v45 = vpop.f32.mrb[160].mxu0 }
 0x352   : > { %v2284_v46 = vadd.f32 %v2283_v45, %v5516_v12  ;;  %v2285_v26 = vpop.f32.mrb[161].mxu0 }
 0x353   : > { %v2286_v7 = vadd.f32 %v2285_v26, %v5521_v39  ;;  %v2287_v6 = vpop.f32.mrb[162].mxu0  ;;  %2674 = vmatprep.mubr.bf16.mxu1 %v2441_v23 }
 0x354   : > { %v2288_v36 = vadd.f32 %v2287_v6, %v5516_v12  ;;  %v2289_v20 = vpop.f32.mrb[163].mxu0  ;;  %2675 = vmatmul.mubr.bf16.gmra.mrb[156].mxu1 %v2440_v10  ;;  %v2394_v52 = vmax.f32 %v2284_v46, 0.0 }
 0x355   : > { %v2290_v53 = vadd.f32 %v2289_v20, %v5521_v39  ;;  %v2395_v33 = vmax.f32 %v2286_v7, 0.0 }
 0x356   : > { %v2396_v1 = vmax.f32 %v2288_v36, 0.0 }
 0x357   : > { %v2397_v3 = vmax.f32 %v2290_v53, 0.0 }
 0x358   : > { %v2442_v56 = vpack.c.bf16 %v2396_v1, %v2394_v52 }
 0x359   : > { %v2443_v44 = vpack.c.bf16 %v2397_v3, %v2395_v33  ;;  %v2293_v37 = vpop.f32.mrb[164].mxu0 }
 0x35a   : > { %v2294_v0 = vadd.f32 %v2293_v37, %v5516_v12  ;;  %v2295_v11 = vpop.f32.mrb[165].mxu0 }
 0x35b   : > { %v2296_v17 = vadd.f32 %v2295_v11, %v5521_v39  ;;  %v2297_v25 = vpop.f32.mrb[166].mxu0  ;;  %2682 = vmatprep.mubr.bf16.mxu1 %v2443_v44 }
 0x35c   : > { %v2298_v49 = vadd.f32 %v2297_v25, %v5516_v12  ;;  %v2299_v57 = vpop.f32.mrb[167].mxu0  ;;  %2683 = vmatmul.mubr.bf16.gmra.mrb[160].mxu1 %v2442_v56  ;;  %v2398_v29 = vmax.f32 %v2294_v0, 0.0 }
 0x35d   : > { %v2300_v15 = vadd.f32 %v2299_v57, %v5521_v39  ;;  %v2399_v58 = vmax.f32 %v2296_v17, 0.0 }
 0x35e   : > { %v2400_v28 = vmax.f32 %v2298_v49, 0.0 }
 0x35f   : > { %v2401_v59 = vmax.f32 %v2300_v15, 0.0 }
 0x360   : > { %v2444_v10 = vpack.c.bf16 %v2400_v28, %v2398_v29 }
 0x361   : > { %v2445_v23 = vpack.c.bf16 %v2401_v59, %v2399_v58  ;;  %v2303_v45 = vpop.f32.mrb[168].mxu0 }
 0x362   : > { %v2304_v46 = vadd.f32 %v2303_v45, %v5516_v12  ;;  %v2305_v26 = vpop.f32.mrb[169].mxu0 }
 0x363   : > { %v2306_v7 = vadd.f32 %v2305_v26, %v5521_v39  ;;  %v2307_v6 = vpop.f32.mrb[170].mxu0  ;;  %2690 = vmatprep.mubr.bf16.mxu1 %v2445_v23 }
 0x364   : > { %v2308_v36 = vadd.f32 %v2307_v6, %v5516_v12  ;;  %v2309_v20 = vpop.f32.mrb[171].mxu0  ;;  %2691 = vmatmul.mubr.bf16.gmra.mrb[164].mxu1 %v2444_v10  ;;  %v2402_v52 = vmax.f32 %v2304_v46, 0.0 }
 0x365   : > { %v2310_v53 = vadd.f32 %v2309_v20, %v5521_v39  ;;  %v2403_v33 = vmax.f32 %v2306_v7, 0.0 }
 0x366   : > { %v2404_v1 = vmax.f32 %v2308_v36, 0.0 }
 0x367   : > { %v2405_v3 = vmax.f32 %v2310_v53, 0.0 }
 0x368   : > { %v2446_v56 = vpack.c.bf16 %v2404_v1, %v2402_v52 }
 0x369   : > { %v2447_v44 = vpack.c.bf16 %v2405_v3, %v2403_v33  ;;  %v2313_v37 = vpop.f32.mrb[172].mxu0 }
 0x36a   : > { %v2314_v0 = vadd.f32 %v2313_v37, %v5516_v12  ;;  %v2315_v11 = vpop.f32.mrb[173].mxu0 }
 0x36b   : > { %v2316_v17 = vadd.f32 %v2315_v11, %v5521_v39  ;;  %v2317_v25 = vpop.f32.mrb[174].mxu0  ;;  %2698 = vmatprep.mubr.bf16.mxu1 %v2447_v44 }
 0x36c   : > { %v2318_v49 = vadd.f32 %v2317_v25, %v5516_v12  ;;  %v2319_v57 = vpop.f32.mrb[175].mxu0  ;;  %2699 = vmatmul.mubr.bf16.gmra.mrb[168].mxu1 %v2446_v56  ;;  %v2406_v29 = vmax.f32 %v2314_v0, 0.0 }
 0x36d   : > { %v2320_v15 = vadd.f32 %v2319_v57, %v5521_v39  ;;  %v2407_v58 = vmax.f32 %v2316_v17, 0.0 }
 0x36e   : > { %v2408_v28 = vmax.f32 %v2318_v49, 0.0 }
 0x36f   : > { %v2409_v59 = vmax.f32 %v2320_v15, 0.0 }
 0x370   : > { %v2448_v10 = vpack.c.bf16 %v2408_v28, %v2406_v29 }
 0x371   : > { %v2449_v23 = vpack.c.bf16 %v2409_v59, %v2407_v58  ;;  %v2323_v45 = vpop.f32.mrb[176].mxu0 }
 0x372   : > { %v2324_v46 = vadd.f32 %v2323_v45, %v5516_v12  ;;  %v2325_v26 = vpop.f32.mrb[177].mxu0 }
 0x373   : > { %v2326_v7 = vadd.f32 %v2325_v26, %v5521_v39  ;;  %v2327_v6 = vpop.f32.mrb[178].mxu0  ;;  %2706 = vmatprep.mubr.bf16.mxu1 %v2449_v23 }
 0x374   : > { %v2328_v36 = vadd.f32 %v2327_v6, %v5516_v12  ;;  %v2329_v20 = vpop.f32.mrb[179].mxu0  ;;  %2707 = vmatmul.mubr.bf16.gmra.mrb[172].mxu1 %v2448_v10  ;;  %v2410_v52 = vmax.f32 %v2324_v46, 0.0 }
 0x375   : > { %v2330_v53 = vadd.f32 %v2329_v20, %v5521_v39  ;;  %v2411_v33 = vmax.f32 %v2326_v7, 0.0 }
 0x376   : > { %v2412_v1 = vmax.f32 %v2328_v36, 0.0 }
 0x377   : > { %v2413_v3 = vmax.f32 %v2330_v53, 0.0 }
 0x378   : > { %v2450_v56 = vpack.c.bf16 %v2412_v1, %v2410_v52 }
 0x379   : > { %v2451_v44 = vpack.c.bf16 %v2413_v3, %v2411_v33  ;;  %v2333_v37 = vpop.f32.mrb[180].mxu0 }
 0x37a   : > { %v2334_v0 = vadd.f32 %v2333_v37, %v5516_v12  ;;  %v2335_v11 = vpop.f32.mrb[181].mxu0 }
 0x37b   : > { %v2336_v17 = vadd.f32 %v2335_v11, %v5521_v39  ;;  %v2337_v25 = vpop.f32.mrb[182].mxu0  ;;  %2714 = vmatprep.mubr.bf16.mxu1 %v2451_v44 }
 0x37c   : > { %v2338_v49 = vadd.f32 %v2337_v25, %v5516_v12  ;;  %v2339_v57 = vpop.f32.mrb[183].mxu0  ;;  %2715 = vmatmul.mubr.bf16.gmra.mrb[176].mxu1 %v2450_v56  ;;  %v2414_v29 = vmax.f32 %v2334_v0, 0.0 }
 0x37d   : > { %v2340_v15 = vadd.f32 %v2339_v57, %v5521_v39  ;;  %v2415_v58 = vmax.f32 %v2336_v17, 0.0 }
 0x37e   : > { %v2416_v28 = vmax.f32 %v2338_v49, 0.0  ;;  %v2811_v49 = vld [vmem:[#allocation7 + $0x6] sm:$0x3] }
 0x37f   : > { %v2417_v59 = vmax.f32 %v2340_v15, 0.0 }
 0x380   : > { %v2452_v10 = vpack.c.bf16 %v2416_v28, %v2414_v29 }
 0x381   : > { %v2453_v23 = vpack.c.bf16 %v2417_v59, %v2415_v58  ;;  %v2343_v45 = vpop.f32.mrb[184].mxu0  ;;  %v5598_v59 = vrot.slane %v2811_v49, %v5989_v30 }
 0x382   : > { %v2344_v46 = vadd.f32 %v2343_v45, %v5516_v12  ;;  %v2345_v26 = vpop.f32.mrb[185].mxu0  ;;  %v5601_v45 = vrot.slane %v2811_v49, %v5990_v61 }
 0x383   : > { %v2346_v7 = vadd.f32 %v2345_v26, %v5521_v39  ;;  %v2347_v6 = vpop.f32.mrb[186].mxu0  ;;  %2722 = vmatprep.mubr.bf16.mxu1 %v2453_v23 }
 0x384   : > { %v2348_v36 = vadd.f32 %v2347_v6, %v5516_v12  ;;  %v2349_v20 = vpop.f32.mrb[187].mxu0  ;;  %2723 = vmatmul.mubr.bf16.gmra.mrb[180].mxu1 %v2452_v10  ;;  %v2418_v52 = vmax.f32 %v2344_v46, 0.0 }
 0x385   : > { %v2350_v53 = vadd.f32 %v2349_v20, %v5521_v39  ;;  %v2419_v33 = vmax.f32 %v2346_v7, 0.0 }
 0x386   : > { %v2420_v1 = vmax.f32 %v2348_v36, 0.0 }
 0x387   : > { %v2421_v3 = vmax.f32 %v2350_v53, 0.0 }
 0x388   : > { %v2454_v56 = vpack.c.bf16 %v2420_v1, %v2418_v52 }
 0x389   : > { %v2455_v44 = vpack.c.bf16 %v2421_v3, %v2419_v33  ;;  %v2353_v37 = vpop.f32.mrb[188].mxu0 }
 0x38a   : > { %v2354_v0 = vadd.f32 %v2353_v37, %v5516_v12  ;;  %v2355_v11 = vpop.f32.mrb[189].mxu0 }
 0x38b   : > { %v2356_v17 = vadd.f32 %v2355_v11, %v5521_v39  ;;  %v2357_v25 = vpop.f32.mrb[190].mxu0  ;;  %2730 = vmatprep.mubr.bf16.mxu1 %v2455_v44 }
 0x38c   : > { %v2358_v57 = vadd.f32 %v2357_v25, %v5516_v12  ;;  %v2359_v15 = vpop.f32.mrb[191].mxu0  ;;  %2731 = vmatmul.mubr.bf16.gmra.mrb[184].mxu1 %v2454_v56  ;;  %v2422_v28 = vmax.f32 %v2354_v0, 0.0 }
 0x38d   : > { %v2360_v29 = vadd.f32 %v2359_v15, %v5521_v39  ;;  %v2423_v10 = vmax.f32 %v2356_v17, 0.0 }
 0x38e   : > { %v2424_v58 = vmax.f32 %v2358_v57, 0.0 }
 0x38f   : > { %v2425_v23 = vmax.f32 %v2360_v29, 0.0 }
 0x390   : > { %v2456_v46 = vpack.c.bf16 %v2424_v58, %v2422_v28 }
 0x391   : > { %v2457_v26 = vpack.c.bf16 %v2425_v23, %v2423_v10  ;;  %v3017_v7 = vpop.f32.mrb[192].mxu0 }
 0x392   : > { %v3018_v6 = vadd.f32 %v3017_v7, %v5598_v59  ;;  %v3019_v12 = vpop.f32.mrb[193].mxu0 }
 0x393   : > { %v3020_v36 = vadd.f32 %v3019_v12, %v5601_v45  ;;  %2738 = vmatprep.mubr.bf16.mxu1 %v2457_v26  ;;  %v3021_v39 = vpop.f32.mrb[194].mxu0 }
 0x394   : > { %v3022_v20 = vadd.f32 %v3021_v39, %v5598_v59  ;;  %2739 = vmatmul.mubr.bf16.gmra.mrb[188].mxu1 %v2456_v46  ;;  %v3023_v30 = vpop.f32.mrb[195].mxu0  ;;  %v3176_v52 = vmax.f32 %v3018_v6, 0.0 }
 0x395   : > { %v3024_v53 = vadd.f32 %v3023_v30, %v5601_v45  ;;  %v3177_v61 = vmax.f32 %v3020_v36, 0.0 }
 0x396   : > { %v3178_v1 = vmax.f32 %v3022_v20, 0.0 }
 0x397   : > { %v3179_v33 = vmax.f32 %v3024_v53, 0.0 }
 0x398   : > { %v3240_v3 = vpack.c.bf16 %v3178_v1, %v3176_v52 }
 0x399   : > { %v3241_v56 = vpack.c.bf16 %v3179_v33, %v3177_v61  ;;  %v3027_v44 = vpop.f32.mrb[196].mxu0 }
 0x39a   : > { %v3028_v37 = vadd.f32 %v3027_v44, %v5598_v59  ;;  %v3029_v0 = vpop.f32.mrb[197].mxu0 }
 0x39b   : > { %v3030_v11 = vadd.f32 %v3029_v0, %v5601_v45  ;;  %v3031_v17 = vpop.f32.mrb[198].mxu0  ;;  %3432 = vmatprep.mubr.bf16.mxu1 %v3241_v56 }
 0x39c   : > { %v3032_v25 = vadd.f32 %v3031_v17, %v5598_v59  ;;  %v3033_v49 = vpop.f32.mrb[199].mxu0  ;;  %3433 = vmatmul.mubr.bf16.vlgmr.msra.gmra.mrb[192].mxu1 %v3240_v3  ;;  %v3180_v15 = vmax.f32 %v3028_v37, 0.0 }
 0x39d   : > { %v3034_v57 = vadd.f32 %v3033_v49, %v5601_v45  ;;  %v3181_v28 = vmax.f32 %v3030_v11, 0.0 }
 0x39e   : > { %v3182_v29 = vmax.f32 %v3032_v25, 0.0 }
 0x39f   : > { %v3183_v58 = vmax.f32 %v3034_v57, 0.0 }
 0x3a0   : > { %v3242_v10 = vpack.c.bf16 %v3182_v29, %v3180_v15 }
 0x3a1   : > { %v3243_v23 = vpack.c.bf16 %v3183_v58, %v3181_v28  ;;  %v3037_v46 = vpop.f32.mrb[200].mxu0 }
 0x3a2   : > { %v3038_v26 = vadd.f32 %v3037_v46, %v5598_v59  ;;  %v3039_v7 = vpop.f32.mrb[201].mxu0 }
 0x3a3   : > { %v3040_v6 = vadd.f32 %v3039_v7, %v5601_v45  ;;  %v3041_v12 = vpop.f32.mrb[202].mxu0  ;;  %3440 = vmatprep.mubr.bf16.mxu1 %v3243_v23 }
 0x3a4   : > { %v3042_v36 = vadd.f32 %v3041_v12, %v5598_v59  ;;  %v3043_v39 = vpop.f32.mrb[203].mxu0  ;;  %3441 = vmatmul.mubr.bf16.gmra.mrb[196].mxu1 %v3242_v10  ;;  %v3184_v30 = vmax.f32 %v3038_v26, 0.0 }
 0x3a5   : > { %v3044_v20 = vadd.f32 %v3043_v39, %v5601_v45  ;;  %v3185_v52 = vmax.f32 %v3040_v6, 0.0 }
 0x3a6   : > { %v3186_v53 = vmax.f32 %v3042_v36, 0.0 }
 0x3a7   : > { %v3187_v1 = vmax.f32 %v3044_v20, 0.0 }
 0x3a8   : > { %v3244_v61 = vpack.c.bf16 %v3186_v53, %v3184_v30 }
 0x3a9   : > { %v3245_v33 = vpack.c.bf16 %v3187_v1, %v3185_v52  ;;  %v3047_v3 = vpop.f32.mrb[204].mxu0 }
 0x3aa   : > { %v3048_v56 = vadd.f32 %v3047_v3, %v5598_v59  ;;  %v3049_v44 = vpop.f32.mrb[205].mxu0 }
 0x3ab   : > { %v3050_v37 = vadd.f32 %v3049_v44, %v5601_v45  ;;  %v3051_v0 = vpop.f32.mrb[206].mxu0  ;;  %3448 = vmatprep.mubr.bf16.mxu1 %v3245_v33 }
 0x3ac   : > { %v3052_v11 = vadd.f32 %v3051_v0, %v5598_v59  ;;  %v3053_v17 = vpop.f32.mrb[207].mxu0  ;;  %3449 = vmatmul.mubr.bf16.gmra.mrb[200].mxu1 %v3244_v61  ;;  %v3188_v49 = vmax.f32 %v3048_v56, 0.0 }
 0x3ad   : > { %v3054_v25 = vadd.f32 %v3053_v17, %v5601_v45  ;;  %v3189_v15 = vmax.f32 %v3050_v37, 0.0 }
 0x3ae   : > { %v3190_v57 = vmax.f32 %v3052_v11, 0.0 }
 0x3af   : > { %v3191_v29 = vmax.f32 %v3054_v25, 0.0 }
 0x3b0   : > { %v3246_v28 = vpack.c.bf16 %v3190_v57, %v3188_v49 }
 0x3b1   : > { %v3247_v58 = vpack.c.bf16 %v3191_v29, %v3189_v15  ;;  %v3057_v10 = vpop.f32.mrb[208].mxu0 }
 0x3b2   : > { %v3058_v23 = vadd.f32 %v3057_v10, %v5598_v59  ;;  %v3059_v46 = vpop.f32.mrb[209].mxu0 }
 0x3b3   : > { %v3060_v26 = vadd.f32 %v3059_v46, %v5601_v45  ;;  %v3061_v7 = vpop.f32.mrb[210].mxu0  ;;  %3456 = vmatprep.mubr.bf16.mxu1 %v3247_v58 }
 0x3b4   : > { %v3062_v6 = vadd.f32 %v3061_v7, %v5598_v59  ;;  %v3063_v12 = vpop.f32.mrb[211].mxu0  ;;  %3457 = vmatmul.mubr.bf16.gmra.mrb[204].mxu1 %v3246_v28  ;;  %v3192_v39 = vmax.f32 %v3058_v23, 0.0 }
 0x3b5   : > { %v3064_v36 = vadd.f32 %v3063_v12, %v5601_v45  ;;  %v3193_v30 = vmax.f32 %v3060_v26, 0.0 }
 0x3b6   : > { %v3194_v20 = vmax.f32 %v3062_v6, 0.0 }
 0x3b7   : > { %v3195_v53 = vmax.f32 %v3064_v36, 0.0 }
 0x3b8   : > { %v3248_v52 = vpack.c.bf16 %v3194_v20, %v3192_v39 }
 0x3b9   : > { %v3249_v1 = vpack.c.bf16 %v3195_v53, %v3193_v30  ;;  %v3067_v61 = vpop.f32.mrb[212].mxu0 }
 0x3ba   : > { %v3068_v33 = vadd.f32 %v3067_v61, %v5598_v59  ;;  %v3069_v3 = vpop.f32.mrb[213].mxu0 }
 0x3bb   : > { %v3070_v56 = vadd.f32 %v3069_v3, %v5601_v45  ;;  %v3071_v44 = vpop.f32.mrb[214].mxu0  ;;  %3464 = vmatprep.mubr.bf16.mxu1 %v3249_v1 }
 0x3bc   : > { %v3072_v37 = vadd.f32 %v3071_v44, %v5598_v59  ;;  %v3073_v0 = vpop.f32.mrb[215].mxu0  ;;  %3465 = vmatmul.mubr.bf16.gmra.mrb[208].mxu1 %v3248_v52  ;;  %v3196_v17 = vmax.f32 %v3068_v33, 0.0 }
 0x3bd   : > { %v3074_v11 = vadd.f32 %v3073_v0, %v5601_v45  ;;  %v3197_v49 = vmax.f32 %v3070_v56, 0.0 }
 0x3be   : > { %v3198_v25 = vmax.f32 %v3072_v37, 0.0 }
 0x3bf   : > { %v3199_v57 = vmax.f32 %v3074_v11, 0.0 }
 0x3c0   : > { %v3250_v15 = vpack.c.bf16 %v3198_v25, %v3196_v17 }
 0x3c1   : > { %v3251_v29 = vpack.c.bf16 %v3199_v57, %v3197_v49  ;;  %v3077_v28 = vpop.f32.mrb[216].mxu0 }
 0x3c2   : > { %v3078_v58 = vadd.f32 %v3077_v28, %v5598_v59  ;;  %v3079_v10 = vpop.f32.mrb[217].mxu0 }
 0x3c3   : > { %v3080_v23 = vadd.f32 %v3079_v10, %v5601_v45  ;;  %v3081_v46 = vpop.f32.mrb[218].mxu0  ;;  %3472 = vmatprep.mubr.bf16.mxu1 %v3251_v29 }
 0x3c4   : > { %v3082_v26 = vadd.f32 %v3081_v46, %v5598_v59  ;;  %v3083_v7 = vpop.f32.mrb[219].mxu0  ;;  %3473 = vmatmul.mubr.bf16.gmra.mrb[212].mxu1 %v3250_v15  ;;  %v3200_v12 = vmax.f32 %v3078_v58, 0.0 }
 0x3c5   : > { %v3084_v6 = vadd.f32 %v3083_v7, %v5601_v45  ;;  %v3201_v39 = vmax.f32 %v3080_v23, 0.0 }
 0x3c6   : > { %v3202_v36 = vmax.f32 %v3082_v26, 0.0 }
 0x3c7   : > { %v3203_v20 = vmax.f32 %v3084_v6, 0.0 }
 0x3c8   : > { %v3252_v30 = vpack.c.bf16 %v3202_v36, %v3200_v12 }
 0x3c9   : > { %v3253_v53 = vpack.c.bf16 %v3203_v20, %v3201_v39  ;;  %v3087_v52 = vpop.f32.mrb[220].mxu0 }
 0x3ca   : > { %v3088_v1 = vadd.f32 %v3087_v52, %v5598_v59  ;;  %v3089_v61 = vpop.f32.mrb[221].mxu0 }
 0x3cb   : > { %v3090_v33 = vadd.f32 %v3089_v61, %v5601_v45  ;;  %v3091_v3 = vpop.f32.mrb[222].mxu0  ;;  %3480 = vmatprep.mubr.bf16.mxu1 %v3253_v53 }
 0x3cc   : > { %v3092_v56 = vadd.f32 %v3091_v3, %v5598_v59  ;;  %v3093_v44 = vpop.f32.mrb[223].mxu0  ;;  %3481 = vmatmul.mubr.bf16.gmra.mrb[216].mxu1 %v3252_v30  ;;  %v3204_v0 = vmax.f32 %v3088_v1, 0.0 }
 0x3cd   : > { %v3094_v37 = vadd.f32 %v3093_v44, %v5601_v45  ;;  %v3205_v17 = vmax.f32 %v3090_v33, 0.0 }
 0x3ce   : > { %v3206_v11 = vmax.f32 %v3092_v56, 0.0 }
 0x3cf   : > { %v3207_v25 = vmax.f32 %v3094_v37, 0.0 }
 0x3d0   : > { %v3254_v49 = vpack.c.bf16 %v3206_v11, %v3204_v0 }
 0x3d1   : > { %v3255_v57 = vpack.c.bf16 %v3207_v25, %v3205_v17  ;;  %v3097_v15 = vpop.f32.mrb[224].mxu0 }
 0x3d2   : > { %v3098_v29 = vadd.f32 %v3097_v15, %v5598_v59  ;;  %v3099_v28 = vpop.f32.mrb[225].mxu0 }
 0x3d3   : > { %v3100_v58 = vadd.f32 %v3099_v28, %v5601_v45  ;;  %v3101_v10 = vpop.f32.mrb[226].mxu0  ;;  %3488 = vmatprep.mubr.bf16.mxu1 %v3255_v57 }
 0x3d4   : > { %v3102_v23 = vadd.f32 %v3101_v10, %v5598_v59  ;;  %v3103_v46 = vpop.f32.mrb[227].mxu0  ;;  %3489 = vmatmul.mubr.bf16.gmra.mrb[220].mxu1 %v3254_v49  ;;  %v3208_v7 = vmax.f32 %v3098_v29, 0.0 }
 0x3d5   : > { %v3104_v26 = vadd.f32 %v3103_v46, %v5601_v45  ;;  %v3209_v12 = vmax.f32 %v3100_v58, 0.0 }
 0x3d6   : > { %v3210_v6 = vmax.f32 %v3102_v23, 0.0 }
 0x3d7   : > { %v3211_v36 = vmax.f32 %v3104_v26, 0.0 }
 0x3d8   : > { %v3256_v39 = vpack.c.bf16 %v3210_v6, %v3208_v7 }
 0x3d9   : > { %v3257_v20 = vpack.c.bf16 %v3211_v36, %v3209_v12  ;;  %v3107_v30 = vpop.f32.mrb[228].mxu0 }
 0x3da   : > { %v3108_v53 = vadd.f32 %v3107_v30, %v5598_v59  ;;  %v3109_v52 = vpop.f32.mrb[229].mxu0 }
 0x3db   : > { %v3110_v1 = vadd.f32 %v3109_v52, %v5601_v45  ;;  %v3111_v61 = vpop.f32.mrb[230].mxu0  ;;  %3496 = vmatprep.mubr.bf16.mxu1 %v3257_v20 }
 0x3dc   : > { %v3112_v33 = vadd.f32 %v3111_v61, %v5598_v59  ;;  %v3113_v3 = vpop.f32.mrb[231].mxu0  ;;  %3497 = vmatmul.mubr.bf16.gmra.mrb[224].mxu1 %v3256_v39  ;;  %v3212_v44 = vmax.f32 %v3108_v53, 0.0 }
 0x3dd   : > { %v3114_v56 = vadd.f32 %v3113_v3, %v5601_v45  ;;  %v3213_v0 = vmax.f32 %v3110_v1, 0.0 }
 0x3de   : > { %v3214_v37 = vmax.f32 %v3112_v33, 0.0 }
 0x3df   : > { %v3215_v11 = vmax.f32 %v3114_v56, 0.0 }
 0x3e0   : > { %v3258_v17 = vpack.c.bf16 %v3214_v37, %v3212_v44 }
 0x3e1   : > { %v3259_v25 = vpack.c.bf16 %v3215_v11, %v3213_v0  ;;  %v3117_v49 = vpop.f32.mrb[232].mxu0 }
 0x3e2   : > { %v3118_v57 = vadd.f32 %v3117_v49, %v5598_v59  ;;  %v3119_v15 = vpop.f32.mrb[233].mxu0 }
 0x3e3   : > { %v3120_v29 = vadd.f32 %v3119_v15, %v5601_v45  ;;  %v3121_v28 = vpop.f32.mrb[234].mxu0  ;;  %3504 = vmatprep.mubr.bf16.mxu1 %v3259_v25 }
 0x3e4   : > { %v3122_v58 = vadd.f32 %v3121_v28, %v5598_v59  ;;  %v3123_v10 = vpop.f32.mrb[235].mxu0  ;;  %3505 = vmatmul.mubr.bf16.gmra.mrb[228].mxu1 %v3258_v17  ;;  %v3216_v46 = vmax.f32 %v3118_v57, 0.0 }
 0x3e5   : > { %v3124_v23 = vadd.f32 %v3123_v10, %v5601_v45  ;;  %v3217_v7 = vmax.f32 %v3120_v29, 0.0 }
 0x3e6   : > { %v3218_v26 = vmax.f32 %v3122_v58, 0.0 }
 0x3e7   : > { %v3219_v6 = vmax.f32 %v3124_v23, 0.0 }
 0x3e8   : > { %v3260_v12 = vpack.c.bf16 %v3218_v26, %v3216_v46 }
 0x3e9   : > { %v3261_v36 = vpack.c.bf16 %v3219_v6, %v3217_v7  ;;  %v3127_v39 = vpop.f32.mrb[236].mxu0 }
 0x3ea   : > { %v3128_v20 = vadd.f32 %v3127_v39, %v5598_v59  ;;  %v3129_v30 = vpop.f32.mrb[237].mxu0 }
 0x3eb   : > { %v3130_v53 = vadd.f32 %v3129_v30, %v5601_v45  ;;  %v3131_v52 = vpop.f32.mrb[238].mxu0  ;;  %3512 = vmatprep.mubr.bf16.mxu1 %v3261_v36 }
 0x3ec   : > { %v3132_v1 = vadd.f32 %v3131_v52, %v5598_v59  ;;  %v3133_v61 = vpop.f32.mrb[239].mxu0  ;;  %3513 = vmatmul.mubr.bf16.gmra.mrb[232].mxu1 %v3260_v12  ;;  %v3220_v3 = vmax.f32 %v3128_v20, 0.0 }
 0x3ed   : > { %v3134_v33 = vadd.f32 %v3133_v61, %v5601_v45  ;;  %v3221_v44 = vmax.f32 %v3130_v53, 0.0 }
 0x3ee   : > { %v3222_v56 = vmax.f32 %v3132_v1, 0.0 }
 0x3ef   : > { %v3223_v37 = vmax.f32 %v3134_v33, 0.0  ;;  %v4253_v0 = vpop.f32.mrb[128].mxu1 }
 0x3f0   : > { %v3262_v11 = vpack.c.bf16 %v3222_v56, %v3220_v3  ;;  %v4254_v17 = vpop.f32.mrb[129].mxu1 }
 0x3f1   : > { %v3263_v25 = vpack.c.bf16 %v3223_v37, %v3221_v44  ;;  %v4255_v49 = vadd.f32 %v4254_v17, %v4253_v0  ;;  %v4256_v57 = vpop.f32.mrb[130].mxu1  ;;  %v3137_v15 = vpop.f32.mrb[240].mxu0 }
 0x3f2   : > { %v3138_v29 = vadd.f32 %v3137_v15, %v5598_v59  ;;  %v4257_v28 = vpop.f32.mrb[131].mxu1  ;;  %v3139_v58 = vpop.f32.mrb[241].mxu0 }
 0x3f3   : > { %v5653_v10 = vadd.f32 %v4255_v49, %v5422_v19  ;;  %v4258_v23 = vadd.f32 %v4257_v28, %v4256_v57  ;;  %v3140_v46 = vadd.f32 %v3139_v58, %v5601_v45  ;;  %v3141_v26 = vpop.f32.mrb[242].mxu0  ;;  %3520 = vmatprep.mubr.bf16.mxu1 %v3263_v25 }
 0x3f4   : > { %v3142_v7 = vadd.f32 %v3141_v26, %v5598_v59  ;;  %v3143_v6 = vpop.f32.mrb[243].mxu0  ;;  %3521 = vmatmul.mubr.bf16.gmra.mrb[236].mxu1 %v3262_v11  ;;  %v3224_v39 = vmax.f32 %v3138_v29, 0.0 }
 0x3f5   : > { %v5658_v12 = vadd.f32 %v4258_v23, %v5425_v5  ;;  %v3144_v36 = vadd.f32 %v3143_v6, %v5601_v45  ;;  %v3225_v30 = vmax.f32 %v3140_v46, 0.0 }
 0x3f6   : > { %v3226_v20 = vmax.f32 %v3142_v7, 0.0 }
 0x3f7   : > { %v3227_v53 = vmax.f32 %v3144_v36, 0.0  ;;  %v4259_v19 = vpop.f32.mrb[132].mxu1 }
 0x3f8   : > { %v3264_v52 = vpack.c.bf16 %v3226_v20, %v3224_v39  ;;  %v4260_v1 = vpop.f32.mrb[133].mxu1 }
 0x3f9   : > { %v3265_v61 = vpack.c.bf16 %v3227_v53, %v3225_v30  ;;  %v4261_v33 = vadd.f32 %v4260_v1, %v4259_v19  ;;  %v4262_v3 = vpop.f32.mrb[134].mxu1  ;;  %v3147_v56 = vpop.f32.mrb[244].mxu0 }
 0x3fa   : > { %v3148_v44 = vadd.f32 %v3147_v56, %v5598_v59  ;;  %v4263_v37 = vpop.f32.mrb[135].mxu1  ;;  %v3149_v0 = vpop.f32.mrb[245].mxu0 }
 0x3fb   : > { %v5663_v5 = vadd.f32 %v4261_v33, %v5428_v63  ;;  %v4264_v11 = vadd.f32 %v4263_v37, %v4262_v3  ;;  %v3150_v17 = vadd.f32 %v3149_v0, %v5601_v45  ;;  %v3151_v25 = vpop.f32.mrb[246].mxu0  ;;  %3528 = vmatprep.mubr.bf16.mxu1 %v3265_v61 }
 0x3fc   : > { %v3152_v49 = vadd.f32 %v3151_v25, %v5598_v59  ;;  %v3153_v57 = vpop.f32.mrb[247].mxu0  ;;  %3529 = vmatmul.mubr.bf16.gmra.mrb[240].mxu1 %v3264_v52  ;;  %v3228_v28 = vmax.f32 %v3148_v44, 0.0 }
 0x3fd   : > { %v5668_v15 = vadd.f32 %v4264_v11, %v5431_v35  ;;  %v3154_v29 = vadd.f32 %v3153_v57, %v5601_v45  ;;  %v3229_v23 = vmax.f32 %v3150_v17, 0.0 }
 0x3fe   : > { %v3230_v58 = vmax.f32 %v3152_v49, 0.0 }
 0x3ff   : > { %v3231_v46 = vmax.f32 %v3154_v29, 0.0  ;;  %v4265_v63 = vpop.f32.mrb[136].mxu1 }
 0x400   : > { %v3266_v26 = vpack.c.bf16 %v3230_v58, %v3228_v28  ;;  %v4266_v7 = vpop.f32.mrb[137].mxu1 }
 0x401   : > { %v3267_v6 = vpack.c.bf16 %v3231_v46, %v3229_v23  ;;  %v4267_v36 = vadd.f32 %v4266_v7, %v4265_v63  ;;  %v4268_v39 = vpop.f32.mrb[138].mxu1  ;;  %v3157_v20 = vpop.f32.mrb[248].mxu0 }
 0x402   : > { %v3158_v30 = vadd.f32 %v3157_v20, %v5598_v59  ;;  %v4269_v53 = vpop.f32.mrb[139].mxu1  ;;  %v3159_v19 = vpop.f32.mrb[249].mxu0 }
 0x403   : > { %v5673_v35 = vadd.f32 %v4267_v36, %v5434_v42  ;;  %v4270_v52 = vadd.f32 %v4269_v53, %v4268_v39  ;;  %v3160_v1 = vadd.f32 %v3159_v19, %v5601_v45  ;;  %v3161_v61 = vpop.f32.mrb[250].mxu0  ;;  %3536 = vmatprep.mubr.bf16.mxu1 %v3267_v6 }
 0x404   : > { %v3162_v33 = vadd.f32 %v3161_v61, %v5598_v59  ;;  %v3163_v3 = vpop.f32.mrb[251].mxu0  ;;  %3537 = vmatmul.mubr.bf16.gmra.mrb[244].mxu1 %v3266_v26  ;;  %v3232_v37 = vmax.f32 %v3158_v30, 0.0 }
 0x405   : > { %v5678_v56 = vadd.f32 %v4270_v52, %v5437_v21  ;;  %v3164_v44 = vadd.f32 %v3163_v3, %v5601_v45  ;;  %v3233_v11 = vmax.f32 %v3160_v1, 0.0 }
 0x406   : > { %v3234_v0 = vmax.f32 %v3162_v33, 0.0 }
 0x407   : > { %v3235_v17 = vmax.f32 %v3164_v44, 0.0  ;;  %v4271_v42 = vpop.f32.mrb[140].mxu1 }
 0x408   : > { %v3268_v25 = vpack.c.bf16 %v3234_v0, %v3232_v37  ;;  %v4272_v49 = vpop.f32.mrb[141].mxu1 }
 0x409   : > { %v3269_v57 = vpack.c.bf16 %v3235_v17, %v3233_v11  ;;  %v4273_v29 = vadd.f32 %v4272_v49, %v4271_v42  ;;  %v4274_v28 = vpop.f32.mrb[142].mxu1  ;;  %v3167_v58 = vpop.f32.mrb[252].mxu0 }
 0x40a   : > { %v3168_v23 = vadd.f32 %v3167_v58, %v5598_v59  ;;  %v4275_v46 = vpop.f32.mrb[143].mxu1  ;;  %v3169_v63 = vpop.f32.mrb[253].mxu0 }
 0x40b   : > { %v5683_v21 = vadd.f32 %v4273_v29, %v5440_v13  ;;  %v4276_v26 = vadd.f32 %v4275_v46, %v4274_v28  ;;  %v3170_v7 = vadd.f32 %v3169_v63, %v5601_v45  ;;  %v3171_v6 = vpop.f32.mrb[254].mxu0  ;;  %3544 = vmatprep.mubr.bf16.mxu1 %v3269_v57 }
 0x40c   : > { %v3172_v36 = vadd.f32 %v3171_v6, %v5598_v59  ;;  %v3173_v39 = vpop.f32.mrb[255].mxu0  ;;  %3545 = vmatmul.mubr.bf16.gmra.mrb[248].mxu1 %v3268_v25  ;;  %v3236_v53 = vmax.f32 %v3168_v23, 0.0 }
 0x40d   : > { %v5688_v20 = vadd.f32 %v4276_v26, %v5443_v47  ;;  %v3174_v30 = vadd.f32 %v3173_v39, %v5601_v45  ;;  %v3237_v52 = vmax.f32 %v3170_v7, 0.0 }
 0x40e   : > { %v3238_v19 = vmax.f32 %v3172_v36, 0.0 }
 0x40f   : > { %v3239_v1 = vmax.f32 %v3174_v30, 0.0  ;;  %v4277_v13 = vpop.f32.mrb[144].mxu1 }
 0x410   : > { %v3270_v61 = vpack.c.bf16 %v3238_v19, %v3236_v53  ;;  %v4278_v33 = vpop.f32.mrb[145].mxu1 }
 0x411   : > { %v3271_v3 = vpack.c.bf16 %v3239_v1, %v3237_v52  ;;  %v4279_v44 = vadd.f32 %v4278_v33, %v4277_v13  ;;  %v4280_v37 = vpop.f32.mrb[146].mxu1 }
 0x412   : > { %v4281_v0 = vpop.f32.mrb[147].mxu1 }
 0x413   : > { %v5692_v59 = vadd.f32 %v4279_v44, %v5446_v14  ;;  %v4282_v11 = vadd.f32 %v4281_v0, %v4280_v37  ;;  %3552 = vmatprep.mubr.bf16.mxu1 %v3271_v3 }
 0x414   : > { %3553 = vmatmul.mubr.bf16.gmra.mrb[252].mxu1 %v3270_v61 }
 0x415   : > { %v5695_v47 = vadd.f32 %v4282_v11, %v5449_v48 }
 0x417   : > { %v4283_v45 = vpop.f32.mrb[148].mxu1 }
 0x418   : > { %v4284_v17 = vpop.f32.mrb[149].mxu1 }
 0x419   : > { %v4285_v42 = vadd.f32 %v4284_v17, %v4283_v45  ;;  %v4286_v25 = vpop.f32.mrb[150].mxu1 }
 0x41a   : > { %v4287_v49 = vpop.f32.mrb[151].mxu1 }
 0x41b   : > { %v5698_v57 = vadd.f32 %v4285_v42, %v5452_v54  ;;  %v4288_v29 = vadd.f32 %v4287_v49, %v4286_v25 }
 0x41d   : > { %v5701_v28 = vadd.f32 %v4288_v29, %v5455_v34 }
 0x41f   : > { %v4289_v14 = vpop.f32.mrb[152].mxu1 }
 0x420   : > { %v4290_v58 = vpop.f32.mrb[153].mxu1 }
 0x421   : > { %v4291_v23 = vadd.f32 %v4290_v58, %v4289_v14  ;;  %v4292_v46 = vpop.f32.mrb[154].mxu1 }
 0x422   : > { %v4293_v63 = vpop.f32.mrb[155].mxu1 }
 0x423   : > { %v5704_v48 = vadd.f32 %v4291_v23, %v5458_v27  ;;  %v4294_v26 = vadd.f32 %v4293_v63, %v4292_v46 }
 0x425   : > { %v5707_v7 = vadd.f32 %v4294_v26, %v5461_v9 }
 0x427   : > { %v4295_v6 = vpop.f32.mrb[156].mxu1 }
 0x428   : > { %v4296_v36 = vpop.f32.mrb[157].mxu1 }
 0x429   : > { %v4297_v54 = vadd.f32 %v4296_v36, %v4295_v6  ;;  %v4298_v39 = vpop.f32.mrb[158].mxu1 }
 0x42a   : > { %v4299_v30 = vpop.f32.mrb[159].mxu1 }
 0x42b   : > { %v5710_v34 = vadd.f32 %v4297_v54, %v5464_v41  ;;  %v4300_v53 = vadd.f32 %v4299_v30, %v4298_v39 }
 0x42d   : > { %v5713_v19 = vadd.f32 %v4300_v53, %v5467_v24 }
 0x42f   : > { %v4301_v52 = vpop.f32.mrb[160].mxu1 }
 0x430   : > { %v4302_v1 = vpop.f32.mrb[161].mxu1 }
 0x431   : > { %v4303_v27 = vadd.f32 %v4302_v1, %v4301_v52  ;;  %v4304_v13 = vpop.f32.mrb[162].mxu1 }
 0x432   : > { %v4305_v61 = vpop.f32.mrb[163].mxu1 }
 0x433   : > { %v5716_v9 = vadd.f32 %v4303_v27, %v5470_v18  ;;  %v4306_v33 = vadd.f32 %v4305_v61, %v4304_v13 }
 0x435   : > { %v5719_v3 = vadd.f32 %v4306_v33, %v5473_v38 }
 0x437   : > { %v4307_v44 = vpop.f32.mrb[164].mxu1 }
 0x438   : > { %v4308_v37 = vpop.f32.mrb[165].mxu1 }
 0x439   : > { %v4309_v41 = vadd.f32 %v4308_v37, %v4307_v44  ;;  %v4310_v0 = vpop.f32.mrb[166].mxu1 }
 0x43a   : > { %v4311_v11 = vpop.f32.mrb[167].mxu1 }
 0x43b   : > { %v5722_v24 = vadd.f32 %v4309_v41, %v5476_v51  ;;  %v4312_v45 = vadd.f32 %v4311_v11, %v4310_v0 }
 0x43d   : > { %v5725_v17 = vadd.f32 %v4312_v45, %v5479_v50 }
 0x43f   : > { %v4313_v42 = vpop.f32.mrb[168].mxu1 }
 0x440   : > { %v4314_v25 = vpop.f32.mrb[169].mxu1 }
 0x441   : > { %v4315_v18 = vadd.f32 %v4314_v25, %v4313_v42  ;;  %v4316_v49 = vpop.f32.mrb[170].mxu1 }
 0x442   : > { %v4317_v29 = vpop.f32.mrb[171].mxu1 }
 0x443   : > { %v5728_v38 = vadd.f32 %v4315_v18, %v5482_v32  ;;  %v4318_v14 = vadd.f32 %v4317_v29, %v4316_v49 }
 0x445   : > { %v5731_v58 = vadd.f32 %v4318_v14, %v5485_v60 }
 0x447   : > { %v4319_v23 = vpop.f32.mrb[172].mxu1 }
 0x448   : > { %v4320_v46 = vpop.f32.mrb[173].mxu1 }
 0x449   : > { %v4321_v51 = vadd.f32 %v4320_v46, %v4319_v23  ;;  %v4322_v63 = vpop.f32.mrb[174].mxu1 }
 0x44a   : > { %v4323_v26 = vpop.f32.mrb[175].mxu1 }
 0x44b   : > { %v5734_v50 = vadd.f32 %v4321_v51, %v5488_v43  ;;  %v4324_v6 = vadd.f32 %v4323_v26, %v4322_v63 }
 0x44d   : > { %v5737_v36 = vadd.f32 %v4324_v6, %v5491_v2 }
 0x44f   : > { %v4325_v54 = vpop.f32.mrb[176].mxu1 }
 0x450   : > { %v4326_v39 = vpop.f32.mrb[177].mxu1 }
 0x451   : > { %v4327_v32 = vadd.f32 %v4326_v39, %v4325_v54  ;;  %v4328_v30 = vpop.f32.mrb[178].mxu1 }
 0x452   : > { %v4329_v53 = vpop.f32.mrb[179].mxu1 }
 0x453   : > { %v5740_v60 = vadd.f32 %v4327_v32, %v5494_v55  ;;  %v4330_v52 = vadd.f32 %v4329_v53, %v4328_v30 }
 0x455   : > { %v5743_v1 = vadd.f32 %v4330_v52, %v5497_v8 }
 0x457   : > { %v4331_v27 = vpop.f32.mrb[180].mxu1 }
 0x458   : > { %v4332_v13 = vpop.f32.mrb[181].mxu1 }
 0x459   : > { %v4333_v43 = vadd.f32 %v4332_v13, %v4331_v27  ;;  %v4334_v61 = vpop.f32.mrb[182].mxu1 }
 0x45a   : > { %v4335_v33 = vpop.f32.mrb[183].mxu1 }
 0x45b   : > { %v5746_v2 = vadd.f32 %v4333_v43, %v5500_v4  ;;  %v4336_v44 = vadd.f32 %v4335_v33, %v4334_v61 }
 0x45d   : > { %v5749_v37 = vadd.f32 %v4336_v44, %v5503_v16 }
 0x45f   : > { %v4337_v41 = vpop.f32.mrb[184].mxu1 }
 0x460   : > { %v4338_v0 = vpop.f32.mrb[185].mxu1 }
 0x461   : > { %v4339_v55 = vadd.f32 %v4338_v0, %v4337_v41  ;;  %v4340_v11 = vpop.f32.mrb[186].mxu1 }
 0x462   : > { %v4341_v45 = vpop.f32.mrb[187].mxu1 }
 0x463   : > { %v5752_v8 = vadd.f32 %v4339_v55, %v5506_v62  ;;  %v4342_v42 = vadd.f32 %v4341_v45, %v4340_v11 }
 0x465   : > { %v5755_v25 = vadd.f32 %v4342_v42, %v5509_v22  ;;  %v5767_v22 = vld [vmem:[%s5934_s4] ss:$0 sm:$0xff] }
 0x467   : > { %v4343_v18 = vpop.f32.mrb[188].mxu1 }
 0x468   : > { %v4344_v4 = vpop.f32.mrb[189].mxu1 }
 0x469   : > { %v4345_v49 = vadd.f32 %v4344_v4, %v4343_v18  ;;  %v4346_v29 = vpop.f32.mrb[190].mxu1 }
 0x46a   : > { %v4347_v14 = vpop.f32.mrb[191].mxu1 }
 0x46b   : > { %v5758_v16 = vadd.f32 %v4345_v49, %v5512_v40  ;;  %v4348_v23 = vadd.f32 %v4347_v14, %v4346_v29 }
 0x46d   : > { %v5761_v46 = vadd.f32 %v4348_v23, %v5518_v31 }
 0x46f   : > { %v4365_v51 = vpop.f32.mrb[192].mxu1 }
 0x470   : > { %v4366_v63 = vpop.f32.mrb[193].mxu1 }
 0x471   : > { %v4367_v62 = vadd.f32 %v4366_v63, %v4365_v51  ;;  %v4368_v26 = vpop.f32.mrb[194].mxu1 }
 0x472   : > { %v4369_v6 = vpop.f32.mrb[195].mxu1 }
 0x473   : > { %v3561_v54 = vadd.f32 %v4367_v62, %v5653_v10  ;;  %v4370_v39 = vadd.f32 %v4369_v6, %v4368_v26 }
 0x475   : > { %v3600_v40 = vadd.f32 %v5767_v22, %v3561_v54  ;;  %v3562_v32 = vadd.f32 %v4370_v39, %v5658_v12 }
 0x477   : > { %3632 = vst [vmem:[%s5772_s17] sm:$0xff] %v3600_v40  ;;  %v3601_v31 = vadd.f32 %v5767_v22, %v3562_v32  ;;  %v4371_v30 = vpop.f32.mrb[196].mxu1 }
 0x478   : > { %v4372_v53 = vpop.f32.mrb[197].mxu1 }
 0x479   : > { %3633 = vst [vmem:[%s5772_s17 + $0x8] sm:$0xff] %v3601_v31  ;;  %v4373_v52 = vadd.f32 %v4372_v53, %v4371_v30  ;;  %v4374_v27 = vpop.f32.mrb[198].mxu1 }
 0x47a   : > { %v4375_v10 = vpop.f32.mrb[199].mxu1 }
 0x47b   : > { %v3563_v13 = vadd.f32 %v4373_v52, %v5663_v5  ;;  %v4376_v43 = vadd.f32 %v4375_v10, %v4374_v27 }
 0x47d   : > { %v3602_v12 = vadd.f32 %v5767_v22, %v3563_v13  ;;  %v3564_v61 = vadd.f32 %v4376_v43, %v5668_v15 }
 0x47f   : > { %3634 = vst [vmem:[%s5772_s17 + $0x10] sm:$0xff] %v3602_v12  ;;  %v3603_v33 = vadd.f32 %v5767_v22, %v3564_v61  ;;  %v4377_v44 = vpop.f32.mrb[200].mxu1 }
 0x480   : > { %v4378_v41 = vpop.f32.mrb[201].mxu1 }
 0x481   : > { %3635 = vst [vmem:[%s5772_s17 + $0x18] sm:$0xff] %v3603_v33  ;;  %v4379_v0 = vadd.f32 %v4378_v41, %v4377_v44  ;;  %v4380_v55 = vpop.f32.mrb[202].mxu1 }
 0x482   : > { %v4381_v11 = vpop.f32.mrb[203].mxu1 }
 0x483   : > { %v3565_v45 = vadd.f32 %v4379_v0, %v5673_v35  ;;  %v4382_v5 = vadd.f32 %v4381_v11, %v4380_v55 }
 0x485   : > { %v3604_v42 = vadd.f32 %v5767_v22, %v3565_v45  ;;  %v3566_v18 = vadd.f32 %v4382_v5, %v5678_v56 }
 0x487   : > { %3636 = vst [vmem:[%s5772_s17 + $0x20] sm:$0xff] %v3604_v42  ;;  %v3605_v15 = vadd.f32 %v5767_v22, %v3566_v18  ;;  %v4383_v4 = vpop.f32.mrb[204].mxu1 }
 0x488   : > { %v4384_v49 = vpop.f32.mrb[205].mxu1 }
 0x489   : > { %3637 = vst [vmem:[%s5772_s17 + $0x28] sm:$0xff] %v3605_v15  ;;  %v4385_v29 = vadd.f32 %v4384_v49, %v4383_v4  ;;  %v4386_v14 = vpop.f32.mrb[206].mxu1 }
 0x48a   : > { %v4387_v23 = vpop.f32.mrb[207].mxu1 }
 0x48b   : > { %v3567_v51 = vadd.f32 %v4385_v29, %v5683_v21  ;;  %v4388_v35 = vadd.f32 %v4387_v23, %v4386_v14 }
 0x48d   : > { %v3606_v63 = vadd.f32 %v5767_v22, %v3567_v51  ;;  %v3568_v62 = vadd.f32 %v4388_v35, %v5688_v20 }
 0x48f   : > { %3638 = vst [vmem:[%s5772_s17 + $0x30] sm:$0xff] %v3606_v63  ;;  %v3607_v56 = vadd.f32 %v5767_v22, %v3568_v62  ;;  %v4389_v26 = vpop.f32.mrb[208].mxu1 }
 0x490   : > { %v4390_v6 = vpop.f32.mrb[209].mxu1 }
 0x491   : > { %3639 = vst [vmem:[%s5772_s17 + $0x38] sm:$0xff] %v3607_v56  ;;  %v4391_v54 = vadd.f32 %v4390_v6, %v4389_v26  ;;  %v4392_v39 = vpop.f32.mrb[210].mxu1 }
 0x492   : > { %v4393_v40 = vpop.f32.mrb[211].mxu1 }
 0x493   : > { %v3569_v32 = vadd.f32 %v4391_v54, %v5692_v59  ;;  %v4394_v21 = vadd.f32 %v4393_v40, %v4392_v39 }
 0x495   : > { %v3608_v31 = vadd.f32 %v5767_v22, %v3569_v32  ;;  %v3570_v30 = vadd.f32 %v4394_v21, %v5695_v47 }
 0x497   : > { %3640 = vst [vmem:[%s5772_s17 + $0x40] sm:$0xff] %v3608_v31  ;;  %v3609_v20 = vadd.f32 %v5767_v22, %v3570_v30  ;;  %v4395_v53 = vpop.f32.mrb[212].mxu1 }
 0x498   : > { %v4396_v52 = vpop.f32.mrb[213].mxu1 }
 0x499   : > { %3641 = vst [vmem:[%s5772_s17 + $0x48] sm:$0xff] %v3609_v20  ;;  %v4397_v27 = vadd.f32 %v4396_v52, %v4395_v53  ;;  %v4398_v10 = vpop.f32.mrb[214].mxu1 }
 0x49a   : > { %v4399_v13 = vpop.f32.mrb[215].mxu1 }
 0x49b   : > { %v3571_v43 = vadd.f32 %v4397_v27, %v5698_v57  ;;  %v4400_v59 = vadd.f32 %v4399_v13, %v4398_v10 }
 0x49d   : > { %v3610_v12 = vadd.f32 %v5767_v22, %v3571_v43  ;;  %v3572_v61 = vadd.f32 %v4400_v59, %v5701_v28 }
 0x49f   : > { %3642 = vst [vmem:[%s5772_s17 + $0x50] sm:$0xff] %v3610_v12  ;;  %v3611_v47 = vadd.f32 %v5767_v22, %v3572_v61  ;;  %v4401_v33 = vpop.f32.mrb[216].mxu1 }
 0x4a0   : > { %v4402_v44 = vpop.f32.mrb[217].mxu1 }
 0x4a1   : > { %3643 = vst [vmem:[%s5772_s17 + $0x58] sm:$0xff] %v3611_v47  ;;  %v4403_v41 = vadd.f32 %v4402_v44, %v4401_v33  ;;  %v4404_v0 = vpop.f32.mrb[218].mxu1 }
 0x4a2   : > { %v4405_v55 = vpop.f32.mrb[219].mxu1 }
 0x4a3   : > { %v3573_v11 = vadd.f32 %v4403_v41, %v5704_v48  ;;  %v4406_v57 = vadd.f32 %v4405_v55, %v4404_v0 }
 0x4a5   : > { %v3612_v45 = vadd.f32 %v5767_v22, %v3573_v11  ;;  %v3574_v5 = vadd.f32 %v4406_v57, %v5707_v7 }
 0x4a7   : > { %3644 = vst [vmem:[%s5772_s17 + $0x60] sm:$0xff] %v3612_v45  ;;  %v3613_v28 = vadd.f32 %v5767_v22, %v3574_v5  ;;  %v4407_v42 = vpop.f32.mrb[220].mxu1 }
 0x4a8   : > { %v4408_v18 = vpop.f32.mrb[221].mxu1 }
 0x4a9   : > { %3645 = vst [vmem:[%s5772_s17 + $0x68] sm:$0xff] %v3613_v28  ;;  %v4409_v15 = vadd.f32 %v4408_v18, %v4407_v42  ;;  %v4410_v4 = vpop.f32.mrb[222].mxu1 }
 0x4aa   : > { %v4411_v49 = vpop.f32.mrb[223].mxu1 }
 0x4ab   : > { %v3575_v29 = vadd.f32 %v4409_v15, %v5710_v34  ;;  %v4412_v48 = vadd.f32 %v4411_v49, %v4410_v4 }
 0x4ad   : > { %v3614_v14 = vadd.f32 %v5767_v22, %v3575_v29  ;;  %v3576_v23 = vadd.f32 %v4412_v48, %v5713_v19 }
 0x4af   : > { %3646 = vst [vmem:[%s5772_s17 + $0x70] sm:$0xff] %v3614_v14  ;;  %v3615_v7 = vadd.f32 %v5767_v22, %v3576_v23  ;;  %v4413_v51 = vpop.f32.mrb[224].mxu1 }
 0x4b0   : > { %v4414_v35 = vpop.f32.mrb[225].mxu1 }
 0x4b1   : > { %3647 = vst [vmem:[%s5772_s17 + $0x78] sm:$0xff] %v3615_v7  ;;  %v4415_v63 = vadd.f32 %v4414_v35, %v4413_v51  ;;  %v4416_v62 = vpop.f32.mrb[226].mxu1 }
 0x4b2   : > { %v4417_v56 = vpop.f32.mrb[227].mxu1 }
 0x4b3   : > { %v3577_v26 = vadd.f32 %v4415_v63, %v5716_v9  ;;  %v4418_v34 = vadd.f32 %v4417_v56, %v4416_v62 }
 0x4b5   : > { %v3616_v6 = vadd.f32 %v5767_v22, %v3577_v26  ;;  %v3578_v54 = vadd.f32 %v4418_v34, %v5719_v3 }
 0x4b7   : > { %3648 = vst [vmem:[%s5772_s17 + $0x80] sm:$0xff] %v3616_v6  ;;  %v3617_v19 = vadd.f32 %v5767_v22, %v3578_v54  ;;  %v4419_v39 = vpop.f32.mrb[228].mxu1 }
 0x4b8   : > { %v4420_v40 = vpop.f32.mrb[229].mxu1 }
 0x4b9   : > { %3649 = vst [vmem:[%s5772_s17 + $0x88] sm:$0xff] %v3617_v19  ;;  %v4421_v32 = vadd.f32 %v4420_v40, %v4419_v39  ;;  %v4422_v21 = vpop.f32.mrb[230].mxu1 }
 0x4ba   : > { %v4423_v31 = vpop.f32.mrb[231].mxu1 }
 0x4bb   : > { %v3579_v30 = vadd.f32 %v4421_v32, %v5722_v24  ;;  %v4424_v9 = vadd.f32 %v4423_v31, %v4422_v21 }
 0x4bd   : > { %v3618_v20 = vadd.f32 %v5767_v22, %v3579_v30  ;;  %v3580_v53 = vadd.f32 %v4424_v9, %v5725_v17 }
 0x4bf   : > { %3650 = vst [vmem:[%s5772_s17 + $0x90] sm:$0xff] %v3618_v20  ;;  %v3619_v3 = vadd.f32 %v5767_v22, %v3580_v53  ;;  %v4425_v52 = vpop.f32.mrb[232].mxu1 }
 0x4c0   : > { %v4426_v27 = vpop.f32.mrb[233].mxu1 }
 0x4c1   : > { %3651 = vst [vmem:[%s5772_s17 + $0x98] sm:$0xff] %v3619_v3  ;;  %v4427_v10 = vadd.f32 %v4426_v27, %v4425_v52  ;;  %v4428_v13 = vpop.f32.mrb[234].mxu1 }
 0x4c2   : > { %v4429_v43 = vpop.f32.mrb[235].mxu1 }
 0x4c3   : > { %v3581_v59 = vadd.f32 %v4427_v10, %v5728_v38  ;;  %v4430_v24 = vadd.f32 %v4429_v43, %v4428_v13 }
 0x4c5   : > { %v3620_v12 = vadd.f32 %v5767_v22, %v3581_v59  ;;  %v3582_v61 = vadd.f32 %v4430_v24, %v5731_v58 }
 0x4c7   : > { %3652 = vst [vmem:[%s5772_s17 + $0xa0] sm:$0xff] %v3620_v12  ;;  %v3621_v17 = vadd.f32 %v5767_v22, %v3582_v61  ;;  %v4431_v47 = vpop.f32.mrb[236].mxu1 }
 0x4c8   : > { %v4432_v33 = vpop.f32.mrb[237].mxu1 }
 0x4c9   : > { %3653 = vst [vmem:[%s5772_s17 + $0xa8] sm:$0xff] %v3621_v17  ;;  %v4433_v44 = vadd.f32 %v4432_v33, %v4431_v47  ;;  %v4434_v41 = vpop.f32.mrb[238].mxu1 }
 0x4ca   : > { %v4435_v0 = vpop.f32.mrb[239].mxu1 }
 0x4cb   : > { %v3583_v55 = vadd.f32 %v4433_v44, %v5734_v50  ;;  %v4436_v38 = vadd.f32 %v4435_v0, %v4434_v41 }
 0x4cd   : > { %v3622_v11 = vadd.f32 %v5767_v22, %v3583_v55  ;;  %v3584_v57 = vadd.f32 %v4436_v38, %v5737_v36 }
 0x4cf   : > { %3654 = vst [vmem:[%s5772_s17 + $0xb0] sm:$0xff] %v3622_v11  ;;  %v3623_v58 = vadd.f32 %v5767_v22, %v3584_v57  ;;  %v4437_v45 = vpop.f32.mrb[240].mxu1 }
 0x4d0   : > { %v4438_v5 = vpop.f32.mrb[241].mxu1 }
 0x4d1   : > { %3655 = vst [vmem:[%s5772_s17 + $0xb8] sm:$0xff] %v3623_v58  ;;  %v4439_v28 = vadd.f32 %v4438_v5, %v4437_v45  ;;  %v4440_v42 = vpop.f32.mrb[242].mxu1 }
 0x4d2   : > { %v4441_v18 = vpop.f32.mrb[243].mxu1 }
 0x4d3   : > { %v3585_v15 = vadd.f32 %v4439_v28, %v5740_v60  ;;  %v4442_v50 = vadd.f32 %v4441_v18, %v4440_v42 }
 0x4d5   : > { %v3624_v4 = vadd.f32 %v5767_v22, %v3585_v15  ;;  %v3586_v49 = vadd.f32 %v4442_v50, %v5743_v1 }
 0x4d7   : > { %3656 = vst [vmem:[%s5772_s17 + $0xc0] sm:$0xff] %v3624_v4  ;;  %v3625_v36 = vadd.f32 %v5767_v22, %v3586_v49  ;;  %v4443_v29 = vpop.f32.mrb[244].mxu1 }
 0x4d8   : > { %v4444_v48 = vpop.f32.mrb[245].mxu1 }
 0x4d9   : > { %3657 = vst [vmem:[%s5772_s17 + $0xc8] sm:$0xff] %v3625_v36  ;;  %v4445_v14 = vadd.f32 %v4444_v48, %v4443_v29  ;;  %v4446_v23 = vpop.f32.mrb[246].mxu1 }
 0x4da   : > { %v4447_v7 = vpop.f32.mrb[247].mxu1 }
 0x4db   : > { %v3587_v51 = vadd.f32 %v4445_v14, %v5746_v2  ;;  %v4448_v60 = vadd.f32 %v4447_v7, %v4446_v23 }
 0x4dd   : > { %v3626_v35 = vadd.f32 %v5767_v22, %v3587_v51  ;;  %v3588_v63 = vadd.f32 %v4448_v60, %v5749_v37 }
 0x4df   : > { %3658 = vst [vmem:[%s5772_s17 + $0xd0] sm:$0xff] %v3626_v35  ;;  %v3627_v1 = vadd.f32 %v5767_v22, %v3588_v63  ;;  %v4449_v62 = vpop.f32.mrb[248].mxu1 }
 0x4e0   : > { %v4450_v56 = vpop.f32.mrb[249].mxu1 }
 0x4e1   : > { %3659 = vst [vmem:[%s5772_s17 + $0xd8] sm:$0xff] %v3627_v1  ;;  %v4451_v26 = vadd.f32 %v4450_v56, %v4449_v62  ;;  %v4452_v34 = vpop.f32.mrb[250].mxu1 }
 0x4e2   : > { %v4453_v6 = vpop.f32.mrb[251].mxu1 }
 0x4e3   : > { %v3589_v54 = vadd.f32 %v4451_v26, %v5752_v8  ;;  %v4454_v2 = vadd.f32 %v4453_v6, %v4452_v34 }
 0x4e5   : > { %v3628_v19 = vadd.f32 %v5767_v22, %v3589_v54  ;;  %v3590_v39 = vadd.f32 %v4454_v2, %v5755_v25 }
 0x4e7   : > { %3660 = vst [vmem:[%s5772_s17 + $0xe0] sm:$0xff] %v3628_v19  ;;  %v3629_v37 = vadd.f32 %v5767_v22, %v3590_v39  ;;  %v4455_v40 = vpop.f32.mrb[252].mxu1 }
 0x4e8   : > { %v4456_v32 = vpop.f32.mrb[253].mxu1 }
 0x4e9   : > { %3661 = vst [vmem:[%s5772_s17 + $0xe8] sm:$0xff] %v3629_v37  ;;  %v4457_v21 = vadd.f32 %v4456_v32, %v4455_v40  ;;  %v4458_v31 = vpop.f32.mrb[254].mxu1 }
 0x4ea   : > { %v4459_v30 = vpop.f32.mrb[255].mxu1 }
 0x4eb   : > { %v3591_v9 = vadd.f32 %v4457_v21, %v5758_v16  ;;  %v4460_v8 = vadd.f32 %v4459_v30, %v4458_v31  ;;  %3671 = sbr.rel (!%p5991_p1) target bundleno = 1294 (0x50e), region = 60 }
 0x4ed   : > { %v3630_v20 = vadd.f32 %v5767_v22, %v3591_v9  ;;  %v3592_v53 = vadd.f32 %v4460_v8, %v5761_v46 }
 0x4ef   : > { %3662 = vst [vmem:[%s5772_s17 + $0xf0] sm:$0xff] %v3630_v20  ;;  %v3631_v25 = vadd.f32 %v5767_v22, %v3592_v53 }
 0x4f1   : > { %3663 = vst [vmem:[%s5772_s17 + $0xf8] sm:$0xff] %v3631_v25 }
 0x4f2   : > { %s6001_s14 = smov (!%p3674_p3, %s3673_s14), 32 }
 0x4f3   : > { %s5871_s15 = sshll.u32 %s6001_s14, 7 }
 0x4f4   : > { %s3678_s16 = ssub.s32 4096, %s5871_s15 }
 0x4f5   : > { %3679 = vsyncadd %s3665_s12, %s3678_s16  ;;  %p4003_p6 = scmp.ne.s32.totalorder %s5871_s15, 0  ;;  %s4012_s30 = sshll.u32 %s4855_s22, 12 }
 0x4f6   : > { %s5881_s28 = scalar_lea.hbm %s5935_s5, %s4012_s30  ;;  %s3684_s26 = sshll.u32 %s5772_s17, 4  ;;  %s5884_s26 = int_to_ptr.vmem [resolvable:$true] %s3684_s26 }
 0x4f7   : > { %s4715_s8 = scalar_lea.vmem %s5884_s26, %s5871_s15  ;;  %s4801_s27 = smov [#allocation10]  }
 0x4f8   : > { %p4716_p5 = scmp.ne.s32.totalorder %s5884_s26, %s4715_s8  ;;  %s4719_s11 = sshll.u32 %s4801_s27, 4  ;;  %s4720_s11 = int_to_ptr.vmem [resolvable:$false] %s4719_s11 }
 0x4f9   : > { %s4721_s22 = scalar_lea.vmem %s4720_s11, 8192  ;;  %p4722_p0 = scmp.lt.s32.totalorder %s5884_s26, %s4720_s11 }
 0x4fa   : > { %p4717_p11 = pnand %p4716_p5, %p4003_p6  ;;  %p4723_p12 = scmp.lt.s32.totalorder %s4721_s22, %s4715_s8 }
 0x4fc   : > { %p4718_p13 = pneg %p4717_p11  ;;  %p4724_p7 = por %p4723_p12, %p4722_p0 }
 0x4fe   : > { %p4725_p2 = pnand %p4724_p7, %p4718_p13 }
 0x500   : > { %4728 = shalt.err (!%p4725_p2)
}
 0x501   : > { %s4729_s23 = scalar_lea.hbm %s5881_s28, %s5871_s15  ;;  %s4733_s10 = scalar_lea.hbm %s5935_s5, 6144 }
 0x502   : > { %p4730_p8 = scmp.ne.s32.totalorder %s5881_s28, %s4729_s23  ;;  %p4734_p1 = scmp.lt.u32.totalorder %s5881_s28, %s5935_s5 }
 0x503   : > { %p4735_p3 = scmp.lt.u32.totalorder %s4733_s10, %s4729_s23  ;;  %p4737_p11 = scmp.lt.u32.totalorder %s4729_s23, %s5881_s28 }
 0x504   : > { %p4731_p9 = pnand %p4730_p8, %p4003_p6 }
 0x505   : > { %p4736_p5 = por %p4735_p3, %p4734_p1 }
 0x506   : > { %p4732_p10 = pneg %p4731_p9 }
 0x507   : > { %p4738_p13 = por %p4737_p11, %p4736_p5 }
 0x509   : > { %p4739_p0 = pnand %p4738_p13, %p4732_p10 }
 0x50b   : > { %4742 = shalt.err (!%p4739_p0)
}
 0x50c   : > { %s4802_s14 = smov 128   ;;  %s4803_s16 = smov 8  }
 0x50d   : > { %3690 = dma.vmem_to_hbm [thread:$0]  (%p4003_p6), %s5884_s26, %s5871_s15, %s5881_s28, %s3665_s12, %s4802_s14, %s4802_s14, %s4803_s16  }
 0x50e PF: > { %s3699_s30 = sand.u32 1, %s4777_s18   ;;  %p5992_p12 = scmp.ne.s32.totalorder %s5962_s6, 0 }
 0x50f   : > { %s3700_s13 = scalar_lea.sflag [#allocation4], %s3699_s30 }
 0x510   : > { %p4486_p7 = pnand %p3791_p4, %p5992_p12 }
 0x512   : > { %4772 = dma.done.wait (!%p4486_p7), %s3700_s13, 4096  }
 0x513   : > { %4774 = vsyncadd (!%p4486_p7), %s3700_s13, 4294963200  ;;  %s5993_s21 = sld [smem:[#allocation15_spill]]  ;;  %s5994_s25 = sld [smem:[#allocation16_spill]] }
 0x514   : > { %s5995_s18 = smov %s4781_s19  ;;  %s5996_s19 = smov %s4785_s20 }
 0x519   : > { %p20_p2 = scmp.ge.s32.totalorder %s5993_s21, 4   ;;  %s5997_s20 = smov %s5994_s25 }
 0x51b   :  { %22 = sbr.rel (!%p20_p2) target bundleno = 7 (0x7), region = 97 }
 0x522   :  { %3705 = vsyncpa [#allocation3], 1 }
 0x523   :  { %3707 = vsyncpa [#allocation3 + $0x1], 1 }
 0x524   :  { %3708 = vsyncpa [#allocation6], 1 }
 0x525   :  { %3709 = vsyncpa [#allocation9], 1 }
 0x526   :  { %3710 = vsyncpa [#allocation4], 1 }
 0x527   :  { %3712 = vsyncpa [#allocation4 + $0x1], 1 }

// kernel: tpu_custom_call.1
= control target key start
LH: loop header
LB: loop body
LE: loop exit
PB: predicated region body
PF: predicated region fallthrough
CT: control target
= control target key end

     0   :  { %10 = vsyncpa [#allocation3], 0  ;;  %s5930_s0 = inlined_call_operand.hbm [shape: f32[384,256], index: 0, kind: input, shape index: {}]   ;;  %s5931_s1 = inlined_call_operand.hbm [shape: bf16[256,1024], index: 1, kind: input, shape index: {}]   ;;  %s5932_s2 = inlined_call_operand.hbm [shape: f32[1,1024], index: 2, kind: input, shape index: {}]   ;;  %s5933_s3 = inlined_call_operand.hbm [shape: bf16[1024,128], index: 3, kind: input, shape index: {}]   ;;  %s5934_s4 = inlined_call_operand.vmem [shape: f32[1,128], index: 4, kind: input, shape index: {}]   ;;  %s5935_s5 = inlined_call_operand.hbm [shape: f32[384,128], index: 5, kind: output, shape index: {}]  }
   0x1   :  { %12 = vsyncpa [#allocation3 + $0x1], 0 }
   0x2   :  { %13 = vsyncpa [#allocation6], 0 }
   0x3   :  { %14 = vsyncpa [#allocation9], 0 }
   0x4   :  { %15 = vsyncpa [#allocation4], 0 }
   0x5   :  { %17 = vsyncpa [#allocation4 + $0x1], 0  ;;  %s4834_s18 = smov 0   ;;  %s4836_s19 = smov 0  }
   0x6   :  { %s4838_s20 = smov 0   ;;  %s4840_s21 = smov 0  }
   0x7 LB: > { %s4855_s22 = sadd.s32 4294967295, %s4789_s21   ;;  %s3786_s23 = sadd.s32 4294967294, %s4789_s21   ;;  %s4789_s21 = sphi %s4840_s21, %s5993_s21   ;;  %s4785_s20 = sphi %s4838_s20, %s5997_s20   ;;  %s4781_s19 = sphi %s4836_s19, %s5996_s19   ;;  %s4777_s18 = sphi %s4834_s18, %s5995_s18  }
   0x8   : > { %s4859_s24 = sadd.s32 1, %s4789_s21   ;;  %s30_s25 = sadd.s32 1, %s4785_s20 }
   0x9   : > { %5957 = sst [smem:[#allocation15_spill]] %s4859_s24  ;;  %s27_s26 = ssub.s32 %s4789_s21, %s4859_s24 }
   0xa   : > { %p37_p0 = scmp.ne.s32.totalorder %s4785_s20, %s4781_s19  ;;  %p28_p1 = scmp.eq.s32.totalorder %s27_s26, 0 }
   0xb   : > { %p38_p2 = scmp.eq.s32.totalorder %s4789_s21, 0  ;;  %p43_p3 = scmp.ne.s32.totalorder %s4781_s19, %s4777_s18 }
   0xc   : > { %p5936_p4 = scmp.eq.s32.totalorder %s4855_s22, 0  ;;  %p151_p7 = scmp.eq.s32.totalorder %s4855_s22, 1 }
   0xd   : > { %s4871_s27 = scalar_select %p28_p1, %s4785_s20, %s30_s25  }
   0xe   : > { %p4873_p5 = por %p38_p2, %p37_p0  ;;  %p4879_p6 = por %p5936_p4, %p43_p3 }
   0xf   : > { %5958 = sst [smem:[#allocation16_spill]] %s4871_s27  ;;  %p157_p8 = scmp.eq.s32.totalorder %s3786_s23, 1 }
  0x10   : > { %s5959_s28 = scalar_select %p4873_p5, 1, 0 }
  0x11   : > { %s5960_s29 = scalar_select %p4879_p6, 1, 0 }
  0x12   : > { %p3787_p9 = scmp.ge.s32.totalorder %s4789_s21, 1  ;;  %p164_p10 = scmp.lt.s32.totalorder %s4789_s21, 3 }
  0x13   : > { %p4886_p11 = por %p151_p7, %p37_p0  ;;  %p4890_p12 = por %p157_p8, %p43_p3 }
  0x14   : > { %p4894_p13 = pnand %p3787_p9, %p164_p10  ;;  %s4791_s8 = smov [#allocation5]  }
  0x15   : > { %s5961_s30 = scalar_select %p4886_p11, 1, 0 }
  0x16   : > { %s5962_s6 = scalar_select %p4890_p12, 1, 0 }
  0x17   : > { %s5963_s7 = scalar_select %p4894_p13, 1, 0 }
  0x18   : > { %p4475_p1 = pneg %p4894_p13  ;;  %s176_s9 = sshll.u32 %s4791_s8, 4  ;;  %s177_s9 = int_to_ptr.vmem [resolvable:$true] %s176_s9 }
  0x19   : > { %s4792_s11 = smov [#allocation7]   ;;  %s4603_s15 = scalar_lea.hbm %s5931_s1, 16384 }
  0x1a   : > { %p4902_p2 = pnand %p4475_p1, %p5936_p4  ;;  %s190_s12 = sshll.u32 %s4792_s11, 4  ;;  %s4906_s12 = int_to_ptr.vmem [resolvable:$true] %s190_s12 }
  0x1b   : > { %p4604_p0 = scmp.ne.s32.totalorder %s5931_s1, %s4603_s15  ;;  %p4610_p9 = scmp.lt.u32.totalorder %s4603_s15, %s5931_s1 }
  0x1c   : > { %p4916_p3 = pneg %p4902_p2 }
  0x1e   : > { %p4606_p7 = pnand %p4916_p3, %p4604_p0 }
  0x20   : > { %p4607_p8 = pneg %p4606_p7 }
  0x22   : > { %p4612_p10 = pnand %p4610_p9, %p4607_p8 }
  0x24   : > { %4615 = shalt.err (!%p4612_p10)
}
  0x25   : > { %s4616_s8 = scalar_lea.vmem %s177_s9, 16384  ;;  %p4624_p11 = scmp.lt.s32.totalorder %s177_s9, %s177_s9 }
  0x26   : > { %p4617_p1 = scmp.ne.s32.totalorder %s177_s9, %s4616_s8  ;;  %p4625_p6 = scmp.lt.s32.totalorder %s4616_s8, %s4616_s8 }
  0x28   : > { %p4619_p4 = pnand %p4617_p1, %p4916_p3  ;;  %p4626_p13 = por %p4625_p6, %p4624_p11 }
  0x2a   : > { %p4620_p12 = pneg %p4619_p4 }
  0x2c   : > { %p4627_p5 = pnand %p4626_p13, %p4620_p12 }
  0x2e   : > { %4630 = shalt.err (!%p4627_p5)
}
  0x2f   : > { %s4793_s11 = smov 512   ;;  %s4794_s13 = smov 32  }
  0x30   : > { %4478 = dma.hbm_to_vmem [thread:$0]  (!%p4902_p2), %s5931_s1, 16384, %s177_s9, [#allocation6], %s4793_s11, %s4793_s11, %s4794_s13  }
  0x31   : > { %s4631_s25 = scalar_lea.hbm %s5932_s2, 128 }
  0x32   : > { %p4632_p4 = scmp.ne.s32.totalorder %s5932_s2, %s4631_s25  ;;  %p4638_p11 = scmp.lt.u32.totalorder %s4631_s25, %s5932_s2 }
  0x34   : > { %p4634_p6 = pnand %p4632_p4, %p4916_p3 }
  0x36   : > { %p4635_p5 = pneg %p4634_p6 }
  0x38   : > { %p4640_p12 = pnand %p4638_p11, %p4635_p5 }
  0x3a   : > { %4643 = shalt.err (!%p4640_p12)
}
  0x3b   : > { %s4644_s9 = scalar_lea.vmem %s4906_s12, 128  ;;  %p4652_p8 = scmp.lt.s32.totalorder %s4906_s12, %s4906_s12 }
  0x3c   : > { %p4645_p13 = scmp.ne.s32.totalorder %s4906_s12, %s4644_s9  ;;  %p4653_p9 = scmp.lt.s32.totalorder %s4644_s9, %s4644_s9 }
  0x3e   : > { %p4647_p0 = pnand %p4645_p13, %p4916_p3  ;;  %p4654_p10 = por %p4653_p9, %p4652_p8 }
  0x40   : > { %p4648_p7 = pneg %p4647_p0 }
  0x42   : > { %p4655_p1 = pnand %p4654_p10, %p4648_p7 }
  0x44   : > { %4658 = shalt.err (!%p4655_p1)
}
  0x45   : > { %4481 = dma.hbm_to_vmem [thread:$0]  (!%p4902_p2), %s5932_s2, 128, %s4906_s12, [#allocation6]  }
  0x46   : > { %s4795_s11 = smov [#allocation8]   ;;  %s4659_s16 = scalar_lea.hbm %s5933_s3, 8192 }
  0x47   : > { %s200_s13 = sshll.u32 %s4795_s11, 4  ;;  %p4660_p4 = scmp.ne.s32.totalorder %s5933_s3, %s4659_s16  ;;  %s201_s13 = int_to_ptr.vmem [resolvable:$true] %s200_s13 }
  0x48   : > { %p4666_p11 = scmp.lt.u32.totalorder %s4659_s16, %s5933_s3 }
  0x49   : > { %p4662_p6 = pnand %p4660_p4, %p4916_p3 }
  0x4b   : > { %p4663_p5 = pneg %p4662_p6 }
  0x4d   : > { %p4668_p12 = pnand %p4666_p11, %p4663_p5 }
  0x4f   : > { %4671 = shalt.err (!%p4668_p12)
}
  0x50   : > { %s4672_s12 = scalar_lea.vmem %s201_s13, 8192  ;;  %p4680_p8 = scmp.lt.s32.totalorder %s201_s13, %s201_s13 }
  0x51   : > { %p4673_p13 = scmp.ne.s32.totalorder %s201_s13, %s4672_s12  ;;  %p4681_p9 = scmp.lt.s32.totalorder %s4672_s12, %s4672_s12 }
  0x53   : > { %p4675_p0 = pnand %p4673_p13, %p4916_p3  ;;  %p4682_p10 = por %p4681_p9, %p4680_p8 }
  0x55   : > { %p4676_p7 = pneg %p4675_p0 }
  0x57   : > { %p4683_p1 = pnand %p4682_p10, %p4676_p7 }
  0x59   : > { %4686 = shalt.err (!%p4683_p1)
}
  0x5a   : > { %s4796_s9 = smov 64   ;;  %s4797_s24 = smov 4  }
  0x5b   : > { %4484 = dma.hbm_to_vmem [thread:$0]  (!%p4902_p2), %s5933_s3, 8192, %s201_s13, [#allocation9], %s4796_s9, %s4796_s9, %s4797_s24  }
  0x5c   : > { %p3791_p4 = scmp.ge.s32.totalorder %s4789_s21, 2 }
  0x5d   : > { %p5966_p3 = scmp.ne.s32.totalorder (!%p3791_p4), %s5959_s28, 0 }
  0x5e   : > { %213 = sbr.rel (%p3791_p4) target bundleno = 136 (0x88), region = 32 }
  0x65   : > { %216 = sbr.rel (!%p5966_p3) target bundleno = 136 (0x88), region = 36  ;;  %s217_s23 = sand.u32 (%p5966_p3), 1, %s4785_s20  }
  0x66   : > { %s3793_s14 = sshll.u32 (%p5966_p3), %s4789_s21, 5  ;;  %s3792_s15 = sshll.u32 (%p5966_p3), %s217_s23, 9 }
  0x67   : > { %s223_s16 = ssub.s32 (%p5966_p3), 48, %s3793_s14  ;;  %s4983_s17 = scalar_lea.sflag (%p5966_p3), [#allocation3], %s217_s23 }
  0x68   : > { %p224_p6 = scmp.lt.s32.totalorder (%p5966_p3), %s223_s16, 32  ;;  %s221_s25 = scalar_lea.vmem (%p5966_p3), [#allocation2], %s3792_s15 }
  0x6c   : > { %s5999_s16 = smov (!%p224_p6, %s223_s16), 32 }
  0x6d   : > { %s4980_s10 = sshll.u32 %s5999_s16, 8 }
  0x6e   : > { %s229_s13 = ssub.s32 8192, %s4980_s10 }
  0x6f   : > { %230 = vsyncadd %s4983_s17, %s229_s13  ;;  %p3796_p2 = scmp.ne.s32.totalorder %s4980_s10, 0  ;;  %s4011_s28 = sshll.u32 %s4789_s21, 13 }
  0x70   : > { %s4991_s12 = scalar_lea.hbm %s5930_s0, %s4011_s28  ;;  %s236_s9 = sshll.u32 %s221_s25, 4  ;;  %s4993_s9 = int_to_ptr.vmem [resolvable:$true] %s236_s9 }
  0x71   : > { %s4687_s24 = scalar_lea.hbm %s4991_s12, %s4980_s10  ;;  %s4691_s23 = scalar_lea.hbm %s5930_s0, 12288 }
  0x72   : > { %p4688_p5 = scmp.ne.s32.totalorder %s4991_s12, %s4687_s24  ;;  %p4692_p13 = scmp.lt.u32.totalorder %s4991_s12, %s5930_s0 }
  0x73   : > { %p4693_p0 = scmp.lt.u32.totalorder %s4691_s23, %s4687_s24  ;;  %p4695_p8 = scmp.lt.u32.totalorder %s4687_s24, %s4991_s12 }
  0x74   : > { %p4689_p11 = pnand %p4688_p5, %p3796_p2 }
  0x75   : > { %p4694_p7 = por %p4693_p0, %p4692_p13 }
  0x76   : > { %p4690_p12 = pneg %p4689_p11 }
  0x77   : > { %p4696_p9 = por %p4695_p8, %p4694_p7 }
  0x79   : > { %p4697_p10 = pnand %p4696_p9, %p4690_p12 }
  0x7b   : > { %4700 = shalt.err (!%p4697_p10)
}
  0x7c   : > { %s4701_s16 = scalar_lea.vmem %s4993_s9, %s4980_s10  ;;  %s4798_s13 = smov [#allocation2]  }
  0x7d   : > { %p4702_p1 = scmp.ne.s32.totalorder %s4993_s9, %s4701_s16  ;;  %s4705_s25 = sshll.u32 %s4798_s13, 4  ;;  %s4706_s25 = int_to_ptr.vmem [resolvable:$false] %s4705_s25 }
  0x7e   : > { %s4707_s28 = scalar_lea.vmem %s4706_s25, 16384  ;;  %p4708_p5 = scmp.lt.s32.totalorder %s4993_s9, %s4706_s25 }
  0x7f   : > { %p4703_p3 = pnand %p4702_p1, %p3796_p2  ;;  %p4709_p11 = scmp.lt.s32.totalorder %s4707_s28, %s4701_s16 }
  0x81   : > { %p4704_p6 = pneg %p4703_p3  ;;  %p4710_p13 = por %p4709_p11, %p4708_p5 }
  0x83   : > { %p4711_p0 = pnand %p4710_p13, %p4704_p6 }
  0x85   : > { %4714 = shalt.err (!%p4711_p0)
}
  0x86   : > { %s4799_s26 = smov 256   ;;  %s4800_s8 = smov 16  }
  0x87   : > { %242 = dma.hbm_to_vmem [thread:$0]  (%p3796_p2), %s4991_s12, %s4980_s10, %s4993_s9, %s4983_s17, %s4799_s26, %s4799_s26, %s4800_s8  }
  0x88 PF: > { %p5967_p12 = scmp.ne.s32.totalorder %s5963_s7, 0 }
  0x8a   : > { %248 = sbr.rel (%p5967_p12) target bundleno = 1294 (0x50e), region = 40 }
  0x91   : > { %s5023_s24 = sand.u32 1, %s4781_s19   ;;  %p5968_p7 = scmp.ne.s32.totalorder %s5960_s29, 0 }
  0x92   : > { %s3802_s27 = sshll.u32 %s5023_s24, 9  ;;  %s251_s11 = scalar_lea.sflag [#allocation3], %s5023_s24 }
  0x93   : > { %s5027_s23 = scalar_lea.vmem [#allocation2], %s3802_s27 }
  0x94   : > { %4760 = dma.done.wait (%p5968_p7), %s251_s11, 8192  }
  0x95   : > { %4762 = vsyncadd (%p5968_p7), %s251_s11, 4294959104  ;;  %p5969_p2 = scmp.eq.s32.totalorder %s4855_s22, 0 }
  0x97   : > { %4764 = dma.done.wait (%p5969_p2), [#allocation6], 16512   ;;  %p5970_p8 = pmov %p5969_p2 }
  0x98   : > { %p5971_p9 = pmov %p5969_p2 }
  0x99   : > { %4766 = vsyncadd (%p5970_p8), [#allocation6], 4294950784 }
  0x9a   : > { %4768 = dma.done.wait (%p5971_p9), [#allocation9], 8192   ;;  %p5972_p10 = pmov %p5969_p2 }
  0x9b   : > { %v401_v0 = vld [vmem:[#allocation5] sm:$0xff]  ;;  %v926_v2 = vld [vmem:[#allocation5 + $0x8] sm:$0xff]  ;;  %v308_v54 = vld [vmem:[%s5027_s23 + $0x18] sm:$0xff]  ;;  %s3806_s29 = sshll.u32 %s5023_s24, 8  ;;  %s3665_s12 = scalar_lea.sflag [#allocation4], %s5023_s24 }
  0x9c   : > { %4770 = vsyncadd (%p5972_p10), [#allocation9], 4294959104  ;;  %v402_v1 = vld [vmem:[#allocation5 + $0x20] sm:$0xff]  ;;  %v927_v4 = vld [vmem:[#allocation5 + $0x28] sm:$0xff]  ;;  %s5772_s17 = scalar_lea.vmem [#allocation10], %s3806_s29  ;;  %p5991_p1 = scmp.ne.s32.totalorder %s5961_s30, 0 }
  0x9d   : > { %v3808_v3 = vcombine.high %v401_v0, %v402_v1  ;;  %v3807_v5 = vcombine.low %v401_v0, %v402_v1  ;;  %v403_v6 = vld [vmem:[#allocation5 + $0x40] sm:$0xff]  ;;  %v3840_v8 = vcombine.high %v926_v2, %v927_v4  ;;  %v3839_v9 = vcombine.low %v926_v2, %v927_v4  ;;  %v928_v11 = vld [vmem:[#allocation5 + $0x48] sm:$0xff]  ;;  %s4001_s9 = sshll.u32 (%p5991_p1), %s4855_s22, 5 }
  0x9e   : > { %v404_v7 = vld [vmem:[#allocation5 + $0x60] sm:$0xff]  ;;  %v929_v12 = vld [vmem:[#allocation5 + $0x68] sm:$0xff]  ;;  %s3673_s14 = ssub.s32 (%p5991_p1), 48, %s4001_s9 }
  0x9f   : > { %v3810_v10 = vcombine.high %v403_v6, %v404_v7  ;;  %v405_v13 = vld [vmem:[#allocation5 + $0x80] sm:$0xff]  ;;  %605 = vmatprep.subr.bf16.mxu0 %v3808_v3  ;;  %v3842_v14 = vcombine.high %v928_v11, %v929_v12  ;;  %v930_v16 = vld [vmem:[#allocation5 + $0x88] sm:$0xff]  ;;  %1130 = vmatprep.subr.bf16.mxu1 %v3840_v8  ;;  %v3809_v18 = vcombine.low %v403_v6, %v404_v7  ;;  %p3674_p3 = scmp.lt.s32.totalorder (%p5991_p1), %s3673_s14, 32 }
  0xa0   : > { %v406_v15 = vld [vmem:[#allocation5 + $0xa0] sm:$0xff]  ;;  %v931_v17 = vld [vmem:[#allocation5 + $0xa8] sm:$0xff]  ;;  %606 = vmatpush1.bf16.msra.mxu0 %v3807_v5  ;;  %1131 = vmatpush1.bf16.msra.mxu1 %v3839_v9  ;;  %v3841_v19 = vcombine.low %v928_v11, %v929_v12 }
  0xa1   : > { %607 = vmatprep.subr.bf16.mxu0 %v3810_v10  ;;  %v3812_v20 = vcombine.high %v405_v13, %v406_v15  ;;  %1132 = vmatprep.subr.bf16.mxu1 %v3842_v14  ;;  %v3844_v21 = vcombine.high %v930_v16, %v931_v17  ;;  %v407_v22 = vld [vmem:[#allocation5 + $0xc0] sm:$0xff]  ;;  %v932_v24 = vld [vmem:[#allocation5 + $0xc8] sm:$0xff]  ;;  %v3811_v26 = vcombine.low %v405_v13, %v406_v15 }
  0xa2   : > { %v408_v23 = vld [vmem:[#allocation5 + $0xe0] sm:$0xff]  ;;  %v933_v25 = vld [vmem:[#allocation5 + $0xe8] sm:$0xff]  ;;  %v3843_v27 = vcombine.low %v930_v16, %v931_v17 }
  0xa3   : > { %v3814_v28 = vcombine.high %v407_v22, %v408_v23  ;;  %v3846_v29 = vcombine.high %v932_v24, %v933_v25  ;;  %v409_v30 = vld [vmem:[#allocation5 + $0x100] sm:$0xff]  ;;  %v934_v32 = vld [vmem:[#allocation5 + $0x108] sm:$0xff]  ;;  %v3813_v34 = vcombine.low %v407_v22, %v408_v23  ;;  %v3845_v35 = vcombine.low %v932_v24, %v933_v25 }
  0xa4   : > { %608 = vmatpush1.bf16.msra.mxu0 %v3809_v18  ;;  %1133 = vmatpush1.bf16.msra.mxu1 %v3841_v19  ;;  %v410_v31 = vld [vmem:[#allocation5 + $0x120] sm:$0xff]  ;;  %v935_v33 = vld [vmem:[#allocation5 + $0x128] sm:$0xff] }
  0xa5   : > { %609 = vmatprep.subr.bf16.mxu0 %v3812_v20  ;;  %1134 = vmatprep.subr.bf16.mxu1 %v3844_v21  ;;  %v3816_v36 = vcombine.high %v409_v30, %v410_v31  ;;  %v3848_v37 = vcombine.high %v934_v32, %v935_v33  ;;  %v411_v38 = vld [vmem:[#allocation5 + $0x140] sm:$0xff]  ;;  %v936_v40 = vld [vmem:[#allocation5 + $0x148] sm:$0xff]  ;;  %v3815_v42 = vcombine.low %v409_v30, %v410_v31 }
  0xa6   : > { %v412_v39 = vld [vmem:[#allocation5 + $0x160] sm:$0xff]  ;;  %v937_v41 = vld [vmem:[#allocation5 + $0x168] sm:$0xff]  ;;  %v3847_v43 = vcombine.low %v934_v32, %v935_v33 }
  0xa7   : > { %v3818_v44 = vcombine.high %v411_v38, %v412_v39  ;;  %v3850_v45 = vcombine.high %v936_v40, %v937_v41  ;;  %v413_v46 = vld [vmem:[#allocation5 + $0x180] sm:$0xff]  ;;  %v938_v48 = vld [vmem:[#allocation5 + $0x188] sm:$0xff]  ;;  %v3817_v50 = vcombine.low %v411_v38, %v412_v39  ;;  %v3849_v51 = vcombine.low %v936_v40, %v937_v41 }
  0xa8   : > { %610 = vmatpush1.bf16.msra.mxu0 %v3811_v26  ;;  %1135 = vmatpush1.bf16.msra.mxu1 %v3843_v27  ;;  %v414_v47 = vld [vmem:[#allocation5 + $0x1a0] sm:$0xff]  ;;  %v939_v49 = vld [vmem:[#allocation5 + $0x1a8] sm:$0xff] }
  0xa9   : > { %611 = vmatprep.subr.bf16.mxu0 %v3814_v28  ;;  %1136 = vmatprep.subr.bf16.mxu1 %v3846_v29  ;;  %v3820_v52 = vcombine.high %v413_v46, %v414_v47  ;;  %v306_v53 = vld [vmem:[%s5027_s23 + $0x8] sm:$0xff]  ;;  %v3852_v55 = vcombine.high %v938_v48, %v939_v49  ;;  %v415_v56 = vld [vmem:[#allocation5 + $0x1c0] sm:$0xff]  ;;  %v3819_v61 = vcombine.low %v413_v46, %v414_v47 }
  0xaa   : > { %v416_v57 = vld [vmem:[#allocation5 + $0x1e0] sm:$0xff]  ;;  %v5043_v58 = vpack.c.bf16 %v308_v54, %v306_v53  ;;  %v940_v59 = vld [vmem:[#allocation5 + $0x1c8] sm:$0xff]  ;;  %v3851_v62 = vcombine.low %v938_v48, %v939_v49 }
  0xab   : > { %v941_v60 = vld [vmem:[#allocation5 + $0x1e8] sm:$0xff]  ;;  %v3822_v63 = vcombine.high %v415_v56, %v416_v57  ;;  %v417_v1 = vld [vmem:[#allocation5 + $0x200] sm:$0xff]  ;;  %v3821_v5 = vcombine.low %v415_v56, %v416_v57 }
  0xac   : > { %612 = vmatpush1.bf16.msra.mxu0 %v3813_v34  ;;  %1137 = vmatpush1.bf16.msra.mxu1 %v3845_v35  ;;  %v3854_v0 = vcombine.high %v940_v59, %v941_v60  ;;  %v418_v2 = vld [vmem:[#allocation5 + $0x220] sm:$0xff]  ;;  %v942_v3 = vld [vmem:[#allocation5 + $0x208] sm:$0xff]  ;;  %v3853_v6 = vcombine.low %v940_v59, %v941_v60 }
  0xad   : > { %613 = vmatprep.subr.bf16.mxu0 %v3816_v36  ;;  %1138 = vmatprep.subr.bf16.mxu1 %v3848_v37  ;;  %v943_v4 = vld [vmem:[#allocation5 + $0x228] sm:$0xff]  ;;  %v3824_v7 = vcombine.high %v417_v1, %v418_v2  ;;  %v419_v9 = vld [vmem:[#allocation5 + $0x240] sm:$0xff]  ;;  %v3823_v13 = vcombine.low %v417_v1, %v418_v2 }
  0xae   : > { %637 = vmatprep.mubr.bf16.mxu0 %v5043_v58  ;;  %1162 = vmatprep.mubr.bf16.mxu1 %v5043_v58  ;;  %v3856_v8 = vcombine.high %v942_v3, %v943_v4  ;;  %v420_v10 = vld [vmem:[#allocation5 + $0x260] sm:$0xff]  ;;  %v944_v11 = vld [vmem:[#allocation5 + $0x248] sm:$0xff]  ;;  %v3855_v14 = vcombine.low %v942_v3, %v943_v4  ;;  %v307_v4 = vld [vmem:[%s5027_s23 + $0x10] sm:$0xff] }
  0xaf   : > { %v945_v12 = vld [vmem:[#allocation5 + $0x268] sm:$0xff]  ;;  %v3826_v15 = vcombine.high %v419_v9, %v420_v10  ;;  %v421_v17 = vld [vmem:[#allocation5 + $0x280] sm:$0xff]  ;;  %v3825_v21 = vcombine.low %v419_v9, %v420_v10 }
  0xb0   : > { %614 = vmatpush1.bf16.msra.mxu0 %v3815_v42  ;;  %1139 = vmatpush1.bf16.msra.mxu1 %v3847_v43  ;;  %v3858_v16 = vcombine.high %v944_v11, %v945_v12  ;;  %v422_v18 = vld [vmem:[#allocation5 + $0x2a0] sm:$0xff]  ;;  %v946_v19 = vld [vmem:[#allocation5 + $0x288] sm:$0xff]  ;;  %v3857_v22 = vcombine.low %v944_v11, %v945_v12 }
  0xb1   : > { %615 = vmatprep.subr.bf16.mxu0 %v3818_v44  ;;  %1140 = vmatprep.subr.bf16.mxu1 %v3850_v45  ;;  %v947_v20 = vld [vmem:[#allocation5 + $0x2a8] sm:$0xff]  ;;  %v3828_v23 = vcombine.high %v421_v17, %v422_v18  ;;  %v423_v24 = vld [vmem:[#allocation5 + $0x2c0] sm:$0xff]  ;;  %v3827_v29 = vcombine.low %v421_v17, %v422_v18  ;;  %v316_v18 = vld [vmem:[%s5027_s23 + $0x58] sm:$0xff] }
  0xb2   : > { %v3860_v25 = vcombine.high %v946_v19, %v947_v20  ;;  %v424_v26 = vld [vmem:[#allocation5 + $0x2e0] sm:$0xff]  ;;  %v948_v27 = vld [vmem:[#allocation5 + $0x2c8] sm:$0xff]  ;;  %v3859_v31 = vcombine.low %v946_v19, %v947_v20  ;;  %v4542_v19 = vld [vmem:[#allocation8 + $0x88] sm:$0xff]  }
  0xb3   : > { %v949_v28 = vld [vmem:[#allocation5 + $0x2e8] sm:$0xff]  ;;  %v425_v30 = vld [vmem:[#allocation5 + $0x300] sm:$0xff]  ;;  %v3830_v32 = vcombine.high %v423_v24, %v424_v26  ;;  %v3829_v37 = vcombine.low %v423_v24, %v424_v26  ;;  %v4555_v20 = vld [vmem:[#allocation8 + $0x48] sm:$0xff]  }
  0xb4   : > { %616 = vmatpush1.bf16.msra.mxu0 %v3817_v50  ;;  %1141 = vmatpush1.bf16.msra.mxu1 %v3849_v51  ;;  %v426_v33 = vld [vmem:[#allocation5 + $0x320] sm:$0xff]  ;;  %v950_v34 = vld [vmem:[#allocation5 + $0x308] sm:$0xff]  ;;  %v3862_v36 = vcombine.high %v948_v27, %v949_v28  ;;  %v3861_v39 = vcombine.low %v948_v27, %v949_v28  ;;  %v4558_v28 = vld [vmem:[#allocation8 + $0x10] sm:$0xff]  }
  0xb5   : > { %617 = vmatprep.subr.bf16.mxu0 %v3820_v52  ;;  %1142 = vmatprep.subr.bf16.mxu1 %v3852_v55  ;;  %v951_v35 = vld [vmem:[#allocation5 + $0x328] sm:$0xff]  ;;  %v427_v38 = vld [vmem:[#allocation5 + $0x340] sm:$0xff]  ;;  %v3832_v40 = vcombine.high %v425_v30, %v426_v33  ;;  %v3831_v45 = vcombine.low %v425_v30, %v426_v33  ;;  %v320_v33 = vld [vmem:[%s5027_s23 + $0x78] sm:$0xff] }
  0xb6   : > { %v428_v41 = vld [vmem:[#allocation5 + $0x360] sm:$0xff]  ;;  %v952_v42 = vld [vmem:[#allocation5 + $0x348] sm:$0xff]  ;;  %v3864_v44 = vcombine.high %v950_v34, %v951_v35  ;;  %v3863_v48 = vcombine.low %v950_v34, %v951_v35 }
  0xb7   : > { %v953_v43 = vld [vmem:[#allocation5 + $0x368] sm:$0xff]  ;;  %v429_v46 = vld [vmem:[#allocation5 + $0x380] sm:$0xff]  ;;  %v3834_v49 = vcombine.high %v427_v38, %v428_v41  ;;  %v3833_v53 = vcombine.low %v427_v38, %v428_v41  ;;  %v4549_v41 = vld [vmem:[#allocation8 + $0xe8] sm:$0xff]  }
  0xb8   : > { %618 = vmatpush1.bf16.msra.mxu0 %v3819_v61  ;;  %1143 = vmatpush1.bf16.msra.mxu1 %v3851_v62  ;;  %v430_v47 = vld [vmem:[#allocation5 + $0x3a0] sm:$0xff]  ;;  %v954_v50 = vld [vmem:[#allocation5 + $0x388] sm:$0xff]  ;;  %v3866_v52 = vcombine.high %v952_v42, %v953_v43  ;;  %v3865_v56 = vcombine.low %v952_v42, %v953_v43  ;;  %v4565_v43 = vld [vmem:[#allocation8 + $0x68] sm:$0xff]  }
  0xb9   : > { %619 = vmatprep.subr.bf16.mxu0 %v3822_v63  ;;  %1144 = vmatprep.subr.bf16.mxu1 %v3854_v0  ;;  %v955_v51 = vld [vmem:[#allocation5 + $0x3a8] sm:$0xff]  ;;  %v431_v54 = vld [vmem:[#allocation5 + $0x3c0] sm:$0xff]  ;;  %v3836_v57 = vcombine.high %v429_v46, %v430_v47  ;;  %v3835_v62 = vcombine.low %v429_v46, %v430_v47  ;;  %v324_v47 = vld [vmem:[%s5027_s23 + $0x98] sm:$0xff] }
  0xba   : > { %v432_v55 = vld [vmem:[#allocation5 + $0x3e0] sm:$0xff]  ;;  %v956_v59 = vld [vmem:[#allocation5 + $0x3c8] sm:$0xff]  ;;  %v3868_v61 = vcombine.high %v954_v50, %v955_v51  ;;  %v3867_v63 = vcombine.low %v954_v50, %v955_v51  ;;  %v4552_v51 = vld [vmem:[#allocation8 + $0xb0] sm:$0xff]  }
  0xbb   : > { %v957_v60 = vld [vmem:[#allocation5 + $0x3e8] sm:$0xff]  ;;  %v3838_v0 = vcombine.high %v431_v54, %v432_v55  ;;  %v3837_v2 = vcombine.low %v431_v54, %v432_v55  ;;  %v305_v3 = vld [vmem:[%s5027_s23] sm:$0xff]  ;;  %v323_v55 = vld [vmem:[%s5027_s23 + $0x90] sm:$0xff] }
  0xbc   : > { %620 = vmatpush1.bf16.msra.mxu0 %v3821_v5  ;;  %1145 = vmatpush1.bf16.msra.mxu1 %v3853_v6  ;;  %v3870_v1 = vcombine.high %v956_v59, %v957_v60  ;;  %v3869_v5 = vcombine.low %v956_v59, %v957_v60  ;;  %v310_v6 = vld [vmem:[%s5027_s23 + $0x28] sm:$0xff]  ;;  %v5051_v9 = vpack.c.bf16 %v307_v4, %v305_v3  ;;  %v4545_v27 = vld [vmem:[#allocation8 + $0xd8] sm:$0xff]  }
  0xbd   : > { %621 = vmatprep.subr.bf16.mxu0 %v3824_v7  ;;  %1146 = vmatprep.subr.bf16.mxu1 %v3856_v8  ;;  %v312_v7 = vld [vmem:[%s5027_s23 + $0x38] sm:$0xff]  ;;  %v4539_v8 = vld [vmem:[#allocation8 + $0xc0] sm:$0xff]   ;;  %v313_v30 = vld [vmem:[%s5027_s23 + $0x40] sm:$0xff] }
  0xbe   : > { %v4553_v10 = vld [vmem:[#allocation8 + $0x40] sm:$0xff]   ;;  %v5053_v11 = vpack.c.bf16 %v312_v7, %v310_v6  ;;  %v4546_v34 = vld [vmem:[#allocation8 + $0x98] sm:$0xff]   ;;  %v336_v7 = vld [vmem:[%s5027_s23 + $0xf8] sm:$0xff] }
  0xbf   : > { %v4540_v12 = vld [vmem:[#allocation8 + $0x80] sm:$0xff]   ;;  %v321_v54 = vld [vmem:[%s5027_s23 + $0x80] sm:$0xff] }
  0xc0   : > { %622 = vmatpush1.bf16.msra.mxu0 %v3823_v13  ;;  %1147 = vmatpush1.bf16.msra.mxu1 %v3855_v14  ;;  %v309_v13 = vld [vmem:[%s5027_s23 + $0x20] sm:$0xff]  ;;  %v311_v14 = vld [vmem:[%s5027_s23 + $0x30] sm:$0xff]  ;;  %v314_v17 = vld [vmem:[%s5027_s23 + $0x48] sm:$0xff]  ;;  %v5099_v60 = vpack.c.bf16 %v323_v55, %v321_v54 }
  0xc1   : > { %623 = vmatprep.subr.bf16.mxu0 %v3826_v15  ;;  %1148 = vmatprep.subr.bf16.mxu1 %v3858_v16  ;;  %v4541_v15 = vld [vmem:[#allocation8 + $0xc8] sm:$0xff]   ;;  %v4554_v16 = vld [vmem:[#allocation8] sm:$0xff]   ;;  %v5063_v24 = vpack.c.bf16 %v311_v14, %v309_v13  ;;  %v5065_v26 = vpack.c.bf16 %v316_v18, %v314_v17  ;;  %v4562_v59 = vld [vmem:[#allocation8 + $0xb8] sm:$0xff]  }
  0xc2   : > { %v4547_v35 = vld [vmem:[#allocation8 + $0xe0] sm:$0xff]   ;;  %v329_v4 = vld [vmem:[%s5027_s23 + $0xc0] sm:$0xff]  ;;  %v335_v13 = vld [vmem:[%s5027_s23 + $0xf0] sm:$0xff] }
  0xc3   : > { %v4564_v42 = vld [vmem:[#allocation8 + $0x20] sm:$0xff]   ;;  %v337_v18 = vld [vmem:[%s5027_s23 + $0x100] sm:$0xff]  ;;  %v360_v55 = vld [vmem:[%s5027_s23 + $0x1b8] sm:$0xff] }
  0xc4   : > { %624 = vmatpush1.bf16.msra.mxu0 %v3825_v21  ;;  %1149 = vmatpush1.bf16.msra.mxu1 %v3857_v22  ;;  %v4543_v21 = vld [vmem:[#allocation8 + $0xd0] sm:$0xff]   ;;  %v4556_v22 = vld [vmem:[#allocation8 + $0x8] sm:$0xff]   ;;  %v322_v46 = vld [vmem:[%s5027_s23 + $0x88] sm:$0xff] }
  0xc5   : > { %625 = vmatprep.subr.bf16.mxu0 %v3828_v23  ;;  %1150 = vmatprep.subr.bf16.mxu1 %v3860_v25  ;;  %v4557_v23 = vld [vmem:[#allocation8 + $0x50] sm:$0xff]   ;;  %v334_v6 = vld [vmem:[%s5027_s23 + $0xe8] sm:$0xff] }
  0xc6   : > { %v4544_v25 = vld [vmem:[#allocation8 + $0x90] sm:$0xff]   ;;  %v338_v14 = vld [vmem:[%s5027_s23 + $0x108] sm:$0xff] }
  0xc7   : > { %v358_v54 = vld [vmem:[%s5027_s23 + $0x1a8] sm:$0xff] }
  0xc8   : > { %626 = vmatpush1.bf16.msra.mxu0 %v3827_v29  ;;  %1151 = vmatpush1.bf16.msra.mxu1 %v3859_v31  ;;  %v4559_v29 = vld [vmem:[#allocation8 + $0x58] sm:$0xff]   ;;  %v315_v31 = vld [vmem:[%s5027_s23 + $0x50] sm:$0xff] }
  0xc9   : > { %627 = vmatprep.subr.bf16.mxu0 %v3830_v32  ;;  %1152 = vmatprep.subr.bf16.mxu1 %v3862_v36  ;;  %v318_v32 = vld [vmem:[%s5027_s23 + $0x68] sm:$0xff]  ;;  %v4560_v36 = vld [vmem:[#allocation8 + $0x18] sm:$0xff]   ;;  %v5075_v38 = vpack.c.bf16 %v315_v31, %v313_v30 }
  0xcc   : > { %628 = vmatpush1.bf16.msra.mxu0 %v3829_v37  ;;  %1153 = vmatpush1.bf16.msra.mxu1 %v3861_v39  ;;  %v4563_v37 = vld [vmem:[#allocation8 + $0x60] sm:$0xff]  }
  0xcd   : > { %629 = vmatprep.subr.bf16.mxu0 %v3832_v40  ;;  %1154 = vmatprep.subr.bf16.mxu1 %v3864_v44  ;;  %v4548_v39 = vld [vmem:[#allocation8 + $0xa0] sm:$0xff]   ;;  %v5077_v40 = vpack.c.bf16 %v320_v33, %v318_v32  ;;  %v317_v44 = vld [vmem:[%s5027_s23 + $0x60] sm:$0xff]  ;;  %v347_v33 = vld [vmem:[%s5027_s23 + $0x150] sm:$0xff] }
  0xce   : > { %v345_v32 = vld [vmem:[%s5027_s23 + $0x140] sm:$0xff] }
  0xd0   : > { %630 = vmatpush1.bf16.msra.mxu0 %v3831_v45  ;;  %1155 = vmatpush1.bf16.msra.mxu1 %v3863_v48  ;;  %v319_v45 = vld [vmem:[%s5027_s23 + $0x70] sm:$0xff] }
  0xd1   : > { %631 = vmatprep.subr.bf16.mxu0 %v3834_v49  ;;  %1156 = vmatprep.subr.bf16.mxu1 %v3866_v52  ;;  %v4550_v48 = vld [vmem:[#allocation8 + $0xa8] sm:$0xff]   ;;  %v4551_v49 = vld [vmem:[#allocation8 + $0xf0] sm:$0xff]   ;;  %v5087_v50 = vpack.c.bf16 %v319_v45, %v317_v44  ;;  %v5089_v52 = vpack.c.bf16 %v324_v47, %v322_v46 }
  0xd2   : > { %v4566_v44 = vld [vmem:[#allocation8 + $0x28] sm:$0xff]   ;;  %v4567_v47 = vld [vmem:[#allocation8 + $0x70] sm:$0xff]  }
  0xd4   : > { %632 = vmatpush1.bf16.msra.mxu0 %v3833_v53  ;;  %1157 = vmatpush1.bf16.msra.mxu1 %v3865_v56  ;;  %v4561_v53 = vld [vmem:[#allocation8 + $0xf8] sm:$0xff]   ;;  %v326_v56 = vld [vmem:[%s5027_s23 + $0xa8] sm:$0xff] }
  0xd5   : > { %633 = vmatprep.subr.bf16.mxu0 %v3836_v57  ;;  %1158 = vmatprep.subr.bf16.mxu1 %v3868_v61  ;;  %v328_v57 = vld [vmem:[%s5027_s23 + $0xb8] sm:$0xff] }
  0xd6   : > { %v5101_v61 = vpack.c.bf16 %v328_v57, %v326_v56  ;;  %v4570_v56 = vld [vmem:[#allocation8 + $0x38] sm:$0xff]  }
  0xd8   : > { %634 = vmatpush1.bf16.msra.mxu0 %v3835_v62  ;;  %1159 = vmatpush1.bf16.msra.mxu1 %v3867_v63  ;;  %v325_v62 = vld [vmem:[%s5027_s23 + $0xa0] sm:$0xff]  ;;  %v327_v63 = vld [vmem:[%s5027_s23 + $0xb0] sm:$0xff] }
  0xd9   : > { %635 = vmatprep.subr.bf16.mxu0 %v3838_v0  ;;  %1160 = vmatprep.subr.bf16.mxu1 %v3870_v1  ;;  %v330_v0 = vld [vmem:[%s5027_s23 + $0xc8] sm:$0xff]  ;;  %v332_v1 = vld [vmem:[%s5027_s23 + $0xd8] sm:$0xff] }
  0xda   : > { %v5113_v3 = vpack.c.bf16 %v332_v1, %v330_v0  ;;  %v362_v0 = vld [vmem:[%s5027_s23 + $0x1c8] sm:$0xff]  ;;  %v364_v1 = vld [vmem:[%s5027_s23 + $0x1d8] sm:$0xff] }
  0xdc   : > { %636 = vmatpush1.bf16.msra.mxu0 %v3837_v2  ;;  %1161 = vmatpush1.bf16.msra.mxu1 %v3869_v5  ;;  %v5111_v2 = vpack.c.bf16 %v327_v63, %v325_v62  ;;  %v331_v5 = vld [vmem:[%s5027_s23 + $0xd0] sm:$0xff]  ;;  %v357_v62 = vld [vmem:[%s5027_s23 + $0x1a0] sm:$0xff] }
  0xdd   : > { %4013 = vmatprep.subr.bf16.mxu0 %v4539_v8  ;;  %4125 = vmatprep.subr.bf16.mxu1 %v4553_v10  ;;  %v5123_v8 = vpack.c.bf16 %v331_v5, %v329_v4  ;;  %v5125_v10 = vpack.c.bf16 %v336_v7, %v334_v6  ;;  %v359_v63 = vld [vmem:[%s5027_s23 + $0x1b0] sm:$0xff] }
  0xde   : > { %v5207_v4 = vld [vmem:[#allocation5 + $0x10] sm:$0xff]  ;;  %v5211_v6 = vpack.c.bf16 %v359_v63, %v357_v62 }
  0xdf   : > { %638 = vmatmul.mubr.bf16.vlgmr.msra.gmra.mrb[0].mxu0 %v5051_v9  ;;  %1163 = vmatmul.mubr.bf16.vlgmr.msra.gmra.mrb[0].mxu1 %v5051_v9  ;;  %v5209_v5 = vld [vmem:[#allocation5 + $0x30] sm:$0xff] }
  0xe0   : > { %647 = vmatprep.mubr.bf16.mxu0 %v5053_v11  ;;  %1172 = vmatprep.mubr.bf16.mxu1 %v5053_v11  ;;  %5974 = vst [vmem:[#allocation18_spill] sm:$0xff] %v5211_v6 }
  0xe1   : > { %4014 = vmatpush3.bf16.msra.mxu0 %v4540_v12  ;;  %4126 = vmatpush3.bf16.msra.mxu1 %v4554_v16  ;;  %v333_v12 = vld [vmem:[%s5027_s23 + $0xe0] sm:$0xff] }
  0xe2   : > { %4015 = vmatprep.subr.bf16.mxu0 %v4541_v15  ;;  %4127 = vmatprep.subr.bf16.mxu1 %v4555_v20  ;;  %v340_v15 = vld [vmem:[%s5027_s23 + $0x118] sm:$0xff]  ;;  %v5135_v16 = vpack.c.bf16 %v335_v13, %v333_v12  ;;  %v342_v20 = vld [vmem:[%s5027_s23 + $0x128] sm:$0xff]  ;;  %v3904_v12 = vcombine.high %v5207_v4, %v5209_v5  ;;  %v5217_v13 = vpack.c.bf16 %v364_v1, %v362_v0 }
  0xe3   : > { %v5137_v17 = vpack.c.bf16 %v340_v15, %v338_v14  ;;  %v361_v14 = vld [vmem:[%s5027_s23 + $0x1c0] sm:$0xff]  ;;  %v363_v15 = vld [vmem:[%s5027_s23 + $0x1d0] sm:$0xff] }
  0xe4   : > { %5975 = vst [vmem:[#allocation19_spill] sm:$0xff] %v5217_v13 }
  0xe5   : > { %4016 = vmatpush3.bf16.msra.mxu0 %v4542_v19  ;;  %4128 = vmatpush3.bf16.msra.mxu1 %v4556_v22  ;;  %v339_v19 = vld [vmem:[%s5027_s23 + $0x110] sm:$0xff] }
  0xe6   : > { %4017 = vmatprep.subr.bf16.mxu0 %v4543_v21  ;;  %4129 = vmatprep.subr.bf16.mxu1 %v4557_v23  ;;  %v344_v21 = vld [vmem:[%s5027_s23 + $0x138] sm:$0xff]  ;;  %v5147_v22 = vpack.c.bf16 %v339_v19, %v337_v18  ;;  %v366_v18 = vld [vmem:[%s5027_s23 + $0x1e8] sm:$0xff] }
  0xe7   : > { %648 = vmatmul.mubr.bf16.gmra.mrb[4].mxu0 %v5063_v24  ;;  %1173 = vmatmul.mubr.bf16.gmra.mrb[4].mxu1 %v5063_v24  ;;  %v5149_v23 = vpack.c.bf16 %v344_v21, %v342_v20  ;;  %v368_v19 = vld [vmem:[%s5027_s23 + $0x1f8] sm:$0xff]  ;;  %v5227_v20 = vpack.c.bf16 %v363_v15, %v361_v14 }
  0xe8   : > { %657 = vmatprep.mubr.bf16.mxu0 %v5065_v26  ;;  %1182 = vmatprep.mubr.bf16.mxu1 %v5065_v26  ;;  %v5229_v21 = vpack.c.bf16 %v368_v19, %v366_v18 }
  0xe9   : > { %4018 = vmatpush3.bf16.msra.mxu0 %v4544_v25  ;;  %4130 = vmatpush3.bf16.msra.mxu1 %v4558_v28  ;;  %v341_v25 = vld [vmem:[%s5027_s23 + $0x120] sm:$0xff]  ;;  %v346_v28 = vld [vmem:[%s5027_s23 + $0x148] sm:$0xff]  ;;  %5976 = vst [vmem:[#allocation20_spill] sm:$0xff] %v5227_v20 }
  0xea   : > { %4019 = vmatprep.subr.bf16.mxu0 %v4545_v27  ;;  %4131 = vmatprep.subr.bf16.mxu1 %v4559_v29  ;;  %v343_v27 = vld [vmem:[%s5027_s23 + $0x130] sm:$0xff]  ;;  %v348_v29 = vld [vmem:[%s5027_s23 + $0x158] sm:$0xff]  ;;  %5977 = vst [vmem:[#allocation21_spill] sm:$0xff] %v5229_v21 }
  0xeb   : > { %v5159_v30 = vpack.c.bf16 %v343_v27, %v341_v25  ;;  %v5161_v31 = vpack.c.bf16 %v348_v29, %v346_v28  ;;  %v365_v25 = vld [vmem:[%s5027_s23 + $0x1e0] sm:$0xff]  ;;  %v367_v27 = vld [vmem:[%s5027_s23 + $0x1f0] sm:$0xff]  ;;  %v435_v29 = vlaneseq }
  0xec   : > { %v5237_v28 = vpack.c.bf16 %v367_v27, %v365_v25 }
  0xed   : > { %4020 = vmatpush3.bf16.msra.mxu0 %v4546_v34  ;;  %4132 = vmatpush3.bf16.msra.mxu1 %v4560_v36  ;;  %v350_v34 = vld [vmem:[%s5027_s23 + $0x168] sm:$0xff]  ;;  %v5171_v36 = vpack.c.bf16 %v347_v33, %v345_v32  ;;  %v436_v32 = vshrl.u32 %v435_v29, 7  ;;  %v433_v33 = vld [vmem:[#allocation7] sm:$0x3]  ;;  %v5265_v29 = vld [vmem:[#allocation5 + $0x18] sm:$0xff] }
  0xee   : > { %4021 = vmatprep.subr.bf16.mxu0 %v4547_v35  ;;  %4133 = vmatprep.subr.bf16.mxu1 %v4563_v37  ;;  %v352_v35 = vld [vmem:[%s5027_s23 + $0x178] sm:$0xff]  ;;  %5978 = vst [vmem:[#allocation22_spill] sm:$0xff] %v5237_v28 }
  0xef   : > { %658 = vmatmul.mubr.bf16.gmra.mrb[8].mxu0 %v5075_v38  ;;  %1183 = vmatmul.mubr.bf16.gmra.mrb[8].mxu1 %v5075_v38  ;;  %v5173_v37 = vpack.c.bf16 %v352_v35, %v350_v34  ;;  %v5241_v34 = vsub.s32 0, %v436_v32  ;;  %v958_v35 = vld [vmem:[#allocation7 + $0x2] sm:$0x3] }
  0xf0   : > { %667 = vmatprep.mubr.bf16.mxu0 %v5077_v40  ;;  %1192 = vmatprep.mubr.bf16.mxu1 %v5077_v40 }
  0xf1   : > { %4022 = vmatpush3.bf16.msra.mxu0 %v4548_v39  ;;  %4134 = vmatpush3.bf16.msra.mxu1 %v4564_v42  ;;  %v349_v39 = vld [vmem:[%s5027_s23 + $0x160] sm:$0xff]  ;;  %v354_v42 = vld [vmem:[%s5027_s23 + $0x188] sm:$0xff]  ;;  %5979 = vst [vmem:[#allocation23_spill] sm:$0xff] %v5241_v34 }
  0xf2   : > { %4023 = vmatprep.subr.bf16.mxu0 %v4549_v41  ;;  %4135 = vmatprep.subr.bf16.mxu1 %v4565_v43  ;;  %v351_v41 = vld [vmem:[%s5027_s23 + $0x170] sm:$0xff]  ;;  %v356_v43 = vld [vmem:[%s5027_s23 + $0x198] sm:$0xff] }
  0xf3   : > { %v5183_v45 = vpack.c.bf16 %v351_v41, %v349_v39  ;;  %v5185_v46 = vpack.c.bf16 %v356_v43, %v354_v42  ;;  %v5243_v39 = vsub.s32 1, %v436_v32  ;;  %v5246_v41 = vrot.slane %v433_v33, %v5241_v34  ;;  %v5267_v32 = vld [vmem:[#allocation5 + $0x38] sm:$0xff] }
  0xf4   : > { %v5249_v42 = vrot.slane %v958_v35, %v5241_v34 }
  0xf5   : > { %4024 = vmatpush3.bf16.msra.mxu0 %v4550_v48  ;;  %4136 = vmatpush3.bf16.msra.mxu1 %v4566_v44  ;;  %v4568_v48 = vld [vmem:[#allocation8 + $0x30] sm:$0xff]   ;;  %5980 = vst [vmem:[#allocation24_spill] sm:$0xff] %v5243_v39  ;;  %v5252_v43 = vrot.slane %v433_v33, %v5243_v39  ;;  %v5255_v44 = vrot.slane %v958_v35, %v5243_v39 }
  0xf6   : > { %4025 = vmatprep.subr.bf16.mxu0 %v4551_v49  ;;  %4137 = vmatprep.subr.bf16.mxu1 %v4567_v47  ;;  %v353_v49 = vld [vmem:[%s5027_s23 + $0x180] sm:$0xff] }
  0xf7   : > { %668 = vmatmul.mubr.bf16.gmra.mrb[12].mxu0 %v5087_v50  ;;  %1193 = vmatmul.mubr.bf16.gmra.mrb[12].mxu1 %v5087_v50 }
  0xf8   : > { %677 = vmatprep.mubr.bf16.mxu0 %v5089_v52  ;;  %1202 = vmatprep.mubr.bf16.mxu1 %v5089_v52 }
  0xf9   : > { %4026 = vmatpush3.bf16.msra.mxu0 %v4552_v51  ;;  %4138 = vmatpush3.bf16.msra.mxu1 %v4568_v48  ;;  %v355_v51 = vld [vmem:[%s5027_s23 + $0x190] sm:$0xff] }
  0xfa   : > { %4027 = vmatprep.subr.bf16.mxu0 %v4561_v53  ;;  %v4569_v53 = vld [vmem:[#allocation8 + $0x78] sm:$0xff]   ;;  %v5195_v57 = vpack.c.bf16 %v355_v51, %v353_v49 }
  0xfb   : > { %4139 = vmatprep.subr.bf16.mxu1 %v4569_v53 }
  0xfd   : > { %4028 = vmatpush3.bf16.msra.mxu0 %v4562_v59  ;;  %4140 = vmatpush3.bf16.msra.mxu1 %v4570_v56  ;;  %v5197_v59 = vpack.c.bf16 %v360_v55, %v358_v54 }
  0xfe   : > { %2169 = vmatprep.subr.bf16.mxu0 %v3904_v12 }
  0xff   : > { %678 = vmatmul.mubr.bf16.gmra.mrb[16].mxu0 %v5099_v60  ;;  %1203 = vmatmul.mubr.bf16.gmra.mrb[16].mxu1 %v5099_v60  ;;  %5973 = vst [vmem:[#allocation17_spill] sm:$0xff] %v5197_v59 }
 0x100   : > { %687 = vmatprep.mubr.bf16.mxu0 %v5101_v61  ;;  %1212 = vmatprep.mubr.bf16.mxu1 %v5101_v61 }
 0x107   : > { %688 = vmatmul.mubr.bf16.gmra.mrb[20].mxu0 %v5111_v2  ;;  %1213 = vmatmul.mubr.bf16.gmra.mrb[20].mxu1 %v5111_v2 }
 0x108   : > { %697 = vmatprep.mubr.bf16.mxu0 %v5113_v3  ;;  %1222 = vmatprep.mubr.bf16.mxu1 %v5113_v3 }
 0x10f   : > { %698 = vmatmul.mubr.bf16.gmra.mrb[24].mxu0 %v5123_v8  ;;  %1223 = vmatmul.mubr.bf16.gmra.mrb[24].mxu1 %v5123_v8 }
 0x110   : > { %707 = vmatprep.mubr.bf16.mxu0 %v5125_v10  ;;  %1232 = vmatprep.mubr.bf16.mxu1 %v5125_v10 }
 0x117   : > { %708 = vmatmul.mubr.bf16.gmra.mrb[28].mxu0 %v5135_v16  ;;  %1233 = vmatmul.mubr.bf16.gmra.mrb[28].mxu1 %v5135_v16 }
 0x118   : > { %717 = vmatprep.mubr.bf16.mxu0 %v5137_v17  ;;  %1242 = vmatprep.mubr.bf16.mxu1 %v5137_v17 }
 0x11f   : > { %718 = vmatmul.mubr.bf16.gmra.mrb[32].mxu0 %v5147_v22  ;;  %1243 = vmatmul.mubr.bf16.gmra.mrb[32].mxu1 %v5147_v22 }
 0x120   : > { %727 = vmatprep.mubr.bf16.mxu0 %v5149_v23  ;;  %1252 = vmatprep.mubr.bf16.mxu1 %v5149_v23 }
 0x127   : > { %728 = vmatmul.mubr.bf16.gmra.mrb[36].mxu0 %v5159_v30  ;;  %1253 = vmatmul.mubr.bf16.gmra.mrb[36].mxu1 %v5159_v30 }
 0x128   : > { %737 = vmatprep.mubr.bf16.mxu0 %v5161_v31  ;;  %1262 = vmatprep.mubr.bf16.mxu1 %v5161_v31 }
 0x12f   : > { %738 = vmatmul.mubr.bf16.gmra.mrb[40].mxu0 %v5171_v36  ;;  %1263 = vmatmul.mubr.bf16.gmra.mrb[40].mxu1 %v5171_v36 }
 0x130   : > { %747 = vmatprep.mubr.bf16.mxu0 %v5173_v37  ;;  %1272 = vmatprep.mubr.bf16.mxu1 %v5173_v37 }
 0x137   : > { %748 = vmatmul.mubr.bf16.gmra.mrb[44].mxu0 %v5183_v45  ;;  %1273 = vmatmul.mubr.bf16.gmra.mrb[44].mxu1 %v5183_v45 }
 0x138   : > { %757 = vmatprep.mubr.bf16.mxu0 %v5185_v46  ;;  %1282 = vmatprep.mubr.bf16.mxu1 %v5185_v46 }
 0x13f   : > { %758 = vmatmul.mubr.bf16.gmra.mrb[48].mxu0 %v5195_v57  ;;  %1283 = vmatmul.mubr.bf16.gmra.mrb[48].mxu1 %v5195_v57 }
 0x140   : > { %767 = vmatprep.mubr.bf16.mxu0 %v5197_v59  ;;  %1292 = vmatprep.mubr.bf16.mxu1 %v5197_v59 }
 0x147   : > { %768 = vmatmul.mubr.bf16.gmra.mrb[52].mxu0 %v5211_v6  ;;  %1293 = vmatmul.mubr.bf16.gmra.mrb[52].mxu1 %v5211_v6 }
 0x148   : > { %777 = vmatprep.mubr.bf16.mxu0 %v5217_v13  ;;  %1302 = vmatprep.mubr.bf16.mxu1 %v5217_v13 }
 0x14f   : > { %778 = vmatmul.mubr.bf16.gmra.mrb[56].mxu0 %v5227_v20  ;;  %1303 = vmatmul.mubr.bf16.gmra.mrb[56].mxu1 %v5227_v20  ;;  %v1971_v20 = vld [vmem:[#allocation5 + $0xd0] sm:$0xff] }
 0x150   : > { %787 = vmatprep.mubr.bf16.mxu0 %v5229_v21  ;;  %1312 = vmatprep.mubr.bf16.mxu1 %v5229_v21 }
 0x157   : > { %788 = vmatmul.mubr.bf16.gmra.mrb[60].mxu0 %v5237_v28  ;;  %1313 = vmatmul.mubr.bf16.gmra.mrb[60].mxu1 %v5237_v28 }
 0x1b2   : > { %v639_v47 = vpop.f32.mrb[0].mxu0  ;;  %v1164_v49 = vpop.f32.mrb[0].mxu1 }
 0x1b3   : > { %v640_v48 = vadd.f32 %v639_v47, %v5246_v41  ;;  %v641_v51 = vpop.f32.mrb[1].mxu0  ;;  %v1165_v53 = vadd.f32 %v1164_v49, %v5249_v42  ;;  %v1166_v55 = vpop.f32.mrb[1].mxu1 }
 0x1b4   : > { %v642_v54 = vadd.f32 %v641_v51, %v5252_v43  ;;  %v643_v56 = vpop.f32.mrb[2].mxu0  ;;  %v1167_v63 = vadd.f32 %v1166_v55, %v5255_v44  ;;  %v1168_v1 = vpop.f32.mrb[2].mxu1  ;;  %v1967_v55 = vld [vmem:[#allocation5 + $0x50] sm:$0xff] }
 0x1b5   : > { %v798_v62 = vmax.f32 %v640_v48, 0.0  ;;  %v644_v0 = vadd.f32 %v643_v56, %v5246_v41  ;;  %v645_v12 = vpop.f32.mrb[3].mxu0  ;;  %v1169_v15 = vadd.f32 %v1168_v1, %v5249_v42  ;;  %v1170_v19 = vpop.f32.mrb[3].mxu1  ;;  %v1323_v33 = vmax.f32 %v1165_v53, 0.0  ;;  %v1968_v56 = vld [vmem:[#allocation5 + $0x70] sm:$0xff] }
 0x1b6   : > { %v799_v14 = vmax.f32 %v642_v54, 0.0  ;;  %v646_v18 = vadd.f32 %v645_v12, %v5252_v43  ;;  %v1171_v27 = vadd.f32 %v1170_v19, %v5255_v44  ;;  %v1324_v49 = vmax.f32 %v1167_v63, 0.0 }
 0x1b7   : > { %v800_v25 = vmax.f32 %v644_v0, 0.0  ;;  %v1325_v35 = vmax.f32 %v1169_v15, 0.0  ;;  %v3906_v63 = vcombine.high %v1967_v55, %v1968_v56 }
 0x1b8   : > { %v801_v47 = vmax.f32 %v646_v18, 0.0  ;;  %v1326_v54 = vmax.f32 %v1171_v27, 0.0 }
 0x1b9   : > { %v862_v51 = vpack.c.bf16 %v800_v25, %v798_v62  ;;  %v1387_v1 = vpack.c.bf16 %v1325_v35, %v1323_v33  ;;  %v1969_v35 = vld [vmem:[#allocation5 + $0x90] sm:$0xff] }
 0x1ba   : > { %v863_v12 = vpack.c.bf16 %v801_v47, %v799_v14  ;;  %v649_v0 = vpop.f32.mrb[4].mxu0  ;;  %v1388_v7 = vpack.c.bf16 %v1326_v54, %v1324_v49  ;;  %v1174_v39 = vpop.f32.mrb[4].mxu1  ;;  %v1970_v47 = vld [vmem:[#allocation5 + $0xb0] sm:$0xff] }
 0x1bb   : > { %v650_v19 = vadd.f32 %v649_v0, %v5246_v41  ;;  %v651_v34 = vpop.f32.mrb[5].mxu0  ;;  %v1175_v53 = vadd.f32 %v1174_v39, %v5249_v42  ;;  %v1176_v18 = vpop.f32.mrb[5].mxu1  ;;  %v3908_v48 = vcombine.high %v1969_v35, %v1970_v47 }
 0x1bc   : > { %v652_v15 = vadd.f32 %v651_v34, %v5252_v43  ;;  %v653_v28 = vpop.f32.mrb[6].mxu0  ;;  %1836 = vmatprep.mubr.bf16.mxu1 %v863_v12  ;;  %v1177_v25 = vadd.f32 %v1176_v18, %v5255_v44  ;;  %v1178_v14 = vpop.f32.mrb[6].mxu1  ;;  %1579 = vmatprep.mubr.bf16.mxu0 %v1388_v7 }
 0x1bd   : > { %v802_v62 = vmax.f32 %v650_v19, 0.0  ;;  %v654_v27 = vadd.f32 %v653_v28, %v5246_v41  ;;  %v655_v33 = vpop.f32.mrb[7].mxu0  ;;  %1837 = vmatmul.mubr.bf16.vlgmr.msra.gmra.mrb[64].mxu1 %v862_v51  ;;  %v1179_v39 = vadd.f32 %v1178_v14, %v5249_v42  ;;  %v1180_v54 = vpop.f32.mrb[7].mxu1  ;;  %1580 = vmatmul.mubr.bf16.vlgmr.msra.gmra.mrb[64].mxu0 %v1387_v1  ;;  %v5981_v19 = vcombine.low %v5207_v4, %v5209_v5 }
 0x1be   : > { %v803_v49 = vmax.f32 %v652_v15, 0.0  ;;  %v656_v34 = vadd.f32 %v655_v33, %v5252_v43  ;;  %v1181_v0 = vadd.f32 %v1180_v54, %v5255_v44  ;;  %v3905_v28 = vcombine.low %v1967_v55, %v1968_v56  ;;  %v1972_v33 = vld [vmem:[#allocation5 + $0xf0] sm:$0xff] }
 0x1bf   : > { %v804_v12 = vmax.f32 %v654_v27, 0.0  ;;  %2170 = vmatpush1.bf16.msra.mxu0 %v5981_v19  ;;  %v1327_v7 = vmax.f32 %v1175_v53, 0.0  ;;  %v1329_v18 = vmax.f32 %v1179_v39, 0.0  ;;  %v1328_v15 = vmax.f32 %v1177_v25, 0.0 }
 0x1c0   : > { %v805_v51 = vmax.f32 %v656_v34, 0.0  ;;  %2171 = vmatprep.subr.bf16.mxu0 %v3906_v63  ;;  %v1330_v14 = vmax.f32 %v1181_v0, 0.0  ;;  %v3907_v5 = vcombine.low %v1969_v35, %v1970_v47  ;;  %v1973_v0 = vld [vmem:[#allocation5 + $0x110] sm:$0xff] }
 0x1c1   : > { %v864_v21 = vpack.c.bf16 %v804_v12, %v802_v62  ;;  %v1389_v13 = vpack.c.bf16 %v1329_v18, %v1327_v7  ;;  %v3910_v62 = vcombine.high %v1971_v20, %v1972_v33  ;;  %v1974_v35 = vld [vmem:[#allocation5 + $0x130] sm:$0xff]  ;;  %v3909_v18 = vcombine.low %v1971_v20, %v1972_v33 }
 0x1c2   : > { %v865_v1 = vpack.c.bf16 %v805_v51, %v803_v49  ;;  %v659_v27 = vpop.f32.mrb[8].mxu0  ;;  %v1390_v6 = vpack.c.bf16 %v1330_v14, %v1328_v15  ;;  %v1184_v59 = vpop.f32.mrb[8].mxu1  ;;  %v3911_v20 = vcombine.low %v1973_v0, %v1974_v35 }
 0x1c3   : > { %v660_v54 = vadd.f32 %v659_v27, %v5246_v41  ;;  %v661_v4 = vpop.f32.mrb[9].mxu0  ;;  %2172 = vmatpush1.bf16.msra.mxu0 %v3905_v28  ;;  %v1185_v55 = vadd.f32 %v1184_v59, %v5249_v42  ;;  %v1186_v53 = vpop.f32.mrb[9].mxu1 }
 0x1c4   : > { %v662_v56 = vadd.f32 %v661_v4, %v5252_v43  ;;  %v663_v63 = vpop.f32.mrb[10].mxu0  ;;  %1844 = vmatprep.mubr.bf16.mxu1 %v865_v1  ;;  %2173 = vmatprep.subr.bf16.mxu0 %v3908_v48  ;;  %v1187_v49 = vadd.f32 %v1186_v53, %v5255_v44  ;;  %v1188_v34 = vpop.f32.mrb[10].mxu1  ;;  %v1976_v4 = vld [vmem:[#allocation5 + $0x170] sm:$0xff] }
 0x1c5   : > { %v806_v25 = vmax.f32 %v660_v54, 0.0  ;;  %v664_v39 = vadd.f32 %v663_v63, %v5246_v41  ;;  %1587 = vmatprep.mubr.bf16.mxu0 %v1390_v6  ;;  %v665_v12 = vpop.f32.mrb[11].mxu0  ;;  %1845 = vmatmul.mubr.bf16.gmra.mrb[68].mxu1 %v864_v21  ;;  %v1189_v59 = vadd.f32 %v1188_v34, %v5249_v42  ;;  %v1190_v28 = vpop.f32.mrb[11].mxu1  ;;  %v1331_v51 = vmax.f32 %v1185_v55, 0.0  ;;  %v1975_v54 = vld [vmem:[#allocation5 + $0x150] sm:$0xff] }
 0x1c6   : > { %v807_v47 = vmax.f32 %v662_v56, 0.0  ;;  %v666_v19 = vadd.f32 %v665_v12, %v5252_v43  ;;  %1588 = vmatmul.mubr.bf16.gmra.mrb[68].mxu0 %v1389_v13  ;;  %v1191_v7 = vadd.f32 %v1190_v28, %v5255_v44  ;;  %v3912_v6 = vcombine.high %v1973_v0, %v1974_v35  ;;  %v1978_v0 = vld [vmem:[#allocation5 + $0x1b0] sm:$0xff] }
 0x1c7   : > { %v808_v48 = vmax.f32 %v664_v39, 0.0  ;;  %2174 = vmatpush1.bf16.msra.mxu0 %v3907_v5  ;;  %v1333_v15 = vmax.f32 %v1189_v59, 0.0  ;;  %v1332_v21 = vmax.f32 %v1187_v49, 0.0 }
 0x1c8   : > { %v809_v14 = vmax.f32 %v666_v19, 0.0  ;;  %2175 = vmatprep.subr.bf16.mxu0 %v3910_v62  ;;  %v1334_v27 = vmax.f32 %v1191_v7, 0.0 }
 0x1c9   : > { %v866_v1 = vpack.c.bf16 %v808_v48, %v806_v25  ;;  %v1391_v56 = vpack.c.bf16 %v1333_v15, %v1331_v51  ;;  %v3914_v25 = vcombine.high %v1975_v54, %v1976_v4  ;;  %v1977_v48 = vld [vmem:[#allocation5 + $0x190] sm:$0xff] }
 0x1ca   : > { %v867_v53 = vpack.c.bf16 %v809_v14, %v807_v47  ;;  %v669_v63 = vpop.f32.mrb[12].mxu0  ;;  %v1392_v34 = vpack.c.bf16 %v1334_v27, %v1332_v21  ;;  %v1194_v39 = vpop.f32.mrb[12].mxu1 }
 0x1cb   : > { %v670_v13 = vadd.f32 %v669_v63, %v5246_v41  ;;  %v671_v12 = vpop.f32.mrb[13].mxu0  ;;  %2176 = vmatpush1.bf16.msra.mxu0 %v3909_v18  ;;  %v1195_v33 = vadd.f32 %v1194_v39, %v5249_v42  ;;  %v1196_v55 = vpop.f32.mrb[13].mxu1  ;;  %v3916_v63 = vcombine.high %v1977_v48, %v1978_v0  ;;  %v1979_v39 = vld [vmem:[#allocation5 + $0x1d0] sm:$0xff] }
 0x1cc   : > { %v672_v5 = vadd.f32 %v671_v12, %v5252_v43  ;;  %v673_v62 = vpop.f32.mrb[14].mxu0  ;;  %1852 = vmatprep.mubr.bf16.mxu1 %v867_v53  ;;  %2177 = vmatprep.subr.bf16.mxu0 %v3912_v6  ;;  %v1197_v47 = vadd.f32 %v1196_v55, %v5255_v44  ;;  %v1198_v19 = vpop.f32.mrb[14].mxu1  ;;  %v3913_v6 = vcombine.low %v1975_v54, %v1976_v4  ;;  %v1980_v12 = vld [vmem:[#allocation5 + $0x1f0] sm:$0xff] }
 0x1cd   : > { %v810_v49 = vmax.f32 %v670_v13, 0.0  ;;  %v674_v59 = vadd.f32 %v673_v62, %v5246_v41  ;;  %1595 = vmatprep.mubr.bf16.mxu0 %v1392_v34  ;;  %v675_v28 = vpop.f32.mrb[15].mxu0  ;;  %1853 = vmatmul.mubr.bf16.gmra.mrb[72].mxu1 %v866_v1  ;;  %v1199_v7 = vadd.f32 %v1198_v19, %v5249_v42  ;;  %v1200_v51 = vpop.f32.mrb[15].mxu1  ;;  %v1335_v21 = vmax.f32 %v1195_v33, 0.0 }
 0x1ce   : > { %v811_v35 = vmax.f32 %v672_v5, 0.0  ;;  %v676_v18 = vadd.f32 %v675_v28, %v5252_v43  ;;  %1596 = vmatmul.mubr.bf16.gmra.mrb[72].mxu0 %v1391_v56  ;;  %v1201_v14 = vadd.f32 %v1200_v51, %v5255_v44  ;;  %v1336_v1 = vmax.f32 %v1197_v47, 0.0 }
 0x1cf   : > { %v812_v15 = vmax.f32 %v674_v59, 0.0  ;;  %2178 = vmatpush1.bf16.msra.mxu0 %v3911_v20  ;;  %v1337_v27 = vmax.f32 %v1199_v7, 0.0  ;;  %v3915_v54 = vcombine.low %v1977_v48, %v1978_v0  ;;  %v1982_v48 = vld [vmem:[#allocation5 + $0x230] sm:$0xff] }
 0x1d0   : > { %v813_v53 = vmax.f32 %v676_v18, 0.0  ;;  %2179 = vmatprep.subr.bf16.mxu0 %v3914_v25  ;;  %v1338_v13 = vmax.f32 %v1201_v14, 0.0 }
 0x1d1   : > { %v868_v34 = vpack.c.bf16 %v812_v15, %v810_v49  ;;  %v1393_v5 = vpack.c.bf16 %v1337_v27, %v1335_v21  ;;  %v3918_v49 = vcombine.high %v1979_v39, %v1980_v12  ;;  %v1981_v15 = vld [vmem:[#allocation5 + $0x210] sm:$0xff] }
 0x1d2   : > { %v869_v55 = vpack.c.bf16 %v813_v53, %v811_v35  ;;  %v679_v62 = vpop.f32.mrb[16].mxu0  ;;  %v1394_v19 = vpack.c.bf16 %v1338_v13, %v1336_v1  ;;  %v1204_v59 = vpop.f32.mrb[16].mxu1 }
 0x1d3   : > { %v680_v56 = vadd.f32 %v679_v62, %v5246_v41  ;;  %v681_v28 = vpop.f32.mrb[17].mxu0  ;;  %2180 = vmatpush1.bf16.msra.mxu0 %v3913_v6  ;;  %v1205_v4 = vadd.f32 %v1204_v59, %v5249_v42  ;;  %v1206_v33 = vpop.f32.mrb[17].mxu1  ;;  %v3920_v62 = vcombine.high %v1981_v15, %v1982_v48  ;;  %v1983_v59 = vld [vmem:[#allocation5 + $0x250] sm:$0xff] }
 0x1d4   : > { %v682_v20 = vadd.f32 %v681_v28, %v5252_v43  ;;  %v683_v25 = vpop.f32.mrb[18].mxu0  ;;  %1860 = vmatprep.mubr.bf16.mxu1 %v869_v55  ;;  %2181 = vmatprep.subr.bf16.mxu0 %v3916_v63  ;;  %v1207_v35 = vadd.f32 %v1206_v33, %v5255_v44  ;;  %v1208_v18 = vpop.f32.mrb[18].mxu1  ;;  %v3917_v63 = vcombine.low %v1979_v39, %v1980_v12  ;;  %v1984_v28 = vld [vmem:[#allocation5 + $0x270] sm:$0xff] }
 0x1d5   : > { %v814_v47 = vmax.f32 %v680_v56, 0.0  ;;  %v684_v7 = vadd.f32 %v683_v25, %v5246_v41  ;;  %1603 = vmatprep.mubr.bf16.mxu0 %v1394_v19  ;;  %v685_v51 = vpop.f32.mrb[19].mxu0  ;;  %1861 = vmatmul.mubr.bf16.gmra.mrb[76].mxu1 %v868_v34  ;;  %v1209_v14 = vadd.f32 %v1208_v18, %v5249_v42  ;;  %v1210_v21 = vpop.f32.mrb[19].mxu1  ;;  %v1339_v1 = vmax.f32 %v1205_v4, 0.0 }
 0x1d6   : > { %v815_v0 = vmax.f32 %v682_v20, 0.0  ;;  %v686_v6 = vadd.f32 %v685_v51, %v5252_v43  ;;  %1604 = vmatmul.mubr.bf16.gmra.mrb[76].mxu0 %v1393_v5  ;;  %v1211_v53 = vadd.f32 %v1210_v21, %v5255_v44  ;;  %v1340_v34 = vmax.f32 %v1207_v35, 0.0 }
 0x1d7   : > { %v816_v27 = vmax.f32 %v684_v7, 0.0  ;;  %2182 = vmatpush1.bf16.msra.mxu0 %v3915_v54  ;;  %v1341_v13 = vmax.f32 %v1209_v14, 0.0  ;;  %v3919_v39 = vcombine.low %v1981_v15, %v1982_v48  ;;  %v1986_v15 = vld [vmem:[#allocation5 + $0x2b0] sm:$0xff] }
 0x1d8   : > { %v817_v55 = vmax.f32 %v686_v6, 0.0  ;;  %2183 = vmatprep.subr.bf16.mxu0 %v3918_v49  ;;  %v1342_v56 = vmax.f32 %v1211_v53, 0.0 }
 0x1d9   : > { %v870_v19 = vpack.c.bf16 %v816_v27, %v814_v47  ;;  %v1395_v20 = vpack.c.bf16 %v1341_v13, %v1339_v1  ;;  %v3922_v47 = vcombine.high %v1983_v59, %v1984_v28  ;;  %v1985_v27 = vld [vmem:[#allocation5 + $0x290] sm:$0xff] }
 0x1da   : > { %v871_v33 = vpack.c.bf16 %v817_v55, %v815_v0  ;;  %v689_v25 = vpop.f32.mrb[20].mxu0  ;;  %v1396_v18 = vpack.c.bf16 %v1342_v56, %v1340_v34  ;;  %v1214_v7 = vpop.f32.mrb[20].mxu1 }
 0x1db   : > { %v690_v5 = vadd.f32 %v689_v25, %v5246_v41  ;;  %v691_v51 = vpop.f32.mrb[21].mxu0  ;;  %2184 = vmatpush1.bf16.msra.mxu0 %v3917_v63  ;;  %v1215_v12 = vadd.f32 %v1214_v7, %v5249_v42  ;;  %v1216_v4 = vpop.f32.mrb[21].mxu1  ;;  %v3924_v25 = vcombine.high %v1985_v27, %v1986_v15  ;;  %v1987_v7 = vld [vmem:[#allocation5 + $0x2d0] sm:$0xff] }
 0x1dc   : > { %v692_v54 = vadd.f32 %v691_v51, %v5252_v43  ;;  %v693_v49 = vpop.f32.mrb[22].mxu0  ;;  %1868 = vmatprep.mubr.bf16.mxu1 %v871_v33  ;;  %2185 = vmatprep.subr.bf16.mxu0 %v3920_v62  ;;  %v1217_v0 = vadd.f32 %v1216_v4, %v5255_v44  ;;  %v1218_v6 = vpop.f32.mrb[22].mxu1  ;;  %v3921_v62 = vcombine.low %v1983_v59, %v1984_v28  ;;  %v1988_v51 = vld [vmem:[#allocation5 + $0x2f0] sm:$0xff] }
 0x1dd   : > { %v818_v35 = vmax.f32 %v690_v5, 0.0  ;;  %v694_v14 = vadd.f32 %v693_v49, %v5246_v41  ;;  %1611 = vmatprep.mubr.bf16.mxu0 %v1396_v18  ;;  %v695_v21 = vpop.f32.mrb[23].mxu0  ;;  %1869 = vmatmul.mubr.bf16.gmra.mrb[80].mxu1 %v870_v19  ;;  %v1219_v53 = vadd.f32 %v1218_v6, %v5249_v42  ;;  %v1220_v1 = vpop.f32.mrb[23].mxu1  ;;  %v1343_v34 = vmax.f32 %v1215_v12, 0.0 }
 0x1de   : > { %v819_v48 = vmax.f32 %v692_v54, 0.0  ;;  %v696_v63 = vadd.f32 %v695_v21, %v5252_v43  ;;  %1612 = vmatmul.mubr.bf16.gmra.mrb[80].mxu0 %v1395_v20  ;;  %v1221_v55 = vadd.f32 %v1220_v1, %v5255_v44  ;;  %v1344_v19 = vmax.f32 %v1217_v0, 0.0 }
 0x1df   : > { %v820_v13 = vmax.f32 %v694_v14, 0.0  ;;  %2186 = vmatpush1.bf16.msra.mxu0 %v3919_v39  ;;  %v1345_v56 = vmax.f32 %v1219_v53, 0.0  ;;  %v3923_v59 = vcombine.low %v1985_v27, %v1986_v15  ;;  %v1990_v27 = vld [vmem:[#allocation5 + $0x330] sm:$0xff] }
 0x1e0   : > { %v821_v33 = vmax.f32 %v696_v63, 0.0  ;;  %2187 = vmatprep.subr.bf16.mxu0 %v3922_v47  ;;  %v1346_v5 = vmax.f32 %v1221_v55, 0.0 }
 0x1e1   : > { %v872_v18 = vpack.c.bf16 %v820_v13, %v818_v35  ;;  %v1397_v54 = vpack.c.bf16 %v1345_v56, %v1343_v34  ;;  %v3926_v35 = vcombine.high %v1987_v7, %v1988_v51  ;;  %v1989_v13 = vld [vmem:[#allocation5 + $0x310] sm:$0xff] }
 0x1e2   : > { %v873_v4 = vpack.c.bf16 %v821_v33, %v819_v48  ;;  %v699_v49 = vpop.f32.mrb[24].mxu0  ;;  %v1398_v6 = vpack.c.bf16 %v1346_v5, %v1344_v19  ;;  %v1224_v14 = vpop.f32.mrb[24].mxu1 }
 0x1e3   : > { %v700_v20 = vadd.f32 %v699_v49, %v5246_v41  ;;  %v701_v21 = vpop.f32.mrb[25].mxu0  ;;  %2188 = vmatpush1.bf16.msra.mxu0 %v3921_v62  ;;  %v1225_v28 = vadd.f32 %v1224_v14, %v5249_v42  ;;  %v1226_v12 = vpop.f32.mrb[25].mxu1  ;;  %v3928_v49 = vcombine.high %v1989_v13, %v1990_v27  ;;  %v1991_v14 = vld [vmem:[#allocation5 + $0x350] sm:$0xff] }
 0x1e4   : > { %v702_v39 = vadd.f32 %v701_v21, %v5252_v43  ;;  %v703_v47 = vpop.f32.mrb[26].mxu0  ;;  %1876 = vmatprep.mubr.bf16.mxu1 %v873_v4  ;;  %2189 = vmatprep.subr.bf16.mxu0 %v3924_v25  ;;  %v1227_v48 = vadd.f32 %v1226_v12, %v5255_v44  ;;  %v1228_v63 = vpop.f32.mrb[26].mxu1  ;;  %v3925_v25 = vcombine.low %v1987_v7, %v1988_v51  ;;  %v1992_v21 = vld [vmem:[#allocation5 + $0x370] sm:$0xff] }
 0x1e5   : > { %v822_v0 = vmax.f32 %v700_v20, 0.0  ;;  %v704_v53 = vadd.f32 %v703_v47, %v5246_v41  ;;  %1619 = vmatprep.mubr.bf16.mxu0 %v1398_v6  ;;  %v705_v1 = vpop.f32.mrb[27].mxu0  ;;  %1877 = vmatmul.mubr.bf16.gmra.mrb[84].mxu1 %v872_v18  ;;  %v1229_v55 = vadd.f32 %v1228_v63, %v5249_v42  ;;  %v1230_v34 = vpop.f32.mrb[27].mxu1  ;;  %v1347_v19 = vmax.f32 %v1225_v28, 0.0 }
 0x1e6   : > { %v823_v15 = vmax.f32 %v702_v39, 0.0  ;;  %v706_v62 = vadd.f32 %v705_v1, %v5252_v43  ;;  %1620 = vmatmul.mubr.bf16.gmra.mrb[84].mxu0 %v1397_v54  ;;  %v1231_v33 = vadd.f32 %v1230_v34, %v5255_v44  ;;  %v1348_v18 = vmax.f32 %v1227_v48, 0.0 }
 0x1e7   : > { %v824_v56 = vmax.f32 %v704_v53, 0.0  ;;  %2190 = vmatpush1.bf16.msra.mxu0 %v3923_v59  ;;  %v1349_v5 = vmax.f32 %v1229_v55, 0.0  ;;  %v3927_v7 = vcombine.low %v1989_v13, %v1990_v27  ;;  %v1994_v13 = vld [vmem:[#allocation5 + $0x3b0] sm:$0xff] }
 0x1e8   : > { %v825_v4 = vmax.f32 %v706_v62, 0.0  ;;  %2191 = vmatprep.subr.bf16.mxu0 %v3926_v35  ;;  %v1350_v20 = vmax.f32 %v1231_v33, 0.0 }
 0x1e9   : > { %v874_v6 = vpack.c.bf16 %v824_v56, %v822_v0  ;;  %v1399_v39 = vpack.c.bf16 %v1349_v5, %v1347_v19  ;;  %v3930_v0 = vcombine.high %v1991_v14, %v1992_v21  ;;  %v1993_v56 = vld [vmem:[#allocation5 + $0x390] sm:$0xff] }
 0x1ea   : > { %v875_v12 = vpack.c.bf16 %v825_v4, %v823_v15  ;;  %v709_v47 = vpop.f32.mrb[28].mxu0  ;;  %v1400_v63 = vpack.c.bf16 %v1350_v20, %v1348_v18  ;;  %v1234_v53 = vpop.f32.mrb[28].mxu1 }
 0x1eb   : > { %v710_v54 = vadd.f32 %v709_v47, %v5246_v41  ;;  %v711_v1 = vpop.f32.mrb[29].mxu0  ;;  %2192 = vmatpush1.bf16.msra.mxu0 %v3925_v25  ;;  %v1235_v51 = vadd.f32 %v1234_v53, %v5249_v42  ;;  %v1236_v28 = vpop.f32.mrb[29].mxu1  ;;  %v3932_v47 = vcombine.high %v1993_v56, %v1994_v13  ;;  %v1995_v53 = vld [vmem:[#allocation5 + $0x3d0] sm:$0xff] }
 0x1ec   : > { %v712_v59 = vadd.f32 %v711_v1, %v5252_v43  ;;  %v713_v35 = vpop.f32.mrb[30].mxu0  ;;  %1884 = vmatprep.mubr.bf16.mxu1 %v875_v12  ;;  %2193 = vmatprep.subr.bf16.mxu0 %v3928_v49  ;;  %v1237_v15 = vadd.f32 %v1236_v28, %v5255_v44  ;;  %v1238_v62 = vpop.f32.mrb[30].mxu1  ;;  %v3929_v49 = vcombine.low %v1991_v14, %v1992_v21  ;;  %v1996_v1 = vld [vmem:[#allocation5 + $0x3f0] sm:$0xff] }
 0x1ed   : > { %v826_v48 = vmax.f32 %v710_v54, 0.0  ;;  %v714_v55 = vadd.f32 %v713_v35, %v5246_v41  ;;  %1627 = vmatprep.mubr.bf16.mxu0 %v1400_v63  ;;  %v715_v34 = vpop.f32.mrb[31].mxu0  ;;  %1885 = vmatmul.mubr.bf16.gmra.mrb[88].mxu1 %v874_v6  ;;  %v1239_v33 = vadd.f32 %v1238_v62, %v5249_v42  ;;  %v1240_v19 = vpop.f32.mrb[31].mxu1  ;;  %v1351_v18 = vmax.f32 %v1235_v51, 0.0 }
 0x1ee   : > { %v827_v27 = vmax.f32 %v712_v59, 0.0  ;;  %v716_v25 = vadd.f32 %v715_v34, %v5252_v43  ;;  %1628 = vmatmul.mubr.bf16.gmra.mrb[88].mxu0 %v1399_v39  ;;  %v1241_v4 = vadd.f32 %v1240_v19, %v5255_v44  ;;  %v1352_v6 = vmax.f32 %v1237_v15, 0.0 }
 0x1ef   : > { %v828_v5 = vmax.f32 %v714_v55, 0.0  ;;  %2194 = vmatpush1.bf16.msra.mxu0 %v3927_v7  ;;  %v1353_v20 = vmax.f32 %v1239_v33, 0.0  ;;  %v3931_v14 = vcombine.low %v1993_v56, %v1994_v13 }
 0x1f0   : > { %v829_v12 = vmax.f32 %v716_v25, 0.0  ;;  %2195 = vmatprep.subr.bf16.mxu0 %v3930_v0  ;;  %v1354_v54 = vmax.f32 %v1241_v4, 0.0 }
 0x1f1   : > { %v876_v63 = vpack.c.bf16 %v828_v5, %v826_v48  ;;  %v1401_v59 = vpack.c.bf16 %v1353_v20, %v1351_v18  ;;  %v3934_v48 = vcombine.high %v1995_v53, %v1996_v1  ;;  %v3933_v20 = vcombine.low %v1995_v53, %v1996_v1 }
 0x1f2   : > { %v877_v28 = vpack.c.bf16 %v829_v12, %v827_v27  ;;  %v719_v35 = vpop.f32.mrb[32].mxu0  ;;  %v1402_v62 = vpack.c.bf16 %v1354_v54, %v1352_v6  ;;  %v1244_v55 = vpop.f32.mrb[32].mxu1  ;;  %v3952_v54 = vcombine.high %v5265_v29, %v5267_v32 }
 0x1f3   : > { %v720_v39 = vadd.f32 %v719_v35, %v5246_v41  ;;  %v721_v34 = vpop.f32.mrb[33].mxu0  ;;  %2196 = vmatpush1.bf16.msra.mxu0 %v3929_v49  ;;  %v1245_v21 = vadd.f32 %v1244_v55, %v5249_v42  ;;  %v1246_v51 = vpop.f32.mrb[33].mxu1 }
 0x1f4   : > { %v722_v7 = vadd.f32 %v721_v34, %v5252_v43  ;;  %v723_v0 = vpop.f32.mrb[34].mxu0  ;;  %1892 = vmatprep.mubr.bf16.mxu1 %v877_v28  ;;  %2197 = vmatprep.subr.bf16.mxu0 %v3932_v47  ;;  %v1247_v27 = vadd.f32 %v1246_v51, %v5255_v44  ;;  %v1248_v25 = vpop.f32.mrb[34].mxu1 }
 0x1f5   : > { %v830_v15 = vmax.f32 %v720_v39, 0.0  ;;  %v724_v33 = vadd.f32 %v723_v0, %v5246_v41  ;;  %1635 = vmatprep.mubr.bf16.mxu0 %v1402_v62  ;;  %v725_v19 = vpop.f32.mrb[35].mxu0  ;;  %1893 = vmatmul.mubr.bf16.gmra.mrb[92].mxu1 %v876_v63  ;;  %v1249_v56 = vadd.f32 %v1248_v25, %v5249_v42  ;;  %v1250_v4 = vpop.f32.mrb[35].mxu1  ;;  %v1355_v12 = vmax.f32 %v1245_v21, 0.0 }
 0x1f6   : > { %v831_v5 = vmax.f32 %v722_v7, 0.0  ;;  %v726_v13 = vadd.f32 %v725_v19, %v5252_v43  ;;  %1636 = vmatmul.mubr.bf16.gmra.mrb[92].mxu0 %v1401_v59  ;;  %v1251_v18 = vadd.f32 %v1250_v4, %v5255_v44  ;;  %v1356_v63 = vmax.f32 %v1247_v27, 0.0 }
 0x1f7   : > { %v832_v49 = vmax.f32 %v724_v33, 0.0  ;;  %2198 = vmatpush1.bf16.msra.mxu0 %v3931_v14  ;;  %v1357_v47 = vmax.f32 %v1249_v56, 0.0 }
 0x1f8   : > { %v833_v6 = vmax.f32 %v726_v13, 0.0  ;;  %2199 = vmatprep.subr.bf16.mxu0 %v3934_v48  ;;  %v1358_v35 = vmax.f32 %v1251_v18, 0.0 }
 0x1f9   : > { %v878_v28 = vpack.c.bf16 %v832_v49, %v830_v15  ;;  %v1403_v62 = vpack.c.bf16 %v1357_v47, %v1355_v12 }
 0x1fa   : > { %v879_v39 = vpack.c.bf16 %v833_v6, %v831_v5  ;;  %v729_v55 = vpop.f32.mrb[36].mxu0  ;;  %v1404_v34 = vpack.c.bf16 %v1358_v35, %v1356_v63  ;;  %v1254_v7 = vpop.f32.mrb[36].mxu1 }
 0x1fb   : > { %v730_v59 = vadd.f32 %v729_v55, %v5246_v41  ;;  %v731_v51 = vpop.f32.mrb[37].mxu0  ;;  %2200 = vmatpush1.bf16.msra.mxu0 %v3933_v20  ;;  %v1255_v53 = vadd.f32 %v1254_v7, %v5249_v42  ;;  %v1256_v14 = vpop.f32.mrb[37].mxu1 }
 0x1fc   : > { %v732_v1 = vadd.f32 %v731_v51, %v5252_v43  ;;  %v733_v21 = vpop.f32.mrb[38].mxu0  ;;  %1900 = vmatprep.mubr.bf16.mxu1 %v879_v39  ;;  %2983 = vmatprep.subr.bf16.mxu0 %v3952_v54  ;;  %v1257_v48 = vadd.f32 %v1256_v14, %v5255_v44  ;;  %v1258_v27 = vpop.f32.mrb[38].mxu1 }
 0x1fd   : > { %v834_v0 = vmax.f32 %v730_v59, 0.0  ;;  %v734_v15 = vadd.f32 %v733_v21, %v5246_v41  ;;  %1643 = vmatprep.mubr.bf16.mxu0 %v1404_v34  ;;  %v735_v33 = vpop.f32.mrb[39].mxu0  ;;  %1901 = vmatmul.mubr.bf16.gmra.mrb[96].mxu1 %v878_v28  ;;  %v1259_v19 = vadd.f32 %v1258_v27, %v5249_v42  ;;  %v1260_v56 = vpop.f32.mrb[39].mxu1  ;;  %v1359_v49 = vmax.f32 %v1255_v53, 0.0 }
 0x1fe   : > { %v835_v25 = vmax.f32 %v732_v1, 0.0  ;;  %v736_v5 = vadd.f32 %v735_v33, %v5252_v43  ;;  %1644 = vmatmul.mubr.bf16.gmra.mrb[96].mxu0 %v1403_v62  ;;  %v1261_v4 = vadd.f32 %v1260_v56, %v5255_v44  ;;  %v1360_v12 = vmax.f32 %v1257_v48, 0.0 }
 0x1ff   : > { %v836_v13 = vmax.f32 %v734_v15, 0.0  ;;  %v1361_v18 = vmax.f32 %v1259_v19, 0.0 }
 0x200   : > { %v837_v20 = vmax.f32 %v736_v5, 0.0  ;;  %v1362_v6 = vmax.f32 %v1261_v4, 0.0 }
 0x201   : > { %v880_v47 = vpack.c.bf16 %v836_v13, %v834_v0  ;;  %v1405_v54 = vpack.c.bf16 %v1361_v18, %v1359_v49 }
 0x202   : > { %v881_v63 = vpack.c.bf16 %v837_v20, %v835_v25  ;;  %v739_v35 = vpop.f32.mrb[40].mxu0  ;;  %v1406_v28 = vpack.c.bf16 %v1362_v6, %v1360_v12  ;;  %v1264_v55 = vpop.f32.mrb[40].mxu1 }
 0x203   : > { %v740_v39 = vadd.f32 %v739_v35, %v5246_v41  ;;  %v741_v34 = vpop.f32.mrb[41].mxu0  ;;  %v1265_v59 = vadd.f32 %v1264_v55, %v5249_v42  ;;  %v1266_v7 = vpop.f32.mrb[41].mxu1 }
 0x204   : > { %v742_v62 = vadd.f32 %v741_v34, %v5252_v43  ;;  %v743_v51 = vpop.f32.mrb[42].mxu0  ;;  %1908 = vmatprep.mubr.bf16.mxu1 %v881_v63  ;;  %v1267_v1 = vadd.f32 %v1266_v7, %v5255_v44  ;;  %v1268_v21 = vpop.f32.mrb[42].mxu1  ;;  %1651 = vmatprep.mubr.bf16.mxu0 %v1406_v28 }
 0x205   : > { %v838_v53 = vmax.f32 %v740_v39, 0.0  ;;  %v744_v14 = vadd.f32 %v743_v51, %v5246_v41  ;;  %v745_v0 = vpop.f32.mrb[43].mxu0  ;;  %1909 = vmatmul.mubr.bf16.gmra.mrb[100].mxu1 %v880_v47  ;;  %v1269_v15 = vadd.f32 %v1268_v21, %v5249_v42  ;;  %v1270_v33 = vpop.f32.mrb[43].mxu1  ;;  %v1363_v5 = vmax.f32 %v1265_v59, 0.0 }
 0x206   : > { %v839_v48 = vmax.f32 %v742_v62, 0.0  ;;  %v746_v27 = vadd.f32 %v745_v0, %v5252_v43  ;;  %1652 = vmatmul.mubr.bf16.gmra.mrb[100].mxu0 %v1405_v54  ;;  %v1271_v19 = vadd.f32 %v1270_v33, %v5255_v44  ;;  %v1364_v4 = vmax.f32 %v1267_v1, 0.0 }
 0x207   : > { %v840_v25 = vmax.f32 %v744_v14, 0.0  ;;  %v1365_v56 = vmax.f32 %v1269_v15, 0.0 }
 0x208   : > { %v841_v13 = vmax.f32 %v746_v27, 0.0  ;;  %v1366_v18 = vmax.f32 %v1271_v19, 0.0 }
 0x209   : > { %v882_v49 = vpack.c.bf16 %v840_v25, %v838_v53  ;;  %v1407_v20 = vpack.c.bf16 %v1365_v56, %v1363_v5 }
 0x20a   : > { %v883_v12 = vpack.c.bf16 %v841_v13, %v839_v48  ;;  %v749_v6 = vpop.f32.mrb[44].mxu0  ;;  %v1408_v47 = vpack.c.bf16 %v1366_v18, %v1364_v4  ;;  %v1274_v35 = vpop.f32.mrb[44].mxu1 }
 0x20b   : > { %v750_v63 = vadd.f32 %v749_v6, %v5246_v41  ;;  %v751_v28 = vpop.f32.mrb[45].mxu0  ;;  %v1275_v39 = vadd.f32 %v1274_v35, %v5249_v42  ;;  %v1276_v55 = vpop.f32.mrb[45].mxu1 }
 0x20c   : > { %v752_v54 = vadd.f32 %v751_v28, %v5252_v43  ;;  %v753_v34 = vpop.f32.mrb[46].mxu0  ;;  %1916 = vmatprep.mubr.bf16.mxu1 %v883_v12  ;;  %v1277_v62 = vadd.f32 %v1276_v55, %v5255_v44  ;;  %v1278_v51 = vpop.f32.mrb[46].mxu1  ;;  %1659 = vmatprep.mubr.bf16.mxu0 %v1408_v47 }
 0x20d   : > { %v842_v59 = vmax.f32 %v750_v63, 0.0  ;;  %v754_v7 = vadd.f32 %v753_v34, %v5246_v41  ;;  %v755_v53 = vpop.f32.mrb[47].mxu0  ;;  %1917 = vmatmul.mubr.bf16.gmra.mrb[104].mxu1 %v882_v49  ;;  %v1279_v14 = vadd.f32 %v1278_v51, %v5249_v42  ;;  %v1280_v0 = vpop.f32.mrb[47].mxu1  ;;  %v1367_v27 = vmax.f32 %v1275_v39, 0.0 }
 0x20e   : > { %v843_v1 = vmax.f32 %v752_v54, 0.0  ;;  %v756_v21 = vadd.f32 %v755_v53, %v5252_v43  ;;  %1660 = vmatmul.mubr.bf16.gmra.mrb[104].mxu0 %v1407_v20  ;;  %v1281_v15 = vadd.f32 %v1280_v0, %v5255_v44  ;;  %v1368_v19 = vmax.f32 %v1277_v62, 0.0 }
 0x20f   : > { %v844_v48 = vmax.f32 %v754_v7, 0.0  ;;  %v1369_v33 = vmax.f32 %v1279_v14, 0.0 }
 0x210   : > { %v845_v25 = vmax.f32 %v756_v21, 0.0  ;;  %v1370_v56 = vmax.f32 %v1281_v15, 0.0 }
 0x211   : > { %v884_v5 = vpack.c.bf16 %v844_v48, %v842_v59  ;;  %v1409_v13 = vpack.c.bf16 %v1369_v33, %v1367_v27 }
 0x212   : > { %v885_v4 = vpack.c.bf16 %v845_v25, %v843_v1  ;;  %v759_v18 = vpop.f32.mrb[48].mxu0  ;;  %v1410_v49 = vpack.c.bf16 %v1370_v56, %v1368_v19  ;;  %v1284_v6 = vpop.f32.mrb[48].mxu1 }
 0x213   : > { %v760_v12 = vadd.f32 %v759_v18, %v5246_v41  ;;  %v761_v47 = vpop.f32.mrb[49].mxu0  ;;  %v1285_v63 = vadd.f32 %v1284_v6, %v5249_v42  ;;  %v1286_v35 = vpop.f32.mrb[49].mxu1 }
 0x214   : > { %v762_v20 = vadd.f32 %v761_v47, %v5252_v43  ;;  %v763_v28 = vpop.f32.mrb[50].mxu0  ;;  %1924 = vmatprep.mubr.bf16.mxu1 %v885_v4  ;;  %v1287_v54 = vadd.f32 %v1286_v35, %v5255_v44  ;;  %v1288_v34 = vpop.f32.mrb[50].mxu1  ;;  %1667 = vmatprep.mubr.bf16.mxu0 %v1410_v49 }
 0x215   : > { %v846_v39 = vmax.f32 %v760_v12, 0.0  ;;  %v764_v55 = vadd.f32 %v763_v28, %v5246_v41  ;;  %v765_v59 = vpop.f32.mrb[51].mxu0  ;;  %1925 = vmatmul.mubr.bf16.gmra.mrb[108].mxu1 %v884_v5  ;;  %v1289_v7 = vadd.f32 %v1288_v34, %v5249_v42  ;;  %v1290_v53 = vpop.f32.mrb[51].mxu1  ;;  %v1371_v21 = vmax.f32 %v1285_v63, 0.0 }
 0x216   : > { %v847_v62 = vmax.f32 %v762_v20, 0.0  ;;  %v766_v51 = vadd.f32 %v765_v59, %v5252_v43  ;;  %1668 = vmatmul.mubr.bf16.gmra.mrb[108].mxu0 %v1409_v13  ;;  %v1291_v14 = vadd.f32 %v1290_v53, %v5255_v44  ;;  %v1372_v15 = vmax.f32 %v1287_v54, 0.0  ;;  %v4571_v54 = vld [vmem:[#allocation8 + $0x140] sm:$0xff]  }
 0x217   : > { %v848_v1 = vmax.f32 %v764_v55, 0.0  ;;  %v1373_v0 = vmax.f32 %v1289_v7, 0.0  ;;  %4237 = vmatprep.subr.bf16.mxu1 %v4571_v54  ;;  %v4572_v53 = vld [vmem:[#allocation8 + $0x100] sm:$0xff]  }
 0x218   : > { %v849_v48 = vmax.f32 %v766_v51, 0.0  ;;  %v1374_v33 = vmax.f32 %v1291_v14, 0.0  ;;  %4238 = vmatpush3.bf16.msra.mxu1 %v4572_v53 }
 0x219   : > { %v886_v27 = vpack.c.bf16 %v848_v1, %v846_v39  ;;  %v1411_v25 = vpack.c.bf16 %v1373_v0, %v1371_v21 }
 0x21a   : > { %v887_v19 = vpack.c.bf16 %v849_v48, %v847_v62  ;;  %v769_v56 = vpop.f32.mrb[52].mxu0  ;;  %v1412_v5 = vpack.c.bf16 %v1374_v33, %v1372_v15  ;;  %v1294_v18 = vpop.f32.mrb[52].mxu1 }
 0x21b   : > { %v770_v4 = vadd.f32 %v769_v56, %v5246_v41  ;;  %v771_v49 = vpop.f32.mrb[53].mxu0  ;;  %v1295_v12 = vadd.f32 %v1294_v18, %v5249_v42  ;;  %v1296_v6 = vpop.f32.mrb[53].mxu1 }
 0x21c   : > { %v772_v13 = vadd.f32 %v771_v49, %v5252_v43  ;;  %v773_v47 = vpop.f32.mrb[54].mxu0  ;;  %1932 = vmatprep.mubr.bf16.mxu1 %v887_v19  ;;  %v1297_v20 = vadd.f32 %v1296_v6, %v5255_v44  ;;  %v1298_v28 = vpop.f32.mrb[54].mxu1  ;;  %1675 = vmatprep.mubr.bf16.mxu0 %v1412_v5 }
 0x21d   : > { %v850_v63 = vmax.f32 %v770_v4, 0.0  ;;  %v774_v35 = vadd.f32 %v773_v47, %v5246_v41  ;;  %v775_v39 = vpop.f32.mrb[55].mxu0  ;;  %1933 = vmatmul.mubr.bf16.gmra.mrb[112].mxu1 %v886_v27  ;;  %v1299_v34 = vadd.f32 %v1298_v28, %v5249_v42  ;;  %v1300_v62 = vpop.f32.mrb[55].mxu1  ;;  %v1375_v1 = vmax.f32 %v1295_v12, 0.0 }
 0x21e   : > { %v851_v55 = vmax.f32 %v772_v13, 0.0  ;;  %v776_v59 = vadd.f32 %v775_v39, %v5252_v43  ;;  %1676 = vmatmul.mubr.bf16.gmra.mrb[112].mxu0 %v1411_v25  ;;  %v1301_v51 = vadd.f32 %v1300_v62, %v5255_v44  ;;  %v1376_v0 = vmax.f32 %v1297_v20, 0.0 }
 0x21f   : > { %v852_v7 = vmax.f32 %v774_v35, 0.0  ;;  %v1377_v14 = vmax.f32 %v1299_v34, 0.0 }
 0x220   : > { %v853_v21 = vmax.f32 %v776_v59, 0.0  ;;  %v1378_v15 = vmax.f32 %v1301_v51, 0.0 }
 0x221   : > { %v888_v48 = vpack.c.bf16 %v852_v7, %v850_v63  ;;  %v1413_v27 = vpack.c.bf16 %v1377_v14, %v1375_v1 }
 0x222   : > { %v889_v33 = vpack.c.bf16 %v853_v21, %v851_v55  ;;  %v779_v19 = vpop.f32.mrb[56].mxu0  ;;  %v1414_v56 = vpack.c.bf16 %v1378_v15, %v1376_v0  ;;  %v1304_v4 = vpop.f32.mrb[56].mxu1 }
 0x223   : > { %v780_v5 = vadd.f32 %v779_v19, %v5246_v41  ;;  %v781_v25 = vpop.f32.mrb[57].mxu0  ;;  %v1305_v18 = vadd.f32 %v1304_v4, %v5249_v42  ;;  %v1306_v13 = vpop.f32.mrb[57].mxu1 }
 0x224   : > { %v782_v49 = vadd.f32 %v781_v25, %v5252_v43  ;;  %v783_v12 = vpop.f32.mrb[58].mxu0  ;;  %1940 = vmatprep.mubr.bf16.mxu1 %v889_v33  ;;  %v1307_v47 = vadd.f32 %v1306_v13, %v5255_v44  ;;  %v1308_v20 = vpop.f32.mrb[58].mxu1  ;;  %1683 = vmatprep.mubr.bf16.mxu0 %v1414_v56 }
 0x225   : > { %v854_v6 = vmax.f32 %v780_v5, 0.0  ;;  %v784_v63 = vadd.f32 %v783_v12, %v5246_v41  ;;  %v785_v35 = vpop.f32.mrb[59].mxu0  ;;  %1941 = vmatmul.mubr.bf16.gmra.mrb[116].mxu1 %v888_v48  ;;  %v1309_v39 = vadd.f32 %v1308_v20, %v5249_v42  ;;  %v1310_v55 = vpop.f32.mrb[59].mxu1  ;;  %v1379_v62 = vmax.f32 %v1305_v18, 0.0 }
 0x226   : > { %v855_v28 = vmax.f32 %v782_v49, 0.0  ;;  %v786_v54 = vadd.f32 %v785_v35, %v5252_v43  ;;  %1684 = vmatmul.mubr.bf16.gmra.mrb[116].mxu0 %v1413_v27  ;;  %v1311_v59 = vadd.f32 %v1310_v55, %v5255_v44  ;;  %v1380_v53 = vmax.f32 %v1307_v47, 0.0  ;;  %v4573_v47 = vld [vmem:[#allocation8 + $0x148] sm:$0xff]  }
 0x227   : > { %v856_v34 = vmax.f32 %v784_v63, 0.0  ;;  %v1381_v7 = vmax.f32 %v1309_v39, 0.0  ;;  %4239 = vmatprep.subr.bf16.mxu1 %v4573_v47  ;;  %v4574_v55 = vld [vmem:[#allocation8 + $0x108] sm:$0xff]  }
 0x228   : > { %v857_v51 = vmax.f32 %v786_v54, 0.0  ;;  %v1382_v14 = vmax.f32 %v1311_v59, 0.0  ;;  %4240 = vmatpush3.bf16.msra.mxu1 %v4574_v55  ;;  %v2793_v55 = vld [vmem:[#allocation5 + $0x1d8] sm:$0xff] }
 0x229   : > { %v890_v1 = vpack.c.bf16 %v856_v34, %v854_v6  ;;  %v1415_v21 = vpack.c.bf16 %v1381_v7, %v1379_v62 }
 0x22a   : > { %v891_v0 = vpack.c.bf16 %v857_v51, %v855_v28  ;;  %v789_v15 = vpop.f32.mrb[60].mxu0  ;;  %v1416_v48 = vpack.c.bf16 %v1382_v14, %v1380_v53  ;;  %v1314_v19 = vpop.f32.mrb[60].mxu1 }
 0x22b   : > { %v790_v33 = vadd.f32 %v789_v15, %v5246_v41  ;;  %v791_v56 = vpop.f32.mrb[61].mxu0  ;;  %v1315_v5 = vadd.f32 %v1314_v19, %v5249_v42  ;;  %v1316_v4 = vpop.f32.mrb[61].mxu1  ;;  %v4575_v15 = vld [vmem:[#allocation8 + $0x150] sm:$0xff]  }
 0x22c   : > { %v792_v27 = vadd.f32 %v791_v56, %v5252_v43  ;;  %v793_v25 = vpop.f32.mrb[62].mxu0  ;;  %1948 = vmatprep.mubr.bf16.mxu1 %v891_v0  ;;  %v1317_v49 = vadd.f32 %v1316_v4, %v5255_v44  ;;  %v1318_v12 = vpop.f32.mrb[62].mxu1  ;;  %1691 = vmatprep.mubr.bf16.mxu0 %v1416_v48  ;;  %v2784_v0 = vld [vmem:[#allocation5 + $0xb8] sm:$0xff]  ;;  %v5982_v48 = vcombine.low %v5265_v29, %v5267_v32 }
 0x22d   : > { %v858_v18 = vmax.f32 %v790_v33, 0.0  ;;  %v794_v13 = vadd.f32 %v793_v25, %v5246_v41  ;;  %v795_v6 = vpop.f32.mrb[63].mxu0  ;;  %1949 = vmatmul.mubr.bf16.gmra.mrb[120].mxu1 %v890_v1  ;;  %v1319_v20 = vadd.f32 %v1318_v12, %v5249_v42  ;;  %v1320_v28 = vpop.f32.mrb[63].mxu1  ;;  %v1383_v34 = vmax.f32 %v1315_v5, 0.0  ;;  %v2781_v42 = vld [vmem:[#allocation5 + $0x58] sm:$0xff]  ;;  %4241 = vmatprep.subr.bf16.mxu1 %v4575_v15 }
 0x22e   : > { %v859_v63 = vmax.f32 %v792_v27, 0.0  ;;  %v796_v35 = vadd.f32 %v795_v6, %v5252_v43  ;;  %1692 = vmatmul.mubr.bf16.gmra.mrb[120].mxu0 %v1415_v21  ;;  %v1321_v54 = vadd.f32 %v1320_v28, %v5255_v44  ;;  %v1384_v62 = vmax.f32 %v1317_v49, 0.0  ;;  %v2782_v43 = vld [vmem:[#allocation5 + $0x78] sm:$0xff] }
 0x22f   : > { %v860_v39 = vmax.f32 %v794_v13, 0.0  ;;  %v1385_v59 = vmax.f32 %v1319_v20, 0.0  ;;  %v3954_v44 = vcombine.high %v2781_v42, %v2782_v43  ;;  %v2783_v21 = vld [vmem:[#allocation5 + $0x98] sm:$0xff]  ;;  %v3953_v33 = vcombine.low %v2781_v42, %v2782_v43 }
 0x230   : > { %v861_v41 = vmax.f32 %v796_v35, 0.0  ;;  %v1386_v51 = vmax.f32 %v1321_v54, 0.0  ;;  %v4576_v19 = vld [vmem:[#allocation8 + $0x110] sm:$0xff]   ;;  %v3956_v56 = vcombine.high %v2783_v21, %v2784_v0  ;;  %v3955_v4 = vcombine.low %v2783_v21, %v2784_v0  ;;  %v4577_v35 = vld [vmem:[#allocation8 + $0x158] sm:$0xff]   ;;  %v4579_v0 = vld [vmem:[#allocation8 + $0x160] sm:$0xff]  }
 0x231   : > { %v892_v7 = vpack.c.bf16 %v860_v39, %v858_v18  ;;  %v1417_v53 = vpack.c.bf16 %v1385_v59, %v1383_v34  ;;  %v2785_v5 = vld [vmem:[#allocation5 + $0xd8] sm:$0xff]  ;;  %4242 = vmatpush3.bf16.msra.mxu1 %v4576_v19  ;;  %v4578_v39 = vld [vmem:[#allocation8 + $0x118] sm:$0xff]  }
 0x232   : > { %v893_v1 = vpack.c.bf16 %v861_v41, %v859_v63  ;;  %v1418_v14 = vpack.c.bf16 %v1386_v51, %v1384_v62  ;;  %v2786_v27 = vld [vmem:[#allocation5 + $0xf8] sm:$0xff]  ;;  %4243 = vmatprep.subr.bf16.mxu1 %v4577_v35  ;;  %v4582_v35 = vld [vmem:[#allocation8 + $0x128] sm:$0xff]  }
 0x233   : > { %v3958_v25 = vcombine.high %v2785_v5, %v2786_v27  ;;  %v2787_v18 = vld [vmem:[#allocation5 + $0x118] sm:$0xff]  ;;  %v3957_v29 = vcombine.low %v2785_v5, %v2786_v27 }
 0x234   : > { %1956 = vmatprep.mubr.bf16.mxu1 %v893_v1  ;;  %1699 = vmatprep.mubr.bf16.mxu0 %v1418_v14  ;;  %v2788_v49 = vld [vmem:[#allocation5 + $0x138] sm:$0xff] }
 0x235   : > { %1957 = vmatmul.mubr.bf16.gmra.mrb[124].mxu1 %v892_v7  ;;  %v3960_v32 = vcombine.high %v2787_v18, %v2788_v49  ;;  %v2789_v13 = vld [vmem:[#allocation5 + $0x158] sm:$0xff]  ;;  %v3959_v6 = vcombine.low %v2787_v18, %v2788_v49 }
 0x236   : > { %1700 = vmatmul.mubr.bf16.gmra.mrb[124].mxu0 %v1417_v53  ;;  %v2790_v12 = vld [vmem:[#allocation5 + $0x178] sm:$0xff]  ;;  %4244 = vmatpush3.bf16.msra.mxu1 %v4578_v39 }
 0x237   : > { %2201 = vmatprep.mubr.bf16.mxu0 %v5043_v58  ;;  %v3962_v47 = vcombine.high %v2789_v13, %v2790_v12  ;;  %v2791_v63 = vld [vmem:[#allocation5 + $0x198] sm:$0xff]  ;;  %v3961_v28 = vcombine.low %v2789_v13, %v2790_v12  ;;  %4245 = vmatprep.subr.bf16.mxu1 %v4579_v0 }
 0x238   : > { %v2792_v20 = vld [vmem:[#allocation5 + $0x1b8] sm:$0xff] }
 0x239   : > { %v3964_v54 = vcombine.high %v2791_v63, %v2792_v20  ;;  %v2794_v34 = vld [vmem:[#allocation5 + $0x1f8] sm:$0xff]  ;;  %v3963_v59 = vcombine.low %v2791_v63, %v2792_v20  ;;  %v4581_v63 = vld [vmem:[#allocation8 + $0x168] sm:$0xff]  }
 0x23a   : > { %v3966_v41 = vcombine.high %v2793_v55, %v2794_v34  ;;  %v2795_v62 = vld [vmem:[#allocation5 + $0x218] sm:$0xff]  ;;  %v3965_v51 = vcombine.low %v2793_v55, %v2794_v34 }
 0x23b   : > { %v2796_v7 = vld [vmem:[#allocation5 + $0x238] sm:$0xff] }
 0x23c   : > { %v3968_v53 = vcombine.high %v2795_v62, %v2796_v7  ;;  %v2797_v1 = vld [vmem:[#allocation5 + $0x258] sm:$0xff]  ;;  %v3967_v42 = vcombine.low %v2795_v62, %v2796_v7  ;;  %v4585_v7 = vld [vmem:[#allocation8 + $0x178] sm:$0xff]  }
 0x23d   : > { %v2798_v14 = vld [vmem:[#allocation5 + $0x278] sm:$0xff] }
 0x23e   : > { %2202 = vmatmul.mubr.bf16.vlgmr.msra.gmra.mrb[128].mxu0 %v5051_v9  ;;  %v3970_v43 = vcombine.high %v2797_v1, %v2798_v14  ;;  %v2800_v21 = vld [vmem:[#allocation5 + $0x2b8] sm:$0xff]  ;;  %v3969_v15 = vcombine.low %v2797_v1, %v2798_v14 }
 0x23f   : > { %2984 = vmatpush1.bf16.msra.mxu0 %v5982_v48  ;;  %2211 = vmatprep.mubr.bf16.mxu0 %v5053_v11  ;;  %v4580_v48 = vld [vmem:[#allocation8 + $0x120] sm:$0xff]   ;;  %v2801_v19 = vld [vmem:[#allocation5 + $0x2d8] sm:$0xff] }
 0x240   : > { %2985 = vmatprep.subr.bf16.mxu0 %v3954_v44  ;;  %v2799_v44 = vld [vmem:[#allocation5 + $0x298] sm:$0xff]  ;;  %4246 = vmatpush3.bf16.msra.mxu1 %v4580_v48 }
 0x241   : > { %v3971_v5 = vcombine.low %v2799_v44, %v2800_v21  ;;  %4247 = vmatprep.subr.bf16.mxu1 %v4581_v63  ;;  %v2809_v39 = vld [vmem:[#allocation5 + $0x3d8] sm:$0xff] }
 0x242   : > { %v4584_v62 = vld [vmem:[#allocation8 + $0x130] sm:$0xff]  }
 0x243   : > { %2986 = vmatpush1.bf16.msra.mxu0 %v3953_v33  ;;  %v3972_v33 = vcombine.high %v2799_v44, %v2800_v21 }
 0x244   : > { %2987 = vmatprep.subr.bf16.mxu0 %v3956_v56  ;;  %v2802_v56 = vld [vmem:[#allocation5 + $0x2f8] sm:$0xff]  ;;  %4248 = vmatpush3.bf16.msra.mxu1 %v4582_v35 }
 0x245   : > { %v3974_v27 = vcombine.high %v2801_v19, %v2802_v56  ;;  %v3973_v18 = vcombine.low %v2801_v19, %v2802_v56 }
 0x246   : > { %2212 = vmatmul.mubr.bf16.gmra.mrb[132].mxu0 %v5063_v24 }
 0x247   : > { %2221 = vmatprep.mubr.bf16.mxu0 %v5065_v26  ;;  %2988 = vmatpush1.bf16.msra.mxu0 %v3955_v4  ;;  %v2803_v4 = vld [vmem:[#allocation5 + $0x318] sm:$0xff] }
 0x248   : > { %2989 = vmatprep.subr.bf16.mxu0 %v3958_v25  ;;  %v2804_v25 = vld [vmem:[#allocation5 + $0x338] sm:$0xff] }
 0x249   : > { %v3976_v49 = vcombine.high %v2803_v4, %v2804_v25  ;;  %v3975_v13 = vcombine.low %v2803_v4, %v2804_v25 }
 0x24b   : > { %2990 = vmatpush1.bf16.msra.mxu0 %v3957_v29  ;;  %v2805_v29 = vld [vmem:[#allocation5 + $0x358] sm:$0xff] }
 0x24c   : > { %2991 = vmatprep.subr.bf16.mxu0 %v3960_v32  ;;  %v2806_v32 = vld [vmem:[#allocation5 + $0x378] sm:$0xff] }
 0x24d   : > { %v3978_v12 = vcombine.high %v2805_v29, %v2806_v32  ;;  %v3977_v20 = vcombine.low %v2805_v29, %v2806_v32 }
 0x24e   : > { %2222 = vmatmul.mubr.bf16.gmra.mrb[136].mxu0 %v5075_v38 }
 0x24f   : > { %2231 = vmatprep.mubr.bf16.mxu0 %v5077_v40  ;;  %2992 = vmatpush1.bf16.msra.mxu0 %v3959_v6  ;;  %v2807_v6 = vld [vmem:[#allocation5 + $0x398] sm:$0xff] }
 0x250   : > { %2993 = vmatprep.subr.bf16.mxu0 %v3962_v47  ;;  %v2808_v47 = vld [vmem:[#allocation5 + $0x3b8] sm:$0xff] }
 0x251   : > { %v3979_v55 = vcombine.low %v2807_v6, %v2808_v47 }
 0x253   : > { %2994 = vmatpush1.bf16.msra.mxu0 %v3961_v28  ;;  %v3980_v28 = vcombine.high %v2807_v6, %v2808_v47 }
 0x254   : > { %2995 = vmatprep.subr.bf16.mxu0 %v3964_v54  ;;  %v2810_v54 = vld [vmem:[#allocation5 + $0x3f8] sm:$0xff] }
 0x255   : > { %v3982_v34 = vcombine.high %v2809_v39, %v2810_v54 }
 0x256   : > { %2232 = vmatmul.mubr.bf16.gmra.mrb[140].mxu0 %v5087_v50 }
 0x257   : > { %2241 = vmatprep.mubr.bf16.mxu0 %v5089_v52  ;;  %2996 = vmatpush1.bf16.msra.mxu0 %v3963_v59  ;;  %v3981_v59 = vcombine.low %v2809_v39, %v2810_v54  ;;  %v4587_v54 = vld [vmem:[#allocation8 + $0x1c0] sm:$0xff]  }
 0x258   : > { %2997 = vmatprep.subr.bf16.mxu0 %v3966_v41  ;;  %v4583_v41 = vld [vmem:[#allocation8 + $0x170] sm:$0xff]  }
 0x259   : > { %4249 = vmatprep.subr.bf16.mxu1 %v4583_v41 }
 0x25a   : > { %4250 = vmatpush3.bf16.msra.mxu1 %v4584_v62 }
 0x25b   : > { %2998 = vmatpush1.bf16.msra.mxu0 %v3965_v51  ;;  %4251 = vmatprep.subr.bf16.mxu1 %v4585_v7  ;;  %v4586_v51 = vld [vmem:[#allocation8 + $0x138] sm:$0xff]  }
 0x25c   : > { %2999 = vmatprep.subr.bf16.mxu0 %v3968_v53 }
 0x25e   : > { %2242 = vmatmul.mubr.bf16.gmra.mrb[144].mxu0 %v5099_v60  ;;  %4252 = vmatpush3.bf16.msra.mxu1 %v4586_v51 }
 0x25f   : > { %2251 = vmatprep.mubr.bf16.mxu0 %v5101_v61  ;;  %3000 = vmatpush1.bf16.msra.mxu0 %v3967_v42 }
 0x260   : > { %3001 = vmatprep.subr.bf16.mxu0 %v3970_v43  ;;  %4349 = vmatprep.subr.bf16.mxu1 %v4587_v54 }
 0x263   : > { %3002 = vmatpush1.bf16.msra.mxu0 %v3969_v15 }
 0x264   : > { %3003 = vmatprep.subr.bf16.mxu0 %v3972_v33 }
 0x266   : > { %2252 = vmatmul.mubr.bf16.gmra.mrb[148].mxu0 %v5111_v2 }
 0x267   : > { %2261 = vmatprep.mubr.bf16.mxu0 %v5113_v3  ;;  %3004 = vmatpush1.bf16.msra.mxu0 %v3971_v5 }
 0x268   : > { %3005 = vmatprep.subr.bf16.mxu0 %v3974_v27 }
 0x26b   : > { %3006 = vmatpush1.bf16.msra.mxu0 %v3973_v18 }
 0x26c   : > { %3007 = vmatprep.subr.bf16.mxu0 %v3976_v49 }
 0x26e   : > { %2262 = vmatmul.mubr.bf16.gmra.mrb[152].mxu0 %v5123_v8 }
 0x26f   : > { %2271 = vmatprep.mubr.bf16.mxu0 %v5125_v10  ;;  %3008 = vmatpush1.bf16.msra.mxu0 %v3975_v13 }
 0x270   : > { %3009 = vmatprep.subr.bf16.mxu0 %v3978_v12 }
 0x273   : > { %3010 = vmatpush1.bf16.msra.mxu0 %v3977_v20 }
 0x274   : > { %3011 = vmatprep.subr.bf16.mxu0 %v3980_v28  ;;  %v5983_v28 = vld [vmem:[#allocation17_spill] sm:$0xff] }
 0x276   : > { %2272 = vmatmul.mubr.bf16.gmra.mrb[156].mxu0 %v5135_v16 }
 0x277   : > { %2281 = vmatprep.mubr.bf16.mxu0 %v5137_v17  ;;  %3012 = vmatpush1.bf16.msra.mxu0 %v3979_v55 }
 0x278   : > { %3013 = vmatprep.subr.bf16.mxu0 %v3982_v34 }
 0x27b   : > { %3014 = vmatpush1.bf16.msra.mxu0 %v3981_v59 }
 0x27e   : > { %2282 = vmatmul.mubr.bf16.gmra.mrb[160].mxu0 %v5147_v22 }
 0x27f   : > { %2291 = vmatprep.mubr.bf16.mxu0 %v5149_v23 }
 0x286   : > { %2292 = vmatmul.mubr.bf16.gmra.mrb[164].mxu0 %v5159_v30 }
 0x287   : > { %2301 = vmatprep.mubr.bf16.mxu0 %v5161_v31 }
 0x28e   : > { %2302 = vmatmul.mubr.bf16.gmra.mrb[168].mxu0 %v5171_v36 }
 0x28f   : > { %2311 = vmatprep.mubr.bf16.mxu0 %v5173_v37 }
 0x290   : > { %v4141_v53 = vpop.f32.mrb[64].mxu1  ;;  %v4029_v1 = vpop.f32.mrb[64].mxu0 }
 0x291   : > { %v4142_v14 = vpop.f32.mrb[65].mxu1  ;;  %v4030_v42 = vpop.f32.mrb[65].mxu0 }
 0x292   : > { %v4143_v43 = vadd.f32 %v4142_v14, %v4141_v53  ;;  %v4144_v44 = vpop.f32.mrb[66].mxu1  ;;  %v4031_v21 = vadd.f32 %v4030_v42, %v4029_v1  ;;  %v4032_v0 = vpop.f32.mrb[66].mxu0 }
 0x293   : > { %v4145_v15 = vpop.f32.mrb[67].mxu1  ;;  %v4033_v48 = vpop.f32.mrb[67].mxu0 }
 0x294   : > { %v4146_v33 = vadd.f32 %v4145_v15, %v4144_v44  ;;  %v5422_v19 = vadd.f32 %v4143_v43, %v4031_v21  ;;  %v4034_v56 = vadd.f32 %v4033_v48, %v4032_v0  ;;  %v5984_v44 = vld [vmem:[#allocation18_spill] sm:$0xff]  ;;  %v5985_v0 = vld [vmem:[#allocation19_spill] sm:$0xff] }
 0x296   : > { %2312 = vmatmul.mubr.bf16.gmra.mrb[172].mxu0 %v5183_v45  ;;  %v5425_v5 = vadd.f32 %v4146_v33, %v4034_v56 }
 0x297   : > { %2321 = vmatprep.mubr.bf16.mxu0 %v5185_v46 }
 0x298   : > { %v4147_v27 = vpop.f32.mrb[68].mxu1 }
 0x299   : > { %v4035_v4 = vpop.f32.mrb[68].mxu0  ;;  %v4148_v25 = vpop.f32.mrb[69].mxu1 }
 0x29a   : > { %v4036_v18 = vpop.f32.mrb[69].mxu0  ;;  %v4149_v49 = vadd.f32 %v4148_v25, %v4147_v27  ;;  %v4150_v29 = vpop.f32.mrb[70].mxu1 }
 0x29b   : > { %v4037_v32 = vadd.f32 %v4036_v18, %v4035_v4  ;;  %v4038_v13 = vpop.f32.mrb[70].mxu0  ;;  %v4151_v12 = vpop.f32.mrb[71].mxu1 }
 0x29c   : > { %v4039_v6 = vpop.f32.mrb[71].mxu0  ;;  %v4152_v47 = vadd.f32 %v4151_v12, %v4150_v29 }
 0x29d   : > { %v5428_v63 = vadd.f32 %v4149_v49, %v4037_v32  ;;  %v4040_v20 = vadd.f32 %v4039_v6, %v4038_v13  ;;  %v5986_v6 = vld [vmem:[#allocation20_spill] sm:$0xff] }
 0x29e   : > { %2322 = vmatmul.mubr.bf16.gmra.mrb[176].mxu0 %v5195_v57 }
 0x29f   : > { %v5431_v35 = vadd.f32 %v4152_v47, %v4040_v20  ;;  %2331 = vmatprep.mubr.bf16.mxu0 %v5983_v28  ;;  %v5987_v20 = vld [vmem:[#allocation21_spill] sm:$0xff] }
 0x2a0   : > { %v4153_v39 = vpop.f32.mrb[72].mxu1 }
 0x2a1   : > { %v4041_v55 = vpop.f32.mrb[72].mxu0  ;;  %v4154_v34 = vpop.f32.mrb[73].mxu1 }
 0x2a2   : > { %v4042_v59 = vpop.f32.mrb[73].mxu0  ;;  %v4155_v41 = vadd.f32 %v4154_v34, %v4153_v39  ;;  %v4156_v62 = vpop.f32.mrb[74].mxu1 }
 0x2a3   : > { %v4043_v7 = vadd.f32 %v4042_v59, %v4041_v55  ;;  %v4044_v51 = vpop.f32.mrb[74].mxu0  ;;  %v4157_v53 = vpop.f32.mrb[75].mxu1 }
 0x2a4   : > { %v4045_v1 = vpop.f32.mrb[75].mxu0  ;;  %v4158_v14 = vadd.f32 %v4157_v53, %v4156_v62 }
 0x2a5   : > { %v5434_v42 = vadd.f32 %v4155_v41, %v4043_v7  ;;  %v4046_v43 = vadd.f32 %v4045_v1, %v4044_v51 }
 0x2a6   : > { %2332 = vmatmul.mubr.bf16.gmra.mrb[180].mxu0 %v5984_v44 }
 0x2a7   : > { %v5437_v21 = vadd.f32 %v4158_v14, %v4046_v43  ;;  %2341 = vmatprep.mubr.bf16.mxu0 %v5985_v0 }
 0x2a8   : > { %v4159_v15 = vpop.f32.mrb[76].mxu1 }
 0x2a9   : > { %v4047_v48 = vpop.f32.mrb[76].mxu0  ;;  %v4160_v33 = vpop.f32.mrb[77].mxu1 }
 0x2aa   : > { %v4048_v56 = vpop.f32.mrb[77].mxu0  ;;  %v4161_v27 = vadd.f32 %v4160_v33, %v4159_v15  ;;  %v4162_v4 = vpop.f32.mrb[78].mxu1  ;;  %v5988_v15 = vld [vmem:[#allocation22_spill] sm:$0xff] }
 0x2ab   : > { %v4049_v25 = vadd.f32 %v4048_v56, %v4047_v48  ;;  %v4050_v18 = vpop.f32.mrb[78].mxu0  ;;  %v4163_v49 = vpop.f32.mrb[79].mxu1 }
 0x2ac   : > { %v4051_v29 = vpop.f32.mrb[79].mxu0  ;;  %v4164_v32 = vadd.f32 %v4163_v49, %v4162_v4 }
 0x2ad   : > { %v5440_v13 = vadd.f32 %v4161_v27, %v4049_v25  ;;  %v4052_v12 = vadd.f32 %v4051_v29, %v4050_v18 }
 0x2ae   : > { %2342 = vmatmul.mubr.bf16.gmra.mrb[184].mxu0 %v5986_v6 }
 0x2af   : > { %v5443_v47 = vadd.f32 %v4164_v32, %v4052_v12  ;;  %2351 = vmatprep.mubr.bf16.mxu0 %v5987_v20 }
 0x2b0   : > { %v4165_v39 = vpop.f32.mrb[80].mxu1 }
 0x2b1   : > { %v4053_v54 = vpop.f32.mrb[80].mxu0  ;;  %v4166_v55 = vpop.f32.mrb[81].mxu1 }
 0x2b2   : > { %v4054_v34 = vpop.f32.mrb[81].mxu0  ;;  %v4167_v59 = vadd.f32 %v4166_v55, %v4165_v39  ;;  %v4168_v41 = vpop.f32.mrb[82].mxu1 }
 0x2b3   : > { %v4055_v62 = vadd.f32 %v4054_v34, %v4053_v54  ;;  %v4056_v7 = vpop.f32.mrb[82].mxu0  ;;  %v4169_v51 = vpop.f32.mrb[83].mxu1 }
 0x2b4   : > { %v4057_v53 = vpop.f32.mrb[83].mxu0  ;;  %v4170_v1 = vadd.f32 %v4169_v51, %v4168_v41 }
 0x2b5   : > { %v5446_v14 = vadd.f32 %v4167_v59, %v4055_v62  ;;  %v4058_v43 = vadd.f32 %v4057_v53, %v4056_v7 }
 0x2b6   : > { %2352 = vmatmul.mubr.bf16.gmra.mrb[188].mxu0 %v5988_v15 }
 0x2b7   : > { %v5449_v48 = vadd.f32 %v4170_v1, %v4058_v43  ;;  %3015 = vmatprep.mubr.bf16.mxu0 %v5043_v58 }
 0x2b8   : > { %v4171_v33 = vpop.f32.mrb[84].mxu1 }
 0x2b9   : > { %v4059_v56 = vpop.f32.mrb[84].mxu0  ;;  %v4172_v27 = vpop.f32.mrb[85].mxu1 }
 0x2ba   : > { %v4060_v4 = vpop.f32.mrb[85].mxu0  ;;  %v4173_v25 = vadd.f32 %v4172_v27, %v4171_v33  ;;  %v4174_v18 = vpop.f32.mrb[86].mxu1 }
 0x2bb   : > { %v4061_v49 = vadd.f32 %v4060_v4, %v4059_v56  ;;  %v4062_v29 = vpop.f32.mrb[86].mxu0  ;;  %v4175_v32 = vpop.f32.mrb[87].mxu1 }
 0x2bc   : > { %v4063_v12 = vpop.f32.mrb[87].mxu0  ;;  %v4176_v39 = vadd.f32 %v4175_v32, %v4174_v18 }
 0x2bd   : > { %v5452_v54 = vadd.f32 %v4173_v25, %v4061_v49  ;;  %v4064_v55 = vadd.f32 %v4063_v12, %v4062_v29 }
 0x2be   : > { %3016 = vmatmul.mubr.bf16.vlgmr.msra.gmra.mrb[192].mxu0 %v5051_v9 }
 0x2bf   : > { %v5455_v34 = vadd.f32 %v4176_v39, %v4064_v55  ;;  %3025 = vmatprep.mubr.bf16.mxu0 %v5053_v11 }
 0x2c0   : > { %v4177_v58 = vpop.f32.mrb[88].mxu1 }
 0x2c1   : > { %v4065_v59 = vpop.f32.mrb[88].mxu0  ;;  %v4178_v41 = vpop.f32.mrb[89].mxu1 }
 0x2c2   : > { %v4066_v62 = vpop.f32.mrb[89].mxu0  ;;  %v4179_v7 = vadd.f32 %v4178_v41, %v4177_v58  ;;  %v4180_v51 = vpop.f32.mrb[90].mxu1 }
 0x2c3   : > { %v4067_v53 = vadd.f32 %v4066_v62, %v4065_v59  ;;  %v4068_v1 = vpop.f32.mrb[90].mxu0  ;;  %v4181_v43 = vpop.f32.mrb[91].mxu1 }
 0x2c4   : > { %v4069_v33 = vpop.f32.mrb[91].mxu0  ;;  %v4182_v56 = vadd.f32 %v4181_v43, %v4180_v51 }
 0x2c5   : > { %v5458_v27 = vadd.f32 %v4179_v7, %v4067_v53  ;;  %v4070_v4 = vadd.f32 %v4069_v33, %v4068_v1 }
 0x2c6   : > { %3026 = vmatmul.mubr.bf16.gmra.mrb[196].mxu0 %v5063_v24 }
 0x2c7   : > { %v5461_v9 = vadd.f32 %v4182_v56, %v4070_v4  ;;  %3035 = vmatprep.mubr.bf16.mxu0 %v5065_v26 }
 0x2c8   : > { %v4183_v11 = vpop.f32.mrb[92].mxu1 }
 0x2c9   : > { %v4071_v25 = vpop.f32.mrb[92].mxu0  ;;  %v4184_v18 = vpop.f32.mrb[93].mxu1 }
 0x2ca   : > { %v4072_v49 = vpop.f32.mrb[93].mxu0  ;;  %v4185_v29 = vadd.f32 %v4184_v18, %v4183_v11  ;;  %v4186_v32 = vpop.f32.mrb[94].mxu1 }
 0x2cb   : > { %v4073_v12 = vadd.f32 %v4072_v49, %v4071_v25  ;;  %v4074_v39 = vpop.f32.mrb[94].mxu0  ;;  %v4187_v55 = vpop.f32.mrb[95].mxu1 }
 0x2cc   : > { %v4075_v58 = vpop.f32.mrb[95].mxu0  ;;  %v4188_v59 = vadd.f32 %v4187_v55, %v4186_v32 }
 0x2cd   : > { %v5464_v41 = vadd.f32 %v4185_v29, %v4073_v12  ;;  %v4076_v62 = vadd.f32 %v4075_v58, %v4074_v39 }
 0x2ce   : > { %3036 = vmatmul.mubr.bf16.gmra.mrb[200].mxu0 %v5075_v38 }
 0x2cf   : > { %v5467_v24 = vadd.f32 %v4188_v59, %v4076_v62  ;;  %3045 = vmatprep.mubr.bf16.mxu0 %v5077_v40 }
 0x2d0   : > { %v4189_v26 = vpop.f32.mrb[96].mxu1 }
 0x2d1   : > { %v4077_v7 = vpop.f32.mrb[96].mxu0  ;;  %v4190_v51 = vpop.f32.mrb[97].mxu1 }
 0x2d2   : > { %v4078_v53 = vpop.f32.mrb[97].mxu0  ;;  %v4191_v1 = vadd.f32 %v4190_v51, %v4189_v26  ;;  %v4192_v43 = vpop.f32.mrb[98].mxu1 }
 0x2d3   : > { %v4079_v33 = vadd.f32 %v4078_v53, %v4077_v7  ;;  %v4080_v56 = vpop.f32.mrb[98].mxu0  ;;  %v4193_v4 = vpop.f32.mrb[99].mxu1 }
 0x2d4   : > { %v4081_v11 = vpop.f32.mrb[99].mxu0  ;;  %v4194_v25 = vadd.f32 %v4193_v4, %v4192_v43 }
 0x2d5   : > { %v5470_v18 = vadd.f32 %v4191_v1, %v4079_v33  ;;  %v4082_v49 = vadd.f32 %v4081_v11, %v4080_v56 }
 0x2d6   : > { %3046 = vmatmul.mubr.bf16.gmra.mrb[204].mxu0 %v5087_v50 }
 0x2d7   : > { %v5473_v38 = vadd.f32 %v4194_v25, %v4082_v49  ;;  %3055 = vmatprep.mubr.bf16.mxu0 %v5089_v52 }
 0x2d8   : > { %v4195_v40 = vpop.f32.mrb[100].mxu1 }
 0x2d9   : > { %v4083_v29 = vpop.f32.mrb[100].mxu0  ;;  %v4196_v32 = vpop.f32.mrb[101].mxu1 }
 0x2da   : > { %v4084_v12 = vpop.f32.mrb[101].mxu0  ;;  %v4197_v39 = vadd.f32 %v4196_v32, %v4195_v40  ;;  %v4198_v55 = vpop.f32.mrb[102].mxu1 }
 0x2db   : > { %v4085_v58 = vadd.f32 %v4084_v12, %v4083_v29  ;;  %v4086_v59 = vpop.f32.mrb[102].mxu0  ;;  %v4199_v62 = vpop.f32.mrb[103].mxu1 }
 0x2dc   : > { %v4087_v26 = vpop.f32.mrb[103].mxu0  ;;  %v4200_v7 = vadd.f32 %v4199_v62, %v4198_v55 }
 0x2dd   : > { %v5476_v51 = vadd.f32 %v4197_v39, %v4085_v58  ;;  %v4088_v53 = vadd.f32 %v4087_v26, %v4086_v59 }
 0x2de   : > { %3056 = vmatmul.mubr.bf16.gmra.mrb[208].mxu0 %v5099_v60 }
 0x2df   : > { %v5479_v50 = vadd.f32 %v4200_v7, %v4088_v53  ;;  %3065 = vmatprep.mubr.bf16.mxu0 %v5101_v61 }
 0x2e0   : > { %v4201_v52 = vpop.f32.mrb[104].mxu1 }
 0x2e1   : > { %v4089_v1 = vpop.f32.mrb[104].mxu0  ;;  %v4202_v43 = vpop.f32.mrb[105].mxu1 }
 0x2e2   : > { %v4090_v33 = vpop.f32.mrb[105].mxu0  ;;  %v4203_v56 = vadd.f32 %v4202_v43, %v4201_v52  ;;  %v4204_v4 = vpop.f32.mrb[106].mxu1 }
 0x2e3   : > { %v4091_v11 = vadd.f32 %v4090_v33, %v4089_v1  ;;  %v4092_v25 = vpop.f32.mrb[106].mxu0  ;;  %v4205_v49 = vpop.f32.mrb[107].mxu1 }
 0x2e4   : > { %v4093_v40 = vpop.f32.mrb[107].mxu0  ;;  %v4206_v29 = vadd.f32 %v4205_v49, %v4204_v4 }
 0x2e5   : > { %v5482_v32 = vadd.f32 %v4203_v56, %v4091_v11  ;;  %v4094_v12 = vadd.f32 %v4093_v40, %v4092_v25 }
 0x2e6   : > { %3066 = vmatmul.mubr.bf16.gmra.mrb[212].mxu0 %v5111_v2 }
 0x2e7   : > { %v5485_v60 = vadd.f32 %v4206_v29, %v4094_v12  ;;  %3075 = vmatprep.mubr.bf16.mxu0 %v5113_v3 }
 0x2e8   : > { %v4207_v61 = vpop.f32.mrb[108].mxu1 }
 0x2e9   : > { %v4095_v39 = vpop.f32.mrb[108].mxu0  ;;  %v4208_v55 = vpop.f32.mrb[109].mxu1 }
 0x2ea   : > { %v4096_v58 = vpop.f32.mrb[109].mxu0  ;;  %v4209_v59 = vadd.f32 %v4208_v55, %v4207_v61  ;;  %v4210_v62 = vpop.f32.mrb[110].mxu1 }
 0x2eb   : > { %v4097_v26 = vadd.f32 %v4096_v58, %v4095_v39  ;;  %v4098_v7 = vpop.f32.mrb[110].mxu0  ;;  %v4211_v53 = vpop.f32.mrb[111].mxu1 }
 0x2ec   : > { %v4099_v52 = vpop.f32.mrb[111].mxu0  ;;  %v4212_v1 = vadd.f32 %v4211_v53, %v4210_v62 }
 0x2ed   : > { %v5488_v43 = vadd.f32 %v4209_v59, %v4097_v26  ;;  %v4100_v33 = vadd.f32 %v4099_v52, %v4098_v7 }
 0x2ee   : > { %3076 = vmatmul.mubr.bf16.gmra.mrb[216].mxu0 %v5123_v8 }
 0x2ef   : > { %v5491_v2 = vadd.f32 %v4212_v1, %v4100_v33  ;;  %3085 = vmatprep.mubr.bf16.mxu0 %v5125_v10 }
 0x2f0   : > { %v4213_v3 = vpop.f32.mrb[112].mxu1 }
 0x2f1   : > { %v4101_v56 = vpop.f32.mrb[112].mxu0  ;;  %v4214_v4 = vpop.f32.mrb[113].mxu1 }
 0x2f2   : > { %v4102_v11 = vpop.f32.mrb[113].mxu0  ;;  %v4215_v25 = vadd.f32 %v4214_v4, %v4213_v3  ;;  %v4216_v49 = vpop.f32.mrb[114].mxu1 }
 0x2f3   : > { %v4103_v40 = vadd.f32 %v4102_v11, %v4101_v56  ;;  %v4104_v29 = vpop.f32.mrb[114].mxu0  ;;  %v4217_v12 = vpop.f32.mrb[115].mxu1 }
 0x2f4   : > { %v4105_v61 = vpop.f32.mrb[115].mxu0  ;;  %v4218_v39 = vadd.f32 %v4217_v12, %v4216_v49 }
 0x2f5   : > { %v5494_v55 = vadd.f32 %v4215_v25, %v4103_v40  ;;  %v4106_v58 = vadd.f32 %v4105_v61, %v4104_v29 }
 0x2f6   : > { %3086 = vmatmul.mubr.bf16.gmra.mrb[220].mxu0 %v5135_v16 }
 0x2f7   : > { %v5497_v8 = vadd.f32 %v4218_v39, %v4106_v58  ;;  %3095 = vmatprep.mubr.bf16.mxu0 %v5137_v17 }
 0x2f8   : > { %v4219_v10 = vpop.f32.mrb[116].mxu1 }
 0x2f9   : > { %v4107_v59 = vpop.f32.mrb[116].mxu0  ;;  %v4220_v62 = vpop.f32.mrb[117].mxu1 }
 0x2fa   : > { %v4108_v26 = vpop.f32.mrb[117].mxu0  ;;  %v4221_v7 = vadd.f32 %v4220_v62, %v4219_v10  ;;  %v4222_v53 = vpop.f32.mrb[118].mxu1 }
 0x2fb   : > { %v4109_v52 = vadd.f32 %v4108_v26, %v4107_v59  ;;  %v4110_v1 = vpop.f32.mrb[118].mxu0  ;;  %v4223_v33 = vpop.f32.mrb[119].mxu1 }
 0x2fc   : > { %v4111_v3 = vpop.f32.mrb[119].mxu0  ;;  %v4224_v56 = vadd.f32 %v4223_v33, %v4222_v53 }
 0x2fd   : > { %v5500_v4 = vadd.f32 %v4221_v7, %v4109_v52  ;;  %v4112_v11 = vadd.f32 %v4111_v3, %v4110_v1 }
 0x2fe   : > { %3096 = vmatmul.mubr.bf16.gmra.mrb[224].mxu0 %v5147_v22 }
 0x2ff   : > { %v5503_v16 = vadd.f32 %v4224_v56, %v4112_v11  ;;  %3105 = vmatprep.mubr.bf16.mxu0 %v5149_v23 }
 0x300   : > { %v4225_v17 = vpop.f32.mrb[120].mxu1 }
 0x301   : > { %v4113_v25 = vpop.f32.mrb[120].mxu0  ;;  %v4226_v49 = vpop.f32.mrb[121].mxu1 }
 0x302   : > { %v4114_v40 = vpop.f32.mrb[121].mxu0  ;;  %v4227_v29 = vadd.f32 %v4226_v49, %v4225_v17  ;;  %v4228_v12 = vpop.f32.mrb[122].mxu1  ;;  %v1997_v17 = vld [vmem:[#allocation7 + $0x4] sm:$0x3] }
 0x303   : > { %v4115_v61 = vadd.f32 %v4114_v40, %v4113_v25  ;;  %v4116_v39 = vpop.f32.mrb[122].mxu0  ;;  %v4229_v58 = vpop.f32.mrb[123].mxu1 }
 0x304   : > { %v4117_v10 = vpop.f32.mrb[123].mxu0  ;;  %v4230_v59 = vadd.f32 %v4229_v58, %v4228_v12 }
 0x305   : > { %v5506_v62 = vadd.f32 %v4227_v29, %v4115_v61  ;;  %v4118_v26 = vadd.f32 %v4117_v10, %v4116_v39  ;;  %v5990_v61 = vld [vmem:[#allocation24_spill] sm:$0xff] }
 0x306   : > { %3106 = vmatmul.mubr.bf16.gmra.mrb[228].mxu0 %v5159_v30  ;;  %v5989_v30 = vld [vmem:[#allocation23_spill] sm:$0xff]  ;;  %v5521_v39 = vrot.slane %v1997_v17, %v5990_v61 }
 0x307   : > { %v5509_v22 = vadd.f32 %v4230_v59, %v4118_v26  ;;  %3115 = vmatprep.mubr.bf16.mxu0 %v5161_v31  ;;  %v5516_v12 = vrot.slane %v1997_v17, %v5989_v30  ;;  %v4588_v17 = vld [vmem:[#allocation8 + $0x180] sm:$0xff]  }
 0x308   : > { %v4231_v23 = vpop.f32.mrb[124].mxu1 }
 0x309   : > { %v4119_v7 = vpop.f32.mrb[124].mxu0  ;;  %v4232_v53 = vpop.f32.mrb[125].mxu1 }
 0x30a   : > { %v4120_v52 = vpop.f32.mrb[125].mxu0  ;;  %v4233_v1 = vadd.f32 %v4232_v53, %v4231_v23  ;;  %v4234_v33 = vpop.f32.mrb[126].mxu1 }
 0x30b   : > { %v4121_v3 = vadd.f32 %v4120_v52, %v4119_v7  ;;  %v4122_v56 = vpop.f32.mrb[126].mxu0  ;;  %v4235_v11 = vpop.f32.mrb[127].mxu1 }
 0x30c   : > { %v4123_v25 = vpop.f32.mrb[127].mxu0  ;;  %v4236_v49 = vadd.f32 %v4235_v11, %v4234_v33 }
 0x30d   : > { %v5512_v40 = vadd.f32 %v4233_v1, %v4121_v3  ;;  %v4124_v29 = vadd.f32 %v4123_v25, %v4122_v56 }
 0x30e   : > { %3116 = vmatmul.mubr.bf16.gmra.mrb[232].mxu0 %v5171_v36 }
 0x30f   : > { %v5518_v31 = vadd.f32 %v4236_v49, %v4124_v29  ;;  %3125 = vmatprep.mubr.bf16.mxu0 %v5173_v37  ;;  %v4589_v29 = vld [vmem:[#allocation8 + $0x1c8] sm:$0xff]  }
 0x311   : > { %v2203_v58 = vpop.f32.mrb[128].mxu0 }
 0x312   : > { %v2204_v10 = vadd.f32 %v2203_v58, %v5516_v12  ;;  %v2205_v59 = vpop.f32.mrb[129].mxu0 }
 0x313   : > { %v2206_v26 = vadd.f32 %v2205_v59, %v5521_v39  ;;  %v2207_v23 = vpop.f32.mrb[130].mxu0 }
 0x314   : > { %v2208_v7 = vadd.f32 %v2207_v23, %v5516_v12  ;;  %v2209_v36 = vpop.f32.mrb[131].mxu0  ;;  %v2362_v52 = vmax.f32 %v2204_v10, 0.0 }
 0x315   : > { %v2210_v53 = vadd.f32 %v2209_v36, %v5521_v39  ;;  %v2363_v33 = vmax.f32 %v2206_v26, 0.0  ;;  %v4591_v36 = vld [vmem:[#allocation8 + $0x1d0] sm:$0xff]  }
 0x316   : > { %v2364_v1 = vmax.f32 %v2208_v7, 0.0  ;;  %3126 = vmatmul.mubr.bf16.gmra.mrb[236].mxu0 %v5183_v45 }
 0x317   : > { %v2365_v3 = vmax.f32 %v2210_v53, 0.0  ;;  %3135 = vmatprep.mubr.bf16.mxu0 %v5185_v46  ;;  %v4590_v46 = vld [vmem:[#allocation8 + $0x188] sm:$0xff]  }
 0x318   : > { %v2426_v37 = vpack.c.bf16 %v2364_v1, %v2362_v52 }
 0x319   : > { %v2427_v56 = vpack.c.bf16 %v2365_v3, %v2363_v33  ;;  %v2213_v11 = vpop.f32.mrb[132].mxu0 }
 0x31a   : > { %v2214_v25 = vadd.f32 %v2213_v11, %v5516_v12  ;;  %v2215_v49 = vpop.f32.mrb[133].mxu0 }
 0x31b   : > { %v2216_v58 = vadd.f32 %v2215_v49, %v5521_v39  ;;  %v2217_v59 = vpop.f32.mrb[134].mxu0  ;;  %2618 = vmatprep.mubr.bf16.mxu1 %v2427_v56  ;;  %v4592_v56 = vld [vmem:[#allocation8 + $0x190] sm:$0xff]  }
 0x31c   : > { %v2218_v10 = vadd.f32 %v2217_v59, %v5516_v12  ;;  %v2219_v23 = vpop.f32.mrb[135].mxu0  ;;  %2619 = vmatmul.mubr.bf16.vlgmr.msra.gmra.mrb[128].mxu1 %v2426_v37  ;;  %v2366_v26 = vmax.f32 %v2214_v25, 0.0 }
 0x31d   : > { %v2220_v45 = vadd.f32 %v2219_v23, %v5521_v39  ;;  %4350 = vmatpush3.bf16.msra.mxu1 %v4588_v17  ;;  %v2367_v53 = vmax.f32 %v2216_v58, 0.0  ;;  %v4593_v17 = vld [vmem:[#allocation8 + $0x1d8] sm:$0xff]   ;;  %v4595_v23 = vld [vmem:[#allocation8 + $0x1e0] sm:$0xff]  }
 0x31e   : > { %v2368_v7 = vmax.f32 %v2218_v10, 0.0  ;;  %3136 = vmatmul.mubr.bf16.gmra.mrb[240].mxu0 %v5195_v57  ;;  %4351 = vmatprep.subr.bf16.mxu1 %v4589_v29  ;;  %v4594_v58 = vld [vmem:[#allocation8 + $0x198] sm:$0xff]  }
 0x31f   : > { %v2369_v52 = vmax.f32 %v2220_v45, 0.0  ;;  %3145 = vmatprep.mubr.bf16.mxu0 %v5983_v28 }
 0x320   : > { %v2428_v1 = vpack.c.bf16 %v2368_v7, %v2366_v26 }
 0x321   : > { %v2429_v33 = vpack.c.bf16 %v2369_v52, %v2367_v53  ;;  %v2223_v3 = vpop.f32.mrb[136].mxu0  ;;  %4352 = vmatpush3.bf16.msra.mxu1 %v4590_v46  ;;  %v4596_v53 = vld [vmem:[#allocation8 + $0x1a0] sm:$0xff]  }
 0x322   : > { %v2224_v37 = vadd.f32 %v2223_v3, %v5516_v12  ;;  %v2225_v11 = vpop.f32.mrb[137].mxu0  ;;  %4353 = vmatprep.subr.bf16.mxu1 %v4591_v36 }
 0x323   : > { %v2226_v25 = vadd.f32 %v2225_v11, %v5521_v39  ;;  %v2227_v49 = vpop.f32.mrb[138].mxu0  ;;  %2626 = vmatprep.mubr.bf16.mxu1 %v2429_v33  ;;  %v4597_v33 = vld [vmem:[#allocation8 + $0x1e8] sm:$0xff]  }
 0x324   : > { %v2228_v57 = vadd.f32 %v2227_v49, %v5516_v12  ;;  %v2229_v29 = vpop.f32.mrb[139].mxu0  ;;  %2627 = vmatmul.mubr.bf16.gmra.mrb[132].mxu1 %v2428_v1  ;;  %v2370_v59 = vmax.f32 %v2224_v37, 0.0  ;;  %v4598_v11 = vld [vmem:[#allocation8 + $0x1a8] sm:$0xff]   ;;  %v4599_v49 = vld [vmem:[#allocation8 + $0x1f0] sm:$0xff]  }
 0x325   : > { %v2230_v28 = vadd.f32 %v2229_v29, %v5521_v39  ;;  %4354 = vmatpush3.bf16.msra.mxu1 %v4592_v56  ;;  %v2371_v45 = vmax.f32 %v2226_v25, 0.0 }
 0x326   : > { %v2372_v10 = vmax.f32 %v2228_v57, 0.0  ;;  %3146 = vmatmul.mubr.bf16.gmra.mrb[244].mxu0 %v5984_v44  ;;  %4355 = vmatprep.subr.bf16.mxu1 %v4593_v17 }
 0x327   : > { %v2373_v46 = vmax.f32 %v2230_v28, 0.0  ;;  %3155 = vmatprep.mubr.bf16.mxu0 %v5985_v0 }
 0x328   : > { %v2430_v26 = vpack.c.bf16 %v2372_v10, %v2370_v59  ;;  %v4600_v10 = vld [vmem:[#allocation8 + $0x1b0] sm:$0xff]  }
 0x329   : > { %v2431_v7 = vpack.c.bf16 %v2373_v46, %v2371_v45  ;;  %v2233_v36 = vpop.f32.mrb[140].mxu0  ;;  %4356 = vmatpush3.bf16.msra.mxu1 %v4594_v58  ;;  %v4601_v46 = vld [vmem:[#allocation8 + $0x1f8] sm:$0xff]  }
 0x32a   : > { %v2234_v52 = vadd.f32 %v2233_v36, %v5516_v12  ;;  %v2235_v1 = vpop.f32.mrb[141].mxu0  ;;  %4357 = vmatprep.subr.bf16.mxu1 %v4595_v23 }
 0x32b   : > { %v2236_v3 = vadd.f32 %v2235_v1, %v5521_v39  ;;  %v2237_v56 = vpop.f32.mrb[142].mxu0  ;;  %2634 = vmatprep.mubr.bf16.mxu1 %v2431_v7 }
 0x32c   : > { %v2238_v44 = vadd.f32 %v2237_v56, %v5516_v12  ;;  %v2239_v37 = vpop.f32.mrb[143].mxu0  ;;  %2635 = vmatmul.mubr.bf16.gmra.mrb[136].mxu1 %v2430_v26  ;;  %v2374_v17 = vmax.f32 %v2234_v52, 0.0 }
 0x32d   : > { %v2240_v0 = vadd.f32 %v2239_v37, %v5521_v39  ;;  %4358 = vmatpush3.bf16.msra.mxu1 %v4596_v53  ;;  %v2375_v57 = vmax.f32 %v2236_v3, 0.0  ;;  %v4602_v53 = vld [vmem:[#allocation8 + $0x1b8] sm:$0xff]  }
 0x32e   : > { %v2376_v25 = vmax.f32 %v2238_v44, 0.0  ;;  %3156 = vmatmul.mubr.bf16.gmra.mrb[248].mxu0 %v5986_v6  ;;  %4359 = vmatprep.subr.bf16.mxu1 %v4597_v33 }
 0x32f   : > { %v2377_v29 = vmax.f32 %v2240_v0, 0.0  ;;  %3165 = vmatprep.mubr.bf16.mxu0 %v5987_v20 }
 0x330   : > { %v2432_v28 = vpack.c.bf16 %v2376_v25, %v2374_v17 }
 0x331   : > { %v2433_v58 = vpack.c.bf16 %v2377_v29, %v2375_v57  ;;  %v2243_v59 = vpop.f32.mrb[144].mxu0  ;;  %4360 = vmatpush3.bf16.msra.mxu1 %v4598_v11 }
 0x332   : > { %v2244_v23 = vadd.f32 %v2243_v59, %v5516_v12  ;;  %v2245_v45 = vpop.f32.mrb[145].mxu0  ;;  %4361 = vmatprep.subr.bf16.mxu1 %v4599_v49 }
 0x333   : > { %v2246_v26 = vadd.f32 %v2245_v45, %v5521_v39  ;;  %v2247_v7 = vpop.f32.mrb[146].mxu0  ;;  %2642 = vmatprep.mubr.bf16.mxu1 %v2433_v58 }
 0x334   : > { %v2248_v6 = vadd.f32 %v2247_v7, %v5516_v12  ;;  %v2249_v36 = vpop.f32.mrb[147].mxu0  ;;  %2643 = vmatmul.mubr.bf16.gmra.mrb[140].mxu1 %v2432_v28  ;;  %v2378_v52 = vmax.f32 %v2244_v23, 0.0 }
 0x335   : > { %v2250_v20 = vadd.f32 %v2249_v36, %v5521_v39  ;;  %4362 = vmatpush3.bf16.msra.mxu1 %v4600_v10  ;;  %v2379_v33 = vmax.f32 %v2246_v26, 0.0 }
 0x336   : > { %v2380_v1 = vmax.f32 %v2248_v6, 0.0  ;;  %3166 = vmatmul.mubr.bf16.gmra.mrb[252].mxu0 %v5988_v15  ;;  %4363 = vmatprep.subr.bf16.mxu1 %v4601_v46 }
 0x337   : > { %v2381_v3 = vmax.f32 %v2250_v20, 0.0 }
 0x338   : > { %v2434_v56 = vpack.c.bf16 %v2380_v1, %v2378_v52 }
 0x339   : > { %v2435_v44 = vpack.c.bf16 %v2381_v3, %v2379_v33  ;;  %v2253_v37 = vpop.f32.mrb[148].mxu0  ;;  %4364 = vmatpush3.bf16.msra.mxu1 %v4602_v53 }
 0x33a   : > { %v2254_v0 = vadd.f32 %v2253_v37, %v5516_v12  ;;  %v2255_v11 = vpop.f32.mrb[149].mxu0 }
 0x33b   : > { %v2256_v17 = vadd.f32 %v2255_v11, %v5521_v39  ;;  %v2257_v25 = vpop.f32.mrb[150].mxu0  ;;  %2650 = vmatprep.mubr.bf16.mxu1 %v2435_v44 }
 0x33c   : > { %v2258_v49 = vadd.f32 %v2257_v25, %v5516_v12  ;;  %v2259_v57 = vpop.f32.mrb[151].mxu0  ;;  %2651 = vmatmul.mubr.bf16.gmra.mrb[144].mxu1 %v2434_v56  ;;  %v2382_v29 = vmax.f32 %v2254_v0, 0.0 }
 0x33d   : > { %v2260_v15 = vadd.f32 %v2259_v57, %v5521_v39  ;;  %v2383_v58 = vmax.f32 %v2256_v17, 0.0 }
 0x33e   : > { %v2384_v28 = vmax.f32 %v2258_v49, 0.0 }
 0x33f   : > { %v2385_v59 = vmax.f32 %v2260_v15, 0.0 }
 0x340   : > { %v2436_v10 = vpack.c.bf16 %v2384_v28, %v2382_v29 }
 0x341   : > { %v2437_v23 = vpack.c.bf16 %v2385_v59, %v2383_v58  ;;  %v2263_v45 = vpop.f32.mrb[152].mxu0 }
 0x342   : > { %v2264_v46 = vadd.f32 %v2263_v45, %v5516_v12  ;;  %v2265_v26 = vpop.f32.mrb[153].mxu0 }
 0x343   : > { %v2266_v7 = vadd.f32 %v2265_v26, %v5521_v39  ;;  %v2267_v6 = vpop.f32.mrb[154].mxu0  ;;  %2658 = vmatprep.mubr.bf16.mxu1 %v2437_v23 }
 0x344   : > { %v2268_v36 = vadd.f32 %v2267_v6, %v5516_v12  ;;  %v2269_v20 = vpop.f32.mrb[155].mxu0  ;;  %2659 = vmatmul.mubr.bf16.gmra.mrb[148].mxu1 %v2436_v10  ;;  %v2386_v52 = vmax.f32 %v2264_v46, 0.0 }
 0x345   : > { %v2270_v53 = vadd.f32 %v2269_v20, %v5521_v39  ;;  %v2387_v33 = vmax.f32 %v2266_v7, 0.0 }
 0x346   : > { %v2388_v1 = vmax.f32 %v2268_v36, 0.0 }
 0x347   : > { %v2389_v3 = vmax.f32 %v2270_v53, 0.0 }
 0x348   : > { %v2438_v56 = vpack.c.bf16 %v2388_v1, %v2386_v52 }
 0x349   : > { %v2439_v44 = vpack.c.bf16 %v2389_v3, %v2387_v33  ;;  %v2273_v37 = vpop.f32.mrb[156].mxu0 }
 0x34a   : > { %v2274_v0 = vadd.f32 %v2273_v37, %v5516_v12  ;;  %v2275_v11 = vpop.f32.mrb[157].mxu0 }
 0x34b   : > { %v2276_v17 = vadd.f32 %v2275_v11, %v5521_v39  ;;  %v2277_v25 = vpop.f32.mrb[158].mxu0  ;;  %2666 = vmatprep.mubr.bf16.mxu1 %v2439_v44 }
 0x34c   : > { %v2278_v49 = vadd.f32 %v2277_v25, %v5516_v12  ;;  %v2279_v57 = vpop.f32.mrb[159].mxu0  ;;  %2667 = vmatmul.mubr.bf16.gmra.mrb[152].mxu1 %v2438_v56  ;;  %v2390_v29 = vmax.f32 %v2274_v0, 0.0 }
 0x34d   : > { %v2280_v15 = vadd.f32 %v2279_v57, %v5521_v39  ;;  %v2391_v58 = vmax.f32 %v2276_v17, 0.0 }
 0x34e   : > { %v2392_v28 = vmax.f32 %v2278_v49, 0.0 }
 0x34f   : > { %v2393_v59 = vmax.f32 %v2280_v15, 0.0 }
 0x350   : > { %v2440_v10 = vpack.c.bf16 %v2392_v28, %v2390_v29 }
 0x351   : > { %v2441_v23 = vpack.c.bf16 %v2393_v59, %v2391_v58  ;;  %v2283_v45 = vpop.f32.mrb[160].mxu0 }
 0x352   : > { %v2284_v46 = vadd.f32 %v2283_v45, %v5516_v12  ;;  %v2285_v26 = vpop.f32.mrb[161].mxu0 }
 0x353   : > { %v2286_v7 = vadd.f32 %v2285_v26, %v5521_v39  ;;  %v2287_v6 = vpop.f32.mrb[162].mxu0  ;;  %2674 = vmatprep.mubr.bf16.mxu1 %v2441_v23 }
 0x354   : > { %v2288_v36 = vadd.f32 %v2287_v6, %v5516_v12  ;;  %v2289_v20 = vpop.f32.mrb[163].mxu0  ;;  %2675 = vmatmul.mubr.bf16.gmra.mrb[156].mxu1 %v2440_v10  ;;  %v2394_v52 = vmax.f32 %v2284_v46, 0.0 }
 0x355   : > { %v2290_v53 = vadd.f32 %v2289_v20, %v5521_v39  ;;  %v2395_v33 = vmax.f32 %v2286_v7, 0.0 }
 0x356   : > { %v2396_v1 = vmax.f32 %v2288_v36, 0.0 }
 0x357   : > { %v2397_v3 = vmax.f32 %v2290_v53, 0.0 }
 0x358   : > { %v2442_v56 = vpack.c.bf16 %v2396_v1, %v2394_v52 }
 0x359   : > { %v2443_v44 = vpack.c.bf16 %v2397_v3, %v2395_v33  ;;  %v2293_v37 = vpop.f32.mrb[164].mxu0 }
 0x35a   : > { %v2294_v0 = vadd.f32 %v2293_v37, %v5516_v12  ;;  %v2295_v11 = vpop.f32.mrb[165].mxu0 }
 0x35b   : > { %v2296_v17 = vadd.f32 %v2295_v11, %v5521_v39  ;;  %v2297_v25 = vpop.f32.mrb[166].mxu0  ;;  %2682 = vmatprep.mubr.bf16.mxu1 %v2443_v44 }
 0x35c   : > { %v2298_v49 = vadd.f32 %v2297_v25, %v5516_v12  ;;  %v2299_v57 = vpop.f32.mrb[167].mxu0  ;;  %2683 = vmatmul.mubr.bf16.gmra.mrb[160].mxu1 %v2442_v56  ;;  %v2398_v29 = vmax.f32 %v2294_v0, 0.0 }
 0x35d   : > { %v2300_v15 = vadd.f32 %v2299_v57, %v5521_v39  ;;  %v2399_v58 = vmax.f32 %v2296_v17, 0.0 }
 0x35e   : > { %v2400_v28 = vmax.f32 %v2298_v49, 0.0 }
 0x35f   : > { %v2401_v59 = vmax.f32 %v2300_v15, 0.0 }
 0x360   : > { %v2444_v10 = vpack.c.bf16 %v2400_v28, %v2398_v29 }
 0x361   : > { %v2445_v23 = vpack.c.bf16 %v2401_v59, %v2399_v58  ;;  %v2303_v45 = vpop.f32.mrb[168].mxu0 }
 0x362   : > { %v2304_v46 = vadd.f32 %v2303_v45, %v5516_v12  ;;  %v2305_v26 = vpop.f32.mrb[169].mxu0 }
 0x363   : > { %v2306_v7 = vadd.f32 %v2305_v26, %v5521_v39  ;;  %v2307_v6 = vpop.f32.mrb[170].mxu0  ;;  %2690 = vmatprep.mubr.bf16.mxu1 %v2445_v23 }
 0x364   : > { %v2308_v36 = vadd.f32 %v2307_v6, %v5516_v12  ;;  %v2309_v20 = vpop.f32.mrb[171].mxu0  ;;  %2691 = vmatmul.mubr.bf16.gmra.mrb[164].mxu1 %v2444_v10  ;;  %v2402_v52 = vmax.f32 %v2304_v46, 0.0 }
 0x365   : > { %v2310_v53 = vadd.f32 %v2309_v20, %v5521_v39  ;;  %v2403_v33 = vmax.f32 %v2306_v7, 0.0 }
 0x366   : > { %v2404_v1 = vmax.f32 %v2308_v36, 0.0 }
 0x367   : > { %v2405_v3 = vmax.f32 %v2310_v53, 0.0 }
 0x368   : > { %v2446_v56 = vpack.c.bf16 %v2404_v1, %v2402_v52 }
 0x369   : > { %v2447_v44 = vpack.c.bf16 %v2405_v3, %v2403_v33  ;;  %v2313_v37 = vpop.f32.mrb[172].mxu0 }
 0x36a   : > { %v2314_v0 = vadd.f32 %v2313_v37, %v5516_v12  ;;  %v2315_v11 = vpop.f32.mrb[173].mxu0 }
 0x36b   : > { %v2316_v17 = vadd.f32 %v2315_v11, %v5521_v39  ;;  %v2317_v25 = vpop.f32.mrb[174].mxu0  ;;  %2698 = vmatprep.mubr.bf16.mxu1 %v2447_v44 }
 0x36c   : > { %v2318_v49 = vadd.f32 %v2317_v25, %v5516_v12  ;;  %v2319_v57 = vpop.f32.mrb[175].mxu0  ;;  %2699 = vmatmul.mubr.bf16.gmra.mrb[168].mxu1 %v2446_v56  ;;  %v2406_v29 = vmax.f32 %v2314_v0, 0.0 }
 0x36d   : > { %v2320_v15 = vadd.f32 %v2319_v57, %v5521_v39  ;;  %v2407_v58 = vmax.f32 %v2316_v17, 0.0 }
 0x36e   : > { %v2408_v28 = vmax.f32 %v2318_v49, 0.0 }
 0x36f   : > { %v2409_v59 = vmax.f32 %v2320_v15, 0.0 }
 0x370   : > { %v2448_v10 = vpack.c.bf16 %v2408_v28, %v2406_v29 }
 0x371   : > { %v2449_v23 = vpack.c.bf16 %v2409_v59, %v2407_v58  ;;  %v2323_v45 = vpop.f32.mrb[176].mxu0 }
 0x372   : > { %v2324_v46 = vadd.f32 %v2323_v45, %v5516_v12  ;;  %v2325_v26 = vpop.f32.mrb[177].mxu0 }
 0x373   : > { %v2326_v7 = vadd.f32 %v2325_v26, %v5521_v39  ;;  %v2327_v6 = vpop.f32.mrb[178].mxu0  ;;  %2706 = vmatprep.mubr.bf16.mxu1 %v2449_v23 }
 0x374   : > { %v2328_v36 = vadd.f32 %v2327_v6, %v5516_v12  ;;  %v2329_v20 = vpop.f32.mrb[179].mxu0  ;;  %2707 = vmatmul.mubr.bf16.gmra.mrb[172].mxu1 %v2448_v10  ;;  %v2410_v52 = vmax.f32 %v2324_v46, 0.0 }
 0x375   : > { %v2330_v53 = vadd.f32 %v2329_v20, %v5521_v39  ;;  %v2411_v33 = vmax.f32 %v2326_v7, 0.0 }
 0x376   : > { %v2412_v1 = vmax.f32 %v2328_v36, 0.0 }
 0x377   : > { %v2413_v3 = vmax.f32 %v2330_v53, 0.0 }
 0x378   : > { %v2450_v56 = vpack.c.bf16 %v2412_v1, %v2410_v52 }
 0x379   : > { %v2451_v44 = vpack.c.bf16 %v2413_v3, %v2411_v33  ;;  %v2333_v37 = vpop.f32.mrb[180].mxu0 }
 0x37a   : > { %v2334_v0 = vadd.f32 %v2333_v37, %v5516_v12  ;;  %v2335_v11 = vpop.f32.mrb[181].mxu0 }
 0x37b   : > { %v2336_v17 = vadd.f32 %v2335_v11, %v5521_v39  ;;  %v2337_v25 = vpop.f32.mrb[182].mxu0  ;;  %2714 = vmatprep.mubr.bf16.mxu1 %v2451_v44 }
 0x37c   : > { %v2338_v49 = vadd.f32 %v2337_v25, %v5516_v12  ;;  %v2339_v57 = vpop.f32.mrb[183].mxu0  ;;  %2715 = vmatmul.mubr.bf16.gmra.mrb[176].mxu1 %v2450_v56  ;;  %v2414_v29 = vmax.f32 %v2334_v0, 0.0 }
 0x37d   : > { %v2340_v15 = vadd.f32 %v2339_v57, %v5521_v39  ;;  %v2415_v58 = vmax.f32 %v2336_v17, 0.0 }
 0x37e   : > { %v2416_v28 = vmax.f32 %v2338_v49, 0.0  ;;  %v2811_v49 = vld [vmem:[#allocation7 + $0x6] sm:$0x3] }
 0x37f   : > { %v2417_v59 = vmax.f32 %v2340_v15, 0.0 }
 0x380   : > { %v2452_v10 = vpack.c.bf16 %v2416_v28, %v2414_v29 }
 0x381   : > { %v2453_v23 = vpack.c.bf16 %v2417_v59, %v2415_v58  ;;  %v2343_v45 = vpop.f32.mrb[184].mxu0  ;;  %v5598_v59 = vrot.slane %v2811_v49, %v5989_v30 }
 0x382   : > { %v2344_v46 = vadd.f32 %v2343_v45, %v5516_v12  ;;  %v2345_v26 = vpop.f32.mrb[185].mxu0  ;;  %v5601_v45 = vrot.slane %v2811_v49, %v5990_v61 }
 0x383   : > { %v2346_v7 = vadd.f32 %v2345_v26, %v5521_v39  ;;  %v2347_v6 = vpop.f32.mrb[186].mxu0  ;;  %2722 = vmatprep.mubr.bf16.mxu1 %v2453_v23 }
 0x384   : > { %v2348_v36 = vadd.f32 %v2347_v6, %v5516_v12  ;;  %v2349_v20 = vpop.f32.mrb[187].mxu0  ;;  %2723 = vmatmul.mubr.bf16.gmra.mrb[180].mxu1 %v2452_v10  ;;  %v2418_v52 = vmax.f32 %v2344_v46, 0.0 }
 0x385   : > { %v2350_v53 = vadd.f32 %v2349_v20, %v5521_v39  ;;  %v2419_v33 = vmax.f32 %v2346_v7, 0.0 }
 0x386   : > { %v2420_v1 = vmax.f32 %v2348_v36, 0.0 }
 0x387   : > { %v2421_v3 = vmax.f32 %v2350_v53, 0.0 }
 0x388   : > { %v2454_v56 = vpack.c.bf16 %v2420_v1, %v2418_v52 }
 0x389   : > { %v2455_v44 = vpack.c.bf16 %v2421_v3, %v2419_v33  ;;  %v2353_v37 = vpop.f32.mrb[188].mxu0 }
 0x38a   : > { %v2354_v0 = vadd.f32 %v2353_v37, %v5516_v12  ;;  %v2355_v11 = vpop.f32.mrb[189].mxu0 }
 0x38b   : > { %v2356_v17 = vadd.f32 %v2355_v11, %v5521_v39  ;;  %v2357_v25 = vpop.f32.mrb[190].mxu0  ;;  %2730 = vmatprep.mubr.bf16.mxu1 %v2455_v44 }
 0x38c   : > { %v2358_v57 = vadd.f32 %v2357_v25, %v5516_v12  ;;  %v2359_v15 = vpop.f32.mrb[191].mxu0  ;;  %2731 = vmatmul.mubr.bf16.gmra.mrb[184].mxu1 %v2454_v56  ;;  %v2422_v28 = vmax.f32 %v2354_v0, 0.0 }
 0x38d   : > { %v2360_v29 = vadd.f32 %v2359_v15, %v5521_v39  ;;  %v2423_v10 = vmax.f32 %v2356_v17, 0.0 }
 0x38e   : > { %v2424_v58 = vmax.f32 %v2358_v57, 0.0 }
 0x38f   : > { %v2425_v23 = vmax.f32 %v2360_v29, 0.0 }
 0x390   : > { %v2456_v46 = vpack.c.bf16 %v2424_v58, %v2422_v28 }
 0x391   : > { %v2457_v26 = vpack.c.bf16 %v2425_v23, %v2423_v10  ;;  %v3017_v7 = vpop.f32.mrb[192].mxu0 }
 0x392   : > { %v3018_v6 = vadd.f32 %v3017_v7, %v5598_v59  ;;  %v3019_v12 = vpop.f32.mrb[193].mxu0 }
 0x393   : > { %v3020_v36 = vadd.f32 %v3019_v12, %v5601_v45  ;;  %2738 = vmatprep.mubr.bf16.mxu1 %v2457_v26  ;;  %v3021_v39 = vpop.f32.mrb[194].mxu0 }
 0x394   : > { %v3022_v20 = vadd.f32 %v3021_v39, %v5598_v59  ;;  %2739 = vmatmul.mubr.bf16.gmra.mrb[188].mxu1 %v2456_v46  ;;  %v3023_v30 = vpop.f32.mrb[195].mxu0  ;;  %v3176_v52 = vmax.f32 %v3018_v6, 0.0 }
 0x395   : > { %v3024_v53 = vadd.f32 %v3023_v30, %v5601_v45  ;;  %v3177_v61 = vmax.f32 %v3020_v36, 0.0 }
 0x396   : > { %v3178_v1 = vmax.f32 %v3022_v20, 0.0 }
 0x397   : > { %v3179_v33 = vmax.f32 %v3024_v53, 0.0 }
 0x398   : > { %v3240_v3 = vpack.c.bf16 %v3178_v1, %v3176_v52 }
 0x399   : > { %v3241_v56 = vpack.c.bf16 %v3179_v33, %v3177_v61  ;;  %v3027_v44 = vpop.f32.mrb[196].mxu0 }
 0x39a   : > { %v3028_v37 = vadd.f32 %v3027_v44, %v5598_v59  ;;  %v3029_v0 = vpop.f32.mrb[197].mxu0 }
 0x39b   : > { %v3030_v11 = vadd.f32 %v3029_v0, %v5601_v45  ;;  %v3031_v17 = vpop.f32.mrb[198].mxu0  ;;  %3432 = vmatprep.mubr.bf16.mxu1 %v3241_v56 }
 0x39c   : > { %v3032_v25 = vadd.f32 %v3031_v17, %v5598_v59  ;;  %v3033_v49 = vpop.f32.mrb[199].mxu0  ;;  %3433 = vmatmul.mubr.bf16.vlgmr.msra.gmra.mrb[192].mxu1 %v3240_v3  ;;  %v3180_v15 = vmax.f32 %v3028_v37, 0.0 }
 0x39d   : > { %v3034_v57 = vadd.f32 %v3033_v49, %v5601_v45  ;;  %v3181_v28 = vmax.f32 %v3030_v11, 0.0 }
 0x39e   : > { %v3182_v29 = vmax.f32 %v3032_v25, 0.0 }
 0x39f   : > { %v3183_v58 = vmax.f32 %v3034_v57, 0.0 }
 0x3a0   : > { %v3242_v10 = vpack.c.bf16 %v3182_v29, %v3180_v15 }
 0x3a1   : > { %v3243_v23 = vpack.c.bf16 %v3183_v58, %v3181_v28  ;;  %v3037_v46 = vpop.f32.mrb[200].mxu0 }
 0x3a2   : > { %v3038_v26 = vadd.f32 %v3037_v46, %v5598_v59  ;;  %v3039_v7 = vpop.f32.mrb[201].mxu0 }
 0x3a3   : > { %v3040_v6 = vadd.f32 %v3039_v7, %v5601_v45  ;;  %v3041_v12 = vpop.f32.mrb[202].mxu0  ;;  %3440 = vmatprep.mubr.bf16.mxu1 %v3243_v23 }
 0x3a4   : > { %v3042_v36 = vadd.f32 %v3041_v12, %v5598_v59  ;;  %v3043_v39 = vpop.f32.mrb[203].mxu0  ;;  %3441 = vmatmul.mubr.bf16.gmra.mrb[196].mxu1 %v3242_v10  ;;  %v3184_v30 = vmax.f32 %v3038_v26, 0.0 }
 0x3a5   : > { %v3044_v20 = vadd.f32 %v3043_v39, %v5601_v45  ;;  %v3185_v52 = vmax.f32 %v3040_v6, 0.0 }
 0x3a6   : > { %v3186_v53 = vmax.f32 %v3042_v36, 0.0 }
 0x3a7   : > { %v3187_v1 = vmax.f32 %v3044_v20, 0.0 }
 0x3a8   : > { %v3244_v61 = vpack.c.bf16 %v3186_v53, %v3184_v30 }
 0x3a9   : > { %v3245_v33 = vpack.c.bf16 %v3187_v1, %v3185_v52  ;;  %v3047_v3 = vpop.f32.mrb[204].mxu0 }
 0x3aa   : > { %v3048_v56 = vadd.f32 %v3047_v3, %v5598_v59  ;;  %v3049_v44 = vpop.f32.mrb[205].mxu0 }
 0x3ab   : > { %v3050_v37 = vadd.f32 %v3049_v44, %v5601_v45  ;;  %v3051_v0 = vpop.f32.mrb[206].mxu0  ;;  %3448 = vmatprep.mubr.bf16.mxu1 %v3245_v33 }
 0x3ac   : > { %v3052_v11 = vadd.f32 %v3051_v0, %v5598_v59  ;;  %v3053_v17 = vpop.f32.mrb[207].mxu0  ;;  %3449 = vmatmul.mubr.bf16.gmra.mrb[200].mxu1 %v3244_v61  ;;  %v3188_v49 = vmax.f32 %v3048_v56, 0.0 }
 0x3ad   : > { %v3054_v25 = vadd.f32 %v3053_v17, %v5601_v45  ;;  %v3189_v15 = vmax.f32 %v3050_v37, 0.0 }
 0x3ae   : > { %v3190_v57 = vmax.f32 %v3052_v11, 0.0 }
 0x3af   : > { %v3191_v29 = vmax.f32 %v3054_v25, 0.0 }
 0x3b0   : > { %v3246_v28 = vpack.c.bf16 %v3190_v57, %v3188_v49 }
 0x3b1   : > { %v3247_v58 = vpack.c.bf16 %v3191_v29, %v3189_v15  ;;  %v3057_v10 = vpop.f32.mrb[208].mxu0 }
 0x3b2   : > { %v3058_v23 = vadd.f32 %v3057_v10, %v5598_v59  ;;  %v3059_v46 = vpop.f32.mrb[209].mxu0 }
 0x3b3   : > { %v3060_v26 = vadd.f32 %v3059_v46, %v5601_v45  ;;  %v3061_v7 = vpop.f32.mrb[210].mxu0  ;;  %3456 = vmatprep.mubr.bf16.mxu1 %v3247_v58 }
 0x3b4   : > { %v3062_v6 = vadd.f32 %v3061_v7, %v5598_v59  ;;  %v3063_v12 = vpop.f32.mrb[211].mxu0  ;;  %3457 = vmatmul.mubr.bf16.gmra.mrb[204].mxu1 %v3246_v28  ;;  %v3192_v39 = vmax.f32 %v3058_v23, 0.0 }
 0x3b5   : > { %v3064_v36 = vadd.f32 %v3063_v12, %v5601_v45  ;;  %v3193_v30 = vmax.f32 %v3060_v26, 0.0 }
 0x3b6   : > { %v3194_v20 = vmax.f32 %v3062_v6, 0.0 }
 0x3b7   : > { %v3195_v53 = vmax.f32 %v3064_v36, 0.0 }
 0x3b8   : > { %v3248_v52 = vpack.c.bf16 %v3194_v20, %v3192_v39 }
 0x3b9   : > { %v3249_v1 = vpack.c.bf16 %v3195_v53, %v3193_v30  ;;  %v3067_v61 = vpop.f32.mrb[212].mxu0 }
 0x3ba   : > { %v3068_v33 = vadd.f32 %v3067_v61, %v5598_v59  ;;  %v3069_v3 = vpop.f32.mrb[213].mxu0 }
 0x3bb   : > { %v3070_v56 = vadd.f32 %v3069_v3, %v5601_v45  ;;  %v3071_v44 = vpop.f32.mrb[214].mxu0  ;;  %3464 = vmatprep.mubr.bf16.mxu1 %v3249_v1 }
 0x3bc   : > { %v3072_v37 = vadd.f32 %v3071_v44, %v5598_v59  ;;  %v3073_v0 = vpop.f32.mrb[215].mxu0  ;;  %3465 = vmatmul.mubr.bf16.gmra.mrb[208].mxu1 %v3248_v52  ;;  %v3196_v17 = vmax.f32 %v3068_v33, 0.0 }
 0x3bd   : > { %v3074_v11 = vadd.f32 %v3073_v0, %v5601_v45  ;;  %v3197_v49 = vmax.f32 %v3070_v56, 0.0 }
 0x3be   : > { %v3198_v25 = vmax.f32 %v3072_v37, 0.0 }
 0x3bf   : > { %v3199_v57 = vmax.f32 %v3074_v11, 0.0 }
 0x3c0   : > { %v3250_v15 = vpack.c.bf16 %v3198_v25, %v3196_v17 }
 0x3c1   : > { %v3251_v29 = vpack.c.bf16 %v3199_v57, %v3197_v49  ;;  %v3077_v28 = vpop.f32.mrb[216].mxu0 }
 0x3c2   : > { %v3078_v58 = vadd.f32 %v3077_v28, %v5598_v59  ;;  %v3079_v10 = vpop.f32.mrb[217].mxu0 }
 0x3c3   : > { %v3080_v23 = vadd.f32 %v3079_v10, %v5601_v45  ;;  %v3081_v46 = vpop.f32.mrb[218].mxu0  ;;  %3472 = vmatprep.mubr.bf16.mxu1 %v3251_v29 }
 0x3c4   : > { %v3082_v26 = vadd.f32 %v3081_v46, %v5598_v59  ;;  %v3083_v7 = vpop.f32.mrb[219].mxu0  ;;  %3473 = vmatmul.mubr.bf16.gmra.mrb[212].mxu1 %v3250_v15  ;;  %v3200_v12 = vmax.f32 %v3078_v58, 0.0 }
 0x3c5   : > { %v3084_v6 = vadd.f32 %v3083_v7, %v5601_v45  ;;  %v3201_v39 = vmax.f32 %v3080_v23, 0.0 }
 0x3c6   : > { %v3202_v36 = vmax.f32 %v3082_v26, 0.0 }
 0x3c7   : > { %v3203_v20 = vmax.f32 %v3084_v6, 0.0 }
 0x3c8   : > { %v3252_v30 = vpack.c.bf16 %v3202_v36, %v3200_v12 }
 0x3c9   : > { %v3253_v53 = vpack.c.bf16 %v3203_v20, %v3201_v39  ;;  %v3087_v52 = vpop.f32.mrb[220].mxu0 }
 0x3ca   : > { %v3088_v1 = vadd.f32 %v3087_v52, %v5598_v59  ;;  %v3089_v61 = vpop.f32.mrb[221].mxu0 }
 0x3cb   : > { %v3090_v33 = vadd.f32 %v3089_v61, %v5601_v45  ;;  %v3091_v3 = vpop.f32.mrb[222].mxu0  ;;  %3480 = vmatprep.mubr.bf16.mxu1 %v3253_v53 }
 0x3cc   : > { %v3092_v56 = vadd.f32 %v3091_v3, %v5598_v59  ;;  %v3093_v44 = vpop.f32.mrb[223].mxu0  ;;  %3481 = vmatmul.mubr.bf16.gmra.mrb[216].mxu1 %v3252_v30  ;;  %v3204_v0 = vmax.f32 %v3088_v1, 0.0 }
 0x3cd   : > { %v3094_v37 = vadd.f32 %v3093_v44, %v5601_v45  ;;  %v3205_v17 = vmax.f32 %v3090_v33, 0.0 }
 0x3ce   : > { %v3206_v11 = vmax.f32 %v3092_v56, 0.0 }
 0x3cf   : > { %v3207_v25 = vmax.f32 %v3094_v37, 0.0 }
 0x3d0   : > { %v3254_v49 = vpack.c.bf16 %v3206_v11, %v3204_v0 }
 0x3d1   : > { %v3255_v57 = vpack.c.bf16 %v3207_v25, %v3205_v17  ;;  %v3097_v15 = vpop.f32.mrb[224].mxu0 }
 0x3d2   : > { %v3098_v29 = vadd.f32 %v3097_v15, %v5598_v59  ;;  %v3099_v28 = vpop.f32.mrb[225].mxu0 }
 0x3d3   : > { %v3100_v58 = vadd.f32 %v3099_v28, %v5601_v45  ;;  %v3101_v10 = vpop.f32.mrb[226].mxu0  ;;  %3488 = vmatprep.mubr.bf16.mxu1 %v3255_v57 }
 0x3d4   : > { %v3102_v23 = vadd.f32 %v3101_v10, %v5598_v59  ;;  %v3103_v46 = vpop.f32.mrb[227].mxu0  ;;  %3489 = vmatmul.mubr.bf16.gmra.mrb[220].mxu1 %v3254_v49  ;;  %v3208_v7 = vmax.f32 %v3098_v29, 0.0 }
 0x3d5   : > { %v3104_v26 = vadd.f32 %v3103_v46, %v5601_v45  ;;  %v3209_v12 = vmax.f32 %v3100_v58, 0.0 }
 0x3d6   : > { %v3210_v6 = vmax.f32 %v3102_v23, 0.0 }
 0x3d7   : > { %v3211_v36 = vmax.f32 %v3104_v26, 0.0 }
 0x3d8   : > { %v3256_v39 = vpack.c.bf16 %v3210_v6, %v3208_v7 }
 0x3d9   : > { %v3257_v20 = vpack.c.bf16 %v3211_v36, %v3209_v12  ;;  %v3107_v30 = vpop.f32.mrb[228].mxu0 }
 0x3da   : > { %v3108_v53 = vadd.f32 %v3107_v30, %v5598_v59  ;;  %v3109_v52 = vpop.f32.mrb[229].mxu0 }
 0x3db   : > { %v3110_v1 = vadd.f32 %v3109_v52, %v5601_v45  ;;  %v3111_v61 = vpop.f32.mrb[230].mxu0  ;;  %3496 = vmatprep.mubr.bf16.mxu1 %v3257_v20 }
 0x3dc   : > { %v3112_v33 = vadd.f32 %v3111_v61, %v5598_v59  ;;  %v3113_v3 = vpop.f32.mrb[231].mxu0  ;;  %3497 = vmatmul.mubr.bf16.gmra.mrb[224].mxu1 %v3256_v39  ;;  %v3212_v44 = vmax.f32 %v3108_v53, 0.0 }
 0x3dd   : > { %v3114_v56 = vadd.f32 %v3113_v3, %v5601_v45  ;;  %v3213_v0 = vmax.f32 %v3110_v1, 0.0 }
 0x3de   : > { %v3214_v37 = vmax.f32 %v3112_v33, 0.0 }
 0x3df   : > { %v3215_v11 = vmax.f32 %v3114_v56, 0.0 }
 0x3e0   : > { %v3258_v17 = vpack.c.bf16 %v3214_v37, %v3212_v44 }
 0x3e1   : > { %v3259_v25 = vpack.c.bf16 %v3215_v11, %v3213_v0  ;;  %v3117_v49 = vpop.f32.mrb[232].mxu0 }
 0x3e2   : > { %v3118_v57 = vadd.f32 %v3117_v49, %v5598_v59  ;;  %v3119_v15 = vpop.f32.mrb[233].mxu0 }
 0x3e3   : > { %v3120_v29 = vadd.f32 %v3119_v15, %v5601_v45  ;;  %v3121_v28 = vpop.f32.mrb[234].mxu0  ;;  %3504 = vmatprep.mubr.bf16.mxu1 %v3259_v25 }
 0x3e4   : > { %v3122_v58 = vadd.f32 %v3121_v28, %v5598_v59  ;;  %v3123_v10 = vpop.f32.mrb[235].mxu0  ;;  %3505 = vmatmul.mubr.bf16.gmra.mrb[228].mxu1 %v3258_v17  ;;  %v3216_v46 = vmax.f32 %v3118_v57, 0.0 }
 0x3e5   : > { %v3124_v23 = vadd.f32 %v3123_v10, %v5601_v45  ;;  %v3217_v7 = vmax.f32 %v3120_v29, 0.0 }
 0x3e6   : > { %v3218_v26 = vmax.f32 %v3122_v58, 0.0 }
 0x3e7   : > { %v3219_v6 = vmax.f32 %v3124_v23, 0.0 }
 0x3e8   : > { %v3260_v12 = vpack.c.bf16 %v3218_v26, %v3216_v46 }
 0x3e9   : > { %v3261_v36 = vpack.c.bf16 %v3219_v6, %v3217_v7  ;;  %v3127_v39 = vpop.f32.mrb[236].mxu0 }
 0x3ea   : > { %v3128_v20 = vadd.f32 %v3127_v39, %v5598_v59  ;;  %v3129_v30 = vpop.f32.mrb[237].mxu0 }
 0x3eb   : > { %v3130_v53 = vadd.f32 %v3129_v30, %v5601_v45  ;;  %v3131_v52 = vpop.f32.mrb[238].mxu0  ;;  %3512 = vmatprep.mubr.bf16.mxu1 %v3261_v36 }
 0x3ec   : > { %v3132_v1 = vadd.f32 %v3131_v52, %v5598_v59  ;;  %v3133_v61 = vpop.f32.mrb[239].mxu0  ;;  %3513 = vmatmul.mubr.bf16.gmra.mrb[232].mxu1 %v3260_v12  ;;  %v3220_v3 = vmax.f32 %v3128_v20, 0.0 }
 0x3ed   : > { %v3134_v33 = vadd.f32 %v3133_v61, %v5601_v45  ;;  %v3221_v44 = vmax.f32 %v3130_v53, 0.0 }
 0x3ee   : > { %v3222_v56 = vmax.f32 %v3132_v1, 0.0 }
 0x3ef   : > { %v3223_v37 = vmax.f32 %v3134_v33, 0.0  ;;  %v4253_v0 = vpop.f32.mrb[128].mxu1 }
 0x3f0   : > { %v3262_v11 = vpack.c.bf16 %v3222_v56, %v3220_v3  ;;  %v4254_v17 = vpop.f32.mrb[129].mxu1 }
 0x3f1   : > { %v3263_v25 = vpack.c.bf16 %v3223_v37, %v3221_v44  ;;  %v4255_v49 = vadd.f32 %v4254_v17, %v4253_v0  ;;  %v4256_v57 = vpop.f32.mrb[130].mxu1  ;;  %v3137_v15 = vpop.f32.mrb[240].mxu0 }
 0x3f2   : > { %v3138_v29 = vadd.f32 %v3137_v15, %v5598_v59  ;;  %v4257_v28 = vpop.f32.mrb[131].mxu1  ;;  %v3139_v58 = vpop.f32.mrb[241].mxu0 }
 0x3f3   : > { %v5653_v10 = vadd.f32 %v4255_v49, %v5422_v19  ;;  %v4258_v23 = vadd.f32 %v4257_v28, %v4256_v57  ;;  %v3140_v46 = vadd.f32 %v3139_v58, %v5601_v45  ;;  %v3141_v26 = vpop.f32.mrb[242].mxu0  ;;  %3520 = vmatprep.mubr.bf16.mxu1 %v3263_v25 }
 0x3f4   : > { %v3142_v7 = vadd.f32 %v3141_v26, %v5598_v59  ;;  %v3143_v6 = vpop.f32.mrb[243].mxu0  ;;  %3521 = vmatmul.mubr.bf16.gmra.mrb[236].mxu1 %v3262_v11  ;;  %v3224_v39 = vmax.f32 %v3138_v29, 0.0 }
 0x3f5   : > { %v5658_v12 = vadd.f32 %v4258_v23, %v5425_v5  ;;  %v3144_v36 = vadd.f32 %v3143_v6, %v5601_v45  ;;  %v3225_v30 = vmax.f32 %v3140_v46, 0.0 }
 0x3f6   : > { %v3226_v20 = vmax.f32 %v3142_v7, 0.0 }
 0x3f7   : > { %v3227_v53 = vmax.f32 %v3144_v36, 0.0  ;;  %v4259_v19 = vpop.f32.mrb[132].mxu1 }
 0x3f8   : > { %v3264_v52 = vpack.c.bf16 %v3226_v20, %v3224_v39  ;;  %v4260_v1 = vpop.f32.mrb[133].mxu1 }
 0x3f9   : > { %v3265_v61 = vpack.c.bf16 %v3227_v53, %v3225_v30  ;;  %v4261_v33 = vadd.f32 %v4260_v1, %v4259_v19  ;;  %v4262_v3 = vpop.f32.mrb[134].mxu1  ;;  %v3147_v56 = vpop.f32.mrb[244].mxu0 }
 0x3fa   : > { %v3148_v44 = vadd.f32 %v3147_v56, %v5598_v59  ;;  %v4263_v37 = vpop.f32.mrb[135].mxu1  ;;  %v3149_v0 = vpop.f32.mrb[245].mxu0 }
 0x3fb   : > { %v5663_v5 = vadd.f32 %v4261_v33, %v5428_v63  ;;  %v4264_v11 = vadd.f32 %v4263_v37, %v4262_v3  ;;  %v3150_v17 = vadd.f32 %v3149_v0, %v5601_v45  ;;  %v3151_v25 = vpop.f32.mrb[246].mxu0  ;;  %3528 = vmatprep.mubr.bf16.mxu1 %v3265_v61 }
 0x3fc   : > { %v3152_v49 = vadd.f32 %v3151_v25, %v5598_v59  ;;  %v3153_v57 = vpop.f32.mrb[247].mxu0  ;;  %3529 = vmatmul.mubr.bf16.gmra.mrb[240].mxu1 %v3264_v52  ;;  %v3228_v28 = vmax.f32 %v3148_v44, 0.0 }
 0x3fd   : > { %v5668_v15 = vadd.f32 %v4264_v11, %v5431_v35  ;;  %v3154_v29 = vadd.f32 %v3153_v57, %v5601_v45  ;;  %v3229_v23 = vmax.f32 %v3150_v17, 0.0 }
 0x3fe   : > { %v3230_v58 = vmax.f32 %v3152_v49, 0.0 }
 0x3ff   : > { %v3231_v46 = vmax.f32 %v3154_v29, 0.0  ;;  %v4265_v63 = vpop.f32.mrb[136].mxu1 }
 0x400   : > { %v3266_v26 = vpack.c.bf16 %v3230_v58, %v3228_v28  ;;  %v4266_v7 = vpop.f32.mrb[137].mxu1 }
 0x401   : > { %v3267_v6 = vpack.c.bf16 %v3231_v46, %v3229_v23  ;;  %v4267_v36 = vadd.f32 %v4266_v7, %v4265_v63  ;;  %v4268_v39 = vpop.f32.mrb[138].mxu1  ;;  %v3157_v20 = vpop.f32.mrb[248].mxu0 }
 0x402   : > { %v3158_v30 = vadd.f32 %v3157_v20, %v5598_v59  ;;  %v4269_v53 = vpop.f32.mrb[139].mxu1  ;;  %v3159_v19 = vpop.f32.mrb[249].mxu0 }
 0x403   : > { %v5673_v35 = vadd.f32 %v4267_v36, %v5434_v42  ;;  %v4270_v52 = vadd.f32 %v4269_v53, %v4268_v39  ;;  %v3160_v1 = vadd.f32 %v3159_v19, %v5601_v45  ;;  %v3161_v61 = vpop.f32.mrb[250].mxu0  ;;  %3536 = vmatprep.mubr.bf16.mxu1 %v3267_v6 }
 0x404   : > { %v3162_v33 = vadd.f32 %v3161_v61, %v5598_v59  ;;  %v3163_v3 = vpop.f32.mrb[251].mxu0  ;;  %3537 = vmatmul.mubr.bf16.gmra.mrb[244].mxu1 %v3266_v26  ;;  %v3232_v37 = vmax.f32 %v3158_v30, 0.0 }
 0x405   : > { %v5678_v56 = vadd.f32 %v4270_v52, %v5437_v21  ;;  %v3164_v44 = vadd.f32 %v3163_v3, %v5601_v45  ;;  %v3233_v11 = vmax.f32 %v3160_v1, 0.0 }
 0x406   : > { %v3234_v0 = vmax.f32 %v3162_v33, 0.0 }
 0x407   : > { %v3235_v17 = vmax.f32 %v3164_v44, 0.0  ;;  %v4271_v42 = vpop.f32.mrb[140].mxu1 }
 0x408   : > { %v3268_v25 = vpack.c.bf16 %v3234_v0, %v3232_v37  ;;  %v4272_v49 = vpop.f32.mrb[141].mxu1 }
 0x409   : > { %v3269_v57 = vpack.c.bf16 %v3235_v17, %v3233_v11  ;;  %v4273_v29 = vadd.f32 %v4272_v49, %v4271_v42  ;;  %v4274_v28 = vpop.f32.mrb[142].mxu1  ;;  %v3167_v58 = vpop.f32.mrb[252].mxu0 }
 0x40a   : > { %v3168_v23 = vadd.f32 %v3167_v58, %v5598_v59  ;;  %v4275_v46 = vpop.f32.mrb[143].mxu1  ;;  %v3169_v63 = vpop.f32.mrb[253].mxu0 }
 0x40b   : > { %v5683_v21 = vadd.f32 %v4273_v29, %v5440_v13  ;;  %v4276_v26 = vadd.f32 %v4275_v46, %v4274_v28  ;;  %v3170_v7 = vadd.f32 %v3169_v63, %v5601_v45  ;;  %v3171_v6 = vpop.f32.mrb[254].mxu0  ;;  %3544 = vmatprep.mubr.bf16.mxu1 %v3269_v57 }
 0x40c   : > { %v3172_v36 = vadd.f32 %v3171_v6, %v5598_v59  ;;  %v3173_v39 = vpop.f32.mrb[255].mxu0  ;;  %3545 = vmatmul.mubr.bf16.gmra.mrb[248].mxu1 %v3268_v25  ;;  %v3236_v53 = vmax.f32 %v3168_v23, 0.0 }
 0x40d   : > { %v5688_v20 = vadd.f32 %v4276_v26, %v5443_v47  ;;  %v3174_v30 = vadd.f32 %v3173_v39, %v5601_v45  ;;  %v3237_v52 = vmax.f32 %v3170_v7, 0.0 }
 0x40e   : > { %v3238_v19 = vmax.f32 %v3172_v36, 0.0 }
 0x40f   : > { %v3239_v1 = vmax.f32 %v3174_v30, 0.0  ;;  %v4277_v13 = vpop.f32.mrb[144].mxu1 }
 0x410   : > { %v3270_v61 = vpack.c.bf16 %v3238_v19, %v3236_v53  ;;  %v4278_v33 = vpop.f32.mrb[145].mxu1 }
 0x411   : > { %v3271_v3 = vpack.c.bf16 %v3239_v1, %v3237_v52  ;;  %v4279_v44 = vadd.f32 %v4278_v33, %v4277_v13  ;;  %v4280_v37 = vpop.f32.mrb[146].mxu1 }
 0x412   : > { %v4281_v0 = vpop.f32.mrb[147].mxu1 }
 0x413   : > { %v5692_v59 = vadd.f32 %v4279_v44, %v5446_v14  ;;  %v4282_v11 = vadd.f32 %v4281_v0, %v4280_v37  ;;  %3552 = vmatprep.mubr.bf16.mxu1 %v3271_v3 }
 0x414   : > { %3553 = vmatmul.mubr.bf16.gmra.mrb[252].mxu1 %v3270_v61 }
 0x415   : > { %v5695_v47 = vadd.f32 %v4282_v11, %v5449_v48 }
 0x417   : > { %v4283_v45 = vpop.f32.mrb[148].mxu1 }
 0x418   : > { %v4284_v17 = vpop.f32.mrb[149].mxu1 }
 0x419   : > { %v4285_v42 = vadd.f32 %v4284_v17, %v4283_v45  ;;  %v4286_v25 = vpop.f32.mrb[150].mxu1 }
 0x41a   : > { %v4287_v49 = vpop.f32.mrb[151].mxu1 }
 0x41b   : > { %v5698_v57 = vadd.f32 %v4285_v42, %v5452_v54  ;;  %v4288_v29 = vadd.f32 %v4287_v49, %v4286_v25 }
 0x41d   : > { %v5701_v28 = vadd.f32 %v4288_v29, %v5455_v34 }
 0x41f   : > { %v4289_v14 = vpop.f32.mrb[152].mxu1 }
 0x420   : > { %v4290_v58 = vpop.f32.mrb[153].mxu1 }
 0x421   : > { %v4291_v23 = vadd.f32 %v4290_v58, %v4289_v14  ;;  %v4292_v46 = vpop.f32.mrb[154].mxu1 }
 0x422   : > { %v4293_v63 = vpop.f32.mrb[155].mxu1 }
 0x423   : > { %v5704_v48 = vadd.f32 %v4291_v23, %v5458_v27  ;;  %v4294_v26 = vadd.f32 %v4293_v63, %v4292_v46 }
 0x425   : > { %v5707_v7 = vadd.f32 %v4294_v26, %v5461_v9 }
 0x427   : > { %v4295_v6 = vpop.f32.mrb[156].mxu1 }
 0x428   : > { %v4296_v36 = vpop.f32.mrb[157].mxu1 }
 0x429   : > { %v4297_v54 = vadd.f32 %v4296_v36, %v4295_v6  ;;  %v4298_v39 = vpop.f32.mrb[158].mxu1 }
 0x42a   : > { %v4299_v30 = vpop.f32.mrb[159].mxu1 }
 0x42b   : > { %v5710_v34 = vadd.f32 %v4297_v54, %v5464_v41  ;;  %v4300_v53 = vadd.f32 %v4299_v30, %v4298_v39 }
 0x42d   : > { %v5713_v19 = vadd.f32 %v4300_v53, %v5467_v24 }
 0x42f   : > { %v4301_v52 = vpop.f32.mrb[160].mxu1 }
 0x430   : > { %v4302_v1 = vpop.f32.mrb[161].mxu1 }
 0x431   : > { %v4303_v27 = vadd.f32 %v4302_v1, %v4301_v52  ;;  %v4304_v13 = vpop.f32.mrb[162].mxu1 }
 0x432   : > { %v4305_v61 = vpop.f32.mrb[163].mxu1 }
 0x433   : > { %v5716_v9 = vadd.f32 %v4303_v27, %v5470_v18  ;;  %v4306_v33 = vadd.f32 %v4305_v61, %v4304_v13 }
 0x435   : > { %v5719_v3 = vadd.f32 %v4306_v33, %v5473_v38 }
 0x437   : > { %v4307_v44 = vpop.f32.mrb[164].mxu1 }
 0x438   : > { %v4308_v37 = vpop.f32.mrb[165].mxu1 }
 0x439   : > { %v4309_v41 = vadd.f32 %v4308_v37, %v4307_v44  ;;  %v4310_v0 = vpop.f32.mrb[166].mxu1 }
 0x43a   : > { %v4311_v11 = vpop.f32.mrb[167].mxu1 }
 0x43b   : > { %v5722_v24 = vadd.f32 %v4309_v41, %v5476_v51  ;;  %v4312_v45 = vadd.f32 %v4311_v11, %v4310_v0 }
 0x43d   : > { %v5725_v17 = vadd.f32 %v4312_v45, %v5479_v50 }
 0x43f   : > { %v4313_v42 = vpop.f32.mrb[168].mxu1 }
 0x440   : > { %v4314_v25 = vpop.f32.mrb[169].mxu1 }
 0x441   : > { %v4315_v18 = vadd.f32 %v4314_v25, %v4313_v42  ;;  %v4316_v49 = vpop.f32.mrb[170].mxu1 }
 0x442   : > { %v4317_v29 = vpop.f32.mrb[171].mxu1 }
 0x443   : > { %v5728_v38 = vadd.f32 %v4315_v18, %v5482_v32  ;;  %v4318_v14 = vadd.f32 %v4317_v29, %v4316_v49 }
 0x445   : > { %v5731_v58 = vadd.f32 %v4318_v14, %v5485_v60 }
 0x447   : > { %v4319_v23 = vpop.f32.mrb[172].mxu1 }
 0x448   : > { %v4320_v46 = vpop.f32.mrb[173].mxu1 }
 0x449   : > { %v4321_v51 = vadd.f32 %v4320_v46, %v4319_v23  ;;  %v4322_v63 = vpop.f32.mrb[174].mxu1 }
 0x44a   : > { %v4323_v26 = vpop.f32.mrb[175].mxu1 }
 0x44b   : > { %v5734_v50 = vadd.f32 %v4321_v51, %v5488_v43  ;;  %v4324_v6 = vadd.f32 %v4323_v26, %v4322_v63 }
 0x44d   : > { %v5737_v36 = vadd.f32 %v4324_v6, %v5491_v2 }
 0x44f   : > { %v4325_v54 = vpop.f32.mrb[176].mxu1 }
 0x450   : > { %v4326_v39 = vpop.f32.mrb[177].mxu1 }
 0x451   : > { %v4327_v32 = vadd.f32 %v4326_v39, %v4325_v54  ;;  %v4328_v30 = vpop.f32.mrb[178].mxu1 }
 0x452   : > { %v4329_v53 = vpop.f32.mrb[179].mxu1 }
 0x453   : > { %v5740_v60 = vadd.f32 %v4327_v32, %v5494_v55  ;;  %v4330_v52 = vadd.f32 %v4329_v53, %v4328_v30 }
 0x455   : > { %v5743_v1 = vadd.f32 %v4330_v52, %v5497_v8 }
 0x457   : > { %v4331_v27 = vpop.f32.mrb[180].mxu1 }
 0x458   : > { %v4332_v13 = vpop.f32.mrb[181].mxu1 }
 0x459   : > { %v4333_v43 = vadd.f32 %v4332_v13, %v4331_v27  ;;  %v4334_v61 = vpop.f32.mrb[182].mxu1 }
 0x45a   : > { %v4335_v33 = vpop.f32.mrb[183].mxu1 }
 0x45b   : > { %v5746_v2 = vadd.f32 %v4333_v43, %v5500_v4  ;;  %v4336_v44 = vadd.f32 %v4335_v33, %v4334_v61 }
 0x45d   : > { %v5749_v37 = vadd.f32 %v4336_v44, %v5503_v16 }
 0x45f   : > { %v4337_v41 = vpop.f32.mrb[184].mxu1 }
 0x460   : > { %v4338_v0 = vpop.f32.mrb[185].mxu1 }
 0x461   : > { %v4339_v55 = vadd.f32 %v4338_v0, %v4337_v41  ;;  %v4340_v11 = vpop.f32.mrb[186].mxu1 }
 0x462   : > { %v4341_v45 = vpop.f32.mrb[187].mxu1 }
 0x463   : > { %v5752_v8 = vadd.f32 %v4339_v55, %v5506_v62  ;;  %v4342_v42 = vadd.f32 %v4341_v45, %v4340_v11 }
 0x465   : > { %v5755_v25 = vadd.f32 %v4342_v42, %v5509_v22  ;;  %v5767_v22 = vld [vmem:[%s5934_s4] ss:$0 sm:$0xff] }
 0x467   : > { %v4343_v18 = vpop.f32.mrb[188].mxu1 }
 0x468   : > { %v4344_v4 = vpop.f32.mrb[189].mxu1 }
 0x469   : > { %v4345_v49 = vadd.f32 %v4344_v4, %v4343_v18  ;;  %v4346_v29 = vpop.f32.mrb[190].mxu1 }
 0x46a   : > { %v4347_v14 = vpop.f32.mrb[191].mxu1 }
 0x46b   : > { %v5758_v16 = vadd.f32 %v4345_v49, %v5512_v40  ;;  %v4348_v23 = vadd.f32 %v4347_v14, %v4346_v29 }
 0x46d   : > { %v5761_v46 = vadd.f32 %v4348_v23, %v5518_v31 }
 0x46f   : > { %v4365_v51 = vpop.f32.mrb[192].mxu1 }
 0x470   : > { %v4366_v63 = vpop.f32.mrb[193].mxu1 }
 0x471   : > { %v4367_v62 = vadd.f32 %v4366_v63, %v4365_v51  ;;  %v4368_v26 = vpop.f32.mrb[194].mxu1 }
 0x472   : > { %v4369_v6 = vpop.f32.mrb[195].mxu1 }
 0x473   : > { %v3561_v54 = vadd.f32 %v4367_v62, %v5653_v10  ;;  %v4370_v39 = vadd.f32 %v4369_v6, %v4368_v26 }
 0x475   : > { %v3600_v40 = vadd.f32 %v5767_v22, %v3561_v54  ;;  %v3562_v32 = vadd.f32 %v4370_v39, %v5658_v12 }
 0x477   : > { %3632 = vst [vmem:[%s5772_s17] sm:$0xff] %v3600_v40  ;;  %v3601_v31 = vadd.f32 %v5767_v22, %v3562_v32  ;;  %v4371_v30 = vpop.f32.mrb[196].mxu1 }
 0x478   : > { %v4372_v53 = vpop.f32.mrb[197].mxu1 }
 0x479   : > { %3633 = vst [vmem:[%s5772_s17 + $0x8] sm:$0xff] %v3601_v31  ;;  %v4373_v52 = vadd.f32 %v4372_v53, %v4371_v30  ;;  %v4374_v27 = vpop.f32.mrb[198].mxu1 }
 0x47a   : > { %v4375_v10 = vpop.f32.mrb[199].mxu1 }
 0x47b   : > { %v3563_v13 = vadd.f32 %v4373_v52, %v5663_v5  ;;  %v4376_v43 = vadd.f32 %v4375_v10, %v4374_v27 }
 0x47d   : > { %v3602_v12 = vadd.f32 %v5767_v22, %v3563_v13  ;;  %v3564_v61 = vadd.f32 %v4376_v43, %v5668_v15 }
 0x47f   : > { %3634 = vst [vmem:[%s5772_s17 + $0x10] sm:$0xff] %v3602_v12  ;;  %v3603_v33 = vadd.f32 %v5767_v22, %v3564_v61  ;;  %v4377_v44 = vpop.f32.mrb[200].mxu1 }
 0x480   : > { %v4378_v41 = vpop.f32.mrb[201].mxu1 }
 0x481   : > { %3635 = vst [vmem:[%s5772_s17 + $0x18] sm:$0xff] %v3603_v33  ;;  %v4379_v0 = vadd.f32 %v4378_v41, %v4377_v44  ;;  %v4380_v55 = vpop.f32.mrb[202].mxu1 }
 0x482   : > { %v4381_v11 = vpop.f32.mrb[203].mxu1 }
 0x483   : > { %v3565_v45 = vadd.f32 %v4379_v0, %v5673_v35  ;;  %v4382_v5 = vadd.f32 %v4381_v11, %v4380_v55 }
 0x485   : > { %v3604_v42 = vadd.f32 %v5767_v22, %v3565_v45  ;;  %v3566_v18 = vadd.f32 %v4382_v5, %v5678_v56 }
 0x487   : > { %3636 = vst [vmem:[%s5772_s17 + $0x20] sm:$0xff] %v3604_v42  ;;  %v3605_v15 = vadd.f32 %v5767_v22, %v3566_v18  ;;  %v4383_v4 = vpop.f32.mrb[204].mxu1 }
 0x488   : > { %v4384_v49 = vpop.f32.mrb[205].mxu1 }
 0x489   : > { %3637 = vst [vmem:[%s5772_s17 + $0x28] sm:$0xff] %v3605_v15  ;;  %v4385_v29 = vadd.f32 %v4384_v49, %v4383_v4  ;;  %v4386_v14 = vpop.f32.mrb[206].mxu1 }
 0x48a   : > { %v4387_v23 = vpop.f32.mrb[207].mxu1 }
 0x48b   : > { %v3567_v51 = vadd.f32 %v4385_v29, %v5683_v21  ;;  %v4388_v35 = vadd.f32 %v4387_v23, %v4386_v14 }
 0x48d   : > { %v3606_v63 = vadd.f32 %v5767_v22, %v3567_v51  ;;  %v3568_v62 = vadd.f32 %v4388_v35, %v5688_v20 }
 0x48f   : > { %3638 = vst [vmem:[%s5772_s17 + $0x30] sm:$0xff] %v3606_v63  ;;  %v3607_v56 = vadd.f32 %v5767_v22, %v3568_v62  ;;  %v4389_v26 = vpop.f32.mrb[208].mxu1 }
 0x490   : > { %v4390_v6 = vpop.f32.mrb[209].mxu1 }
 0x491   : > { %3639 = vst [vmem:[%s5772_s17 + $0x38] sm:$0xff] %v3607_v56  ;;  %v4391_v54 = vadd.f32 %v4390_v6, %v4389_v26  ;;  %v4392_v39 = vpop.f32.mrb[210].mxu1 }
 0x492   : > { %v4393_v40 = vpop.f32.mrb[211].mxu1 }
 0x493   : > { %v3569_v32 = vadd.f32 %v4391_v54, %v5692_v59  ;;  %v4394_v21 = vadd.f32 %v4393_v40, %v4392_v39 }
 0x495   : > { %v3608_v31 = vadd.f32 %v5767_v22, %v3569_v32  ;;  %v3570_v30 = vadd.f32 %v4394_v21, %v5695_v47 }
 0x497   : > { %3640 = vst [vmem:[%s5772_s17 + $0x40] sm:$0xff] %v3608_v31  ;;  %v3609_v20 = vadd.f32 %v5767_v22, %v3570_v30  ;;  %v4395_v53 = vpop.f32.mrb[212].mxu1 }
 0x498   : > { %v4396_v52 = vpop.f32.mrb[213].mxu1 }
 0x499   : > { %3641 = vst [vmem:[%s5772_s17 + $0x48] sm:$0xff] %v3609_v20  ;;  %v4397_v27 = vadd.f32 %v4396_v52, %v4395_v53  ;;  %v4398_v10 = vpop.f32.mrb[214].mxu1 }
 0x49a   : > { %v4399_v13 = vpop.f32.mrb[215].mxu1 }
 0x49b   : > { %v3571_v43 = vadd.f32 %v4397_v27, %v5698_v57  ;;  %v4400_v59 = vadd.f32 %v4399_v13, %v4398_v10 }
 0x49d   : > { %v3610_v12 = vadd.f32 %v5767_v22, %v3571_v43  ;;  %v3572_v61 = vadd.f32 %v4400_v59, %v5701_v28 }
 0x49f   : > { %3642 = vst [vmem:[%s5772_s17 + $0x50] sm:$0xff] %v3610_v12  ;;  %v3611_v47 = vadd.f32 %v5767_v22, %v3572_v61  ;;  %v4401_v33 = vpop.f32.mrb[216].mxu1 }
 0x4a0   : > { %v4402_v44 = vpop.f32.mrb[217].mxu1 }
 0x4a1   : > { %3643 = vst [vmem:[%s5772_s17 + $0x58] sm:$0xff] %v3611_v47  ;;  %v4403_v41 = vadd.f32 %v4402_v44, %v4401_v33  ;;  %v4404_v0 = vpop.f32.mrb[218].mxu1 }
 0x4a2   : > { %v4405_v55 = vpop.f32.mrb[219].mxu1 }
 0x4a3   : > { %v3573_v11 = vadd.f32 %v4403_v41, %v5704_v48  ;;  %v4406_v57 = vadd.f32 %v4405_v55, %v4404_v0 }
 0x4a5   : > { %v3612_v45 = vadd.f32 %v5767_v22, %v3573_v11  ;;  %v3574_v5 = vadd.f32 %v4406_v57, %v5707_v7 }
 0x4a7   : > { %3644 = vst [vmem:[%s5772_s17 + $0x60] sm:$0xff] %v3612_v45  ;;  %v3613_v28 = vadd.f32 %v5767_v22, %v3574_v5  ;;  %v4407_v42 = vpop.f32.mrb[220].mxu1 }
 0x4a8   : > { %v4408_v18 = vpop.f32.mrb[221].mxu1 }
 0x4a9   : > { %3645 = vst [vmem:[%s5772_s17 + $0x68] sm:$0xff] %v3613_v28  ;;  %v4409_v15 = vadd.f32 %v4408_v18, %v4407_v42  ;;  %v4410_v4 = vpop.f32.mrb[222].mxu1 }
 0x4aa   : > { %v4411_v49 = vpop.f32.mrb[223].mxu1 }
 0x4ab   : > { %v3575_v29 = vadd.f32 %v4409_v15, %v5710_v34  ;;  %v4412_v48 = vadd.f32 %v4411_v49, %v4410_v4 }
 0x4ad   : > { %v3614_v14 = vadd.f32 %v5767_v22, %v3575_v29  ;;  %v3576_v23 = vadd.f32 %v4412_v48, %v5713_v19 }
 0x4af   : > { %3646 = vst [vmem:[%s5772_s17 + $0x70] sm:$0xff] %v3614_v14  ;;  %v3615_v7 = vadd.f32 %v5767_v22, %v3576_v23  ;;  %v4413_v51 = vpop.f32.mrb[224].mxu1 }
 0x4b0   : > { %v4414_v35 = vpop.f32.mrb[225].mxu1 }
 0x4b1   : > { %3647 = vst [vmem:[%s5772_s17 + $0x78] sm:$0xff] %v3615_v7  ;;  %v4415_v63 = vadd.f32 %v4414_v35, %v4413_v51  ;;  %v4416_v62 = vpop.f32.mrb[226].mxu1 }
 0x4b2   : > { %v4417_v56 = vpop.f32.mrb[227].mxu1 }
 0x4b3   : > { %v3577_v26 = vadd.f32 %v4415_v63, %v5716_v9  ;;  %v4418_v34 = vadd.f32 %v4417_v56, %v4416_v62 }
 0x4b5   : > { %v3616_v6 = vadd.f32 %v5767_v22, %v3577_v26  ;;  %v3578_v54 = vadd.f32 %v4418_v34, %v5719_v3 }
 0x4b7   : > { %3648 = vst [vmem:[%s5772_s17 + $0x80] sm:$0xff] %v3616_v6  ;;  %v3617_v19 = vadd.f32 %v5767_v22, %v3578_v54  ;;  %v4419_v39 = vpop.f32.mrb[228].mxu1 }
 0x4b8   : > { %v4420_v40 = vpop.f32.mrb[229].mxu1 }
 0x4b9   : > { %3649 = vst [vmem:[%s5772_s17 + $0x88] sm:$0xff] %v3617_v19  ;;  %v4421_v32 = vadd.f32 %v4420_v40, %v4419_v39  ;;  %v4422_v21 = vpop.f32.mrb[230].mxu1 }
 0x4ba   : > { %v4423_v31 = vpop.f32.mrb[231].mxu1 }
 0x4bb   : > { %v3579_v30 = vadd.f32 %v4421_v32, %v5722_v24  ;;  %v4424_v9 = vadd.f32 %v4423_v31, %v4422_v21 }
 0x4bd   : > { %v3618_v20 = vadd.f32 %v5767_v22, %v3579_v30  ;;  %v3580_v53 = vadd.f32 %v4424_v9, %v5725_v17 }
 0x4bf   : > { %3650 = vst [vmem:[%s5772_s17 + $0x90] sm:$0xff] %v3618_v20  ;;  %v3619_v3 = vadd.f32 %v5767_v22, %v3580_v53  ;;  %v4425_v52 = vpop.f32.mrb[232].mxu1 }
 0x4c0   : > { %v4426_v27 = vpop.f32.mrb[233].mxu1 }
 0x4c1   : > { %3651 = vst [vmem:[%s5772_s17 + $0x98] sm:$0xff] %v3619_v3  ;;  %v4427_v10 = vadd.f32 %v4426_v27, %v4425_v52  ;;  %v4428_v13 = vpop.f32.mrb[234].mxu1 }
 0x4c2   : > { %v4429_v43 = vpop.f32.mrb[235].mxu1 }
 0x4c3   : > { %v3581_v59 = vadd.f32 %v4427_v10, %v5728_v38  ;;  %v4430_v24 = vadd.f32 %v4429_v43, %v4428_v13 }
 0x4c5   : > { %v3620_v12 = vadd.f32 %v5767_v22, %v3581_v59  ;;  %v3582_v61 = vadd.f32 %v4430_v24, %v5731_v58 }
 0x4c7   : > { %3652 = vst [vmem:[%s5772_s17 + $0xa0] sm:$0xff] %v3620_v12  ;;  %v3621_v17 = vadd.f32 %v5767_v22, %v3582_v61  ;;  %v4431_v47 = vpop.f32.mrb[236].mxu1 }
 0x4c8   : > { %v4432_v33 = vpop.f32.mrb[237].mxu1 }
 0x4c9   : > { %3653 = vst [vmem:[%s5772_s17 + $0xa8] sm:$0xff] %v3621_v17  ;;  %v4433_v44 = vadd.f32 %v4432_v33, %v4431_v47  ;;  %v4434_v41 = vpop.f32.mrb[238].mxu1 }
 0x4ca   : > { %v4435_v0 = vpop.f32.mrb[239].mxu1 }
 0x4cb   : > { %v3583_v55 = vadd.f32 %v4433_v44, %v5734_v50  ;;  %v4436_v38 = vadd.f32 %v4435_v0, %v4434_v41 }
 0x4cd   : > { %v3622_v11 = vadd.f32 %v5767_v22, %v3583_v55  ;;  %v3584_v57 = vadd.f32 %v4436_v38, %v5737_v36 }
 0x4cf   : > { %3654 = vst [vmem:[%s5772_s17 + $0xb0] sm:$0xff] %v3622_v11  ;;  %v3623_v58 = vadd.f32 %v5767_v22, %v3584_v57  ;;  %v4437_v45 = vpop.f32.mrb[240].mxu1 }
 0x4d0   : > { %v4438_v5 = vpop.f32.mrb[241].mxu1 }
 0x4d1   : > { %3655 = vst [vmem:[%s5772_s17 + $0xb8] sm:$0xff] %v3623_v58  ;;  %v4439_v28 = vadd.f32 %v4438_v5, %v4437_v45  ;;  %v4440_v42 = vpop.f32.mrb[242].mxu1 }
 0x4d2   : > { %v4441_v18 = vpop.f32.mrb[243].mxu1 }
 0x4d3   : > { %v3585_v15 = vadd.f32 %v4439_v28, %v5740_v60  ;;  %v4442_v50 = vadd.f32 %v4441_v18, %v4440_v42 }
 0x4d5   : > { %v3624_v4 = vadd.f32 %v5767_v22, %v3585_v15  ;;  %v3586_v49 = vadd.f32 %v4442_v50, %v5743_v1 }
 0x4d7   : > { %3656 = vst [vmem:[%s5772_s17 + $0xc0] sm:$0xff] %v3624_v4  ;;  %v3625_v36 = vadd.f32 %v5767_v22, %v3586_v49  ;;  %v4443_v29 = vpop.f32.mrb[244].mxu1 }
 0x4d8   : > { %v4444_v48 = vpop.f32.mrb[245].mxu1 }
 0x4d9   : > { %3657 = vst [vmem:[%s5772_s17 + $0xc8] sm:$0xff] %v3625_v36  ;;  %v4445_v14 = vadd.f32 %v4444_v48, %v4443_v29  ;;  %v4446_v23 = vpop.f32.mrb[246].mxu1 }
 0x4da   : > { %v4447_v7 = vpop.f32.mrb[247].mxu1 }
 0x4db   : > { %v3587_v51 = vadd.f32 %v4445_v14, %v5746_v2  ;;  %v4448_v60 = vadd.f32 %v4447_v7, %v4446_v23 }
 0x4dd   : > { %v3626_v35 = vadd.f32 %v5767_v22, %v3587_v51  ;;  %v3588_v63 = vadd.f32 %v4448_v60, %v5749_v37 }
 0x4df   : > { %3658 = vst [vmem:[%s5772_s17 + $0xd0] sm:$0xff] %v3626_v35  ;;  %v3627_v1 = vadd.f32 %v5767_v22, %v3588_v63  ;;  %v4449_v62 = vpop.f32.mrb[248].mxu1 }
 0x4e0   : > { %v4450_v56 = vpop.f32.mrb[249].mxu1 }
 0x4e1   : > { %3659 = vst [vmem:[%s5772_s17 + $0xd8] sm:$0xff] %v3627_v1  ;;  %v4451_v26 = vadd.f32 %v4450_v56, %v4449_v62  ;;  %v4452_v34 = vpop.f32.mrb[250].mxu1 }
 0x4e2   : > { %v4453_v6 = vpop.f32.mrb[251].mxu1 }
 0x4e3   : > { %v3589_v54 = vadd.f32 %v4451_v26, %v5752_v8  ;;  %v4454_v2 = vadd.f32 %v4453_v6, %v4452_v34 }
 0x4e5   : > { %v3628_v19 = vadd.f32 %v5767_v22, %v3589_v54  ;;  %v3590_v39 = vadd.f32 %v4454_v2, %v5755_v25 }
 0x4e7   : > { %3660 = vst [vmem:[%s5772_s17 + $0xe0] sm:$0xff] %v3628_v19  ;;  %v3629_v37 = vadd.f32 %v5767_v22, %v3590_v39  ;;  %v4455_v40 = vpop.f32.mrb[252].mxu1 }
 0x4e8   : > { %v4456_v32 = vpop.f32.mrb[253].mxu1 }
 0x4e9   : > { %3661 = vst [vmem:[%s5772_s17 + $0xe8] sm:$0xff] %v3629_v37  ;;  %v4457_v21 = vadd.f32 %v4456_v32, %v4455_v40  ;;  %v4458_v31 = vpop.f32.mrb[254].mxu1 }
 0x4ea   : > { %v4459_v30 = vpop.f32.mrb[255].mxu1 }
 0x4eb   : > { %v3591_v9 = vadd.f32 %v4457_v21, %v5758_v16  ;;  %v4460_v8 = vadd.f32 %v4459_v30, %v4458_v31  ;;  %3671 = sbr.rel (!%p5991_p1) target bundleno = 1294 (0x50e), region = 60 }
 0x4ed   : > { %v3630_v20 = vadd.f32 %v5767_v22, %v3591_v9  ;;  %v3592_v53 = vadd.f32 %v4460_v8, %v5761_v46 }
 0x4ef   : > { %3662 = vst [vmem:[%s5772_s17 + $0xf0] sm:$0xff] %v3630_v20  ;;  %v3631_v25 = vadd.f32 %v5767_v22, %v3592_v53 }
 0x4f1   : > { %3663 = vst [vmem:[%s5772_s17 + $0xf8] sm:$0xff] %v3631_v25 }
 0x4f2   : > { %s6001_s14 = smov (!%p3674_p3, %s3673_s14), 32 }
 0x4f3   : > { %s5871_s15 = sshll.u32 %s6001_s14, 7 }
 0x4f4   : > { %s3678_s16 = ssub.s32 4096, %s5871_s15 }
 0x4f5   : > { %3679 = vsyncadd %s3665_s12, %s3678_s16  ;;  %p4003_p6 = scmp.ne.s32.totalorder %s5871_s15, 0  ;;  %s4012_s30 = sshll.u32 %s4855_s22, 12 }
 0x4f6   : > { %s5881_s28 = scalar_lea.hbm %s5935_s5, %s4012_s30  ;;  %s3684_s26 = sshll.u32 %s5772_s17, 4  ;;  %s5884_s26 = int_to_ptr.vmem [resolvable:$true] %s3684_s26 }
 0x4f7   : > { %s4715_s8 = scalar_lea.vmem %s5884_s26, %s5871_s15  ;;  %s4801_s27 = smov [#allocation10]  }
 0x4f8   : > { %p4716_p5 = scmp.ne.s32.totalorder %s5884_s26, %s4715_s8  ;;  %s4719_s11 = sshll.u32 %s4801_s27, 4  ;;  %s4720_s11 = int_to_ptr.vmem [resolvable:$false] %s4719_s11 }
 0x4f9   : > { %s4721_s22 = scalar_lea.vmem %s4720_s11, 8192  ;;  %p4722_p0 = scmp.lt.s32.totalorder %s5884_s26, %s4720_s11 }
 0x4fa   : > { %p4717_p11 = pnand %p4716_p5, %p4003_p6  ;;  %p4723_p12 = scmp.lt.s32.totalorder %s4721_s22, %s4715_s8 }
 0x4fc   : > { %p4718_p13 = pneg %p4717_p11  ;;  %p4724_p7 = por %p4723_p12, %p4722_p0 }
 0x4fe   : > { %p4725_p2 = pnand %p4724_p7, %p4718_p13 }
 0x500   : > { %4728 = shalt.err (!%p4725_p2)
}
 0x501   : > { %s4729_s23 = scalar_lea.hbm %s5881_s28, %s5871_s15  ;;  %s4733_s10 = scalar_lea.hbm %s5935_s5, 6144 }
 0x502   : > { %p4730_p8 = scmp.ne.s32.totalorder %s5881_s28, %s4729_s23  ;;  %p4734_p1 = scmp.lt.u32.totalorder %s5881_s28, %s5935_s5 }
 0x503   : > { %p4735_p3 = scmp.lt.u32.totalorder %s4733_s10, %s4729_s23  ;;  %p4737_p11 = scmp.lt.u32.totalorder %s4729_s23, %s5881_s28 }
 0x504   : > { %p4731_p9 = pnand %p4730_p8, %p4003_p6 }
 0x505   : > { %p4736_p5 = por %p4735_p3, %p4734_p1 }
 0x506   : > { %p4732_p10 = pneg %p4731_p9 }
 0x507   : > { %p4738_p13 = por %p4737_p11, %p4736_p5 }
 0x509   : > { %p4739_p0 = pnand %p4738_p13, %p4732_p10 }
 0x50b   : > { %4742 = shalt.err (!%p4739_p0)
}
 0x50c   : > { %s4802_s14 = smov 128   ;;  %s4803_s16 = smov 8  }
 0x50d   : > { %3690 = dma.vmem_to_hbm [thread:$0]  (%p4003_p6), %s5884_s26, %s5871_s15, %s5881_s28, %s3665_s12, %s4802_s14, %s4802_s14, %s4803_s16  }
 0x50e PF: > { %s3699_s30 = sand.u32 1, %s4777_s18   ;;  %p5992_p12 = scmp.ne.s32.totalorder %s5962_s6, 0 }
 0x50f   : > { %s3700_s13 = scalar_lea.sflag [#allocation4], %s3699_s30 }
 0x510   : > { %p4486_p7 = pnand %p3791_p4, %p5992_p12 }
 0x512   : > { %4772 = dma.done.wait (!%p4486_p7), %s3700_s13, 4096  }
 0x513   : > { %4774 = vsyncadd (!%p4486_p7), %s3700_s13, 4294963200  ;;  %s5993_s21 = sld [smem:[#allocation15_spill]]  ;;  %s5994_s25 = sld [smem:[#allocation16_spill]] }
 0x514   : > { %s5995_s18 = smov %s4781_s19  ;;  %s5996_s19 = smov %s4785_s20 }
 0x519   : > { %p20_p2 = scmp.ge.s32.totalorder %s5993_s21, 4   ;;  %s5997_s20 = smov %s5994_s25 }
 0x51b   :  { %22 = sbr.rel (!%p20_p2) target bundleno = 7 (0x7), region = 97 }
 0x522   :  { %3705 = vsyncpa [#allocation3], 1 }
 0x523   :  { %3707 = vsyncpa [#allocation3 + $0x1], 1 }
 0x524   :  { %3708 = vsyncpa [#allocation6], 1 }
 0x525   :  { %3709 = vsyncpa [#allocation9], 1 }
 0x526   :  { %3710 = vsyncpa [#allocation4], 1 }
 0x527   :  { %3712 = vsyncpa [#allocation4 + $0x1], 1 }

</bundles_post_ra>
